<compile_context>
chip_gen: v5e
topology: v5e:2x2
jax: 0.10.0
libtpu: 0.0.40
codegen_flags: <defaults>
</compile_context>

<pallas_src>
import math
import jax
import jax.numpy as jnp
from jax import lax
from jax.experimental import pallas as pl
from jax.experimental.pallas import tpu as pltpu

LN_EPS = 1e-5
BN_EPS = 1e-5
# fp32 contract precision on the MXU: keeps the segment-mean matmuls exact and
# matches PyTorch's f32 linear-layer numerics.
_PREC = lax.Precision.HIGHEST


def _gelu(x):
    # PyTorch nn.GELU() default = exact erf formulation
    return 0.5 * x * (1.0 + lax.erf(x * (1.0 / math.sqrt(2.0))))


def _round_up(x, m):
    return (x + m - 1) // m * m


def embed_kernel(x_ref,
                 bn_scale_ref, bn_shift_ref,
                 seg1_ref, ln1_g_ref, ln1_b_ref, w1_ref, b1_ref,
                 seg2_ref, ln2_g_ref, ln2_b_ref, w2_ref, b2_ref,
                 o_ref):
    """One grid step processes `tm_rows` sublane rows; each row carries P
    consecutive tokens side by side on the lane axis (lane-dense layout)."""
    x = x_ref[...]                                            # (tm_rows, P*C)

    # BatchNorm1d (eval): running stats folded into per-channel scale/shift,
    # tiled P times so they line up with the packed tokens.
    x = x * bn_scale_ref[...] + bn_shift_ref[...]

    def ln_lin_gelu(h, seg, g, b, w, bias):
        # Per-token LayerNorm.  seg = kron(I_P, ones(C,C)/C): h @ seg gives
        # every lane the mean over its own token's feature segment (already
        # broadcast back to all C lanes of that segment).
        mu = jnp.dot(h, seg, preferred_element_type=jnp.float32,
                     precision=_PREC)
        hc = h - mu
        var = jnp.dot(hc * hc, seg, preferred_element_type=jnp.float32,
                      precision=_PREC)
        h = hc * lax.rsqrt(var + LN_EPS) * g + b
        # Linear with block-diagonal kron(I_P, W) weights, then exact GELU.
        h = jnp.dot(h, w, preferred_element_type=jnp.float32,
                    precision=_PREC) + bias
        return _gelu(h)

    h = ln_lin_gelu(x, seg1_ref[...], ln1_g_ref[...], ln1_b_ref[...],
                    w1_ref[...], b1_ref[...])
    h = ln_lin_gelu(h, seg2_ref[...], ln2_g_ref[...], ln2_b_ref[...],
                    w2_ref[...], b2_ref[...])
    o_ref[...] = h                                            # (tm_rows, P*D2)


def embed_forward(x, params, *, tile_tokens=2048):
    """x: (N, C, L) float32.  Returns (L, N, dims[-1]) float32."""
    N, C, L = x.shape
    D1 = params["w1"].shape[1]
    D2 = params["w2"].shape[1]

    # --- choose P = tokens packed per sublane row so activation widths become
    # multiples of 128 lanes (full lane occupancy, unmasked stores).  Cap P so
    # the replicated block-diagonal weights (which grow ~P^2) stay small.
    g = math.gcd(128, math.gcd(C, math.gcd(D1, D2)))
    P = 128 // g
    max_w = max(C * D1, D1 * D2)
    while P > 1 and (P * P * max_w * 4) > (8 << 20):
        P //= 2

    T = L * N
    rows = pl.cdiv(T, P)
    # ~tile_tokens tokens per grid step; keep >=8 sublane rows and a multiple
    # of 8.  Keep several grid steps at real sizes so v7x can use both cores.
    tm_rows = max(8, min(_round_up(max(1, tile_tokens // P), 8),
                         _round_up(rows, 8)))
    rows_pad = _round_up(rows, tm_rows)
    T_pad = rows_pad * P

    # glue: (N, C, L) -> (L, N, C) token matrix, pad ragged tail with zeros,
    # then view (free reshape) as (rows_pad, P*C): P consecutive tokens per row.
    x_tok = jnp.transpose(x.astype(jnp.float32), (2, 0, 1)).reshape(T, C)
    if T_pad != T:
        x_tok = jnp.pad(x_tok, ((0, T_pad - T), (0, 0)))
    x_pk = x_tok.reshape(rows_pad, P * C)

    # fold BatchNorm running stats + affine into a single scale/shift
    bn_scale = params["bn_gamma"] / jnp.sqrt(params["bn_var"] + BN_EPS)  # (C,)
    bn_shift = params["bn_beta"] - params["bn_mean"] * bn_scale          # (C,)

    eye_p = jnp.eye(P, dtype=jnp.float32)
    seg1 = jnp.kron(eye_p, jnp.full((C, C), 1.0 / C, jnp.float32))       # (PC, PC)
    seg2 = jnp.kron(eye_p, jnp.full((D1, D1), 1.0 / D1, jnp.float32))    # (PD1, PD1)
    w1_blk = jnp.kron(eye_p, params["w1"].astype(jnp.float32))           # (PC, PD1)
    w2_blk = jnp.kron(eye_p, params["w2"].astype(jnp.float32))           # (PD1, PD2)

    def tile_row(v):
        return jnp.tile(v.astype(jnp.float32), P).reshape(1, -1)

    param_args = [
        tile_row(bn_scale), tile_row(bn_shift),
        seg1, tile_row(params["ln1_g"]), tile_row(params["ln1_b"]),
        w1_blk, tile_row(params["b1"]),
        seg2, tile_row(params["ln2_g"]), tile_row(params["ln2_b"]),
        w2_blk, tile_row(params["b2"]),
    ]

    def full_spec(a):
        return pl.BlockSpec(a.shape, lambda i: (0, 0))

    out = pl.pallas_call(
        embed_kernel,
        out_shape=jax.ShapeDtypeStruct((rows_pad, P * D2), jnp.float32),
        grid_spec=pltpu.PrefetchScalarGridSpec(
            num_scalar_prefetch=0,
            grid=(rows_pad // tm_rows,),
            in_specs=[pl.BlockSpec((tm_rows, P * C), lambda i: (i, 0))]
                     + [full_spec(a) for a in param_args],
            out_specs=pl.BlockSpec((tm_rows, P * D2), lambda i: (i, 0)),
        ),
        compiler_params=pltpu.CompilerParams(
            dimension_semantics=("parallel",)),
    )(x_pk, *param_args)

    # (rows_pad, P*D2) row-major == (T_pad, D2) token-major: free view.
    out = out.reshape(T_pad, D2)
    if T_pad != T:
        out = out[:T]
    return out.reshape(L, N, D2)


def embed_reference(x, params):
    """Pure-JAX reference mirroring the PyTorch module (f32 math)."""
    bn_scale = params["bn_gamma"] / jnp.sqrt(params["bn_var"] + BN_EPS)
    bn_shift = params["bn_beta"] - params["bn_mean"] * bn_scale
    xb = x * bn_scale[None, :, None] + bn_shift[None, :, None]
    h = jnp.transpose(xb, (2, 0, 1))                          # (L, N, C)
    for (g, b, w, bias) in [
        (params["ln1_g"], params["ln1_b"], params["w1"], params["b1"]),
        (params["ln2_g"], params["ln2_b"], params["w2"], params["b2"]),
    ]:
        mu = jnp.mean(h, axis=-1, keepdims=True)
        var = jnp.mean((h - mu) ** 2, axis=-1, keepdims=True)
        h = (h - mu) * lax.rsqrt(var + LN_EPS) * g + b
        h = jnp.dot(h, w, precision=_PREC) + bias
        h = _gelu(h)
    return h


if __name__ == "__main__":
    # Small shapes consistent with the module: batch=2, input_dim=16, seq=8,
    # dims=(32, 64).
    N, C, L = 2, 16, 8
    D1, D2 = 32, 64

    ks = jax.random.split(jax.random.PRNGKey(0), 9)
    x = jax.random.normal(ks[0], (N, C, L), dtype=jnp.float32)

    params = {
        # BatchNorm1d(C): deterministic "running" stats + affine
        "bn_gamma": 1.0 + 0.1 * jax.random.normal(ks[1], (C,), jnp.float32),
        "bn_beta": 0.05 * jax.random.normal(ks[2], (C,), jnp.float32),
        "bn_mean": 0.1 * jax.random.normal(ks[3], (C,), jnp.float32),
        "bn_var": jnp.abs(1.0 + 0.1 * jax.random.normal(ks[4], (C,), jnp.float32)),
        # LayerNorm(C) + Linear(C, D1)
        "ln1_g": jnp.ones((C,), jnp.float32),
        "ln1_b": jnp.zeros((C,), jnp.float32),
        "w1": jax.random.normal(ks[5], (C, D1), jnp.float32) / math.sqrt(C),
        "b1": 0.01 * jax.random.normal(ks[6], (D1,), jnp.float32),
        # LayerNorm(D1) + Linear(D1, D2)
        "ln2_g": jnp.ones((D1,), jnp.float32),
        "ln2_b": jnp.zeros((D1,), jnp.float32),
        "w2": jax.random.normal(ks[7], (D1, D2), jnp.float32) / math.sqrt(D1),
        "b2": 0.01 * jax.random.normal(ks[8], (D2,), jnp.float32),
    }

    out = embed_forward(x, params)
    out = jax.block_until_ready(out)

    ref = embed_reference(x, params)
    assert out.shape == (L, N, D2), out.shape
    err = float(jnp.max(jnp.abs(out - ref)))
    assert jnp.allclose(out, ref, atol=1e-4, rtol=1e-4), err

    print("KERNEL_OK")
</pallas_src>

<mosaic_0001>
module attributes {stable_mosaic.version = 11 : i64} {
  func.func @embed_kernel(%arg0: i32, %arg1: memref<8x128xf32, #tpu.memory_space<vmem>>, %arg2: memref<1x128xf32, #tpu.memory_space<vmem>>, %arg3: memref<1x128xf32, #tpu.memory_space<vmem>>, %arg4: memref<128x128xf32, #tpu.memory_space<vmem>>, %arg5: memref<1x128xf32, #tpu.memory_space<vmem>>, %arg6: memref<1x128xf32, #tpu.memory_space<vmem>>, %arg7: memref<128x256xf32, #tpu.memory_space<vmem>>, %arg8: memref<1x256xf32, #tpu.memory_space<vmem>>, %arg9: memref<256x256xf32, #tpu.memory_space<vmem>>, %arg10: memref<1x256xf32, #tpu.memory_space<vmem>>, %arg11: memref<1x256xf32, #tpu.memory_space<vmem>>, %arg12: memref<256x512xf32, #tpu.memory_space<vmem>>, %arg13: memref<1x512xf32, #tpu.memory_space<vmem>>, %arg14: memref<8x512xf32, #tpu.memory_space<vmem>>) attributes {dimension_semantics = [#tpu.dimension_semantics<parallel>], iteration_bounds = array<i64: 1>, scalar_prefetch = 0 : i64, scratch_operands = 0 : i64, tpu.core_type = #tpu.core_type<tc>, window_params = [{transform_indices = @transform_0, window_bounds = array<i64: 8, 128>}, {pipeline_mode = #tpu.pipeline_mode<synchronous>, transform_indices = @transform_1, window_bounds = array<i64: 1, 128>}, {pipeline_mode = #tpu.pipeline_mode<synchronous>, transform_indices = @transform_2, window_bounds = array<i64: 1, 128>}, {pipeline_mode = #tpu.pipeline_mode<synchronous>, transform_indices = @transform_3, window_bounds = array<i64: 128, 128>}, {pipeline_mode = #tpu.pipeline_mode<synchronous>, transform_indices = @transform_4, window_bounds = array<i64: 1, 128>}, {pipeline_mode = #tpu.pipeline_mode<synchronous>, transform_indices = @transform_5, window_bounds = array<i64: 1, 128>}, {pipeline_mode = #tpu.pipeline_mode<synchronous>, transform_indices = @transform_6, window_bounds = array<i64: 128, 256>}, {pipeline_mode = #tpu.pipeline_mode<synchronous>, transform_indices = @transform_7, window_bounds = array<i64: 1, 256>}, {pipeline_mode = #tpu.pipeline_mode<synchronous>, transform_indices = @transform_8, window_bounds = array<i64: 256, 256>}, {pipeline_mode = #tpu.pipeline_mode<synchronous>, transform_indices = @transform_9, window_bounds = array<i64: 1, 256>}, {pipeline_mode = #tpu.pipeline_mode<synchronous>, transform_indices = @transform_10, window_bounds = array<i64: 1, 256>}, {pipeline_mode = #tpu.pipeline_mode<synchronous>, transform_indices = @transform_11, window_bounds = array<i64: 256, 512>}, {pipeline_mode = #tpu.pipeline_mode<synchronous>, transform_indices = @transform_12, window_bounds = array<i64: 1, 512>}, {transform_indices = @transform_13, window_bounds = array<i64: 8, 512>}]} {
    %c0 = arith.constant 0 : index
    %c0_0 = arith.constant 0 : index
    %0 = vector.load %arg1[%c0, %c0_0] : memref<8x128xf32, #tpu.memory_space<vmem>>, vector<8x128xf32>
    %c0_1 = arith.constant 0 : index
    %c0_2 = arith.constant 0 : index
    %1 = vector.load %arg2[%c0_1, %c0_2] : memref<1x128xf32, #tpu.memory_space<vmem>>, vector<1x128xf32>
    %2 = vector.broadcast %1 : vector<1x128xf32> to vector<8x128xf32>
    %3 = arith.mulf %0, %2 : vector<8x128xf32>
    %c0_3 = arith.constant 0 : index
    %c0_4 = arith.constant 0 : index
    %4 = vector.load %arg3[%c0_3, %c0_4] : memref<1x128xf32, #tpu.memory_space<vmem>>, vector<1x128xf32>
    %5 = vector.broadcast %4 : vector<1x128xf32> to vector<8x128xf32>
    %6 = arith.addf %3, %5 : vector<8x128xf32>
    %c0_5 = arith.constant 0 : index
    %c0_6 = arith.constant 0 : index
    %7 = vector.load %arg4[%c0_5, %c0_6] : memref<128x128xf32, #tpu.memory_space<vmem>>, vector<128x128xf32>
    %c0_7 = arith.constant 0 : index
    %c0_8 = arith.constant 0 : index
    %8 = vector.load %arg5[%c0_7, %c0_8] : memref<1x128xf32, #tpu.memory_space<vmem>>, vector<1x128xf32>
    %c0_9 = arith.constant 0 : index
    %c0_10 = arith.constant 0 : index
    %9 = vector.load %arg6[%c0_9, %c0_10] : memref<1x128xf32, #tpu.memory_space<vmem>>, vector<1x128xf32>
    %c0_11 = arith.constant 0 : index
    %c0_12 = arith.constant 0 : index
    %10 = vector.load %arg7[%c0_11, %c0_12] : memref<128x256xf32, #tpu.memory_space<vmem>>, vector<128x256xf32>
    %c0_13 = arith.constant 0 : index
    %c0_14 = arith.constant 0 : index
    %11 = vector.load %arg8[%c0_13, %c0_14] : memref<1x256xf32, #tpu.memory_space<vmem>>, vector<1x256xf32>
    %cst = arith.constant dense<0.000000e+00> : vector<8x128xf32>
    %12 = tpu.matmul %6, %7, %cst {dimension_numbers = #tpu.dot_dimension_numbers<[1], [0], [0], [1], [0, 0, 1, 1], [], []>, precision = #tpu.contract_precision<fp32>} : vector<8x128xf32>, vector<128x128xf32>, vector<8x128xf32> -> vector<8x128xf32>
    %13 = arith.subf %6, %12 : vector<8x128xf32>
    %14 = arith.mulf %13, %13 : vector<8x128xf32>
    %cst_15 = arith.constant dense<0.000000e+00> : vector<8x128xf32>
    %15 = tpu.matmul %14, %7, %cst_15 {dimension_numbers = #tpu.dot_dimension_numbers<[1], [0], [0], [1], [0, 0, 1, 1], [], []>, precision = #tpu.contract_precision<fp32>} : vector<8x128xf32>, vector<128x128xf32>, vector<8x128xf32> -> vector<8x128xf32>
    %cst_16 = arith.constant 9.99999974E-6 : f32
    %16 = vector.broadcast %cst_16 : f32 to vector<8x128xf32>
    %17 = arith.addf %15, %16 : vector<8x128xf32>
    %18 = math.rsqrt %17 : vector<8x128xf32>
    %19 = arith.mulf %13, %18 : vector<8x128xf32>
    %20 = vector.broadcast %8 : vector<1x128xf32> to vector<8x128xf32>
    %21 = arith.mulf %19, %20 : vector<8x128xf32>
    %22 = vector.broadcast %9 : vector<1x128xf32> to vector<8x128xf32>
    %23 = arith.addf %21, %22 : vector<8x128xf32>
    %cst_17 = arith.constant dense<0.000000e+00> : vector<8x256xf32>
    %24 = tpu.matmul %23, %10, %cst_17 {dimension_numbers = #tpu.dot_dimension_numbers<[1], [0], [0], [1], [0, 0, 1, 1], [], []>, precision = #tpu.contract_precision<fp32>} : vector<8x128xf32>, vector<128x256xf32>, vector<8x256xf32> -> vector<8x256xf32>
    %25 = vector.broadcast %11 : vector<1x256xf32> to vector<8x256xf32>
    %26 = arith.addf %24, %25 : vector<8x256xf32>
    %cst_18 = arith.constant 5.000000e-01 : f32
    %27 = vector.broadcast %cst_18 : f32 to vector<8x256xf32>
    %28 = arith.mulf %27, %26 : vector<8x256xf32>
    %cst_19 = arith.constant 0.707106769 : f32
    %29 = vector.broadcast %cst_19 : f32 to vector<8x256xf32>
    %30 = arith.mulf %26, %29 : vector<8x256xf32>
    %31 = math.erf %30 : vector<8x256xf32>
    %cst_20 = arith.constant 1.000000e+00 : f32
    %32 = vector.broadcast %cst_20 : f32 to vector<8x256xf32>
    %33 = arith.addf %32, %31 : vector<8x256xf32>
    %34 = arith.mulf %28, %33 : vector<8x256xf32>
    %c0_21 = arith.constant 0 : index
    %c0_22 = arith.constant 0 : index
    %35 = vector.load %arg9[%c0_21, %c0_22] : memref<256x256xf32, #tpu.memory_space<vmem>>, vector<256x256xf32>
    %c0_23 = arith.constant 0 : index
    %c0_24 = arith.constant 0 : index
    %36 = vector.load %arg10[%c0_23, %c0_24] : memref<1x256xf32, #tpu.memory_space<vmem>>, vector<1x256xf32>
    %c0_25 = arith.constant 0 : index
    %c0_26 = arith.constant 0 : index
    %37 = vector.load %arg11[%c0_25, %c0_26] : memref<1x256xf32, #tpu.memory_space<vmem>>, vector<1x256xf32>
    %c0_27 = arith.constant 0 : index
    %c0_28 = arith.constant 0 : index
    %38 = vector.load %arg12[%c0_27, %c0_28] : memref<256x512xf32, #tpu.memory_space<vmem>>, vector<256x512xf32>
    %c0_29 = arith.constant 0 : index
    %c0_30 = arith.constant 0 : index
    %39 = vector.load %arg13[%c0_29, %c0_30] : memref<1x512xf32, #tpu.memory_space<vmem>>, vector<1x512xf32>
    %cst_31 = arith.constant dense<0.000000e+00> : vector<8x256xf32>
    %40 = tpu.matmul %34, %35, %cst_31 {dimension_numbers = #tpu.dot_dimension_numbers<[1], [0], [0], [1], [0, 0, 1, 1], [], []>, precision = #tpu.contract_precision<fp32>} : vector<8x256xf32>, vector<256x256xf32>, vector<8x256xf32> -> vector<8x256xf32>
    %41 = arith.subf %34, %40 : vector<8x256xf32>
    %42 = arith.mulf %41, %41 : vector<8x256xf32>
    %cst_32 = arith.constant dense<0.000000e+00> : vector<8x256xf32>
    %43 = tpu.matmul %42, %35, %cst_32 {dimension_numbers = #tpu.dot_dimension_numbers<[1], [0], [0], [1], [0, 0, 1, 1], [], []>, precision = #tpu.contract_precision<fp32>} : vector<8x256xf32>, vector<256x256xf32>, vector<8x256xf32> -> vector<8x256xf32>
    %cst_33 = arith.constant 9.99999974E-6 : f32
    %44 = vector.broadcast %cst_33 : f32 to vector<8x256xf32>
    %45 = arith.addf %43, %44 : vector<8x256xf32>
    %46 = math.rsqrt %45 : vector<8x256xf32>
    %47 = arith.mulf %41, %46 : vector<8x256xf32>
    %48 = vector.broadcast %36 : vector<1x256xf32> to vector<8x256xf32>
    %49 = arith.mulf %47, %48 : vector<8x256xf32>
    %50 = vector.broadcast %37 : vector<1x256xf32> to vector<8x256xf32>
    %51 = arith.addf %49, %50 : vector<8x256xf32>
    %cst_34 = arith.constant dense<0.000000e+00> : vector<8x512xf32>
    %52 = tpu.matmul %51, %38, %cst_34 {dimension_numbers = #tpu.dot_dimension_numbers<[1], [0], [0], [1], [0, 0, 1, 1], [], []>, precision = #tpu.contract_precision<fp32>} : vector<8x256xf32>, vector<256x512xf32>, vector<8x512xf32> -> vector<8x512xf32>
    %53 = vector.broadcast %39 : vector<1x512xf32> to vector<8x512xf32>
    %54 = arith.addf %52, %53 : vector<8x512xf32>
    %cst_35 = arith.constant 5.000000e-01 : f32
    %55 = vector.broadcast %cst_35 : f32 to vector<8x512xf32>
    %56 = arith.mulf %55, %54 : vector<8x512xf32>
    %cst_36 = arith.constant 0.707106769 : f32
    %57 = vector.broadcast %cst_36 : f32 to vector<8x512xf32>
    %58 = arith.mulf %54, %57 : vector<8x512xf32>
    %59 = math.erf %58 : vector<8x512xf32>
    %cst_37 = arith.constant 1.000000e+00 : f32
    %60 = vector.broadcast %cst_37 : f32 to vector<8x512xf32>
    %61 = arith.addf %60, %59 : vector<8x512xf32>
    %62 = arith.mulf %56, %61 : vector<8x512xf32>
    %c0_38 = arith.constant 0 : index
    %c0_39 = arith.constant 0 : index
    %63 = vector.load %arg14[%c0_38, %c0_39] : memref<8x512xf32, #tpu.memory_space<vmem>>, vector<8x512xf32>
    tpu.vector_store %arg14[%c0_38, %c0_39], %62 {strides = array<i32>} : memref<8x512xf32, #tpu.memory_space<vmem>>, vector<8x512xf32>,
    return
  }
  func.func @transform_0(%arg0: i32) -> (i32, i32) {
    %c0_i32 = arith.constant 0 : i32
    %c0_i32_0 = arith.constant 0 : i32
    return %arg0, %c0_i32 : i32, i32
  }
  func.func @transform_1(%arg0: i32) -> (i32, i32) {
    %c0_i32 = arith.constant 0 : i32
    %c0_i32_0 = arith.constant 0 : i32
    %c0_i32_1 = arith.constant 0 : i32
    return %c0_i32, %c0_i32_0 : i32, i32
  }
  func.func @transform_2(%arg0: i32) -> (i32, i32) {
    %c0_i32 = arith.constant 0 : i32
    %c0_i32_0 = arith.constant 0 : i32
    %c0_i32_1 = arith.constant 0 : i32
    return %c0_i32, %c0_i32_0 : i32, i32
  }
  func.func @transform_3(%arg0: i32) -> (i32, i32) {
    %c0_i32 = arith.constant 0 : i32
    %c0_i32_0 = arith.constant 0 : i32
    %c0_i32_1 = arith.constant 0 : i32
    return %c0_i32, %c0_i32_0 : i32, i32
  }
  func.func @transform_4(%arg0: i32) -> (i32, i32) {
    %c0_i32 = arith.constant 0 : i32
    %c0_i32_0 = arith.constant 0 : i32
    %c0_i32_1 = arith.constant 0 : i32
    return %c0_i32, %c0_i32_0 : i32, i32
  }
  func.func @transform_5(%arg0: i32) -> (i32, i32) {
    %c0_i32 = arith.constant 0 : i32
    %c0_i32_0 = arith.constant 0 : i32
    %c0_i32_1 = arith.constant 0 : i32
    return %c0_i32, %c0_i32_0 : i32, i32
  }
  func.func @transform_6(%arg0: i32) -> (i32, i32) {
    %c0_i32 = arith.constant 0 : i32
    %c0_i32_0 = arith.constant 0 : i32
    %c0_i32_1 = arith.constant 0 : i32
    return %c0_i32, %c0_i32_0 : i32, i32
  }
  func.func @transform_7(%arg0: i32) -> (i32, i32) {
    %c0_i32 = arith.constant 0 : i32
    %c0_i32_0 = arith.constant 0 : i32
    %c0_i32_1 = arith.constant 0 : i32
    return %c0_i32, %c0_i32_0 : i32, i32
  }
  func.func @transform_8(%arg0: i32) -> (i32, i32) {
    %c0_i32 = arith.constant 0 : i32
    %c0_i32_0 = arith.constant 0 : i32
    %c0_i32_1 = arith.constant 0 : i32
    return %c0_i32, %c0_i32_0 : i32, i32
  }
  func.func @transform_9(%arg0: i32) -> (i32, i32) {
    %c0_i32 = arith.constant 0 : i32
    %c0_i32_0 = arith.constant 0 : i32
    %c0_i32_1 = arith.constant 0 : i32
    return %c0_i32, %c0_i32_0 : i32, i32
  }
  func.func @transform_10(%arg0: i32) -> (i32, i32) {
    %c0_i32 = arith.constant 0 : i32
    %c0_i32_0 = arith.constant 0 : i32
    %c0_i32_1 = arith.constant 0 : i32
    return %c0_i32, %c0_i32_0 : i32, i32
  }
  func.func @transform_11(%arg0: i32) -> (i32, i32) {
    %c0_i32 = arith.constant 0 : i32
    %c0_i32_0 = arith.constant 0 : i32
    %c0_i32_1 = arith.constant 0 : i32
    return %c0_i32, %c0_i32_0 : i32, i32
  }
  func.func @transform_12(%arg0: i32) -> (i32, i32) {
    %c0_i32 = arith.constant 0 : i32
    %c0_i32_0 = arith.constant 0 : i32
    %c0_i32_1 = arith.constant 0 : i32
    return %c0_i32, %c0_i32_0 : i32, i32
  }
  func.func @transform_13(%arg0: i32) -> (i32, i32) {
    %c0_i32 = arith.constant 0 : i32
    %c0_i32_0 = arith.constant 0 : i32
    return %arg0, %c0_i32 : i32, i32
  }
}

</mosaic_0001>

<bundles_post_ra>
// kernel: tpu_custom_call.1
= control target key start
LH: loop header
LB: loop body
LE: loop exit
PB: predicated region body
PF: predicated region fallthrough
CT: control target
= control target key end

     0   :  { %18 = vsyncpa [#allocation3], 0  ;;  %s12730_s0 = inlined_call_operand.hbm [shape: f32[8,128], index: 0, kind: input, shape index: {}]   ;;  %s12731_s1 = inlined_call_operand.hbm [shape: f32[1,128], index: 1, kind: input, shape index: {}]   ;;  %s12732_s2 = inlined_call_operand.hbm [shape: f32[1,128], index: 2, kind: input, shape index: {}]   ;;  %s12733_s3 = inlined_call_operand.hbm [shape: f32[128,128], index: 3, kind: input, shape index: {}]   ;;  %s12734_s4 = inlined_call_operand.hbm [shape: f32[1,128], index: 4, kind: input, shape index: {}]   ;;  %s12735_s5 = inlined_call_operand.hbm [shape: f32[1,128], index: 5, kind: input, shape index: {}]   ;;  %s12736_s6 = inlined_call_operand.hbm [shape: f32[128,256], index: 6, kind: input, shape index: {}]   ;;  %s12737_s7 = inlined_call_operand.vmem [shape: f32[1,256], index: 7, kind: input, shape index: {}]   ;;  %s12738_s8 = inlined_call_operand.hbm [shape: f32[256,256], index: 8, kind: input, shape index: {}]   ;;  %s12739_s9 = inlined_call_operand.vmem [shape: f32[1,256], index: 9, kind: input, shape index: {}]   ;;  %s12740_s10 = inlined_call_operand.hbm [shape: f32[1,256], index: 10, kind: input, shape index: {}]   ;;  %s12741_s11 = inlined_call_operand.hbm [shape: f32[256,512], index: 11, kind: input, shape index: {}]   ;;  %s12742_s12 = inlined_call_operand.vmem [shape: f32[1,512], index: 12, kind: input, shape index: {}]   ;;  %s12743_s13 = inlined_call_operand.hbm [shape: f32[8,512], index: 13, kind: output, shape index: {}]  }
   0x1   :  { %19 = vsyncpa [#allocation6], 0 }
   0x2   :  { %20 = vsyncpa [#allocation9], 0 }
   0x3   :  { %21 = vsyncpa [#allocation12], 0 }
   0x4   :  { %22 = vsyncpa [#allocation15], 0 }
   0x5   :  { %23 = vsyncpa [#allocation18], 0  ;;  %s41_s27 = sshll.u32 %s12731_s1, 4  ;;  %s42_s27 = int_to_ptr.hbm [resolvable:$true] %s41_s27 }
   0x6   :  { %24 = vsyncpa [#allocation4], 0  ;;  %s7955_s28 = smov [#allocation5]   ;;  %s62_s15 = sshll.u32 %s12733_s3, 4  ;;  %s63_s15 = int_to_ptr.hbm [resolvable:$true] %s62_s15 }
   0x7   :  { %s43_s29 = sshll.u32 %s7955_s28, 4  ;;  %s7956_s16 = smov [#allocation8]   ;;  %s44_s29 = int_to_ptr.vmem [resolvable:$true] %s43_s29 }
   0x8   :  { %46 = dma.hbm_to_vmem [thread:$0]  %s42_s27, 16, %s44_s29, [#allocation6]  }
   0x9   :  { %s64_s17 = sshll.u32 %s7956_s16, 4  ;;  %s7957_s18 = smov 128   ;;  %s65_s17 = int_to_ptr.vmem [resolvable:$true] %s64_s17 }
   0xa   :  { %s7958_s19 = smov 8   ;;  %s87_s1 = sshll.u32 %s12735_s5, 4  ;;  %s88_s1 = int_to_ptr.hbm [resolvable:$true] %s87_s1 }
   0xb   :  { %70 = dma.hbm_to_vmem [thread:$0]  %s63_s15, 2048, %s65_s17, [#allocation9], %s7957_s18, %s7957_s18, %s7958_s19  }
   0xc   :  { %s7959_s22 = smov [#allocation11]   ;;  %s112_s3 = sshll.u32 %s12738_s8, 4  ;;  %s113_s3 = int_to_ptr.hbm [resolvable:$true] %s112_s3 }
   0xd   :  { %s89_s23 = sshll.u32 %s7959_s22, 4  ;;  %s7960_s26 = smov [#allocation14]   ;;  %s90_s23 = int_to_ptr.vmem [resolvable:$true] %s89_s23 }
   0xe   :  { %92 = dma.hbm_to_vmem [thread:$0]  %s88_s1, 16, %s90_s23, [#allocation12]  }
   0xf   :  { %s114_s27 = sshll.u32 %s7960_s26, 4  ;;  %s30_s30 = sshll.u32 %s12730_s0, 4  ;;  %s115_s27 = int_to_ptr.vmem [resolvable:$true] %s114_s27  ;;  %s31_s30 = int_to_ptr.hbm [resolvable:$true] %s30_s30 }
  0x10   :  { %s7961_s14 = smov 256   ;;  %s7962_s5 = smov 16  }
  0x11   :  { %120 = dma.hbm_to_vmem [thread:$0]  %s113_s3, 8192, %s115_s27, [#allocation15], %s7961_s14, %s7961_s14, %s7962_s5  }
  0x12   :  { %s52_s17 = sshll.u32 %s12732_s2, 4  ;;  %s7963_s18 = smov [#allocation2]   ;;  %s53_s17 = int_to_ptr.hbm [resolvable:$true] %s52_s17 }
  0x13   :  { %s32_s19 = sshll.u32 %s7963_s18, 4  ;;  %s7964_s8 = smov [#allocation7]   ;;  %s33_s19 = int_to_ptr.vmem [resolvable:$true] %s32_s19 }
  0x14   :  { %35 = dma.hbm_to_vmem [thread:$0]  %s31_s30, 128, %s33_s19, [#allocation3]  }
  0x15   :  { %s54_s20 = sshll.u32 %s7964_s8, 4  ;;  %s76_s0 = sshll.u32 %s12734_s4, 4  ;;  %s55_s20 = int_to_ptr.vmem [resolvable:$true] %s54_s20  ;;  %s77_s0 = int_to_ptr.hbm [resolvable:$true] %s76_s0 }
  0x16   :  { %57 = dma.hbm_to_vmem [thread:$0]  %s53_s17, 16, %s55_s20, [#allocation6]  }
  0x17   :  { %s97_s24 = sshll.u32 %s12736_s6, 4  ;;  %s7965_s25 = smov [#allocation10]   ;;  %s98_s24 = int_to_ptr.hbm [resolvable:$true] %s97_s24 }
  0x18   :  { %s78_s2 = sshll.u32 %s7965_s25, 4  ;;  %s7966_s3 = smov [#allocation13]   ;;  %s79_s2 = int_to_ptr.vmem [resolvable:$true] %s78_s2 }
  0x19   :  { %81 = dma.hbm_to_vmem [thread:$0]  %s77_s0, 16, %s79_s2, [#allocation9]  }
  0x1a   :  { %s99_s26 = sshll.u32 %s7966_s3, 4  ;;  %s128_s29 = sshll.u32 %s12740_s10, 4  ;;  %s100_s26 = int_to_ptr.vmem [resolvable:$true] %s99_s26  ;;  %s129_s29 = int_to_ptr.hbm [resolvable:$true] %s128_s29 }
  0x1b   :  { %105 = dma.hbm_to_vmem [thread:$0]  %s98_s24, 4096, %s100_s26, [#allocation12], %s7961_s14, %s7961_s14, %s7962_s5  }
  0x1c   :  { %s138_s15 = sshll.u32 %s12741_s11, 4  ;;  %s7967_s16 = smov [#allocation16]   ;;  %s139_s15 = int_to_ptr.hbm [resolvable:$true] %s138_s15 }
  0x1d   :  { %s130_s6 = sshll.u32 %s7967_s16, 4  ;;  %s7968_s17 = smov [#allocation17]   ;;  %s131_s6 = int_to_ptr.vmem [resolvable:$true] %s130_s6 }
  0x1e   :  { %133 = dma.hbm_to_vmem [thread:$0]  %s129_s29, 32, %s131_s6, [#allocation15]  }
  0x1f   :  { %s140_s18 = sshll.u32 %s7968_s17, 4  ;;  %s7969_s19 = smov 512   ;;  %s141_s18 = int_to_ptr.vmem [resolvable:$true] %s140_s18 }
  0x20   :  { %s7970_s8 = smov 32  }
  0x21   :  { %146 = dma.hbm_to_vmem [thread:$0]  %s139_s15, 16384, %s141_s18, [#allocation18], %s7969_s19, %s7969_s19, %s7970_s8  }
  0x22   :  { %7941 = dma.done.wait [#allocation3], 128  }
  0x23   :  { %7942 = vsyncadd [#allocation3], 4294967168 }
  0x24   :  { %7943 = dma.done.wait [#allocation6], 32  }
  0x25   :  { %7944 = vsyncadd [#allocation6], 4294967264 }
  0x26   :  { %7945 = dma.done.wait [#allocation9], 2064  }
  0x27   :  { %7946 = vsyncadd [#allocation9], 4294965232 }
  0x28   :  { %7947 = dma.done.wait [#allocation12], 4112  }
  0x29   :  { %7948 = vsyncadd [#allocation12], 4294963184 }
  0x2a   :  { %7949 = dma.done.wait [#allocation15], 8224  }
  0x2b   :  { %7950 = vsyncadd [#allocation15], 4294959072 }
  0x2c   :  { %7951 = dma.done.wait [#allocation18], 16384  }
  0x2d   :  { %7952 = vsyncadd [#allocation18], 4294950912  ;;  %v215_v0 = vld [vmem:[#allocation8 + $0x78] sm:$0xff]  ;;  %v214_v1 = vld [vmem:[#allocation8 + $0x70] sm:$0xff]  ;;  %s7616_s23 = sshll.u32 %s12743_s13, 4  ;;  %s7617_s23 = int_to_ptr.hbm [resolvable:$true] %s7616_s23 }
  0x2e   :  { %v213_v2 = vld [vmem:[#allocation8 + $0x68] sm:$0xff]  ;;  %v8072_v3 = vand.u32 4294901760, %v215_v0  ;;  %v8074_v4 = vand.u32 4294901760, %v214_v1  ;;  %v212_v6 = vld [vmem:[#allocation8 + $0x60] sm:$0xff]  ;;  %v211_v7 = vld [vmem:[#allocation8 + $0x58] sm:$0xff] }
  0x2f   :  { %v8076_v5 = vand.u32 4294901760, %v213_v2  ;;  %v210_v8 = vld [vmem:[#allocation8 + $0x50] sm:$0xff]  ;;  %v8078_v9 = vand.u32 4294901760, %v212_v6  ;;  %v8080_v10 = vand.u32 4294901760, %v211_v7  ;;  %v209_v12 = vld [vmem:[#allocation8 + $0x48] sm:$0xff]  ;;  %v208_v13 = vld [vmem:[#allocation8 + $0x40] sm:$0xff] }
  0x30   :  { %v8082_v11 = vand.u32 4294901760, %v210_v8  ;;  %252 = vmatpush.msra.mxu0 %v8072_v3  ;;  %v8086_v14 = vsub.f32 %v215_v0, %v8072_v3  ;;  %v8089_v15 = vsub.f32 %v214_v1, %v8074_v4  ;;  %v8094_v17 = vand.u32 4294901760, %v209_v12  ;;  %v207_v18 = vld [vmem:[#allocation8 + $0x38] sm:$0xff]  ;;  %448 = vmatpush.msra.mxu3 %v8072_v3  ;;  %v206_v26 = vld [vmem:[#allocation8 + $0x30] sm:$0xff]  ;;  %v205_v36 = vld [vmem:[#allocation8 + $0x28] sm:$0xff] }
  0x31   :  { %v8092_v16 = vsub.f32 %v213_v2, %v8076_v5  ;;  %v8098_v19 = vsub.f32 %v212_v6, %v8078_v9  ;;  %v8101_v20 = vsub.f32 %v211_v7, %v8080_v10  ;;  %v8116_v25 = vand.u32 4294901760, %v208_v13  ;;  %v204_v41 = vld [vmem:[#allocation8 + $0x20] sm:$0xff]  ;;  %v203_v47 = vld [vmem:[#allocation8 + $0x18] sm:$0xff]  ;;  %v202_v55 = vld [vmem:[#allocation8 + $0x10] sm:$0xff] }
  0x32   :  { %v8104_v21 = vsub.f32 %v210_v8, %v8082_v11  ;;  %254 = vmatpush.msra.mxu0 %v8074_v4  ;;  %v8108_v22 = vand.u32 4294901760, %v8086_v14  ;;  %v8111_v23 = vand.u32 4294901760, %v8089_v15  ;;  %395 = vmatpush.msra.mxu2 %v8086_v14  ;;  %v8122_v28 = vand.u32 4294901760, %v207_v18  ;;  %v7654_v59 = vld [vmem:[#allocation5] ss:$0 sm:$0xff]  ;;  %v201_v61 = vld [vmem:[#allocation8 + $0x8] sm:$0xff] }
  0x33   :  { %v8114_v24 = vand.u32 4294901760, %v8092_v16  ;;  %v8120_v27 = vand.u32 4294901760, %v8098_v19  ;;  %v8125_v29 = vsub.f32 %v209_v12, %v8094_v17  ;;  %450 = vmatpush.msra.mxu3 %v8074_v4  ;;  %v8136_v33 = vand.u32 4294901760, %v8101_v20  ;;  %v189_v62 = vld [vmem:[#allocation2] sm:$0xff]  ;;  %v200_v6 = vld [vmem:[#allocation8] sm:$0xff] }
  0x34   :  { %256 = vmatpush.msra.mxu0 %v8076_v5  ;;  %v295_v30 = vsub.f32 %v8086_v14, %v8108_v22  ;;  %v301_v31 = vsub.f32 %v8089_v15, %v8111_v23  ;;  %398 = vmatpush.msra.mxu2 %v8089_v15  ;;  %v8140_v34 = vand.u32 4294901760, %v8104_v21  ;;  %v8142_v35 = vand.u32 4294901760, %v206_v26  ;;  %v7655_v7 = vld [vmem:[#allocation7] ss:$0 sm:$0xff] }
  0x35   :  { %v307_v32 = vsub.f32 %v8092_v16, %v8114_v24  ;;  %452 = vmatpush.msra.mxu3 %v8076_v5  ;;  %v313_v39 = vsub.f32 %v8098_v19, %v8120_v27  ;;  %v8153_v40 = vsub.f32 %v208_v13, %v8116_v25  ;;  %v8157_v42 = vand.u32 4294901760, %v8125_v29 }
  0x36   :  { %v8145_v37 = vand.u32 4294901760, %v295_v30  ;;  %258 = vmatpush.msra.mxu0 %v8078_v9  ;;  %v8148_v38 = vand.u32 4294901760, %v301_v31  ;;  %401 = vmatpush.msra.mxu2 %v8092_v16  ;;  %v319_v44 = vsub.f32 %v8101_v20, %v8136_v33  ;;  %v8166_v45 = vand.u32 4294901760, %v205_v36 }
  0x37   :  { %13150 = vst [vmem:[#allocation27_spill] sm:$0xff] %v8153_v40  ;;  %454 = vmatpush.msra.mxu3 %v8078_v9  ;;  %v8162_v43 = vand.u32 4294901760, %v307_v32  ;;  %v8169_v46 = vsub.f32 %v207_v18, %v8122_v28  ;;  %v8171_v48 = vand.u32 4294901760, %v204_v41  ;;  %v8177_v49 = vand.u32 4294901760, %v313_v39 }
  0x38   :  { %297 = vmatpush.msra.mxu1 %v8145_v37  ;;  %260 = vmatpush.msra.mxu0 %v8080_v10  ;;  %v325_v50 = vsub.f32 %v8104_v21, %v8140_v34  ;;  %v8182_v51 = vand.u32 4294901760, %v8153_v40  ;;  %v8185_v52 = vsub.f32 %v206_v26, %v8142_v35  ;;  %v331_v53 = vsub.f32 %v8125_v29, %v8157_v42 }
  0x39   :  { %13151 = vst [vmem:[#allocation28_spill] sm:$0xff] %v8169_v46  ;;  %404 = vmatpush.msra.mxu2 %v8098_v19  ;;  %456 = vmatpush.msra.mxu3 %v8080_v10  ;;  %v8189_v54 = vand.u32 4294901760, %v203_v47  ;;  %v8195_v56 = vand.u32 4294901760, %v319_v44  ;;  %v8198_v57 = vand.u32 4294901760, %v8169_v46  ;;  %v8201_v58 = vsub.f32 %v205_v36, %v8166_v45 }
  0x3a   :  { %303 = vmatpush.msra.mxu1 %v8148_v38  ;;  %262 = vmatpush.msra.mxu0 %v8082_v11  ;;  %13152 = vst [vmem:[#allocation29_spill] sm:$0xff] %v8185_v52  ;;  %v8204_v60 = vsub.f32 %v204_v41, %v8171_v48  ;;  %v8210_v63 = vand.u32 4294901760, %v325_v50  ;;  %v337_v0 = vsub.f32 %v8153_v40, %v8182_v51  ;;  %v8215_v1 = vand.u32 4294901760, %v8185_v52 }
  0x3b   :  { %407 = vmatpush.msra.mxu2 %v8101_v20  ;;  %458 = vmatpush.msra.mxu3 %v8082_v11  ;;  %13153 = vst [vmem:[#allocation30_spill] sm:$0xff] %v8201_v58  ;;  %v8217_v2 = vand.u32 4294901760, %v202_v55  ;;  %v8219_v8 = vand.u32 4294901760, %v331_v53  ;;  %v8222_v12 = vsub.f32 %v203_v47, %v8189_v54  ;;  %v343_v13 = vsub.f32 %v8169_v46, %v8198_v57 }
  0x3c   :  { %309 = vmatpush.msra.mxu1 %v8162_v43  ;;  %264 = vmatpush.msra.mxu0 %v8094_v17  ;;  %13154 = vst [vmem:[#allocation31_spill] sm:$0xff] %v8204_v60  ;;  %v8231_v18 = vand.u32 4294901760, %v8201_v58  ;;  %v8233_v26 = vand.u32 4294901760, %v201_v61  ;;  %v194_v30 = vmul.f32 %v7654_v59, %v189_v62  ;;  %v8236_v31 = vand.u32 4294901760, %v8204_v60 }
  0x3d   :  { %410 = vmatpush.msra.mxu2 %v8104_v21  ;;  %460 = vmatpush.msra.mxu3 %v8094_v17  ;;  %13155 = vst [vmem:[#allocation32_spill] sm:$0xff] %v8222_v12  ;;  %v8238_v32 = vand.u32 4294901760, %v200_v6  ;;  %v8244_v36 = vand.u32 4294901760, %v337_v0  ;;  %v349_v39 = vsub.f32 %v8185_v52, %v8215_v1  ;;  %v8249_v41 = vsub.f32 %v202_v55, %v8217_v2 }
  0x3e   :  { %315 = vmatpush.msra.mxu1 %v8177_v49  ;;  %266 = vmatpush.msra.mxu0 %v8116_v25  ;;  %v8251_v44 = vadd.f32 %v7655_v7, %v194_v30  ;;  %v8254_v47 = vand.u32 4294901760, %v8222_v12  ;;  %v8260_v50 = vand.u32 4294901760, %v343_v13  ;;  %v355_v53 = vsub.f32 %v8201_v58, %v8231_v18 }
  0x3f   :  { %413 = vmatpush.msra.mxu2 %v8125_v29  ;;  %462 = vmatpush.msra.mxu3 %v8116_v25  ;;  %13156 = vst [vmem:[#allocation33_spill] sm:$0xff] %v8249_v41  ;;  %v8265_v55 = vsub.f32 %v201_v61, %v8233_v26  ;;  %v361_v62 = vsub.f32 %v8204_v60, %v8236_v31  ;;  %v8276_v0 = vand.u32 4294901760, %v349_v39  ;;  %v8279_v7 = vand.u32 4294901760, %v8249_v41 }
  0x40   :  { %321 = vmatpush.msra.mxu1 %v8195_v56  ;;  %268 = vmatpush.msra.mxu0 %v8122_v28  ;;  %13157 = vst [vmem:[#allocation34_spill] sm:$0xff] %v8251_v44  ;;  %v8268_v59 = vand.u32 4294901760, %v8251_v44  ;;  %v8282_v61 = vsub.f32 %v200_v6, %v8238_v32  ;;  %v8290_v30 = vand.u32 4294901760, %v355_v53  ;;  %v367_v39 = vsub.f32 %v8222_v12, %v8254_v47 }
  0x41   :  { %416 = vmatpush.msra.mxu2 %v8153_v40  ;;  %464 = vmatpush.msra.mxu3 %v8122_v28  ;;  %v373_v53 = vsub.f32 %v8249_v41, %v8279_v7 }
  0x42   :  { %327 = vmatpush.msra.mxu1 %v8210_v63  ;;  %270 = vmatpush.msra.mxu0 %v8142_v35  ;;  %v284_v13 = vsub.f32 %v8251_v44, %v8268_v59  ;;  %v8301_v44 = vand.u32 4294901760, %v361_v62 }
  0x43   :  { %419 = vmatpush.msra.mxu2 %v8169_v46  ;;  %466 = vmatpush.msra.mxu3 %v8142_v35 }
  0x44   :  { %333 = vmatpush.msra.mxu1 %v8219_v8  ;;  %272 = vmatpush.msra.mxu0 %v8166_v45  ;;  %v285_v6 = vand.u32 4294901760, %v284_v13 }
  0x45   :  { %422 = vmatpush.msra.mxu2 %v8185_v52  ;;  %468 = vmatpush.msra.mxu3 %v8166_v45  ;;  %v8295_v52 = vand.u32 4294901760, %v8265_v55 }
  0x46   :  { %339 = vmatpush.msra.mxu1 %v8244_v36  ;;  %274 = vmatpush.msra.mxu0 %v8171_v48  ;;  %v286_v46 = vsub.f32 %v284_v13, %v285_v6 }
  0x47   :  { %425 = vmatpush.msra.mxu2 %v8201_v58  ;;  %470 = vmatpush.msra.mxu3 %v8171_v48  ;;  %v8306_v58 = vand.u32 4294901760, %v8282_v61  ;;  %v379_v62 = vsub.f32 %v8265_v55, %v8295_v52 }
  0x48   :  { %345 = vmatpush.msra.mxu1 %v8260_v50  ;;  %276 = vmatpush.msra.mxu0 %v8189_v54 }
  0x49   :  { %428 = vmatpush.msra.mxu2 %v8204_v60  ;;  %472 = vmatpush.msra.mxu3 %v8189_v54  ;;  %v8312_v60 = vand.u32 4294901760, %v367_v39  ;;  %v385_v40 = vsub.f32 %v8282_v61, %v8306_v58  ;;  %v8327_v39 = vand.u32 4294901760, %v379_v62 }
  0x4a   :  { %351 = vmatpush.msra.mxu1 %v8276_v0  ;;  %278 = vmatpush.msra.mxu0 %v8217_v2 }
  0x4b   :  { %431 = vmatpush.msra.mxu2 %v8222_v12  ;;  %474 = vmatpush.msra.mxu3 %v8217_v2  ;;  %v8320_v12 = vand.u32 4294901760, %v373_v53  ;;  %v8333_v53 = vand.u32 4294901760, %v385_v40 }
  0x4c   :  { %357 = vmatpush.msra.mxu1 %v8290_v30  ;;  %280 = vmatpush.msra.mxu0 %v8233_v26 }
  0x4d   :  { %434 = vmatpush.msra.mxu2 %v8249_v41  ;;  %476 = vmatpush.msra.mxu3 %v8233_v26  ;;  %v287_v41 = vand.u32 4294901760, %v286_v46 }
  0x4e   :  { %363 = vmatpush.msra.mxu1 %v8301_v44  ;;  %282 = vmatpush.msra.mxu0 %v8238_v32 }
  0x4f   :  { %437 = vmatpush.msra.mxu2 %v8265_v55  ;;  %478 = vmatpush.msra.mxu3 %v8238_v32 }
  0x50   :  { %489 = vmatpush.msrb.mxu0 %v8108_v22  ;;  %369 = vmatpush.msra.mxu1 %v8312_v60 }
  0x51   :  { %440 = vmatpush.msra.mxu2 %v8282_v61  ;;  %482 = vmatmul.f32.vlgmr.msra.gmra.mxu3 %v285_v6 }
  0x52   :  { %493 = vmatpush.msrb.mxu0 %v8111_v23  ;;  %375 = vmatpush.msra.mxu1 %v8320_v12 }
  0x53   :  { %443 = vmatmul.f32.vlgmr.msra.gmra.mxu2 %v284_v13  ;;  %288 = vmatmul.f32.vlgmr.msra.gmra.mxu0 %v287_v41 }
  0x54   :  { %497 = vmatpush.msrb.mxu0 %v8114_v24  ;;  %381 = vmatpush.msra.mxu1 %v8327_v39 }
  0x55   :  { %640 = vmatpush.msrb.mxu3 %v8145_v37  ;;  %595 = vmatpush.msrb.mxu2 %v8072_v3 }
  0x56   :  { %501 = vmatpush.msrb.mxu0 %v8120_v27  ;;  %387 = vmatpush.msra.mxu1 %v8333_v53 }
  0x57   :  { %389 = vmatmul.f32.vlgmr.msra.gmra.mxu1 %v8268_v59  ;;  %646 = vmatpush.msrb.mxu3 %v8148_v38 }
  0x58   :  { %556 = vmatpush.msrb.mxu1 %v8072_v3  ;;  %505 = vmatpush.msrb.mxu0 %v8136_v33 }
  0x59   :  { %652 = vmatpush.msrb.mxu3 %v8162_v43  ;;  %597 = vmatpush.msrb.mxu2 %v8074_v4 }
  0x5a   :  { %558 = vmatpush.msrb.mxu1 %v8074_v4  ;;  %509 = vmatpush.msrb.mxu0 %v8140_v34 }
  0x5b   :  { %658 = vmatpush.msrb.mxu3 %v8177_v49  ;;  %599 = vmatpush.msrb.mxu2 %v8076_v5 }
  0x5c   :  { %560 = vmatpush.msrb.mxu1 %v8076_v5  ;;  %513 = vmatpush.msrb.mxu0 %v8157_v42 }
  0x5d   :  { %664 = vmatpush.msrb.mxu3 %v8195_v56  ;;  %601 = vmatpush.msrb.mxu2 %v8078_v9 }
  0x5e   :  { %562 = vmatpush.msrb.mxu1 %v8078_v9  ;;  %517 = vmatpush.msrb.mxu0 %v8182_v51 }
  0x5f   :  { %670 = vmatpush.msrb.mxu3 %v8210_v63  ;;  %603 = vmatpush.msrb.mxu2 %v8080_v10 }
  0x60   :  { %564 = vmatpush.msrb.mxu1 %v8080_v10  ;;  %521 = vmatpush.msrb.mxu0 %v8198_v57 }
  0x61   :  { %676 = vmatpush.msrb.mxu3 %v8219_v8  ;;  %605 = vmatpush.msrb.mxu2 %v8082_v11 }
  0x62   :  { %566 = vmatpush.msrb.mxu1 %v8082_v11  ;;  %525 = vmatpush.msrb.mxu0 %v8215_v1 }
  0x63   :  { %682 = vmatpush.msrb.mxu3 %v8244_v36  ;;  %607 = vmatpush.msrb.mxu2 %v8094_v17  ;;  %v13165_v36 = vld [vmem:[#allocation34_spill] sm:$0xff] }
  0x64   :  { %568 = vmatpush.msrb.mxu1 %v8094_v17  ;;  %529 = vmatpush.msrb.mxu0 %v8231_v18 }
  0x65   :  { %688 = vmatpush.msrb.mxu3 %v8260_v50  ;;  %609 = vmatpush.msrb.mxu2 %v8116_v25 }
  0x66   :  { %570 = vmatpush.msrb.mxu1 %v8116_v25  ;;  %533 = vmatpush.msrb.mxu0 %v8236_v31 }
  0x67   :  { %694 = vmatpush.msrb.mxu3 %v8276_v0  ;;  %611 = vmatpush.msrb.mxu2 %v8122_v28 }
  0x68   :  { %572 = vmatpush.msrb.mxu1 %v8122_v28  ;;  %537 = vmatpush.msrb.mxu0 %v8254_v47 }
  0x69   :  { %700 = vmatpush.msrb.mxu3 %v8290_v30  ;;  %613 = vmatpush.msrb.mxu2 %v8142_v35 }
  0x6a   :  { %574 = vmatpush.msrb.mxu1 %v8142_v35  ;;  %541 = vmatpush.msrb.mxu0 %v8279_v7 }
  0x6b   :  { %706 = vmatpush.msrb.mxu3 %v8301_v44  ;;  %615 = vmatpush.msrb.mxu2 %v8166_v45 }
  0x6c   :  { %576 = vmatpush.msrb.mxu1 %v8166_v45  ;;  %545 = vmatpush.msrb.mxu0 %v8295_v52 }
  0x6d   :  { %712 = vmatpush.msrb.mxu3 %v8312_v60  ;;  %617 = vmatpush.msrb.mxu2 %v8171_v48 }
  0x6e   :  { %578 = vmatpush.msrb.mxu1 %v8171_v48  ;;  %549 = vmatpush.msrb.mxu0 %v8306_v58 }
  0x6f   :  { %551 = vmatmul.f32.vlgmr.msrb.gmra.mxu0 %v8268_v59  ;;  %718 = vmatpush.msrb.mxu3 %v8320_v12 }
  0x70   :  { %580 = vmatpush.msrb.mxu1 %v8189_v54  ;;  %738 = vmatpush.msra.mxu0 %v8086_v14  ;;  %v13164_v14 = vld [vmem:[#allocation33_spill] sm:$0xff] }
  0x71   :  { %724 = vmatpush.msrb.mxu3 %v8327_v39  ;;  %619 = vmatpush.msrb.mxu2 %v8189_v54  ;;  %v236_v39 = vld [vmem:[#allocation13 + $0x90] sm:$0xff] }
  0x72   :  { %582 = vmatpush.msrb.mxu1 %v8217_v2  ;;  %741 = vmatpush.msra.mxu0 %v8089_v15 }
  0x73   :  { %730 = vmatpush.msrb.mxu3 %v8333_v53  ;;  %621 = vmatpush.msrb.mxu2 %v8217_v2  ;;  %v8543_v53 = vand.u32 4294901760, %v236_v39 }
  0x74   :  { %584 = vmatpush.msrb.mxu1 %v8233_v26  ;;  %744 = vmatpush.msra.mxu0 %v8092_v16 }
  0x75   :  { %899 = vmatpush.msra.mxu3 %v8072_v3  ;;  %623 = vmatpush.msrb.mxu2 %v8233_v26 }
  0x76   :  { %586 = vmatpush.msrb.mxu1 %v8238_v32  ;;  %747 = vmatpush.msra.mxu0 %v8098_v19 }
  0x77   :  { %588 = vmatmul.f32.vlgmr.msrb.gmra.mxu1 %v8268_v59  ;;  %901 = vmatpush.msra.mxu3 %v8074_v4 }
  0x78   :  { %791 = vmatpush.msra.mxu1 %v8072_v3  ;;  %750 = vmatpush.msra.mxu0 %v8101_v20  ;;  %v13158_v3 = vld [vmem:[#allocation27_spill] sm:$0xff] }
  0x79   :  { %903 = vmatpush.msra.mxu3 %v8076_v5  ;;  %625 = vmatpush.msrb.mxu2 %v8238_v32 }
  0x7a   :  { %793 = vmatpush.msra.mxu1 %v8074_v4  ;;  %753 = vmatpush.msra.mxu0 %v8104_v21  ;;  %v13159_v4 = vld [vmem:[#allocation28_spill] sm:$0xff] }
  0x7b   :  { %905 = vmatpush.msra.mxu3 %v8078_v9  ;;  %832 = vmatpush.msra.mxu2 %v8108_v22  ;;  %v248_v22 = vld [vmem:[#allocation13 + $0xf0] sm:$0xff] }
  0x7c   :  { %795 = vmatpush.msra.mxu1 %v8076_v5  ;;  %756 = vmatpush.msra.mxu0 %v8125_v29  ;;  %v13160_v5 = vld [vmem:[#allocation29_spill] sm:$0xff]  ;;  %v242_v29 = vld [vmem:[#allocation13 + $0xc0] sm:$0xff] }
  0x7d   :  { %907 = vmatpush.msra.mxu3 %v8080_v10  ;;  %836 = vmatpush.msra.mxu2 %v8111_v23  ;;  %v246_v23 = vld [vmem:[#allocation13 + $0xe0] sm:$0xff]  ;;  %v8472_v37 = vand.u32 4294901760, %v242_v29 }
  0x7e   :  { %797 = vmatpush.msra.mxu1 %v8078_v9  ;;  %759 = vmatpush.msra.mxu0 %v13158_v3  ;;  %v13161_v9 = vld [vmem:[#allocation30_spill] sm:$0xff] }
  0x7f   :  { %909 = vmatpush.msra.mxu3 %v8082_v11  ;;  %840 = vmatpush.msra.mxu2 %v8114_v24  ;;  %v244_v24 = vld [vmem:[#allocation13 + $0xd0] sm:$0xff]  ;;  %v234_v3 = vld [vmem:[#allocation13 + $0x80] sm:$0xff] }
  0x80   :  { %799 = vmatpush.msra.mxu1 %v8080_v10  ;;  %762 = vmatpush.msra.mxu0 %v13159_v4  ;;  %v13162_v10 = vld [vmem:[#allocation31_spill] sm:$0xff]  ;;  %v8546_v4 = vsub.f32 %v236_v39, %v8543_v53 }
  0x81   :  { %911 = vmatpush.msra.mxu3 %v8094_v17  ;;  %844 = vmatpush.msra.mxu2 %v8120_v27  ;;  %v8468_v27 = vand.u32 4294901760, %v246_v23 }
  0x82   :  { %801 = vmatpush.msra.mxu1 %v8082_v11  ;;  %765 = vmatpush.msra.mxu0 %v13160_v5  ;;  %v13163_v11 = vld [vmem:[#allocation32_spill] sm:$0xff]  ;;  %v8548_v5 = vand.u32 4294901760, %v234_v3 }
  0x83   :  { %913 = vmatpush.msra.mxu3 %v8116_v25  ;;  %848 = vmatpush.msra.mxu2 %v8136_v33  ;;  %v240_v33 = vld [vmem:[#allocation13 + $0xb0] sm:$0xff] }
  0x84   :  { %803 = vmatpush.msra.mxu1 %v8094_v17  ;;  %768 = vmatpush.msra.mxu0 %v13161_v9  ;;  %v8474_v38 = vand.u32 4294901760, %v240_v33  ;;  %v232_v9 = vld [vmem:[#allocation13 + $0x70] sm:$0xff] }
  0x85   :  { %915 = vmatpush.msra.mxu3 %v8122_v28  ;;  %852 = vmatpush.msra.mxu2 %v8140_v34  ;;  %v238_v34 = vld [vmem:[#allocation13 + $0xa0] sm:$0xff] }
  0x86   :  { %805 = vmatpush.msra.mxu1 %v8116_v25  ;;  %771 = vmatpush.msra.mxu0 %v13162_v10  ;;  %v8466_v25 = vand.u32 4294901760, %v248_v22  ;;  %v8476_v40 = vand.u32 4294901760, %v238_v34  ;;  %v8492_v49 = vsub.f32 %v240_v33, %v8474_v38  ;;  %v1038_v10 = vand.u32 4294901760, %v8546_v4 }
  0x87   :  { %917 = vmatpush.msra.mxu3 %v8142_v35  ;;  %856 = vmatpush.msra.mxu2 %v8157_v42 }
  0x88   :  { %807 = vmatpush.msra.mxu1 %v8122_v28  ;;  %774 = vmatpush.msra.mxu0 %v13163_v11  ;;  %v8470_v28 = vand.u32 4294901760, %v244_v24  ;;  %v8479_v43 = vsub.f32 %v248_v22, %v8466_v25  ;;  %v8499_v56 = vsub.f32 %v238_v34, %v8476_v40  ;;  %v1026_v8 = vand.u32 4294901760, %v8492_v49  ;;  %v226_v34 = vld [vmem:[#allocation13 + $0x40] sm:$0xff] }
  0x89   :  { %919 = vmatpush.msra.mxu3 %v8166_v45  ;;  %860 = vmatpush.msra.mxu2 %v8182_v51  ;;  %v8554_v11 = vsub.f32 %v234_v3, %v8548_v5 }
  0x8a   :  { %809 = vmatpush.msra.mxu1 %v8142_v35  ;;  %777 = vmatpush.msra.mxu0 %v13164_v14  ;;  %v8485_v46 = vsub.f32 %v244_v24, %v8470_v28  ;;  %v1002_v51 = vand.u32 4294901760, %v8479_v43  ;;  %v8557_v14 = vand.u32 4294901760, %v232_v9 }
  0x8b   :  { %921 = vmatpush.msra.mxu3 %v8171_v48  ;;  %864 = vmatpush.msra.mxu2 %v8198_v57 }
  0x8c   :  { %811 = vmatpush.msra.mxu1 %v8166_v45  ;;  %780 = vmatpush.msra.mxu0 %v8265_v55  ;;  %v8482_v45 = vsub.f32 %v246_v23, %v8468_v27  ;;  %v1003_v63 = vsub.f32 %v8479_v43, %v1002_v51 }
  0x8d   :  { %923 = vmatpush.msra.mxu3 %v8189_v54  ;;  %868 = vmatpush.msra.mxu2 %v8215_v1 }
  0x8e   :  { %813 = vmatpush.msra.mxu1 %v8171_v48  ;;  %783 = vmatpush.msra.mxu0 %v8282_v61  ;;  %v8489_v48 = vsub.f32 %v242_v29, %v8472_v37 }
  0x8f   :  { %925 = vmatpush.msra.mxu3 %v8217_v2  ;;  %872 = vmatpush.msra.mxu2 %v8231_v18  ;;  %v1004_v18 = vand.u32 4294901760, %v1003_v63 }
  0x90   :  { %815 = vmatpush.msra.mxu1 %v8189_v54  ;;  %960 = vmatpush.msrb.mxu0 %v8466_v25  ;;  %v1014_v54 = vand.u32 4294901760, %v8485_v46 }
  0x91   :  { %927 = vmatpush.msra.mxu3 %v8233_v26  ;;  %876 = vmatpush.msra.mxu2 %v8236_v31 }
  0x92   :  { %817 = vmatpush.msra.mxu1 %v8217_v2  ;;  %962 = vmatpush.msrb.mxu0 %v8468_v27  ;;  %v1015_v2 = vsub.f32 %v8485_v46, %v1014_v54 }
  0x93   :  { %929 = vmatpush.msra.mxu3 %v8238_v32  ;;  %880 = vmatpush.msra.mxu2 %v8254_v47  ;;  %v1027_v47 = vsub.f32 %v8492_v49, %v1026_v8 }
  0x94   :  { %819 = vmatpush.msra.mxu1 %v8233_v26  ;;  %964 = vmatpush.msrb.mxu0 %v8470_v28  ;;  %v1016_v44 = vand.u32 4294901760, %v1015_v2 }
  0x95   :  { %884 = vmatpush.msra.mxu2 %v8279_v7  ;;  %v1028_v7 = vand.u32 4294901760, %v1027_v47 }
  0x96   :  { %821 = vmatpush.msra.mxu1 %v8238_v32  ;;  %v1032_v32 = vand.u32 4294901760, %v8499_v56  ;;  %966 = vmatpush.msrb.mxu0 %v8472_v37 }
  0x97   :  { %888 = vmatpush.msra.mxu2 %v8295_v52  ;;  %v1008_v52 = vand.u32 4294901760, %v8482_v45 }
  0x98   :  { %1005 = vmatpush.msrb.mxu1 %v1004_v18  ;;  %968 = vmatpush.msrb.mxu0 %v8474_v38  ;;  %v1033_v59 = vsub.f32 %v8499_v56, %v1032_v32 }
  0x99   :  { %892 = vmatpush.msra.mxu2 %v8306_v58  ;;  %v1020_v58 = vand.u32 4294901760, %v8489_v48  ;;  %v1009_v1 = vsub.f32 %v8482_v45, %v1008_v52 }
  0x9a   :  { %970 = vmatpush.msrb.mxu0 %v8476_v40  ;;  %v1034_v13 = vand.u32 4294901760, %v1033_v59 }
  0x9b   :  { %v1010_v26 = vand.u32 4294901760, %v1009_v1  ;;  %v1021_v31 = vsub.f32 %v8489_v48, %v1020_v58  ;;  %v224_v1 = vld [vmem:[#allocation13 + $0x30] sm:$0xff] }
  0x9c   :  { %972 = vmatpush.msrb.mxu0 %v8543_v53 }
  0x9d   :  { %1011 = vmatpush.msrb.mxu1 %v1010_v26  ;;  %v1022_v55 = vand.u32 4294901760, %v1021_v31  ;;  %v8603_v26 = vand.u32 4294901760, %v224_v1 }
  0x9e   :  { %974 = vmatpush.msrb.mxu0 %v8548_v5 }
  0x9f   :  { %1017 = vmatpush.msrb.mxu1 %v1016_v44 }
  0xa0   :  { %976 = vmatpush.msrb.mxu0 %v8557_v14 }
  0xa1   :  { %1023 = vmatpush.msrb.mxu1 %v1022_v55 }
  0xa3   :  { %1029 = vmatpush.msrb.mxu1 %v1028_v7 }
  0xa5   :  { %1035 = vmatpush.msrb.mxu1 %v1034_v13 }
  0xd0   :  { %v289_v16 = vpop.f32.mrf.mxu0 }
  0xd4   :  { %v390_v15 = vpop.f32.mrf.mxu1  ;;  %v483_v21 = vpop.f32.mrf.mxu3 }
  0xd5   :  { %v391_v17 = vadd.f32 %v390_v15, %v289_v16  ;;  %v230_v15 = vld [vmem:[#allocation13 + $0x60] sm:$0xff]  ;;  %v1039_v16 = vsub.f32 %v8546_v4, %v1038_v10 }
  0xd6   :  { %v444_v19 = vpop.f32.mrf.mxu2 }
  0xd7   :  { %v445_v20 = vadd.f32 %v444_v19, %v391_v17  ;;  %v1044_v17 = vand.u32 4294901760, %v8554_v11  ;;  %v8566_v19 = vsub.f32 %v232_v9, %v8557_v14  ;;  %v1040_v22 = vand.u32 4294901760, %v1039_v16 }
  0xd9   :  { %v484_v35 = vadd.f32 %v483_v21, %v445_v20  ;;  %v8569_v20 = vand.u32 4294901760, %v230_v15  ;;  %v228_v21 = vld [vmem:[#allocation13 + $0x50] sm:$0xff]  ;;  %v1045_v23 = vsub.f32 %v8554_v11, %v1044_v17  ;;  %v1050_v24 = vand.u32 4294901760, %v8566_v19  ;;  %1041 = vmatpush.msrb.mxu1 %v1040_v22 }
  0xda   :  { %v8582_v33 = vand.u32 4294901760, %v228_v21 }
  0xdb   :  { %v8578_v29 = vsub.f32 %v230_v15, %v8569_v20  ;;  %978 = vmatpush.msrb.mxu0 %v8569_v20 }
  0xdc   :  { %v8593_v63 = vsub.f32 %v228_v21, %v8582_v33 }
  0xdd   :  { %980 = vmatpush.msrb.mxu0 %v8582_v33 }
  0xde   :  { %v1062_v31 = vand.u32 4294901760, %v8593_v63 }
  0xe0   :  { %v1063_v59 = vsub.f32 %v8593_v63, %v1062_v31 }
  0xec   :  { %v552_v42 = vpop.f32.mrf.mxu0 }
  0xed   :  { %v553_v57 = vadd.f32 %v552_v42, %v484_v35  ;;  %v1046_v35 = vand.u32 4294901760, %v1045_v23  ;;  %v1051_v42 = vsub.f32 %v8566_v19, %v1050_v24 }
  0xef   :  { %1047 = vmatpush.msrb.mxu1 %v1046_v35  ;;  %v1052_v2 = vand.u32 4294901760, %v1051_v42 }
  0xf1   :  { %1053 = vmatpush.msrb.mxu1 %v1052_v2 }
  0xf4   :  { %v589_v60 = vpop.f32.mrf.mxu1 }
  0xf5   :  { %v590_v12 = vadd.f32 %v589_v60, %v553_v57  ;;  %v1056_v57 = vand.u32 4294901760, %v8578_v29  ;;  %v8590_v60 = vand.u32 4294901760, %v226_v34 }
  0xf7   :  { %v8519_v41 = vsub.f32 %v13165_v36, %v590_v12  ;;  %v1057_v12 = vsub.f32 %v8578_v29, %v1056_v57  ;;  %v8601_v18 = vsub.f32 %v226_v34, %v8590_v60  ;;  %v222_v36 = vld [vmem:[#allocation13 + $0x20] sm:$0xff]  ;;  %982 = vmatpush.msrb.mxu0 %v8590_v60 }
  0xf8   :  { %v8612_v55 = vand.u32 4294901760, %v222_v36 }
  0xf9   :  { %v593_v50 = vmul.f32 %v8519_v41, %v8519_v41  ;;  %v1058_v44 = vand.u32 4294901760, %v1057_v12  ;;  %v1068_v47 = vand.u32 4294901760, %v8601_v18  ;;  %984 = vmatpush.msrb.mxu0 %v8603_v26 }
  0xfa   :  { %v8625_v13 = vsub.f32 %v222_v36, %v8612_v55 }
  0xfb   :  { %v626_v0 = vand.u32 4294901760, %v593_v50  ;;  %1059 = vmatpush.msrb.mxu1 %v1058_v44  ;;  %v1069_v7 = vsub.f32 %v8601_v18, %v1068_v47  ;;  %986 = vmatpush.msrb.mxu0 %v8612_v55  ;;  %v247_v44 = vld [vmem:[#allocation13 + $0xe8] sm:$0xff] }
  0xfc   :  { %v1080_v9 = vand.u32 4294901760, %v8625_v13 }
  0xfd   :  { %732 = vmatmul.f32.vlgmr.msrb.gmra.mxu3 %v626_v0  ;;  %v627_v61 = vsub.f32 %v593_v50, %v626_v0  ;;  %v8610_v50 = vsub.f32 %v224_v1, %v8603_v26  ;;  %v1070_v39 = vand.u32 4294901760, %v1069_v7  ;;  %v249_v1 = vld [vmem:[#allocation13 + $0xf8] sm:$0xff]  ;;  %v8671_v7 = vand.u32 4294901760, %v247_v44 }
  0xfe   :  { %1156 = vmatpush.msrb.mxu3 %v8466_v25  ;;  %v1081_v22 = vsub.f32 %v8625_v13, %v1080_v9  ;;  %v8660_v12 = vand.u32 4294901760, %v249_v1 }
  0xff   :  { %786 = vmatmul.f32.vlgmr.msra.gmra.mxu0 %v627_v61  ;;  %v628_v30 = vand.u32 4294901760, %v627_v61 }
 0x100   :  { %1158 = vmatpush.msrb.mxu3 %v8468_v27  ;;  %v1082_v35 = vand.u32 4294901760, %v1081_v22 }
 0x101   :  { %825 = vmatmul.f32.vlgmr.msra.gmra.mxu1 %v628_v30  ;;  %v629_v6 = vsub.f32 %v627_v61, %v628_v30  ;;  %v1074_v61 = vand.u32 4294901760, %v8610_v50 }
 0x102   :  { %1160 = vmatpush.msrb.mxu3 %v8470_v28 }
 0x103   :  { %v630_v62 = vand.u32 4294901760, %v629_v6  ;;  %v1064_v6 = vand.u32 4294901760, %v1063_v59  ;;  %v1075_v3 = vsub.f32 %v8610_v50, %v1074_v61 }
 0x104   :  { %1162 = vmatpush.msrb.mxu3 %v8472_v37 }
 0x105   :  { %631 = vmatmul.f32.vlgmr.msrb.gmra.mxu2 %v630_v62  ;;  %931 = vmatmul.f32.vlgmr.msra.gmra.mxu3 %v626_v0  ;;  %v218_v62 = vld [vmem:[#allocation13] sm:$0xff]  ;;  %v1076_v21 = vand.u32 4294901760, %v1075_v3  ;;  %v243_v3 = vld [vmem:[#allocation13 + $0xc8] sm:$0xff] }
 0x106   :  { %1103 = vmatpush.msrb.mxu2 %v8479_v43  ;;  %1164 = vmatpush.msrb.mxu3 %v8474_v38  ;;  %v8641_v16 = vand.u32 4294901760, %v218_v62 }
 0x107   :  { %1065 = vmatpush.msrb.mxu1 %v1064_v6  ;;  %v245_v6 = vld [vmem:[#allocation13 + $0xd8] sm:$0xff] }
 0x108   :  { %1106 = vmatpush.msrb.mxu2 %v8482_v45  ;;  %1166 = vmatpush.msrb.mxu3 %v8476_v40  ;;  %v8650_v34 = vsub.f32 %v218_v62, %v8641_v16 }
 0x109   :  { %1071 = vmatpush.msrb.mxu1 %v1070_v39  ;;  %v8680_v39 = vsub.f32 %v247_v44, %v8671_v7 }
 0x10a   :  { %1109 = vmatpush.msrb.mxu2 %v8485_v46  ;;  %1168 = vmatpush.msrb.mxu3 %v8543_v53  ;;  %v1092_v2 = vand.u32 4294901760, %v8650_v34 }
 0x10b   :  { %1077 = vmatpush.msrb.mxu1 %v1076_v21  ;;  %v8689_v21 = vand.u32 4294901760, %v243_v3 }
 0x10c   :  { %1112 = vmatpush.msrb.mxu2 %v8489_v48  ;;  %1170 = vmatpush.msrb.mxu3 %v8548_v5  ;;  %v1093_v59 = vsub.f32 %v8650_v34, %v1092_v2 }
 0x10d   :  { %894 = vmatmul.f32.vlgmr.msra.gmra.mxu2 %v626_v0  ;;  %v220_v0 = vld [vmem:[#allocation13 + $0x10] sm:$0xff]  ;;  %1083 = vmatpush.msrb.mxu1 %v1082_v35  ;;  %v241_v35 = vld [vmem:[#allocation13 + $0xb8] sm:$0xff] }
 0x10e   :  { %1115 = vmatpush.msrb.mxu2 %v8492_v49  ;;  %1172 = vmatpush.msrb.mxu3 %v8557_v14  ;;  %v8627_v30 = vand.u32 4294901760, %v220_v0  ;;  %v1094_v62 = vand.u32 4294901760, %v1093_v59 }
 0x110   :  { %1118 = vmatpush.msrb.mxu2 %v8499_v56  ;;  %1174 = vmatpush.msrb.mxu3 %v8569_v20  ;;  %v8637_v15 = vsub.f32 %v220_v0, %v8627_v30  ;;  %v8669_v0 = vsub.f32 %v249_v1, %v8660_v12  ;;  %v8702_v1 = vand.u32 4294901760, %v241_v35 }
 0x111   :  { %988 = vmatpush.msrb.mxu0 %v8627_v30 }
 0x112   :  { %1121 = vmatpush.msrb.mxu2 %v8546_v4  ;;  %1176 = vmatpush.msrb.mxu3 %v8582_v33  ;;  %v1086_v23 = vand.u32 4294901760, %v8637_v15  ;;  %v1343_v43 = vand.u32 4294901760, %v8669_v0  ;;  %v8717_v59 = vsub.f32 %v241_v35, %v8702_v1 }
 0x113   :  { %990 = vmatpush.msrb.mxu0 %v8641_v16 }
 0x114   :  { %1124 = vmatpush.msrb.mxu2 %v8554_v11  ;;  %1178 = vmatpush.msrb.mxu3 %v8590_v60  ;;  %v1087_v42 = vsub.f32 %v8637_v15, %v1086_v23  ;;  %v1344_v45 = vsub.f32 %v8669_v0, %v1343_v43 }
 0x115   :  { %1197 = vmatpush.msra.mxu0 %v1002_v51  ;;  %v8677_v51 = vand.u32 4294901760, %v245_v6 }
 0x116   :  { %1127 = vmatpush.msrb.mxu2 %v8566_v19  ;;  %1180 = vmatpush.msrb.mxu3 %v8603_v26  ;;  %v1088_v36 = vand.u32 4294901760, %v1087_v42  ;;  %v1345_v46 = vand.u32 4294901760, %v1344_v45  ;;  %v235_v45 = vld [vmem:[#allocation13 + $0x88] sm:$0xff] }
 0x117   :  { %1201 = vmatpush.msra.mxu0 %v1008_v52  ;;  %v1349_v52 = vand.u32 4294901760, %v8680_v39  ;;  %v8692_v22 = vsub.f32 %v245_v6, %v8677_v51  ;;  %v237_v6 = vld [vmem:[#allocation13 + $0x98] sm:$0xff]  ;;  %v8741_v35 = vand.u32 4294901760, %v235_v45  ;;  %v227_v19 = vld [vmem:[#allocation13 + $0x48] sm:$0xff] }
 0x118   :  { %1130 = vmatpush.msrb.mxu2 %v8578_v29  ;;  %1182 = vmatpush.msrb.mxu3 %v8612_v55 }
 0x119   :  { %1089 = vmatpush.msrb.mxu1 %v1088_v36  ;;  %1205 = vmatpush.msra.mxu0 %v1014_v54  ;;  %v1350_v54 = vsub.f32 %v8680_v39, %v1349_v52  ;;  %v1355_v42 = vand.u32 4294901760, %v8692_v22  ;;  %v8706_v36 = vsub.f32 %v243_v3, %v8689_v21 }
 0x11a   :  { %1133 = vmatpush.msrb.mxu2 %v8593_v63  ;;  %1184 = vmatpush.msrb.mxu3 %v8627_v30  ;;  %v223_v63 = vld [vmem:[#allocation13 + $0x28] sm:$0xff] }
 0x11b   :  { %1095 = vmatpush.msrb.mxu1 %v1094_v62  ;;  %1209 = vmatpush.msra.mxu0 %v1020_v58  ;;  %v1351_v48 = vand.u32 4294901760, %v1350_v54  ;;  %v1356_v58 = vsub.f32 %v8692_v22, %v1355_v42  ;;  %v8725_v62 = vand.u32 4294901760, %v237_v6  ;;  %v233_v54 = vld [vmem:[#allocation13 + $0x78] sm:$0xff] }
 0x11c   :  { %1136 = vmatpush.msrb.mxu2 %v8601_v18  ;;  %1186 = vmatpush.msrb.mxu3 %v8641_v16  ;;  %v221_v18 = vld [vmem:[#allocation13 + $0x18] sm:$0xff] }
 0x11d   :  { %1264 = vmatpush.msra.mxu1 %v8466_v25  ;;  %v239_v25 = vld [vmem:[#allocation13 + $0xa8] sm:$0xff]  ;;  %1213 = vmatpush.msra.mxu0 %v1026_v8  ;;  %v1357_v49 = vand.u32 4294901760, %v1356_v58  ;;  %v1367_v8 = vand.u32 4294901760, %v8717_v59 }
 0x11e   :  { %1139 = vmatpush.msrb.mxu2 %v8610_v50  ;;  %1346 = vmatpush.msra.mxu3 %v1345_v46  ;;  %v8714_v44 = vand.u32 4294901760, %v239_v25  ;;  %v231_v58 = vld [vmem:[#allocation13 + $0x68] sm:$0xff] }
 0x11f   :  { %1266 = vmatpush.msra.mxu1 %v8468_v27  ;;  %v1361_v27 = vand.u32 4294901760, %v8706_v36  ;;  %1217 = vmatpush.msra.mxu0 %v1032_v32  ;;  %v1368_v56 = vsub.f32 %v8717_v59, %v1367_v8 }
 0x120   :  { %1142 = vmatpush.msrb.mxu2 %v8625_v13  ;;  %1352 = vmatpush.msra.mxu3 %v1351_v48  ;;  %v8728_v3 = vsub.f32 %v239_v25, %v8714_v44  ;;  %v8754_v48 = vand.u32 4294901760, %v233_v54 }
 0x121   :  { %1268 = vmatpush.msra.mxu1 %v8470_v28  ;;  %v1362_v28 = vsub.f32 %v8706_v36, %v1361_v27  ;;  %1221 = vmatpush.msra.mxu0 %v1038_v10  ;;  %v1369_v4 = vand.u32 4294901760, %v1368_v56 }
 0x122   :  { %1145 = vmatpush.msrb.mxu2 %v8637_v15  ;;  %1358 = vmatpush.msra.mxu3 %v1357_v49  ;;  %v1373_v32 = vand.u32 4294901760, %v8728_v3  ;;  %v8767_v49 = vsub.f32 %v233_v54, %v8754_v48 }
 0x123   :  { %1270 = vmatpush.msra.mxu1 %v8472_v37  ;;  %v8744_v37 = vsub.f32 %v237_v6, %v8725_v62  ;;  %v1363_v46 = vand.u32 4294901760, %v1362_v28  ;;  %1225 = vmatpush.msra.mxu0 %v1044_v17  ;;  %v8764_v6 = vand.u32 4294901760, %v231_v58  ;;  %v229_v28 = vld [vmem:[#allocation13 + $0x58] sm:$0xff] }
 0x124   :  { %1148 = vmatpush.msrb.mxu2 %v8650_v34  ;;  %v1374_v10 = vsub.f32 %v8728_v3, %v1373_v32  ;;  %v12752_v56 = vand.u32 4294901760, %v8767_v49 }
 0x125   :  { %1272 = vmatpush.msra.mxu1 %v8474_v38  ;;  %v1379_v25 = vand.u32 4294901760, %v8744_v37  ;;  %1364 = vmatpush.msra.mxu3 %v1363_v46  ;;  %v8758_v38 = vsub.f32 %v235_v45, %v8741_v35  ;;  %v8775_v46 = vand.u32 4294901760, %v229_v28 }
 0x126   :  { %1301 = vmatpush.msra.mxu2 %v8660_v12  ;;  %v1375_v11 = vand.u32 4294901760, %v1374_v10  ;;  %1229 = vmatpush.msra.mxu0 %v1050_v24  ;;  %v8778_v10 = vsub.f32 %v231_v58, %v8764_v6  ;;  %v1392_v24 = vsub.f32 %v8767_v49, %v12752_v56 }
 0x127   :  { %1274 = vmatpush.msra.mxu1 %v8476_v40  ;;  %v1380_v17 = vsub.f32 %v8744_v37, %v1379_v25  ;;  %1370 = vmatpush.msra.mxu3 %v1369_v4  ;;  %v1385_v40 = vand.u32 4294901760, %v8758_v38  ;;  %v8791_v4 = vand.u32 4294901760, %v227_v19  ;;  %v8794_v29 = vsub.f32 %v229_v28, %v8775_v46 }
 0x128   :  { %1303 = vmatpush.msra.mxu2 %v8671_v7  ;;  %1233 = vmatpush.msra.mxu0 %v1056_v57  ;;  %v1397_v54 = vand.u32 4294901760, %v8778_v10  ;;  %v225_v57 = vld [vmem:[#allocation13 + $0x38] sm:$0xff]  ;;  %v1393_v58 = vand.u32 4294901760, %v1392_v24  ;;  %v8827_v24 = vand.u32 4294901760, %v221_v18 }
 0x129   :  { %1276 = vmatpush.msra.mxu1 %v8543_v53  ;;  %v1381_v45 = vand.u32 4294901760, %v1380_v17  ;;  %1376 = vmatpush.msra.mxu3 %v1375_v11  ;;  %v1386_v53 = vsub.f32 %v8758_v38, %v1385_v40  ;;  %v1403_v17 = vand.u32 4294901760, %v8794_v29  ;;  %v8804_v56 = vand.u32 4294901760, %v225_v57 }
 0x12a   :  { %1305 = vmatpush.msra.mxu2 %v8677_v51  ;;  %1237 = vmatpush.msra.mxu0 %v1062_v31  ;;  %v1398_v11 = vsub.f32 %v8778_v10, %v1397_v54 }
 0x12b   :  { %1278 = vmatpush.msra.mxu1 %v8548_v5  ;;  %1382 = vmatpush.msra.mxu3 %v1381_v45  ;;  %v1387_v5 = vand.u32 4294901760, %v1386_v53  ;;  %v1404_v28 = vsub.f32 %v8794_v29, %v1403_v17  ;;  %v8816_v45 = vand.u32 4294901760, %v223_v63  ;;  %v8819_v53 = vsub.f32 %v225_v57, %v8804_v56 }
 0x12c   :  { %1307 = vmatpush.msra.mxu2 %v8689_v21  ;;  %1241 = vmatpush.msra.mxu0 %v1068_v47  ;;  %v1399_v31 = vand.u32 4294901760, %v1398_v11  ;;  %v219_v11 = vld [vmem:[#allocation13 + $0x8] sm:$0xff] }
 0x12d   :  { %1280 = vmatpush.msra.mxu1 %v8557_v14  ;;  %1388 = vmatpush.msra.mxu3 %v1387_v5  ;;  %v8810_v14 = vsub.f32 %v227_v19, %v8791_v4  ;;  %v1405_v47 = vand.u32 4294901760, %v1404_v28  ;;  %v1415_v19 = vand.u32 4294901760, %v8819_v53  ;;  %v8830_v5 = vsub.f32 %v223_v63, %v8816_v45 }
 0x12e   :  { %1309 = vmatpush.msra.mxu2 %v8702_v1  ;;  %1245 = vmatpush.msra.mxu0 %v1074_v61  ;;  %v8849_v63 = vsub.f32 %v221_v18, %v8827_v24 }
 0x12f   :  { %1282 = vmatpush.msra.mxu1 %v8569_v20  ;;  %1394 = vmatpush.msra.mxu3 %v1393_v58  ;;  %v1409_v20 = vand.u32 4294901760, %v8810_v14  ;;  %v1416_v57 = vsub.f32 %v8819_v53, %v1415_v19  ;;  %v1421_v58 = vand.u32 4294901760, %v8830_v5 }
 0x130   :  { %1311 = vmatpush.msra.mxu2 %v8714_v44  ;;  %1249 = vmatpush.msra.mxu0 %v1080_v9  ;;  %v8846_v9 = vand.u32 4294901760, %v219_v11 }
 0x131   :  { %1284 = vmatpush.msra.mxu1 %v8582_v33  ;;  %1400 = vmatpush.msra.mxu3 %v1399_v31  ;;  %v1410_v33 = vsub.f32 %v8810_v14, %v1409_v20  ;;  %v1417_v31 = vand.u32 4294901760, %v1416_v57  ;;  %v1422_v28 = vsub.f32 %v8830_v5, %v1421_v58 }
 0x132   :  { %1313 = vmatpush.msra.mxu2 %v8725_v62  ;;  %1253 = vmatpush.msra.mxu0 %v1086_v23  ;;  %v8859_v23 = vsub.f32 %v219_v11, %v8846_v9 }
 0x133   :  { %1286 = vmatpush.msra.mxu1 %v8590_v60  ;;  %1406 = vmatpush.msra.mxu3 %v1405_v47  ;;  %v1411_v13 = vand.u32 4294901760, %v1410_v33  ;;  %v1423_v18 = vand.u32 4294901760, %v1422_v28 }
 0x134   :  { %1315 = vmatpush.msra.mxu2 %v8741_v35  ;;  %1257 = vmatpush.msra.mxu0 %v1092_v2 }
 0x135   :  { %1288 = vmatpush.msra.mxu1 %v8603_v26  ;;  %1412 = vmatpush.msra.mxu3 %v1411_v13  ;;  %v1427_v26 = vand.u32 4294901760, %v8849_v63 }
 0x136   :  { %1317 = vmatpush.msra.mxu2 %v8754_v48 }
 0x137   :  { %1290 = vmatpush.msra.mxu1 %v8612_v55  ;;  %1418 = vmatpush.msra.mxu3 %v1417_v31  ;;  %v1428_v34 = vsub.f32 %v8849_v63, %v1427_v26  ;;  %v12753_v55 = vand.u32 4294901760, %v8859_v23 }
 0x138   :  { %1319 = vmatpush.msra.mxu2 %v8764_v6 }
 0x139   :  { %1292 = vmatpush.msra.mxu1 %v8627_v30  ;;  %1424 = vmatpush.msra.mxu3 %v1423_v18  ;;  %v1434_v57 = vsub.f32 %v8859_v23, %v12753_v55  ;;  %v7656_v18 = vld [vmem:[#allocation10] ss:$0 sm:$0xff] }
 0x13a   :  { %1321 = vmatpush.msra.mxu2 %v8775_v46 }
 0x13b   :  { %1294 = vmatpush.msra.mxu1 %v8641_v16  ;;  %v1435_v30 = vand.u32 4294901760, %v1434_v57 }
 0x13c   :  { %1323 = vmatpush.msra.mxu2 %v8791_v4 }
 0x13e   :  { %1325 = vmatpush.msra.mxu2 %v8804_v56 }
 0x140   :  { %1327 = vmatpush.msra.mxu2 %v8816_v45 }
 0x142   :  { %1329 = vmatpush.msra.mxu2 %v8827_v24 }
 0x144   :  { %1331 = vmatpush.msra.mxu2 %v8846_v9 }
 0x17c   :  { %v787_v47 = vpop.f32.mrf.mxu0 }
 0x17e   :  { %v826_v2 = vpop.f32.mrf.mxu1 }
 0x180   :  { %v733_v50 = vpop.f32.mrf.mxu3 }
 0x188   :  { %v632_v61 = vpop.f32.mrf.mxu2  ;;  %v932_v13 = vpop.f32.mrf.mxu3 }
 0x189   :  { %v633_v60 = vadd.f32 1e-05, %v632_v61  ;;  %v1429_v61 = vand.u32 4294901760, %v1428_v34 }
 0x18b   :  { %v734_v15 = vadd.f32 %v733_v50, %v633_v60  ;;  %1430 = vmatpush.msra.mxu3 %v1429_v61 }
 0x18d   :  { %v788_v33 = vadd.f32 %v787_v47, %v734_v15  ;;  %1436 = vmatpush.msra.mxu3 %v1435_v30 }
 0x18f   :  { %v827_v50 = vadd.f32 %v826_v2, %v788_v33 }
 0x190   :  { %v895_v11 = vpop.f32.mrf.mxu2 }
 0x191   :  { %v896_v60 = vadd.f32 %v895_v11, %v827_v50  ;;  %v7657_v50 = vld [vmem:[#allocation11] ss:$0 sm:$0xff] }
 0x193   :  { %v933_v31 = vadd.f32 %v932_v13, %v896_v60  ;;  %v1741_v13 = vld [vmem:[#allocation14 + $0x60] sm:$0xff] }
 0x195   :  { %7658 = vrsqrt.f32 %v933_v31  ;;  %vm941_vm1 = vweird.f32 %v933_v31 }
 0x19b   :  { %v7659_v28 = vpop.eup %7658 }
 0x19c   :  { %v936_v15 = vmul.f32 %v7659_v28, %v933_v31  ;;  %vm942_vm0 = vweird.f32 %v7659_v28 }
 0x19d   :  { %vm943_vm2 = vmor %vm941_vm1, %vm942_vm0 }
 0x19e   :  { %v937_v47 = vmul.f32 %v7659_v28, %v936_v15 }
 0x1a0   :  { %v938_v33 = vmul.f32 0.5, %v937_v47 }
 0x1a2   :  { %v939_v2 = vsub.f32 1.5, %v938_v33  ;;  %v9095_v33 = vand.u32 4294901760, %v1741_v13 }
 0x1a4   :  { %v940_v16 = vmul.f32 %v7659_v28, %v939_v2  ;;  %13200 = vst [vmem:[#allocation59_spill] sm:$0xff] %v9095_v33  ;;  %v1739_v2 = vld [vmem:[#allocation14 + $0x50] sm:$0xff] }
 0x1a6   :  { %v944_v34 = vsel %vm943_vm2, %v7659_v28, %v940_v16 }
 0x1a7   :  { %v945_v55 = vmul.f32 %v944_v34, %v8519_v41 }
 0x1a9   :  { %v949_v61 = vmul.f32 %v7656_v18, %v945_v55 }
 0x1ab   :  { %v953_v57 = vadd.f32 %v7657_v50, %v949_v61  ;;  %v9105_v50 = vand.u32 4294901760, %v1739_v2  ;;  %v9111_v61 = vsub.f32 %v1741_v13, %v9095_v33 }
 0x1ad   :  { %v8872_v11 = vand.u32 4294901760, %v953_v57  ;;  %13203 = vst [vmem:[#allocation62_spill] sm:$0xff] %v9105_v50 }
 0x1ae   :  { %13204 = vst [vmem:[#allocation63_spill] sm:$0xff] %v9111_v61 }
 0x1af   :  { %1097 = vmatmul.f32.vlgmr.msrb.gmra.mxu1 %v8872_v11  ;;  %v8876_v60 = vsub.f32 %v953_v57, %v8872_v11  ;;  %v1737_v57 = vld [vmem:[#allocation14 + $0x40] sm:$0xff] }
 0x1b0   :  { %1497 = vmatpush.msrb.mxu1 %v8660_v12 }
 0x1b1   :  { %1151 = vmatmul.f32.vlgmr.msrb.gmra.mxu2 %v8876_v60  ;;  %v8881_v30 = vand.u32 4294901760, %v8876_v60 }
 0x1b2   :  { %1499 = vmatpush.msrb.mxu1 %v8671_v7  ;;  %1538 = vmatpush.msrb.mxu2 %v1343_v43 }
 0x1b3   :  { %1190 = vmatmul.f32.vlgmr.msrb.gmra.mxu3 %v8881_v30  ;;  %v994_v41 = vsub.f32 %v8876_v60, %v8881_v30 }
 0x1b4   :  { %1501 = vmatpush.msrb.mxu1 %v8677_v51  ;;  %1542 = vmatpush.msrb.mxu2 %v1349_v52 }
 0x1b5   :  { %1605 = vmatpush.msrb.mxu3 %v8660_v12  ;;  %v995_v55 = vand.u32 4294901760, %v994_v41  ;;  %v13166_v12 = vand.u32 4294901760, %v8767_v49  ;;  %v9121_v41 = vand.u32 4294901760, %v1737_v57 }
 0x1b6   :  { %1503 = vmatpush.msrb.mxu1 %v8689_v21  ;;  %1546 = vmatpush.msrb.mxu2 %v1355_v42 }
 0x1b7   :  { %1607 = vmatpush.msrb.mxu3 %v8671_v7  ;;  %996 = vmatmul.f32.vlgmr.msrb.gmra.mxu0 %v995_v55  ;;  %v1759_v7 = vld [vmem:[#allocation14 + $0xf0] sm:$0xff]  ;;  %13207 = vst [vmem:[#allocation66_spill] sm:$0xff] %v9121_v41 }
 0x1b8   :  { %1296 = vmatmul.f32.vlgmr.msra.gmra.mxu1 %v8872_v11  ;;  %1444 = vmatpush.msrb.mxu0 %v8669_v0  ;;  %v13167_v0 = vand.u32 4294901760, %v8859_v23  ;;  %v8972_v43 = vand.u32 4294901760, %v1759_v7 }
 0x1b9   :  { %1505 = vmatpush.msrb.mxu1 %v8702_v1  ;;  %1550 = vmatpush.msrb.mxu2 %v1361_v27 }
 0x1ba   :  { %1609 = vmatpush.msrb.mxu3 %v8677_v51  ;;  %1337 = vmatmul.f32.vlgmr.msra.gmra.mxu2 %v995_v55  ;;  %13168 = vst [vmem:[#allocation27_spill] sm:$0xff] %v8972_v43  ;;  %v1757_v51 = vld [vmem:[#allocation14 + $0xe0] sm:$0xff]  ;;  %v9127_v55 = vand.u32 4294901760, %v9111_v61 }
 0x1bb   :  { %1447 = vmatpush.msrb.mxu0 %v8680_v39  ;;  %1507 = vmatpush.msrb.mxu1 %v8714_v44  ;;  %v8975_v39 = vsub.f32 %v1759_v7, %v8972_v43  ;;  %v8977_v52 = vand.u32 4294901760, %v1757_v51 }
 0x1bc   :  { %1554 = vmatpush.msrb.mxu2 %v1367_v8  ;;  %1611 = vmatpush.msrb.mxu3 %v8689_v21  ;;  %v1755_v21 = vld [vmem:[#allocation14 + $0xd0] sm:$0xff]  ;;  %13208 = vst [vmem:[#allocation67_spill] sm:$0xff] %v9127_v55 }
 0x1bd   :  { %1438 = vmatmul.f32.vlgmr.msra.gmra.mxu3 %v8872_v11  ;;  %1450 = vmatpush.msrb.mxu0 %v8692_v22  ;;  %13169 = vst [vmem:[#allocation28_spill] sm:$0xff] %v8975_v39  ;;  %v8982_v22 = vand.u32 4294901760, %v8975_v39  ;;  %v8985_v42 = vsub.f32 %v1757_v51, %v8977_v52  ;;  %v9136_v51 = vsub.f32 %v1737_v57, %v9121_v41 }
 0x1be   :  { %1509 = vmatpush.msrb.mxu1 %v8725_v62  ;;  %1558 = vmatpush.msrb.mxu2 %v1373_v32  ;;  %13170 = vst [vmem:[#allocation29_spill] sm:$0xff] %v8977_v52 }
 0x1bf   :  { %1613 = vmatpush.msrb.mxu3 %v8702_v1  ;;  %1453 = vmatpush.msrb.mxu0 %v8706_v36  ;;  %13171 = vst [vmem:[#allocation30_spill] sm:$0xff] %v8982_v22  ;;  %v8987_v1 = vand.u32 4294901760, %v1755_v21  ;;  %v1753_v36 = vld [vmem:[#allocation14 + $0xc0] sm:$0xff] }
 0x1c0   :  { %1511 = vmatpush.msrb.mxu1 %v8741_v35  ;;  %1562 = vmatpush.msrb.mxu2 %v1379_v25  ;;  %13172 = vst [vmem:[#allocation31_spill] sm:$0xff] %v8985_v42  ;;  %v9000_v8 = vand.u32 4294901760, %v1753_v36 }
 0x1c1   :  { %1615 = vmatpush.msrb.mxu3 %v8714_v44  ;;  %1259 = vmatmul.f32.vlgmr.msra.gmra.mxu0 %v8872_v11  ;;  %13173 = vst [vmem:[#allocation32_spill] sm:$0xff] %v8987_v1  ;;  %v1968_v44 = vsub.f32 %v8975_v39, %v8982_v22  ;;  %v8998_v27 = vsub.f32 %v1755_v21, %v8987_v1 }
 0x1c2   :  { %1456 = vmatpush.msrb.mxu0 %v8717_v59  ;;  %1513 = vmatpush.msrb.mxu1 %v8754_v48  ;;  %v8995_v59 = vand.u32 4294901760, %v8985_v42  ;;  %13176 = vst [vmem:[#allocation35_spill] sm:$0xff] %v9000_v8 }
 0x1c3   :  { %1566 = vmatpush.msrb.mxu2 %v1385_v40  ;;  %1617 = vmatpush.msrb.mxu3 %v8725_v62  ;;  %13175 = vst [vmem:[#allocation34_spill] sm:$0xff] %v8998_v27  ;;  %v1751_v62 = vld [vmem:[#allocation14 + $0xb0] sm:$0xff] }
 0x1c4   :  { %1459 = vmatpush.msrb.mxu0 %v8728_v3  ;;  %1515 = vmatpush.msrb.mxu1 %v8764_v6  ;;  %13174 = vst [vmem:[#allocation33_spill] sm:$0xff] %v8995_v59  ;;  %v9005_v3 = vand.u32 4294901760, %v1968_v44  ;;  %v1974_v32 = vsub.f32 %v8985_v42, %v8995_v59  ;;  %v9017_v25 = vand.u32 4294901760, %v1751_v62  ;;  %v1733_v44 = vld [vmem:[#allocation14 + $0x20] sm:$0xff] }
 0x1c5   :  { %1570 = vmatpush.msrb.mxu2 %v13166_v12  ;;  %1619 = vmatpush.msrb.mxu3 %v8741_v35  ;;  %v9010_v35 = vand.u32 4294901760, %v8998_v27  ;;  %v1735_v12 = vld [vmem:[#allocation14 + $0x30] sm:$0xff]  ;;  %13211 = vst [vmem:[#allocation70_spill] sm:$0xff] %v9136_v51 }
 0x1c6   :  { %1462 = vmatpush.msrb.mxu0 %v8744_v37  ;;  %1517 = vmatpush.msrb.mxu1 %v8775_v46  ;;  %13177 = vst [vmem:[#allocation36_spill] sm:$0xff] %v9005_v3  ;;  %v9013_v37 = vsub.f32 %v1753_v36, %v9000_v8  ;;  %v9138_v21 = vand.u32 4294901760, %v1735_v12  ;;  %v2022_v36 = vsub.f32 %v9111_v61, %v9127_v55 }
 0x1c7   :  { %1574 = vmatpush.msrb.mxu2 %v1397_v54  ;;  %1621 = vmatpush.msrb.mxu3 %v8754_v48  ;;  %13178 = vst [vmem:[#allocation37_spill] sm:$0xff] %v9010_v35  ;;  %v1749_v48 = vld [vmem:[#allocation14 + $0xa0] sm:$0xff] }
 0x1c8   :  { %1465 = vmatpush.msrb.mxu0 %v8758_v38  ;;  %1519 = vmatpush.msrb.mxu1 %v8791_v4  ;;  %13179 = vst [vmem:[#allocation38_spill] sm:$0xff] %v9013_v37  ;;  %v9021_v38 = vand.u32 4294901760, %v1974_v32  ;;  %v9028_v40 = vand.u32 4294901760, %v1749_v48  ;;  %v9149_v32 = vand.u32 4294901760, %v9136_v51 }
 0x1c9   :  { %1578 = vmatpush.msrb.mxu2 %v1403_v17  ;;  %1623 = vmatpush.msrb.mxu3 %v8764_v6  ;;  %13180 = vst [vmem:[#allocation39_spill] sm:$0xff] %v9017_v25  ;;  %v1980_v6 = vsub.f32 %v8998_v27, %v9010_v35 }
 0x1ca   :  { %1468 = vmatpush.msrb.mxu0 %v8767_v49  ;;  %1521 = vmatpush.msrb.mxu1 %v8804_v56  ;;  %13181 = vst [vmem:[#allocation40_spill] sm:$0xff] %v9021_v38  ;;  %v9026_v49 = vand.u32 4294901760, %v9013_v37 }
 0x1cb   :  { %1582 = vmatpush.msrb.mxu2 %v1409_v20  ;;  %1625 = vmatpush.msrb.mxu3 %v8775_v46  ;;  %13183 = vst [vmem:[#allocation42_spill] sm:$0xff] %v9028_v40  ;;  %v1747_v46 = vld [vmem:[#allocation14 + $0x90] sm:$0xff] }
 0x1cc   :  { %1471 = vmatpush.msrb.mxu0 %v8778_v10  ;;  %1523 = vmatpush.msrb.mxu1 %v8816_v45  ;;  %13182 = vst [vmem:[#allocation41_spill] sm:$0xff] %v9026_v49  ;;  %v9037_v10 = vand.u32 4294901760, %v1980_v6  ;;  %v1986_v54 = vsub.f32 %v9013_v37, %v9026_v49  ;;  %v9154_v6 = vand.u32 4294901760, %v1733_v44 }
 0x1cd   :  { %1586 = vmatpush.msrb.mxu2 %v1415_v19  ;;  %1627 = vmatpush.msrb.mxu3 %v8791_v4  ;;  %v9042_v4 = vsub.f32 %v1749_v48, %v9028_v40  ;;  %13212 = vst [vmem:[#allocation71_spill] sm:$0xff] %v9138_v21  ;;  %v9152_v48 = vsub.f32 %v1735_v12, %v9138_v21 }
 0x1ce   :  { %1474 = vmatpush.msrb.mxu0 %v8794_v29  ;;  %1525 = vmatpush.msrb.mxu1 %v8827_v24  ;;  %13185 = vst [vmem:[#allocation44_spill] sm:$0xff] %v9037_v10  ;;  %v9044_v29 = vand.u32 4294901760, %v1747_v46  ;;  %v9175_v13 = vsub.f32 %v1733_v44, %v9154_v6 }
 0x1cf   :  { %1590 = vmatpush.msrb.mxu2 %v1421_v58  ;;  %1629 = vmatpush.msrb.mxu3 %v8804_v56  ;;  %v9032_v56 = vsub.f32 %v1751_v62, %v9017_v25  ;;  %13186 = vst [vmem:[#allocation45_spill] sm:$0xff] %v9042_v4 }
 0x1d0   :  { %1477 = vmatpush.msrb.mxu0 %v8810_v14  ;;  %1527 = vmatpush.msrb.mxu1 %v8846_v9  ;;  %13187 = vst [vmem:[#allocation46_spill] sm:$0xff] %v9044_v29  ;;  %v1745_v14 = vld [vmem:[#allocation14 + $0x80] sm:$0xff]  ;;  %v9058_v20 = vsub.f32 %v1747_v46, %v9044_v29  ;;  %v9159_v46 = vand.u32 4294901760, %v2022_v36  ;;  %v9188_v57 = vand.u32 4294901760, %v9175_v13 }
 0x1d1   :  { %1594 = vmatpush.msrb.mxu2 %v1427_v26  ;;  %1631 = vmatpush.msrb.mxu3 %v8816_v45  ;;  %13184 = vst [vmem:[#allocation43_spill] sm:$0xff] %v9032_v56  ;;  %v9047_v17 = vand.u32 4294901760, %v9032_v56  ;;  %v9052_v45 = vand.u32 4294901760, %v1986_v54  ;;  %v9060_v19 = vand.u32 4294901760, %v1745_v14  ;;  %v1731_v54 = vld [vmem:[#allocation14 + $0x10] sm:$0xff] }
 0x1d2   :  { %1531 = vmatmul.f32.vlgmr.msrb.gmra.mxu1 %v8881_v30  ;;  %1480 = vmatpush.msrb.mxu0 %v8819_v53  ;;  %v9055_v53 = vand.u32 4294901760, %v9042_v4  ;;  %13191 = vst [vmem:[#allocation50_spill] sm:$0xff] %v9058_v20  ;;  %v9119_v30 = vsub.f32 %v1739_v2, %v9105_v50 }
 0x1d3   :  { %1598 = vmatpush.msrb.mxu2 %v13167_v0  ;;  %1633 = vmatpush.msrb.mxu3 %v8827_v24  ;;  %13188 = vst [vmem:[#allocation47_spill] sm:$0xff] %v9047_v17  ;;  %v1992_v24 = vsub.f32 %v9032_v56, %v9047_v17 }
 0x1d4   :  { %1600 = vmatmul.f32.vlgmr.msrb.gmra.mxu2 %v8872_v11  ;;  %1483 = vmatpush.msrb.mxu0 %v8830_v5  ;;  %13189 = vst [vmem:[#allocation48_spill] sm:$0xff] %v9052_v45  ;;  %v1743_v5 = vld [vmem:[#allocation14 + $0x70] sm:$0xff]  ;;  %v1998_v58 = vsub.f32 %v9042_v4, %v9055_v53  ;;  %v9133_v7 = vand.u32 4294901760, %v9119_v30 }
 0x1d5   :  { %1635 = vmatpush.msrb.mxu3 %v8846_v9  ;;  %2068 = vmatpush.msra.mxu2 %v8975_v39  ;;  %13190 = vst [vmem:[#allocation49_spill] sm:$0xff] %v9055_v53  ;;  %v9071_v9 = vand.u32 4294901760, %v9058_v20  ;;  %v9076_v26 = vand.u32 4294901760, %v1743_v5 }
 0x1d6   :  { %1637 = vmatmul.f32.vlgmr.msrb.gmra.mxu3 %v8872_v11  ;;  %1486 = vmatpush.msrb.mxu0 %v8849_v63  ;;  %13192 = vst [vmem:[#allocation51_spill] sm:$0xff] %v9060_v19  ;;  %v9074_v63 = vsub.f32 %v1745_v14, %v9060_v19  ;;  %v9083_v31 = vand.u32 4294901760, %v1998_v58  ;;  %v2028_v62 = vsub.f32 %v9119_v30, %v9133_v7  ;;  %v9165_v14 = vld [vmem:[%s12737_s7] sm:$0x3]  ;;  %v9172_v58 = vand.u32 4294901760, %v9152_v48 }
 0x1d7   :  { %2121 = vmatpush.msra.mxu3 %v8972_v43  ;;  %2071 = vmatpush.msra.mxu2 %v8985_v42  ;;  %13193 = vst [vmem:[#allocation52_spill] sm:$0xff] %v9071_v9  ;;  %v2004_v28 = vsub.f32 %v9058_v20, %v9071_v9  ;;  %v9091_v47 = vsub.f32 %v1743_v5, %v9076_v26  ;;  %v955_v12 = vperm.slane %v9165_v14, 0 }
 0x1d8   :  { %1489 = vmatpush.msrb.mxu0 %v8859_v23  ;;  %1970 = vmatpush.msra.mxu1 %v9005_v3  ;;  %13194 = vst [vmem:[#allocation53_spill] sm:$0xff] %v9074_v63  ;;  %v9079_v23 = vand.u32 4294901760, %v1992_v24  ;;  %v9088_v15 = vand.u32 4294901760, %v9074_v63  ;;  %v9167_v24 = vand.u32 4294901760, %v2028_v62  ;;  %v2034_v5 = vsub.f32 %v9136_v51, %v9149_v32 }
 0x1d9   :  { %1492 = vmatmul.f32.vlgmr.msrb.gmra.mxu0 %v8876_v60  ;;  %2123 = vmatpush.msra.mxu3 %v8977_v52  ;;  %13195 = vst [vmem:[#allocation54_spill] sm:$0xff] %v9076_v26  ;;  %v9098_v16 = vand.u32 4294901760, %v2004_v28  ;;  %v9103_v34 = vand.u32 4294901760, %v9091_v47  ;;  %v9180_v28 = vand.u32 4294901760, %v1731_v54 }
 0x1da   :  { %1925 = vmatpush.msra.mxu0 %v8972_v43  ;;  %2074 = vmatpush.msra.mxu2 %v8998_v27  ;;  %13196 = vst [vmem:[#allocation55_spill] sm:$0xff] %v9079_v23  ;;  %v2010_v18 = vsub.f32 %v9074_v63, %v9088_v15  ;;  %v9183_v2 = vand.u32 4294901760, %v2034_v5  ;;  %v2046_v5 = vsub.f32 %v9175_v13, %v9188_v57 }
 0x1db   :  { %2125 = vmatpush.msra.mxu3 %v8987_v1  ;;  %1976 = vmatpush.msra.mxu1 %v9021_v38  ;;  %13197 = vst [vmem:[#allocation56_spill] sm:$0xff] %v9083_v31  ;;  %v2016_v60 = vsub.f32 %v9091_v47, %v9103_v34  ;;  %v9195_v36 = vsub.f32 %v1731_v54, %v9180_v28 }
 0x1dc   :  { %1927 = vmatpush.msra.mxu0 %v8977_v52  ;;  %2077 = vmatpush.msra.mxu2 %v9013_v37  ;;  %13198 = vst [vmem:[#allocation57_spill] sm:$0xff] %v9088_v15  ;;  %v9114_v11 = vand.u32 4294901760, %v2010_v18  ;;  %v2040_v18 = vsub.f32 %v9152_v48, %v9172_v58 }
 0x1dd   :  { %2127 = vmatpush.msra.mxu3 %v9000_v8  ;;  %1982 = vmatpush.msra.mxu1 %v9037_v10  ;;  %13199 = vst [vmem:[#allocation58_spill] sm:$0xff] %v9091_v47  ;;  %v9130_v0 = vand.u32 4294901760, %v2016_v60  ;;  %v1729_v60 = vld [vmem:[#allocation14] sm:$0xff] }
 0x1de   :  { %1929 = vmatpush.msra.mxu0 %v8987_v1  ;;  %2080 = vmatpush.msra.mxu2 %v9032_v56  ;;  %13201 = vst [vmem:[#allocation60_spill] sm:$0xff] %v9098_v16  ;;  %v9197_v44 = vand.u32 4294901760, %v1729_v60  ;;  %v9200_v62 = vand.u32 4294901760, %v2040_v18  ;;  %v9214_v18 = vand.u32 4294901760, %v2046_v5 }
 0x1df   :  { %2129 = vmatpush.msra.mxu3 %v9017_v25  ;;  %1988 = vmatpush.msra.mxu1 %v9052_v45  ;;  %13202 = vst [vmem:[#allocation61_spill] sm:$0xff] %v9103_v34 }
 0x1e0   :  { %1931 = vmatpush.msra.mxu0 %v9000_v8  ;;  %2083 = vmatpush.msra.mxu2 %v9042_v4  ;;  %13205 = vst [vmem:[#allocation64_spill] sm:$0xff] %v9114_v11  ;;  %v9211_v54 = vsub.f32 %v1729_v60, %v9197_v44  ;;  %v1791_v60 = vld [vmem:[#allocation14 + $0x1f0] sm:$0xff] }
 0x1e1   :  { %2131 = vmatpush.msra.mxu3 %v9028_v40  ;;  %1994 = vmatpush.msra.mxu1 %v9079_v23  ;;  %13206 = vst [vmem:[#allocation65_spill] sm:$0xff] %v9119_v30 }
 0x1e2   :  { %1933 = vmatpush.msra.mxu0 %v9017_v25  ;;  %2086 = vmatpush.msra.mxu2 %v9058_v20  ;;  %13209 = vst [vmem:[#allocation68_spill] sm:$0xff] %v9130_v0 }
 0x1e3   :  { %2133 = vmatpush.msra.mxu3 %v9044_v29  ;;  %2000 = vmatpush.msra.mxu1 %v9083_v31  ;;  %13210 = vst [vmem:[#allocation69_spill] sm:$0xff] %v9133_v7 }
 0x1e4   :  { %1935 = vmatpush.msra.mxu0 %v9028_v40  ;;  %2089 = vmatpush.msra.mxu2 %v9074_v63  ;;  %13213 = vst [vmem:[#allocation72_spill] sm:$0xff] %v9149_v32 }
 0x1e5   :  { %2135 = vmatpush.msra.mxu3 %v9060_v19  ;;  %2006 = vmatpush.msra.mxu1 %v9098_v16  ;;  %13214 = vst [vmem:[#allocation73_spill] sm:$0xff] %v9152_v48 }
 0x1e6   :  { %1937 = vmatpush.msra.mxu0 %v9044_v29  ;;  %2092 = vmatpush.msra.mxu2 %v9091_v47  ;;  %13215 = vst [vmem:[#allocation74_spill] sm:$0xff] %v9154_v6 }
 0x1e7   :  { %2137 = vmatpush.msra.mxu3 %v9076_v26  ;;  %2012 = vmatpush.msra.mxu1 %v9114_v11  ;;  %13216 = vst [vmem:[#allocation75_spill] sm:$0xff] %v9159_v46 }
 0x1e8   :  { %1939 = vmatpush.msra.mxu0 %v9060_v19  ;;  %2095 = vmatpush.msra.mxu2 %v9111_v61  ;;  %13217 = vst [vmem:[#allocation76_spill] sm:$0xff] %v9167_v24 }
 0x1e9   :  { %2139 = vmatpush.msra.mxu3 %v9095_v33  ;;  %2018 = vmatpush.msra.mxu1 %v9130_v0  ;;  %13218 = vst [vmem:[#allocation77_spill] sm:$0xff] %v9172_v58 }
 0x1ea   :  { %1941 = vmatpush.msra.mxu0 %v9076_v26  ;;  %2098 = vmatpush.msra.mxu2 %v9119_v30  ;;  %13219 = vst [vmem:[#allocation78_spill] sm:$0xff] %v9175_v13 }
 0x1eb   :  { %2141 = vmatpush.msra.mxu3 %v9105_v50  ;;  %2024 = vmatpush.msra.mxu1 %v9159_v46  ;;  %13220 = vst [vmem:[#allocation79_spill] sm:$0xff] %v9180_v28 }
 0x1ec   :  { %1943 = vmatpush.msra.mxu0 %v9095_v33  ;;  %2101 = vmatpush.msra.mxu2 %v9136_v51  ;;  %13221 = vst [vmem:[#allocation80_spill] sm:$0xff] %v9183_v2 }
 0x1ed   :  { %2143 = vmatpush.msra.mxu3 %v9121_v41  ;;  %13222 = vst [vmem:[#allocation81_spill] sm:$0xff] %v9188_v57  ;;  %2030 = vmatpush.msra.mxu1 %v9167_v24  ;;  %v9225_v24 = vand.u32 4294901760, %v1791_v60 }
 0x1ee   :  { %1945 = vmatpush.msra.mxu0 %v9105_v50  ;;  %2104 = vmatpush.msra.mxu2 %v9152_v48  ;;  %13223 = vst [vmem:[#allocation82_spill] sm:$0xff] %v9195_v36  ;;  %v9208_v48 = vand.u32 4294901760, %v9195_v36 }
 0x1ef   :  { %2145 = vmatpush.msra.mxu3 %v9138_v21  ;;  %13224 = vst [vmem:[#allocation83_spill] sm:$0xff] %v9197_v44  ;;  %2036 = vmatpush.msra.mxu1 %v9183_v2  ;;  %v9222_v2 = vand.u32 4294901760, %v9211_v54  ;;  %v9235_v47 = vsub.f32 %v1791_v60, %v9225_v24 }
 0x1f0   :  { %1947 = vmatpush.msra.mxu0 %v9121_v41  ;;  %2107 = vmatpush.msra.mxu2 %v9175_v13  ;;  %13225 = vst [vmem:[#allocation84_spill] sm:$0xff] %v9200_v62  ;;  %v2052_v30 = vsub.f32 %v9195_v36, %v9208_v48 }
 0x1f1   :  { %2147 = vmatpush.msra.mxu3 %v9154_v6  ;;  %13226 = vst [vmem:[#allocation85_spill] sm:$0xff] %v9208_v48  ;;  %2042 = vmatpush.msra.mxu1 %v9200_v62 }
 0x1f2   :  { %1949 = vmatpush.msra.mxu0 %v9138_v21  ;;  %13227 = vst [vmem:[#allocation86_spill] sm:$0xff] %v9211_v54  ;;  %2110 = vmatpush.msra.mxu2 %v9195_v36  ;;  %v1789_v36 = vld [vmem:[#allocation14 + $0x1e0] sm:$0xff] }
 0x1f3   :  { %2149 = vmatpush.msra.mxu3 %v9180_v28  ;;  %13228 = vst [vmem:[#allocation87_spill] sm:$0xff] %v9214_v18  ;;  %2048 = vmatpush.msra.mxu1 %v9214_v18  ;;  %v9237_v46 = vand.u32 4294901760, %v1789_v36 }
 0x1f4   :  { %1951 = vmatpush.msra.mxu0 %v9154_v6  ;;  %13229 = vst [vmem:[#allocation88_spill] sm:$0xff] %v9222_v2  ;;  %2113 = vmatpush.msra.mxu2 %v9211_v54 }
 0x1f5   :  { %2151 = vmatpush.msra.mxu3 %v9197_v44  ;;  %13230 = vst [vmem:[#allocation89_spill] sm:$0xff] %v9225_v24  ;;  %v9248_v18 = vsub.f32 %v1789_v36, %v9237_v46 }
 0x1f6   :  { %1953 = vmatpush.msra.mxu0 %v9180_v28  ;;  %2266 = vmatpush.msrb.mxu2 %v9225_v24  ;;  %13232 = vst [vmem:[#allocation91_spill] sm:$0xff] %v9235_v47 }
 0x1f7   :  { %13233 = vst [vmem:[#allocation92_spill] sm:$0xff] %v9237_v46 }
 0x1f8   :  { %1955 = vmatpush.msra.mxu0 %v9197_v44  ;;  %2268 = vmatpush.msrb.mxu2 %v9237_v46  ;;  %13236 = vst [vmem:[#allocation95_spill] sm:$0xff] %v9248_v18 }
 0x1fa   :  { %2162 = vmatpush.msrb.mxu0 %v8982_v22 }
 0x1fc   :  { %2166 = vmatpush.msrb.mxu0 %v8995_v59 }
 0x1fe   :  { %2170 = vmatpush.msrb.mxu0 %v9010_v35  ;;  %v1783_v35 = vld [vmem:[#allocation14 + $0x1b0] sm:$0xff] }
 0x1ff   :  { %v9279_v20 = vand.u32 4294901760, %v1783_v35 }
 0x200   :  { %2174 = vmatpush.msrb.mxu0 %v9026_v49  ;;  %v1781_v49 = vld [vmem:[#allocation14 + $0x1a0] sm:$0xff] }
 0x201   :  { %13244 = vst [vmem:[#allocation103_spill] sm:$0xff] %v9279_v20  ;;  %v9288_v16 = vand.u32 4294901760, %v1781_v49 }
 0x202   :  { %2178 = vmatpush.msrb.mxu0 %v9047_v17  ;;  %v1779_v17 = vld [vmem:[#allocation14 + $0x190] sm:$0xff] }
 0x203   :  { %13246 = vst [vmem:[#allocation105_spill] sm:$0xff] %v9288_v16 }
 0x204   :  { %2182 = vmatpush.msrb.mxu0 %v9055_v53  ;;  %v1777_v53 = vld [vmem:[#allocation14 + $0x180] sm:$0xff] }
 0x206   :  { %2186 = vmatpush.msrb.mxu0 %v9071_v9 }
 0x208   :  { %2190 = vmatpush.msrb.mxu0 %v9088_v15  ;;  %v1773_v15 = vld [vmem:[#allocation14 + $0x160] sm:$0xff] }
 0x20a   :  { %2194 = vmatpush.msrb.mxu0 %v9103_v34 }
 0x20c   :  { %2198 = vmatpush.msrb.mxu0 %v9127_v55  ;;  %v956_v55 = vperm.slane %v9165_v14, 1 }
 0x20e   :  { %2202 = vmatpush.msrb.mxu0 %v9133_v7 }
 0x210   :  { %2206 = vmatpush.msrb.mxu0 %v9149_v32 }
 0x212   :  { %2210 = vmatpush.msrb.mxu0 %v9172_v58 }
 0x214   :  { %2214 = vmatpush.msrb.mxu0 %v9188_v57 }
 0x216   :  { %2218 = vmatpush.msrb.mxu0 %v9208_v48 }
 0x218   :  { %2222 = vmatpush.msrb.mxu0 %v9222_v2 }
 0x22c   :  { %v1098_v61 = vpop.f32.mrf.mxu1 }
 0x234   :  { %v997_v51 = vpop.f32.mrf.mxu0  ;;  %v1152_v62 = vpop.f32.mrf.mxu2 }
 0x235   :  { %v998_v13 = vadd.f32 %v997_v51, %v955_v12  ;;  %v9229_v51 = vand.u32 4294901760, %v2052_v30  ;;  %v2058_v12 = vsub.f32 %v9211_v54, %v9222_v2  ;;  %v1787_v30 = vld [vmem:[#allocation14 + $0x1d0] sm:$0xff]  ;;  %v9244_v54 = vand.u32 4294901760, %v9235_v47  ;;  %v1297_v11 = vpop.f32.mrf.mxu1 }
 0x236   :  { %v9250_v60 = vand.u32 4294901760, %v1787_v30 }
 0x237   :  { %v1099_v5 = vadd.f32 %v1098_v61, %v998_v13  ;;  %13231 = vst [vmem:[#allocation90_spill] sm:$0xff] %v9229_v51  ;;  %2054 = vmatpush.msra.mxu1 %v9229_v51  ;;  %v9241_v61 = vand.u32 4294901760, %v2058_v12  ;;  %v1191_v13 = vpop.f32.mrf.mxu3  ;;  %v9258_v12 = vand.u32 4294901760, %v9248_v18 }
 0x238   :  { %13235 = vst [vmem:[#allocation94_spill] sm:$0xff] %v9244_v54  ;;  %2270 = vmatpush.msrb.mxu2 %v9250_v60  ;;  %v9262_v36 = vsub.f32 %v1787_v30, %v9250_v60 }
 0x239   :  { %v1153_v22 = vadd.f32 %v1152_v62, %v1099_v5  ;;  %13234 = vst [vmem:[#allocation93_spill] sm:$0xff] %v9241_v61  ;;  %2060 = vmatpush.msra.mxu1 %v9241_v61  ;;  %v1785_v62 = vld [vmem:[#allocation14 + $0x1c0] sm:$0xff]  ;;  %v2309_v5 = vsub.f32 %v9235_v47, %v9244_v54  ;;  %v2315_v61 = vsub.f32 %v9248_v18, %v9258_v12 }
 0x23a   :  { %13237 = vst [vmem:[#allocation96_spill] sm:$0xff] %v9250_v60  ;;  %v9264_v51 = vand.u32 4294901760, %v1785_v62  ;;  %v9273_v63 = vand.u32 4294901760, %v9262_v36 }
 0x23b   :  { %v1192_v59 = vadd.f32 %v1191_v13, %v1153_v22  ;;  %2229 = vmatpush.msrb.mxu1 %v8972_v43  ;;  %13238 = vst [vmem:[#allocation97_spill] sm:$0xff] %v9258_v12  ;;  %v9268_v13 = vand.u32 4294901760, %v2309_v5  ;;  %v9284_v5 = vand.u32 4294901760, %v2315_v61 }
 0x23c   :  { %13239 = vst [vmem:[#allocation98_spill] sm:$0xff] %v9262_v36  ;;  %2272 = vmatpush.msrb.mxu2 %v9264_v51  ;;  %v9277_v0 = vsub.f32 %v1785_v62, %v9264_v51  ;;  %v2321_v4 = vsub.f32 %v9262_v36, %v9273_v63 }
 0x23d   :  { %13240 = vst [vmem:[#allocation99_spill] sm:$0xff] %v9264_v51  ;;  %2231 = vmatpush.msrb.mxu1 %v8977_v52  ;;  %2311 = vmatpush.msrb.mxu3 %v9268_v13 }
 0x23e   :  { %v1260_v22 = vpop.f32.mrf.mxu0  ;;  %13241 = vst [vmem:[#allocation100_spill] sm:$0xff] %v9268_v13  ;;  %v9293_v62 = vand.u32 4294901760, %v9277_v0  ;;  %2274 = vmatpush.msrb.mxu2 %v9279_v20  ;;  %v9302_v61 = vand.u32 4294901760, %v2321_v4 }
 0x23f   :  { %13242 = vst [vmem:[#allocation101_spill] sm:$0xff] %v9273_v63  ;;  %v1261_v30 = vadd.f32 %v1260_v22, %v1192_v59  ;;  %2233 = vmatpush.msrb.mxu1 %v8987_v1  ;;  %v9297_v22 = vsub.f32 %v1783_v35, %v9279_v20  ;;  %2317 = vmatpush.msrb.mxu3 %v9284_v5 }
 0x240   :  { %13243 = vst [vmem:[#allocation102_spill] sm:$0xff] %v9277_v0  ;;  %v2327_v35 = vsub.f32 %v9277_v0, %v9293_v62  ;;  %2276 = vmatpush.msrb.mxu2 %v9288_v16 }
 0x241   :  { %13245 = vst [vmem:[#allocation104_spill] sm:$0xff] %v9284_v5  ;;  %v9290_v59 = vadd.f32 %v1297_v11, %v1261_v30  ;;  %2235 = vmatpush.msrb.mxu1 %v9000_v8  ;;  %v9305_v11 = vsub.f32 %v1781_v49, %v9288_v16  ;;  %v9307_v30 = vand.u32 4294901760, %v1779_v17  ;;  %v9315_v56 = vand.u32 4294901760, %v9297_v22  ;;  %2323 = vmatpush.msrb.mxu3 %v9302_v61 }
 0x242   :  { %13247 = vst [vmem:[#allocation106_spill] sm:$0xff] %v9293_v62  ;;  %v9327_v5 = vand.u32 4294901760, %v1777_v53  ;;  %v9331_v31 = vand.u32 4294901760, %v2327_v35 }
 0x243   :  { %13248 = vst [vmem:[#allocation107_spill] sm:$0xff] %v9297_v22  ;;  %v9310_v13 = vmul.f32 0.70710677, %v9290_v59  ;;  %2237 = vmatpush.msrb.mxu1 %v9017_v25  ;;  %v9322_v49 = vand.u32 4294901760, %v9305_v11  ;;  %v9325_v4 = vsub.f32 %v1779_v17, %v9307_v30  ;;  %v2333_v9 = vsub.f32 %v9297_v22, %v9315_v56  ;;  %2278 = vmatpush.msrb.mxu2 %v9307_v30  ;;  %v1775_v25 = vld [vmem:[#allocation14 + $0x170] sm:$0xff] }
 0x244   :  { %13249 = vst [vmem:[#allocation108_spill] sm:$0xff] %v9302_v61  ;;  %v9344_v1 = vsub.f32 %v1777_v53, %v9327_v5  ;;  %v9346_v35 = vand.u32 4294901760, %v1775_v25  ;;  %2329 = vmatpush.msrb.mxu3 %v9331_v31 }
 0x245   :  { %13250 = vst [vmem:[#allocation109_spill] sm:$0xff] %v9305_v11  ;;  %v1645_v8 = vmul.f32 %v9310_v13, %v9310_v13  ;;  %2239 = vmatpush.msrb.mxu1 %v9028_v40  ;;  %v2339_v17 = vsub.f32 %v9305_v11, %v9322_v49  ;;  %v9341_v61 = vand.u32 4294901760, %v9325_v4  ;;  %v9351_v23 = vand.u32 4294901760, %v2333_v9  ;;  %2280 = vmatpush.msrb.mxu2 %v9327_v5 }
 0x246   :  { %13251 = vst [vmem:[#allocation110_spill] sm:$0xff] %v9307_v30  ;;  %v9360_v53 = vand.u32 4294901760, %v9344_v1 }
 0x247   :  { %13252 = vst [vmem:[#allocation111_spill] sm:$0xff] %v9315_v56  ;;  %v9348_v37 = vmin.f32 %v1645_v8, 16.0  ;;  %2241 = vmatpush.msrb.mxu1 %v9044_v29  ;;  %v9355_v40 = vand.u32 4294901760, %v2339_v17  ;;  %v2345_v52 = vsub.f32 %v9325_v4, %v9341_v61  ;;  %v9363_v8 = vsub.f32 %v1775_v25, %v9346_v35  ;;  %2335 = vmatpush.msrb.mxu3 %v9351_v23  ;;  %v1771_v29 = vld [vmem:[#allocation14 + $0x150] sm:$0xff] }
 0x248   :  { %13253 = vst [vmem:[#allocation112_spill] sm:$0xff] %v9322_v49  ;;  %2282 = vmatpush.msrb.mxu2 %v9346_v35  ;;  %v9370_v17 = vand.u32 4294901760, %v1773_v15  ;;  %v2351_v25 = vsub.f32 %v9344_v1, %v9360_v53  ;;  %v9380_v45 = vand.u32 4294901760, %v1771_v29 }
 0x249   :  { %13254 = vst [vmem:[#allocation113_spill] sm:$0xff] %v9325_v4  ;;  %v1647_v9 = vmul.f32 2.1237322e-06, %v9348_v37  ;;  %2243 = vmatpush.msrb.mxu1 %v9060_v19  ;;  %v9373_v27 = vand.u32 4294901760, %v2345_v52  ;;  %v9378_v34 = vand.u32 4294901760, %v9363_v8  ;;  %2341 = vmatpush.msrb.mxu3 %v9355_v40  ;;  %v1769_v52 = vld [vmem:[#allocation14 + $0x140] sm:$0xff] }
 0x24a   :  { %13255 = vst [vmem:[#allocation114_spill] sm:$0xff] %v9327_v5  ;;  %2284 = vmatpush.msrb.mxu2 %v9370_v17  ;;  %v9386_v19 = vsub.f32 %v1773_v15, %v9370_v17  ;;  %v9389_v10 = vand.u32 4294901760, %v2351_v25  ;;  %v9394_v39 = vsub.f32 %v1771_v29, %v9380_v45  ;;  %v1338_v29 = vpop.f32.mrf.mxu2 }
 0x24b   :  { %13256 = vst [vmem:[#allocation115_spill] sm:$0xff] %v9331_v31  ;;  %v1658_v31 = vmul.f32 3.8918573e-05, %v9348_v37  ;;  %2245 = vmatpush.msrb.mxu1 %v9076_v26  ;;  %v2357_v43 = vsub.f32 %v9363_v8, %v9378_v34  ;;  %2347 = vmatpush.msrb.mxu3 %v9373_v27 }
 0x24c   :  { %13257 = vst [vmem:[#allocation116_spill] sm:$0xff] %v9341_v61  ;;  %v9404_v25 = vand.u32 4294901760, %v9386_v19  ;;  %2286 = vmatpush.msrb.mxu2 %v9380_v45  ;;  %v9411_v7 = vand.u32 4294901760, %v9394_v39 }
 0x24d   :  { %13258 = vst [vmem:[#allocation117_spill] sm:$0xff] %v9344_v1  ;;  %v1659_v42 = vadd.f32 0.001143296, %v1658_v31  ;;  %2247 = vmatpush.msrb.mxu1 %v9095_v33  ;;  %v9408_v26 = vand.u32 4294901760, %v2357_v43  ;;  %2353 = vmatpush.msrb.mxu3 %v9389_v10  ;;  %v1765_v43 = vld [vmem:[#allocation14 + $0x120] sm:$0xff] }
 0x24e   :  { %13259 = vst [vmem:[#allocation118_spill] sm:$0xff] %v9346_v35  ;;  %v2363_v38 = vsub.f32 %v9386_v19, %v9404_v25 }
 0x24f   :  { %13260 = vst [vmem:[#allocation119_spill] sm:$0xff] %v9351_v23  ;;  %v1648_v23 = vadd.f32 0.00028619796, %v1647_v9  ;;  %v9396_v9 = vand.u32 4294901760, %v1769_v52  ;;  %v1660_v15 = vmul.f32 %v1659_v42, %v9348_v37  ;;  %2249 = vmatpush.msrb.mxu1 %v9105_v50  ;;  %2359 = vmatpush.msrb.mxu3 %v9408_v26  ;;  %v1763_v50 = vld [vmem:[#allocation14 + $0x110] sm:$0xff] }
 0x250   :  { %13261 = vst [vmem:[#allocation120_spill] sm:$0xff] %v9355_v40  ;;  %v1767_v40 = vld [vmem:[#allocation14 + $0x130] sm:$0xff]  ;;  %v9437_v3 = vand.u32 4294901760, %v2363_v38 }
 0x251   :  { %13262 = vst [vmem:[#allocation121_spill] sm:$0xff] %v9360_v53  ;;  %v1649_v31 = vmul.f32 %v1648_v23, %v9348_v37  ;;  %v9414_v42 = vsub.f32 %v1769_v52, %v9396_v9  ;;  %v9416_v23 = vand.u32 4294901760, %v1767_v40  ;;  %2288 = vmatpush.msrb.mxu2 %v9396_v9  ;;  %v2369_v52 = vsub.f32 %v9394_v39, %v9411_v7 }
 0x252   :  { %13263 = vst [vmem:[#allocation122_spill] sm:$0xff] %v9363_v8  ;;  %2251 = vmatpush.msrb.mxu1 %v9121_v41  ;;  %2365 = vmatpush.msrb.mxu3 %v9437_v3 }
 0x253   :  { %13264 = vst [vmem:[#allocation123_spill] sm:$0xff] %v9370_v17  ;;  %v1650_v14 = vadd.f32 0.0036580483, %v1649_v31  ;;  %v9427_v33 = vand.u32 4294901760, %v9414_v42  ;;  %v9430_v32 = vsub.f32 %v1767_v40, %v9416_v23  ;;  %v9432_v31 = vand.u32 4294901760, %v1765_v43  ;;  %2290 = vmatpush.msrb.mxu2 %v9416_v23 }
 0x254   :  { %13265 = vst [vmem:[#allocation124_spill] sm:$0xff] %v9373_v27  ;;  %v1661_v27 = vadd.f32 0.014752088, %v1660_v15  ;;  %2253 = vmatpush.msrb.mxu1 %v9138_v21 }
 0x255   :  { %13266 = vst [vmem:[#allocation125_spill] sm:$0xff] %v9378_v34  ;;  %v2375_v40 = vsub.f32 %v9414_v42, %v9427_v33  ;;  %v9446_v58 = vand.u32 4294901760, %v9430_v32  ;;  %v1651_v38 = vmul.f32 %v1650_v14, %v9348_v37  ;;  %2292 = vmatpush.msrb.mxu2 %v9432_v31 }
 0x256   :  { %13267 = vst [vmem:[#allocation126_spill] sm:$0xff] %v9380_v45  ;;  %v1662_v15 = vmul.f32 %v1661_v27, %v9348_v37  ;;  %v9449_v27 = vsub.f32 %v1765_v43, %v9432_v31  ;;  %2255 = vmatpush.msrb.mxu1 %v9154_v6 }
 0x257   :  { %13268 = vst [vmem:[#allocation127_spill] sm:$0xff] %v9386_v19  ;;  %v9441_v19 = vand.u32 4294901760, %v2369_v52  ;;  %v1761_v52 = vld [vmem:[#allocation14 + $0x100] sm:$0xff]  ;;  %v2381_v43 = vsub.f32 %v9430_v32, %v9446_v58 }
 0x258   :  { %13269 = vst [vmem:[#allocation128_spill] sm:$0xff] %v9389_v10  ;;  %v1339_v10 = vadd.f32 %v1338_v29, %v956_v55  ;;  %v1663_v55 = vadd.f32 0.112945676, %v1662_v15  ;;  %v9455_v29 = vand.u32 4294901760, %v1763_v50  ;;  %v9463_v41 = vand.u32 4294901760, %v9449_v27  ;;  %2257 = vmatpush.msrb.mxu1 %v9180_v28 }
 0x259   :  { %13270 = vst [vmem:[#allocation129_spill] sm:$0xff] %v9394_v39  ;;  %v1439_v39 = vpop.f32.mrf.mxu3  ;;  %v9465_v57 = vand.u32 4294901760, %v1761_v52  ;;  %2371 = vmatpush.msrb.mxu3 %v9441_v19  ;;  %v9475_v21 = vand.u32 4294901760, %v2381_v43  ;;  %v1532_v43 = vpop.f32.mrf.mxu1 }
 0x25a   :  { %13271 = vst [vmem:[#allocation130_spill] sm:$0xff] %v9396_v9  ;;  %v1664_v14 = vmul.f32 %v1663_v55, %v9348_v37  ;;  %v1440_v15 = vadd.f32 %v1439_v39, %v1339_v10  ;;  %2294 = vmatpush.msrb.mxu2 %v9455_v29  ;;  %v1652_v39 = vadd.f32 0.05243302, %v1651_v38  ;;  %2259 = vmatpush.msrb.mxu1 %v9197_v44 }
 0x25b   :  { %13272 = vst [vmem:[#allocation131_spill] sm:$0xff] %v9404_v25  ;;  %v9480_v48 = vsub.f32 %v1761_v52, %v9465_v57 }
 0x25c   :  { %13273 = vst [vmem:[#allocation132_spill] sm:$0xff] %v9408_v26  ;;  %v9458_v26 = vand.u32 4294901760, %v2375_v40  ;;  %v9472_v40 = vsub.f32 %v1763_v50, %v9455_v29  ;;  %v1665_v10 = vadd.f32 0.4994258, %v1664_v14  ;;  %2296 = vmatpush.msrb.mxu2 %v9465_v57  ;;  %v1601_v14 = vpop.f32.mrf.mxu2 }
 0x25d   :  { %13274 = vst [vmem:[#allocation133_spill] sm:$0xff] %v9411_v7  ;;  %v9492_v52 = vand.u32 4294901760, %v9480_v48 }
 0x25e   :  { %13275 = vst [vmem:[#allocation134_spill] sm:$0xff] %v9414_v42  ;;  %2377 = vmatpush.msrb.mxu3 %v9458_v26  ;;  %v9485_v50 = vand.u32 4294901760, %v9472_v40  ;;  %v1666_v2 = vmul.f32 %v1665_v10, %v9348_v37 }
 0x25f   :  { %13276 = vst [vmem:[#allocation135_spill] sm:$0xff] %v9416_v23 }
 0x260   :  { %13277 = vst [vmem:[#allocation136_spill] sm:$0xff] %v9427_v33  ;;  %2383 = vmatpush.msrb.mxu3 %v9475_v21 }
 0x261   :  { %13278 = vst [vmem:[#allocation137_spill] sm:$0xff] %v9430_v32  ;;  %v2387_v32 = vsub.f32 %v9449_v27, %v9463_v41 }
 0x262   :  { %13279 = vst [vmem:[#allocation138_spill] sm:$0xff] %v9432_v31 }
 0x263   :  { %13280 = vst [vmem:[#allocation139_spill] sm:$0xff] %v9437_v3  ;;  %v1493_v3 = vpop.f32.mrf.mxu0 }
 0x264   :  { %13281 = vst [vmem:[#allocation140_spill] sm:$0xff] %v9441_v19  ;;  %v1494_v55 = vadd.f32 %v1493_v3, %v1440_v15  ;;  %v9489_v19 = vand.u32 4294901760, %v2387_v32  ;;  %v2393_v3 = vsub.f32 %v9472_v40, %v9485_v50  ;;  %v2399_v15 = vsub.f32 %v9480_v48, %v9492_v52 }
 0x265   :  { %13282 = vst [vmem:[#allocation141_spill] sm:$0xff] %v9446_v58  ;;  %v1653_v32 = vmul.f32 %v1652_v39, %v9348_v37 }
 0x266   :  { %13283 = vst [vmem:[#allocation142_spill] sm:$0xff] %v9449_v27  ;;  %v1533_v38 = vadd.f32 %v1532_v43, %v1494_v55  ;;  %2389 = vmatpush.msrb.mxu3 %v9489_v19  ;;  %v9503_v6 = vand.u32 4294901760, %v2393_v3  ;;  %v9505_v10 = vand.u32 4294901760, %v2399_v15  ;;  %v1638_v55 = vpop.f32.mrf.mxu3 }
 0x267   :  { %13284 = vst [vmem:[#allocation143_spill] sm:$0xff] %v9455_v29 }
 0x268   :  { %13285 = vst [vmem:[#allocation144_spill] sm:$0xff] %v9458_v26  ;;  %v1667_v26 = vadd.f32 1.0, %v1666_v2  ;;  %v1602_v28 = vadd.f32 %v1601_v14, %v1533_v38  ;;  %2395 = vmatpush.msrb.mxu3 %v9503_v6 }
 0x269   :  { %13286 = vst [vmem:[#allocation145_spill] sm:$0xff] %v9463_v41 }
 0x26a   :  { %13287 = vst [vmem:[#allocation146_spill] sm:$0xff] %v9465_v57  ;;  %7660 = vrcp.f32 %v1667_v26  ;;  %v9508_v43 = vadd.f32 %v1638_v55, %v1602_v28  ;;  %2401 = vmatpush.msrb.mxu3 %v9505_v10  ;;  %v1677_v28 = vand.u32 2147483647, %v1667_v26  ;;  %v1679_v55 = vand.u32 2147483648, %v1667_v26 }
 0x26b   :  { %13288 = vst [vmem:[#allocation147_spill] sm:$0xff] %v9472_v40  ;;  %vm1673_vm4 = vweird.f32 %v1667_v26 }
 0x26c   :  { %13289 = vst [vmem:[#allocation148_spill] sm:$0xff] %v9475_v21  ;;  %v1654_v21 = vadd.f32 0.18741608, %v1653_v32  ;;  %v9512_v44 = vmul.f32 0.70710677, %v9508_v43  ;;  %v1680_v41 = vor.u32 1.1754944e-38, %v1679_v55 }
 0x26d   :  { %13290 = vst [vmem:[#allocation149_spill] sm:$0xff] %v9480_v48  ;;  %vm1678_vm6 = vcmp.eq.f32.partialorder %v1677_v28, 8.507059e+37 }
 0x26e   :  { %13291 = vst [vmem:[#allocation150_spill] sm:$0xff] %v9485_v50  ;;  %v1685_v2 = vmul.f32 %v9512_v44, %v9512_v44  ;;  %v1655_v38 = vmul.f32 %v1654_v21, %v9348_v37 }
 0x26f   :  { %13292 = vst [vmem:[#allocation151_spill] sm:$0xff] %v9489_v19 }
 0x270   :  { %13293 = vst [vmem:[#allocation152_spill] sm:$0xff] %v9492_v52  ;;  %v7661_v39 = vpop.eup %7660  ;;  %v1686_v14 = vmin.f32 %v1685_v2, 16.0 }
 0x271   :  { %13294 = vst [vmem:[#allocation153_spill] sm:$0xff] %v9503_v6  ;;  %v1669_v3 = vmul.f32 %v7661_v39, %v1667_v26  ;;  %v1656_v6 = vadd.f32 1.1283791, %v1655_v38  ;;  %vm1674_vm3 = vweird.f32 %v7661_v39 }
 0x272   :  { %13295 = vst [vmem:[#allocation154_spill] sm:$0xff] %v9505_v10  ;;  %v1687_v19 = vmul.f32 2.1237322e-06, %v1686_v14  ;;  %v1698_v48 = vmul.f32 3.8918573e-05, %v1686_v14  ;;  %vm1675_vm5 = vmor %vm1673_vm4, %vm1674_vm3 }
 0x273   :  { %v1670_v15 = vsub.f32 1.0, %v1669_v3  ;;  %v1657_v37 = vmul.f32 %v1656_v6, %v9310_v13 }
 0x274   :  { %v1688_v10 = vadd.f32 0.00028619796, %v1687_v19  ;;  %v1699_v40 = vadd.f32 0.001143296, %v1698_v48  ;;  %v1641_v19 = vmul.f32 0.5, %v9290_v59 }
 0x275   :  { %v1671_v32 = vmul.f32 %v7661_v39, %v1670_v15 }
 0x276   :  { %v1689_v27 = vmul.f32 %v1688_v10, %v1686_v14  ;;  %v1700_v50 = vmul.f32 %v1699_v40, %v1686_v14 }
 0x277   :  { %v1672_v52 = vadd.f32 %v7661_v39, %v1671_v32 }
 0x278   :  { %v1701_v2 = vadd.f32 0.014752088, %v1700_v50  ;;  %v1690_v57 = vadd.f32 0.0036580483, %v1689_v27 }
 0x279   :  { %v1676_v21 = vsel %vm1675_vm5, %v7661_v39, %v1672_v52 }
 0x27a   :  { %v1681_v3 = vsel %vm1678_vm6, %v1680_v41, %v1676_v21  ;;  %v1702_v42 = vmul.f32 %v1701_v2, %v1686_v14  ;;  %v1691_v29 = vmul.f32 %v1690_v57, %v1686_v14 }
 0x27b   :  { %v1682_v38 = vmul.f32 %v1681_v3, %v1657_v37  ;;  %v1758_v3 = vld [vmem:[#allocation14 + $0xe8] sm:$0xff] }
 0x27c   :  { %v1703_v15 = vadd.f32 0.112945676, %v1702_v42  ;;  %v1692_v55 = vadd.f32 0.05243302, %v1691_v29 }
 0x27d   :  { %v7631_v58 = vclamps-f32 %v1682_v38, 1.0 }
 0x27e   :  { %v1704_v26 = vmul.f32 %v1703_v15, %v1686_v14  ;;  %v1693_v57 = vmul.f32 %v1692_v55, %v1686_v14  ;;  %v1756_v55 = vld [vmem:[#allocation14 + $0xd8] sm:$0xff] }
 0x27f   :  { %v1725_v48 = vadd.f32 1.0, %v7631_v58 }
 0x280   :  { %v1705_v40 = vadd.f32 0.4994258, %v1704_v26  ;;  %v1694_v59 = vadd.f32 0.18741608, %v1693_v57  ;;  %v1754_v57 = vld [vmem:[#allocation14 + $0xc8] sm:$0xff] }
 0x281   :  { %v9519_v10 = vmul.f32 %v1725_v48, %v1641_v19 }
 0x282   :  { %v1706_v13 = vmul.f32 %v1705_v40, %v1686_v14  ;;  %v1695_v52 = vmul.f32 %v1694_v59, %v1686_v14  ;;  %v1760_v14 = vld [vmem:[#allocation14 + $0xf8] sm:$0xff]  ;;  %v9568_v40 = vand.u32 4294901760, %v1758_v3  ;;  %v9579_v59 = vand.u32 4294901760, %v1756_v55 }
 0x283   :  { %13296 = vst [vmem:[#allocation155_spill] sm:$0xff] %v9519_v10  ;;  %v9522_v6 = vand.u32 4294901760, %v9519_v10  ;;  %v9561_v15 = vand.u32 4294901760, %v1760_v14 }
 0x284   :  { %v1707_v50 = vadd.f32 1.0, %v1706_v13  ;;  %v1696_v37 = vadd.f32 1.1283791, %v1695_v52  ;;  %13298 = vst [vmem:[#allocation157_spill] sm:$0xff] %v9568_v40  ;;  %v1752_v52 = vld [vmem:[#allocation14 + $0xb8] sm:$0xff] }
 0x285   :  { %2062 = vmatmul.f32.vlgmr.msra.gmra.mxu1 %v9522_v6  ;;  %v9527_v41 = vsub.f32 %v9519_v10, %v9522_v6  ;;  %13297 = vst [vmem:[#allocation156_spill] sm:$0xff] %v9561_v15  ;;  %v1788_v10 = vld [vmem:[#allocation14 + $0x1d8] sm:$0xff] }
 0x286   :  { %2462 = vmatpush.msra.mxu1 %v9225_v24  ;;  %7662 = vrcp.f32 %v1707_v50  ;;  %v1719_v32 = vand.u32 2147483648, %v1707_v50  ;;  %v1717_v2 = vand.u32 2147483647, %v1707_v50  ;;  %vm1713_vm8 = vweird.f32 %v1707_v50  ;;  %13300 = vst [vmem:[#allocation159_spill] sm:$0xff] %v9579_v59 }
 0x287   :  { %2116 = vmatmul.f32.vlgmr.msra.gmra.mxu2 %v9527_v41  ;;  %v9533_v58 = vand.u32 4294901760, %v9527_v41  ;;  %v1697_v48 = vmul.f32 %v1696_v37, %v9512_v44  ;;  %v9575_v44 = vsub.f32 %v1760_v14, %v9561_v15  ;;  %v1750_v37 = vld [vmem:[#allocation14 + $0xa8] sm:$0xff] }
 0x288   :  { %2464 = vmatpush.msra.mxu1 %v9237_v46  ;;  %2503 = vmatpush.msra.mxu2 %v9244_v54  ;;  %v1720_v19 = vor.u32 1.1754944e-38, %v1719_v32  ;;  %vm1718_vm10 = vcmp.eq.f32.partialorder %v1717_v2, 8.507059e+37  ;;  %v9601_v2 = vand.u32 4294901760, %v1752_v52 }
 0x289   :  { %2155 = vmatmul.f32.vlgmr.msra.gmra.mxu3 %v9533_v58  ;;  %v1959_v42 = vsub.f32 %v9527_v41, %v9533_v58  ;;  %13299 = vst [vmem:[#allocation158_spill] sm:$0xff] %v9575_v44  ;;  %v9594_v14 = vand.u32 4294901760, %v9575_v44 }
 0x28a   :  { %2466 = vmatpush.msra.mxu1 %v9250_v60  ;;  %2570 = vmatpush.msra.mxu3 %v9225_v24  ;;  %13305 = vst [vmem:[#allocation164_spill] sm:$0xff] %v9601_v2  ;;  %v1778_v24 = vld [vmem:[#allocation14 + $0x188] sm:$0xff] }
 0x28b   :  { %2507 = vmatpush.msra.mxu2 %v9258_v12  ;;  %v9543_v27 = vand.u32 4294901760, %v1959_v42  ;;  %13303 = vst [vmem:[#allocation162_spill] sm:$0xff] %v9594_v14 }
 0x28c   :  { %2468 = vmatpush.msra.mxu1 %v9264_v51  ;;  %v7663_v29 = vpop.eup %7662  ;;  %2572 = vmatpush.msra.mxu3 %v9237_v46 }
 0x28d   :  { %2261 = vmatmul.f32.vlgmr.msrb.gmra.mxu1 %v9522_v6  ;;  %v1709_v39 = vmul.f32 %v7663_v29, %v1707_v50  ;;  %1961 = vmatmul.f32.vlgmr.msra.gmra.mxu0 %v9543_v27  ;;  %vm1714_vm7 = vweird.f32 %v7663_v29 }
 0x28e   :  { %2470 = vmatpush.msra.mxu1 %v9279_v20  ;;  %2409 = vmatpush.msra.mxu0 %v9235_v47  ;;  %vm1715_vm9 = vmor %vm1713_vm8, %vm1714_vm7 }
 0x28f   :  { %2511 = vmatpush.msra.mxu2 %v9273_v63  ;;  %v1710_v28 = vsub.f32 1.0, %v1709_v39  ;;  %2574 = vmatpush.msra.mxu3 %v9250_v60  ;;  %v9588_v39 = vand.u32 4294901760, %v1754_v57  ;;  %v1784_v60 = vld [vmem:[#allocation14 + $0x1b8] sm:$0xff] }
 0x290   :  { %2472 = vmatpush.msra.mxu1 %v9288_v16  ;;  %2412 = vmatpush.msra.mxu0 %v9248_v18 }
 0x291   :  { %2515 = vmatpush.msra.mxu2 %v9293_v62  ;;  %v1711_v21 = vmul.f32 %v7663_v29, %v1710_v28  ;;  %2576 = vmatpush.msra.mxu3 %v9264_v51  ;;  %13302 = vst [vmem:[#allocation161_spill] sm:$0xff] %v9588_v39  ;;  %v1642_v28 = vmul.f32 0.5, %v9508_v43  ;;  %v1742_v62 = vld [vmem:[#allocation14 + $0x68] sm:$0xff] }
 0x292   :  { %2474 = vmatpush.msra.mxu1 %v9307_v30  ;;  %2415 = vmatpush.msra.mxu0 %v9262_v36  ;;  %v9691_v54 = vand.u32 4294901760, %v1742_v62  ;;  %v1786_v51 = vld [vmem:[#allocation14 + $0x1c8] sm:$0xff] }
 0x293   :  { %2519 = vmatpush.msra.mxu2 %v9315_v56  ;;  %v1712_v38 = vadd.f32 %v7663_v29, %v1711_v21  ;;  %2578 = vmatpush.msra.mxu3 %v9279_v20  ;;  %v9599_v21 = vsub.f32 %v1756_v55, %v9579_v59  ;;  %v2650_v55 = vsub.f32 %v9575_v44, %v9594_v14 }
 0x294   :  { %2476 = vmatpush.msra.mxu1 %v9327_v5  ;;  %2418 = vmatpush.msra.mxu0 %v9277_v0  ;;  %13331 = vst [vmem:[#allocation182_spill] sm:$0xff] %v9691_v54 }
 0x295   :  { %2523 = vmatpush.msra.mxu2 %v9322_v49  ;;  %v1716_v26 = vsel %vm1715_vm9, %v7663_v29, %v1712_v38  ;;  %2580 = vmatpush.msra.mxu3 %v9288_v16  ;;  %v9584_v29 = vsub.f32 %v1758_v3, %v9568_v40  ;;  %13304 = vst [vmem:[#allocation163_spill] sm:$0xff] %v9599_v21  ;;  %v1748_v38 = vld [vmem:[#allocation14 + $0x98] sm:$0xff] }
 0x296   :  { %2224 = vmatmul.f32.vlgmr.msrb.gmra.mxu0 %v9522_v6  ;;  %v1721_v13 = vsel %vm1718_vm10, %v1720_v19, %v1716_v26  ;;  %2478 = vmatpush.msra.mxu1 %v9346_v35  ;;  %v9613_v19 = vsub.f32 %v1754_v57, %v9588_v39  ;;  %v9627_v57 = vand.u32 4294901760, %v9599_v21 }
 0x297   :  { %2421 = vmatpush.msra.mxu0 %v9297_v22  ;;  %v1722_v50 = vmul.f32 %v1721_v13, %v1697_v48  ;;  %2527 = vmatpush.msra.mxu2 %v9341_v61  ;;  %13301 = vst [vmem:[#allocation160_spill] sm:$0xff] %v9584_v29  ;;  %v9608_v43 = vand.u32 4294901760, %v9584_v29  ;;  %v9615_v48 = vand.u32 4294901760, %v1750_v37  ;;  %v1746_v13 = vld [vmem:[#allocation14 + $0x88] sm:$0xff]  ;;  %v13332_v22 = vld [vmem:[#allocation150_spill] sm:$0xff] }
 0x298   :  { %2582 = vmatpush.msra.mxu3 %v9307_v30  ;;  %2480 = vmatpush.msra.mxu1 %v9370_v17  ;;  %13308 = vst [vmem:[#allocation167_spill] sm:$0xff] %v9613_v19  ;;  %v13319_v61 = vld [vmem:[#allocation143_spill] sm:$0xff] }
 0x299   :  { %2424 = vmatpush.msra.mxu0 %v9305_v11  ;;  %v7632_v42 = vclamps-f32 %v1722_v50, 1.0  ;;  %2531 = vmatpush.msra.mxu2 %v9360_v53  ;;  %13307 = vst [vmem:[#allocation166_spill] sm:$0xff] %v9608_v43  ;;  %v13310_v50 = vld [vmem:[#allocation127_spill] sm:$0xff]  ;;  %v9650_v53 = vand.u32 4294901760, %v1746_v13 }
 0x29a   :  { %2584 = vmatpush.msra.mxu3 %v9327_v5  ;;  %2482 = vmatpush.msra.mxu1 %v9380_v45  ;;  %13309 = vst [vmem:[#allocation168_spill] sm:$0xff] %v9615_v48 }
 0x29b   :  { %2427 = vmatpush.msra.mxu0 %v9325_v4  ;;  %v1726_v32 = vadd.f32 1.0, %v7632_v42  ;;  %2535 = vmatpush.msra.mxu2 %v9378_v34  ;;  %13311 = vst [vmem:[#allocation169_spill] sm:$0xff] %v9627_v57  ;;  %v9630_v42 = vsub.f32 %v1752_v52, %v9601_v2  ;;  %v9645_v52 = vand.u32 4294901760, %v9613_v19  ;;  %v9648_v34 = vsub.f32 %v1750_v37, %v9615_v48 }
 0x29c   :  { %2586 = vmatpush.msra.mxu3 %v9346_v35  ;;  %2484 = vmatpush.msra.mxu1 %v9396_v9  ;;  %13318 = vst [vmem:[#allocation175_spill] sm:$0xff] %v9650_v53  ;;  %v2662_v37 = vsub.f32 %v9599_v21, %v9627_v57  ;;  %v9685_v12 = vsub.f32 %v1746_v13, %v9650_v53 }
 0x29d   :  { %2430 = vmatpush.msra.mxu0 %v9344_v1  ;;  %v9603_v3 = vmul.f32 %v1726_v32, %v1642_v28  ;;  %2539 = vmatpush.msra.mxu2 %v9404_v25  ;;  %13312 = vst [vmem:[#allocation170_spill] sm:$0xff] %v9630_v42  ;;  %v9632_v28 = vand.u32 4294901760, %v1748_v38  ;;  %v13315_v25 = vld [vmem:[#allocation129_spill] sm:$0xff]  ;;  %v9664_v56 = vand.u32 4294901760, %v9630_v42  ;;  %v9682_v4 = vand.u32 4294901760, %v9648_v34 }
 0x29e   :  { %2588 = vmatpush.msra.mxu3 %v9370_v17  ;;  %2486 = vmatpush.msra.mxu1 %v9416_v23  ;;  %13316 = vst [vmem:[#allocation173_spill] sm:$0xff] %v9645_v52  ;;  %v13327_v1 = vld [vmem:[#allocation145_spill] sm:$0xff]  ;;  %v9695_v0 = vand.u32 4294901760, %v2662_v37  ;;  %v9716_v18 = vand.u32 4294901760, %v9685_v12 }
 0x29f   :  { %13306 = vst [vmem:[#allocation165_spill] sm:$0xff] %v9603_v3  ;;  %2433 = vmatpush.msra.mxu0 %v9363_v8  ;;  %v9618_v26 = vand.u32 4294901760, %v9603_v3  ;;  %2543 = vmatpush.msra.mxu2 %v9411_v7  ;;  %v2656_v7 = vsub.f32 %v9584_v29, %v9608_v43  ;;  %v9667_v8 = vsub.f32 %v1748_v38, %v9632_v28 }
 0x2a0   :  { %2590 = vmatpush.msra.mxu3 %v9380_v45  ;;  %2488 = vmatpush.msra.mxu1 %v9432_v31  ;;  %13313 = vst [vmem:[#allocation171_spill] sm:$0xff] %v9632_v28  ;;  %v2668_v38 = vsub.f32 %v9613_v19, %v9645_v52  ;;  %v2674_v36 = vsub.f32 %v9630_v42, %v9664_v56 }
 0x2a1   :  { %2436 = vmatpush.msra.mxu0 %v13310_v50  ;;  %v9636_v32 = vsub.f32 %v9603_v3, %v9618_v26  ;;  %2547 = vmatpush.msra.mxu2 %v9427_v33  ;;  %13317 = vst [vmem:[#allocation174_spill] sm:$0xff] %v9648_v34  ;;  %v1744_v3 = vld [vmem:[#allocation14 + $0x78] sm:$0xff]  ;;  %v9657_v50 = vand.u32 4294901760, %v2650_v55  ;;  %v9671_v55 = vand.u32 4294901760, %v2656_v7  ;;  %v9700_v13 = vand.u32 4294901760, %v9667_v8 }
 0x2a2   :  { %2592 = vmatpush.msra.mxu3 %v9396_v9  ;;  %2490 = vmatpush.msra.mxu1 %v13319_v61  ;;  %v13320_v33 = vld [vmem:[#allocation141_spill] sm:$0xff]  ;;  %13324 = vst [vmem:[#allocation178_spill] sm:$0xff] %v9664_v56  ;;  %v9711_v37 = vand.u32 4294901760, %v2668_v38  ;;  %v9727_v38 = vand.u32 4294901760, %v2674_v36 }
 0x2a3   :  { %13314 = vst [vmem:[#allocation172_spill] sm:$0xff] %v9636_v32  ;;  %2403 = vmatmul.f32.vlgmr.msrb.gmra.mxu3 %v9618_v26  ;;  %2439 = vmatpush.msra.mxu0 %v13315_v25  ;;  %v9655_v49 = vand.u32 4294901760, %v9636_v32  ;;  %v13323_v25 = vld [vmem:[#allocation134_spill] sm:$0xff] }
 0x2a4   :  { %2551 = vmatpush.msra.mxu2 %v13320_v33  ;;  %13322 = vst [vmem:[#allocation177_spill] sm:$0xff] %v9657_v50  ;;  %2594 = vmatpush.msra.mxu3 %v9416_v23  ;;  %v13326_v33 = vld [vmem:[#allocation146_spill] sm:$0xff]  ;;  %v13341_v23 = vld [vmem:[#allocation147_spill] sm:$0xff] }
 0x2a5   :  { %13321 = vst [vmem:[#allocation176_spill] sm:$0xff] %v9655_v49  ;;  %2442 = vmatpush.msra.mxu0 %v13323_v25  ;;  %2492 = vmatpush.msra.mxu1 %v13326_v33  ;;  %v2300_v63 = vsub.f32 %v9636_v32, %v9655_v49  ;;  %v9675_v25 = vand.u32 4294901760, %v1744_v3  ;;  %v1740_v7 = vld [vmem:[#allocation14 + $0x58] sm:$0xff] }
 0x2a6   :  { %13325 = vst [vmem:[#allocation179_spill] sm:$0xff] %v9667_v8  ;;  %2555 = vmatpush.msra.mxu2 %v13327_v1  ;;  %2596 = vmatpush.msra.mxu3 %v9432_v31  ;;  %v13330_v1 = vld [vmem:[#allocation137_spill] sm:$0xff]  ;;  %v1738_v31 = vld [vmem:[#allocation14 + $0x48] sm:$0xff] }
 0x2a7   :  { %13328 = vst [vmem:[#allocation180_spill] sm:$0xff] %v9671_v55  ;;  %2496 = vmatmul.f32.vlgmr.msra.gmra.mxu1 %v9655_v49  ;;  %2445 = vmatpush.msra.mxu0 %v13330_v1  ;;  %v9689_v11 = vand.u32 4294901760, %v2300_v63  ;;  %v9705_v63 = vsub.f32 %v1744_v3, %v9675_v25  ;;  %v9707_v1 = vand.u32 4294901760, %v1740_v7  ;;  %v9721_v3 = vsub.f32 %v1742_v62, %v9691_v54 }
 0x2a8   :  { %13329 = vst [vmem:[#allocation181_spill] sm:$0xff] %v9685_v12  ;;  %2652 = vmatpush.msrb.mxu1 %v9657_v50  ;;  %2559 = vmatpush.msra.mxu2 %v13332_v22  ;;  %v13335_v50 = vld [vmem:[#allocation142_spill] sm:$0xff]  ;;  %v13337_v22 = vld [vmem:[#allocation152_spill] sm:$0xff]  ;;  %v9929_v49 = vand.u32 4294901760, %v1778_v24 }
 0x2a9   :  { %2598 = vmatpush.msra.mxu3 %v13319_v61  ;;  %13333 = vst [vmem:[#allocation183_spill] sm:$0xff] %v9695_v0  ;;  %2448 = vmatpush.msra.mxu0 %v13335_v50  ;;  %v2680_v61 = vsub.f32 %v9648_v34, %v9682_v4  ;;  %v9723_v50 = vand.u32 4294901760, %v1738_v31  ;;  %v9734_v47 = vand.u32 4294901760, %v9705_v63  ;;  %v9737_v62 = vsub.f32 %v1740_v7, %v9707_v1 }
 0x2aa   :  { %13334 = vst [vmem:[#allocation184_spill] sm:$0xff] %v9700_v13  ;;  %2658 = vmatpush.msrb.mxu1 %v9671_v55  ;;  %2563 = vmatpush.msra.mxu2 %v13337_v22  ;;  %v1736_v55 = vld [vmem:[#allocation14 + $0x38] sm:$0xff]  ;;  %v2686_v22 = vsub.f32 %v9667_v8, %v9700_v13  ;;  %v9750_v45 = vand.u32 4294901760, %v9721_v3 }
 0x2ab   :  { %13336 = vst [vmem:[#allocation185_spill] sm:$0xff] %v9705_v63  ;;  %2600 = vmatpush.msra.mxu3 %v13326_v33  ;;  %2302 = vmatmul.f32.vlgmr.msrb.gmra.mxu2 %v9689_v11  ;;  %v1734_v33 = vld [vmem:[#allocation14 + $0x28] sm:$0xff]  ;;  %v9739_v9 = vand.u32 4294901760, %v1736_v55  ;;  %v9743_v36 = vand.u32 4294901760, %v2680_v61  ;;  %v9753_v7 = vsub.f32 %v1738_v31, %v9723_v50 }
 0x2ac   :  { %13338 = vst [vmem:[#allocation186_spill] sm:$0xff] %v9711_v37  ;;  %2602 = vmatmul.f32.vlgmr.msra.gmra.mxu3 %v9618_v26  ;;  %2664 = vmatpush.msrb.mxu1 %v9695_v0  ;;  %v1732_v0 = vld [vmem:[#allocation14 + $0x18] sm:$0xff]  ;;  %v9755_v17 = vand.u32 4294901760, %v1734_v33  ;;  %v9759_v61 = vand.u32 4294901760, %v2686_v22 }
 0x2ad   :  { %13339 = vst [vmem:[#allocation187_spill] sm:$0xff] %v9721_v3  ;;  %2750 = vmatpush.msrb.mxu2 %v9575_v44  ;;  %2803 = vmatpush.msrb.mxu3 %v9561_v15  ;;  %v2692_v44 = vsub.f32 %v9685_v12, %v9716_v18  ;;  %v9769_v31 = vsub.f32 %v1736_v55, %v9739_v9  ;;  %v9771_v35 = vand.u32 4294901760, %v1732_v0 }
 0x2ae   :  { %13340 = vst [vmem:[#allocation188_spill] sm:$0xff] %v9727_v38  ;;  %2451 = vmatpush.msra.mxu0 %v13341_v23  ;;  %2670 = vmatpush.msrb.mxu1 %v9711_v37  ;;  %v13344_v23 = vld [vmem:[#allocation149_spill] sm:$0xff]  ;;  %v2698_v37 = vsub.f32 %v9705_v63, %v9734_v47  ;;  %v9785_v55 = vsub.f32 %v1734_v33, %v9755_v17 }
 0x2af   :  { %13342 = vst [vmem:[#allocation189_spill] sm:$0xff] %v9737_v62  ;;  %2753 = vmatpush.msrb.mxu2 %v9584_v29  ;;  %2805 = vmatpush.msrb.mxu3 %v9568_v40  ;;  %v1730_v29 = vld [vmem:[#allocation14 + $0x8] sm:$0xff]  ;;  %v9775_v22 = vand.u32 4294901760, %v2692_v44  ;;  %v9801_v33 = vsub.f32 %v1732_v0, %v9771_v35  ;;  %v1792_v0 = vld [vmem:[#allocation14 + $0x1f8] sm:$0xff] }
 0x2b0   :  { %13343 = vst [vmem:[#allocation190_spill] sm:$0xff] %v9743_v36  ;;  %2454 = vmatpush.msra.mxu0 %v13344_v23  ;;  %2676 = vmatpush.msrb.mxu1 %v9727_v38  ;;  %v9766_v23 = vand.u32 4294901760, %v9737_v62  ;;  %v9782_v38 = vand.u32 4294901760, %v9753_v7  ;;  %v9787_v5 = vand.u32 4294901760, %v1730_v29  ;;  %v9793_v44 = vand.u32 4294901760, %v2698_v37 }
 0x2b1   :  { %13345 = vst [vmem:[#allocation191_spill] sm:$0xff] %v9753_v7  ;;  %2457 = vmatmul.f32.vlgmr.msra.gmra.mxu0 %v9636_v32  ;;  %2756 = vmatpush.msrb.mxu2 %v9599_v21  ;;  %v2704_v21 = vsub.f32 %v9721_v3, %v9750_v45  ;;  %v9812_v30 = vand.u32 4294901760, %v9785_v55  ;;  %v9839_v20 = vand.u32 4294901760, %v1792_v0  ;;  %v1776_v32 = vld [vmem:[#allocation14 + $0x178] sm:$0xff] }
 0x2b2   :  { %13346 = vst [vmem:[#allocation192_spill] sm:$0xff] %v9759_v61  ;;  %2607 = vmatpush.msrb.mxu0 %v9561_v15  ;;  %2807 = vmatpush.msrb.mxu3 %v9579_v59  ;;  %v2716_v37 = vsub.f32 %v9753_v7, %v9782_v38  ;;  %v9815_v16 = vsub.f32 %v1730_v29, %v9787_v5  ;;  %v1790_v29 = vld [vmem:[#allocation14 + $0x1e8] sm:$0xff] }
 0x2b3   :  { %13347 = vst [vmem:[#allocation193_spill] sm:$0xff] %v9769_v31  ;;  %2682 = vmatpush.msrb.mxu1 %v9743_v36  ;;  %2759 = vmatpush.msrb.mxu2 %v9613_v19  ;;  %v2710_v19 = vsub.f32 %v9737_v62, %v9766_v23  ;;  %v9798_v36 = vand.u32 4294901760, %v9769_v31 }
 0x2b4   :  { %13348 = vst [vmem:[#allocation194_spill] sm:$0xff] %v9775_v22  ;;  %2609 = vmatpush.msrb.mxu0 %v9568_v40  ;;  %2809 = vmatpush.msrb.mxu3 %v9588_v39 }
 0x2b5   :  { %13349 = vst [vmem:[#allocation195_spill] sm:$0xff] %v9785_v55  ;;  %2565 = vmatmul.f32.vlgmr.msra.gmra.mxu2 %v9618_v26  ;;  %2688 = vmatpush.msrb.mxu1 %v9759_v61  ;;  %v9807_v61 = vand.u32 4294901760, %v2704_v21  ;;  %v9821_v21 = vand.u32 4294901760, %v2710_v19  ;;  %v2728_v19 = vsub.f32 %v9785_v55, %v9812_v30 }
 0x2b6   :  { %2611 = vmatpush.msrb.mxu0 %v9579_v59  ;;  %13350 = vst [vmem:[#allocation196_spill] sm:$0xff] %v9793_v44  ;;  %2762 = vmatpush.msrb.mxu2 %v9630_v42  ;;  %v2722_v42 = vsub.f32 %v9769_v31, %v9798_v36 }
 0x2b7   :  { %13351 = vst [vmem:[#allocation197_spill] sm:$0xff] %v9801_v33  ;;  %2811 = vmatpush.msrb.mxu3 %v9601_v2  ;;  %2694 = vmatpush.msrb.mxu1 %v9775_v22  ;;  %v9826_v22 = vand.u32 4294901760, %v9801_v33 }
 0x2b8   :  { %2613 = vmatpush.msrb.mxu0 %v9588_v39  ;;  %13352 = vst [vmem:[#allocation198_spill] sm:$0xff] %v9807_v61  ;;  %2765 = vmatpush.msrb.mxu2 %v9648_v34  ;;  %v9832_v34 = vand.u32 4294901760, %v2716_v37 }
 0x2b9   :  { %13353 = vst [vmem:[#allocation199_spill] sm:$0xff] %v9815_v16  ;;  %2813 = vmatpush.msrb.mxu3 %v9615_v48  ;;  %2700 = vmatpush.msrb.mxu1 %v9793_v44  ;;  %v9837_v44 = vand.u32 4294901760, %v9815_v16  ;;  %v2734_v37 = vsub.f32 %v9801_v33, %v9826_v22 }
 0x2ba   :  { %2615 = vmatpush.msrb.mxu0 %v9601_v2  ;;  %13354 = vst [vmem:[#allocation200_spill] sm:$0xff] %v9821_v21  ;;  %2768 = vmatpush.msrb.mxu2 %v9667_v8  ;;  %v9845_v8 = vand.u32 4294901760, %v2722_v42 }
 0x2bb   :  { %2815 = vmatpush.msrb.mxu3 %v9632_v28  ;;  %2706 = vmatpush.msrb.mxu1 %v9807_v61  ;;  %13355 = vst [vmem:[#allocation201_spill] sm:$0xff] %v9832_v34  ;;  %v9849_v61 = vand.u32 4294901760, %v1790_v29  ;;  %v2740_v42 = vsub.f32 %v9815_v16, %v9837_v44 }
 0x2bc   :  { %2617 = vmatpush.msrb.mxu0 %v9615_v48  ;;  %13356 = vst [vmem:[#allocation202_spill] sm:$0xff] %v9837_v44  ;;  %2771 = vmatpush.msrb.mxu2 %v9685_v12  ;;  %v9855_v12 = vand.u32 4294901760, %v2728_v19  ;;  %v9868_v19 = vand.u32 4294901760, %v2734_v37  ;;  %v9884_v37 = vand.u32 4294901760, %v1784_v60  ;;  %v9945_v44 = vand.u32 4294901760, %v1776_v32 }
 0x2bd   :  { %2817 = vmatpush.msrb.mxu3 %v9650_v53  ;;  %2712 = vmatpush.msrb.mxu1 %v9821_v21  ;;  %13357 = vst [vmem:[#allocation203_spill] sm:$0xff] %v9845_v8  ;;  %v9860_v21 = vsub.f32 %v1792_v0, %v9839_v20  ;;  %v9875_v0 = vand.u32 4294901760, %v1786_v51  ;;  %v9879_v46 = vand.u32 4294901760, %v2740_v42 }
 0x2be   :  { %2619 = vmatpush.msrb.mxu0 %v9632_v28  ;;  %2774 = vmatpush.msrb.mxu2 %v9705_v63  ;;  %13358 = vst [vmem:[#allocation204_spill] sm:$0xff] %v9855_v12  ;;  %v9864_v63 = vand.u32 4294901760, %v1788_v10 }
 0x2bf   :  { %2819 = vmatpush.msrb.mxu3 %v9675_v25  ;;  %2718 = vmatpush.msrb.mxu1 %v9832_v34  ;;  %13359 = vst [vmem:[#allocation205_spill] sm:$0xff] %v9860_v21  ;;  %v9871_v34 = vsub.f32 %v1790_v29, %v9849_v61 }
 0x2c0   :  { %2621 = vmatpush.msrb.mxu0 %v9650_v53  ;;  %2777 = vmatpush.msrb.mxu2 %v9721_v3  ;;  %13360 = vst [vmem:[#allocation206_spill] sm:$0xff] %v9868_v19  ;;  %v1782_v3 = vld [vmem:[#allocation14 + $0x1a8] sm:$0xff]  ;;  %v9889_v29 = vsub.f32 %v1788_v10, %v9864_v63 }
 0x2c1   :  { %2821 = vmatpush.msrb.mxu3 %v9691_v54  ;;  %2724 = vmatpush.msrb.mxu1 %v9845_v8  ;;  %13361 = vst [vmem:[#allocation207_spill] sm:$0xff] %v9871_v34  ;;  %v9882_v8 = vand.u32 4294901760, %v9860_v21  ;;  %v9896_v42 = vand.u32 4294901760, %v1782_v3 }
 0x2c2   :  { %2623 = vmatpush.msrb.mxu0 %v9675_v25  ;;  %2780 = vmatpush.msrb.mxu2 %v9737_v62  ;;  %13362 = vst [vmem:[#allocation208_spill] sm:$0xff] %v9879_v46  ;;  %v9894_v62 = vand.u32 4294901760, %v9871_v34 }
 0x2c3   :  { %2823 = vmatpush.msrb.mxu3 %v9707_v1  ;;  %2730 = vmatpush.msrb.mxu1 %v9855_v12  ;;  %13363 = vst [vmem:[#allocation209_spill] sm:$0xff] %v9882_v8  ;;  %v1780_v12 = vld [vmem:[#allocation14 + $0x198] sm:$0xff]  ;;  %v2991_v10 = vsub.f32 %v9860_v21, %v9882_v8 }
 0x2c4   :  { %2625 = vmatpush.msrb.mxu0 %v9691_v54  ;;  %2783 = vmatpush.msrb.mxu2 %v9753_v7  ;;  %13364 = vst [vmem:[#allocation210_spill] sm:$0xff] %v9889_v29  ;;  %v9901_v7 = vsub.f32 %v1786_v51, %v9875_v0  ;;  %v9915_v51 = vand.u32 4294901760, %v1780_v12 }
 0x2c5   :  { %2825 = vmatpush.msrb.mxu3 %v9723_v50  ;;  %2736 = vmatpush.msrb.mxu1 %v9868_v19  ;;  %13365 = vst [vmem:[#allocation211_spill] sm:$0xff] %v9894_v62  ;;  %v9908_v19 = vsub.f32 %v1784_v60, %v9884_v37  ;;  %v9922_v60 = vsub.f32 %v1782_v3, %v9896_v42  ;;  %v9933_v21 = vand.u32 4294901760, %v2991_v10  ;;  %v1774_v3 = vld [vmem:[#allocation14 + $0x168] sm:$0xff] }
 0x2c6   :  { %2627 = vmatpush.msrb.mxu0 %v9707_v1  ;;  %2786 = vmatpush.msrb.mxu2 %v9769_v31  ;;  %13366 = vst [vmem:[#allocation212_spill] sm:$0xff] %v9901_v7  ;;  %v9913_v31 = vand.u32 4294901760, %v9889_v29 }
 0x2c7   :  { %2827 = vmatpush.msrb.mxu3 %v9739_v9  ;;  %2742 = vmatpush.msrb.mxu1 %v9879_v46  ;;  %13367 = vst [vmem:[#allocation213_spill] sm:$0xff] %v9908_v19  ;;  %v2997_v46 = vsub.f32 %v9871_v34, %v9894_v62  ;;  %v9936_v34 = vand.u32 4294901760, %v9908_v19  ;;  %v9952_v62 = vand.u32 4294901760, %v9922_v60 }
 0x2c8   :  { %2629 = vmatpush.msrb.mxu0 %v9723_v50  ;;  %2789 = vmatpush.msrb.mxu2 %v9785_v55  ;;  %13368 = vst [vmem:[#allocation214_spill] sm:$0xff] %v9913_v31  ;;  %v9927_v55 = vand.u32 4294901760, %v9901_v7 }
 0x2c9   :  { %2829 = vmatpush.msrb.mxu3 %v9755_v17  ;;  %2744 = vmatmul.f32.vlgmr.msrb.gmra.mxu1 %v9522_v6  ;;  %13369 = vst [vmem:[#allocation215_spill] sm:$0xff] %v9922_v60  ;;  %v9949_v10 = vand.u32 4294901760, %v2997_v46  ;;  %v3015_v46 = vsub.f32 %v9908_v19, %v9936_v34  ;;  %v1768_v19 = vld [vmem:[#allocation14 + $0x138] sm:$0xff] }
 0x2ca   :  { %2631 = vmatpush.msrb.mxu0 %v9739_v9  ;;  %2911 = vmatpush.msra.mxu1 %v9561_v15  ;;  %13370 = vst [vmem:[#allocation216_spill] sm:$0xff] %v9927_v55  ;;  %v9943_v15 = vsub.f32 %v1780_v12, %v9915_v51  ;;  %v3009_v12 = vsub.f32 %v9901_v7, %v9927_v55 }
 0x2cb   :  { %2792 = vmatpush.msrb.mxu2 %v9801_v33  ;;  %2831 = vmatpush.msrb.mxu3 %v9771_v35  ;;  %13371 = vst [vmem:[#allocation217_spill] sm:$0xff] %v9933_v21  ;;  %v3003_v33 = vsub.f32 %v9889_v29, %v9913_v31  ;;  %v9961_v29 = vand.u32 4294901760, %v1774_v3 }
 0x2cc   :  { %2633 = vmatpush.msrb.mxu0 %v9755_v17  ;;  %13372 = vst [vmem:[#allocation218_spill] sm:$0xff] %v9936_v34  ;;  %2913 = vmatpush.msra.mxu1 %v9568_v40  ;;  %v1772_v40 = vld [vmem:[#allocation14 + $0x158] sm:$0xff] }
 0x2cd   :  { %2795 = vmatpush.msrb.mxu2 %v9815_v16  ;;  %13373 = vst [vmem:[#allocation219_spill] sm:$0xff] %v9945_v44  ;;  %2833 = vmatpush.msrb.mxu3 %v9787_v5  ;;  %v9959_v16 = vsub.f32 %v1778_v24, %v9929_v49  ;;  %v9975_v24 = vsub.f32 %v1776_v32, %v9945_v44  ;;  %v9977_v7 = vand.u32 4294901760, %v1772_v40 }
 0x2ce   :  { %2798 = vmatmul.f32.vlgmr.msrb.gmra.mxu2 %v9527_v41  ;;  %13374 = vst [vmem:[#allocation220_spill] sm:$0xff] %v9949_v10  ;;  %2837 = vmatmul.f32.vlgmr.msrb.gmra.mxu3 %v9533_v58  ;;  %v1770_v41 = vld [vmem:[#allocation14 + $0x148] sm:$0xff]  ;;  %v9969_v58 = vand.u32 4294901760, %v3003_v33  ;;  %v9985_v33 = vand.u32 4294901760, %v3009_v12  ;;  %v9991_v32 = vsub.f32 %v1774_v3, %v9961_v29 }
 0x2cf   :  { %13375 = vst [vmem:[#allocation221_spill] sm:$0xff] %v9952_v62  ;;  %2915 = vmatpush.msra.mxu1 %v9579_v59  ;;  %2948 = vmatpush.msra.mxu2 %v9839_v20  ;;  %v9972_v59 = vand.u32 4294901760, %v9943_v15  ;;  %v9993_v34 = vand.u32 4294901760, %v1770_v41  ;;  %v10007_v3 = vsub.f32 %v1772_v40, %v9977_v7 }
 0x2d0   :  { %13376 = vst [vmem:[#allocation222_spill] sm:$0xff] %v9959_v16  ;;  %2993 = vmatpush.msra.mxu3 %v9933_v21  ;;  %2635 = vmatpush.msrb.mxu0 %v9771_v35  ;;  %v3021_v21 = vsub.f32 %v9922_v60, %v9952_v62  ;;  %v1766_v60 = vld [vmem:[#allocation14 + $0x128] sm:$0xff]  ;;  %v10009_v62 = vand.u32 4294901760, %v1768_v19 }
 0x2d1   :  { %13377 = vst [vmem:[#allocation223_spill] sm:$0xff] %v9961_v29  ;;  %2917 = vmatpush.msra.mxu1 %v9588_v39  ;;  %2950 = vmatpush.msra.mxu2 %v9849_v61  ;;  %v9988_v39 = vand.u32 4294901760, %v9959_v16  ;;  %v3027_v12 = vsub.f32 %v9943_v15, %v9972_v59  ;;  %v10023_v40 = vsub.f32 %v1770_v41, %v9993_v34 }
 0x2d2   :  { %13378 = vst [vmem:[#allocation224_spill] sm:$0xff] %v9969_v58  ;;  %2999 = vmatpush.msra.mxu3 %v9949_v10  ;;  %2637 = vmatpush.msrb.mxu0 %v9787_v5  ;;  %v9997_v10 = vand.u32 4294901760, %v3015_v46  ;;  %v10039_v41 = vsub.f32 %v1768_v19, %v10009_v62 }
 0x2d3   :  { %13379 = vst [vmem:[#allocation225_spill] sm:$0xff] %v9972_v59  ;;  %2919 = vmatpush.msra.mxu1 %v9601_v2  ;;  %2643 = vmatmul.f32.vlgmr.msrb.gmra.mxu0 %v9543_v27  ;;  %v10004_v2 = vand.u32 4294901760, %v9975_v24  ;;  %v10013_v27 = vand.u32 4294901760, %v3021_v21  ;;  %v3033_v46 = vsub.f32 %v9959_v16, %v9988_v39  ;;  %v10031_v21 = vand.u32 4294901760, %v3027_v12  ;;  %v1762_v16 = vld [vmem:[#allocation14 + $0x108] sm:$0xff] }
 0x2d4   :  { %13380 = vst [vmem:[#allocation226_spill] sm:$0xff] %v9977_v7  ;;  %2952 = vmatpush.msra.mxu2 %v9864_v63  ;;  %2844 = vmatpush.msra.mxu0 %v9594_v14  ;;  %v10025_v14 = vand.u32 4294901760, %v1766_v60 }
 0x2d5   :  { %13381 = vst [vmem:[#allocation227_spill] sm:$0xff] %v9985_v33  ;;  %3005 = vmatpush.msra.mxu3 %v9969_v58  ;;  %2921 = vmatpush.msra.mxu1 %v9615_v48  ;;  %v10020_v58 = vand.u32 4294901760, %v9991_v32  ;;  %v1764_v48 = vld [vmem:[#allocation14 + $0x118] sm:$0xff]  ;;  %v10047_v12 = vand.u32 4294901760, %v3033_v46 }
 0x2d6   :  { %13382 = vst [vmem:[#allocation228_spill] sm:$0xff] %v9988_v39  ;;  %2954 = vmatpush.msra.mxu2 %v9875_v0  ;;  %2848 = vmatpush.msra.mxu0 %v9608_v43  ;;  %v10036_v43 = vand.u32 4294901760, %v10007_v3  ;;  %v10055_v19 = vsub.f32 %v1766_v60, %v10025_v14 }
 0x2d7   :  { %13383 = vst [vmem:[#allocation229_spill] sm:$0xff] %v9993_v34  ;;  %3011 = vmatpush.msra.mxu3 %v9985_v33  ;;  %2923 = vmatpush.msra.mxu1 %v9632_v28  ;;  %v3039_v33 = vsub.f32 %v9975_v24, %v10004_v2  ;;  %v10043_v28 = vand.u32 4294901760, %v1764_v48 }
 0x2d8   :  { %13384 = vst [vmem:[#allocation230_spill] sm:$0xff] %v9997_v10  ;;  %2956 = vmatpush.msra.mxu2 %v9884_v37  ;;  %2852 = vmatpush.msra.mxu0 %v9627_v57  ;;  %v10052_v57 = vand.u32 4294901760, %v10023_v40 }
 0x2d9   :  { %13385 = vst [vmem:[#allocation231_spill] sm:$0xff] %v10004_v2  ;;  %3017 = vmatpush.msra.mxu3 %v9997_v10  ;;  %2925 = vmatpush.msra.mxu1 %v9650_v53  ;;  %v3045_v10 = vsub.f32 %v9991_v32, %v10020_v58  ;;  %v10059_v53 = vand.u32 4294901760, %v1762_v16  ;;  %v10063_v46 = vand.u32 4294901760, %v3039_v33  ;;  %v10073_v60 = vsub.f32 %v1764_v48, %v10043_v28 }
 0x2da   :  { %13386 = vst [vmem:[#allocation232_spill] sm:$0xff] %v10007_v3  ;;  %2958 = vmatpush.msra.mxu2 %v9896_v42  ;;  %2856 = vmatpush.msra.mxu0 %v9645_v52  ;;  %v10068_v52 = vand.u32 4294901760, %v10039_v41  ;;  %v3057_v33 = vsub.f32 %v10023_v40, %v10052_v57 }
 0x2db   :  { %13387 = vst [vmem:[#allocation233_spill] sm:$0xff] %v10009_v62  ;;  %3023 = vmatpush.msra.mxu3 %v10013_v27  ;;  %2927 = vmatpush.msra.mxu1 %v9675_v25 }
 0x2dc   :  { %13388 = vst [vmem:[#allocation234_spill] sm:$0xff] %v10013_v27  ;;  %2960 = vmatpush.msra.mxu2 %v9915_v51  ;;  %2860 = vmatpush.msra.mxu0 %v9664_v56  ;;  %v3051_v27 = vsub.f32 %v10007_v3, %v10036_v43  ;;  %v10082_v56 = vand.u32 4294901760, %v10055_v19 }
 0x2dd   :  { %13389 = vst [vmem:[#allocation235_spill] sm:$0xff] %v10020_v58  ;;  %3029 = vmatpush.msra.mxu3 %v10031_v21  ;;  %2929 = vmatpush.msra.mxu1 %v9691_v54  ;;  %v10087_v54 = vsub.f32 %v1762_v16, %v10059_v53  ;;  %v10102_v16 = vand.u32 4294901760, %v3057_v33 }
 0x2de   :  { %13390 = vst [vmem:[#allocation236_spill] sm:$0xff] %v10023_v40  ;;  %2962 = vmatpush.msra.mxu2 %v9929_v49  ;;  %2864 = vmatpush.msra.mxu0 %v9682_v4  ;;  %v10091_v48 = vand.u32 4294901760, %v3051_v27  ;;  %v3069_v27 = vsub.f32 %v10055_v19, %v10082_v56 }
 0x2df   :  { %13391 = vst [vmem:[#allocation237_spill] sm:$0xff] %v10025_v14  ;;  %3035 = vmatpush.msra.mxu3 %v10047_v12  ;;  %2931 = vmatpush.msra.mxu1 %v9707_v1 }
 0x2e0   :  { %13392 = vst [vmem:[#allocation238_spill] sm:$0xff] %v10031_v21  ;;  %v10077_v21 = vand.u32 4294901760, %v3045_v10  ;;  %2964 = vmatpush.msra.mxu2 %v9945_v44  ;;  %2868 = vmatpush.msra.mxu0 %v9700_v13  ;;  %v3063_v10 = vsub.f32 %v10039_v41, %v10068_v52 }
 0x2e1   :  { %13393 = vst [vmem:[#allocation239_spill] sm:$0xff] %v10036_v43  ;;  %3041 = vmatpush.msra.mxu3 %v10063_v46  ;;  %2933 = vmatpush.msra.mxu1 %v9723_v50 }
 0x2e2   :  { %13394 = vst [vmem:[#allocation240_spill] sm:$0xff] %v10039_v41  ;;  %2966 = vmatpush.msra.mxu2 %v9961_v29  ;;  %2872 = vmatpush.msra.mxu0 %v9716_v18  ;;  %v10113_v13 = vand.u32 4294901760, %v3063_v10 }
 0x2e3   :  { %13395 = vst [vmem:[#allocation241_spill] sm:$0xff] %v10043_v28  ;;  %3047 = vmatpush.msra.mxu3 %v10077_v21  ;;  %2935 = vmatpush.msra.mxu1 %v9739_v9 }
 0x2e4   :  { %13396 = vst [vmem:[#allocation242_spill] sm:$0xff] %v10047_v12  ;;  %v10098_v12 = vand.u32 4294901760, %v10073_v60  ;;  %2968 = vmatpush.msra.mxu2 %v9977_v7  ;;  %2876 = vmatpush.msra.mxu0 %v9734_v47 }
 0x2e5   :  { %13397 = vst [vmem:[#allocation243_spill] sm:$0xff] %v10052_v57  ;;  %3053 = vmatpush.msra.mxu3 %v10091_v48  ;;  %2937 = vmatpush.msra.mxu1 %v9755_v17 }
 0x2e6   :  { %13398 = vst [vmem:[#allocation244_spill] sm:$0xff] %v10055_v19  ;;  %2970 = vmatpush.msra.mxu2 %v9993_v34  ;;  %v3075_v33 = vsub.f32 %v10073_v60, %v10098_v12  ;;  %2880 = vmatpush.msra.mxu0 %v9750_v45 }
 0x2e7   :  { %13399 = vst [vmem:[#allocation245_spill] sm:$0xff] %v10059_v53  ;;  %3059 = vmatpush.msra.mxu3 %v10102_v16  ;;  %2939 = vmatpush.msra.mxu1 %v9771_v35 }
 0x2e8   :  { %13400 = vst [vmem:[#allocation246_spill] sm:$0xff] %v10063_v46  ;;  %v10109_v46 = vand.u32 4294901760, %v10087_v54  ;;  %2972 = vmatpush.msra.mxu2 %v10009_v62  ;;  %2884 = vmatpush.msra.mxu0 %v9766_v23 }
 0x2e9   :  { %13401 = vst [vmem:[#allocation247_spill] sm:$0xff] %v10068_v52  ;;  %3065 = vmatpush.msra.mxu3 %v10113_v13  ;;  %2941 = vmatpush.msra.mxu1 %v9787_v5 }
 0x2ea   :  { %13402 = vst [vmem:[#allocation248_spill] sm:$0xff] %v10073_v60  ;;  %v3081_v10 = vsub.f32 %v10087_v54, %v10109_v46  ;;  %2974 = vmatpush.msra.mxu2 %v10025_v14  ;;  %2888 = vmatpush.msra.mxu0 %v9782_v38 }
 0x2eb   :  { %13403 = vst [vmem:[#allocation249_spill] sm:$0xff] %v10077_v21  ;;  %v10121_v21 = vand.u32 4294901760, %v3069_v27  ;;  %2943 = vmatmul.f32.vlgmr.msra.gmra.mxu1 %v9522_v6 }
 0x2ec   :  { %13404 = vst [vmem:[#allocation250_spill] sm:$0xff] %v10082_v56  ;;  %2976 = vmatpush.msra.mxu2 %v10043_v28  ;;  %v10137_v27 = vand.u32 4294901760, %v3081_v10  ;;  %3144 = vmatpush.msrb.mxu1 %v9839_v20  ;;  %v13415_v10 = vld [vmem:[#allocation202_spill] sm:$0xff] }
 0x2ed   :  { %13405 = vst [vmem:[#allocation251_spill] sm:$0xff] %v10087_v54  ;;  %3071 = vmatpush.msra.mxu3 %v10121_v21  ;;  %2892 = vmatpush.msra.mxu0 %v9798_v36 }
 0x2ee   :  { %13406 = vst [vmem:[#allocation252_spill] sm:$0xff] %v10091_v48  ;;  %v10131_v48 = vand.u32 4294901760, %v3075_v33  ;;  %2978 = vmatpush.msra.mxu2 %v10059_v53  ;;  %3146 = vmatpush.msrb.mxu1 %v9849_v61  ;;  %v13414_v33 = vld [vmem:[#allocation211_spill] sm:$0xff] }
 0x2ef   :  { %13407 = vst [vmem:[#allocation253_spill] sm:$0xff] %v10098_v12  ;;  %2896 = vmatpush.msra.mxu0 %v9812_v30  ;;  %2984 = vmatmul.f32.vlgmr.msra.gmra.mxu2 %v9689_v11  ;;  %v13416_v11 = vld [vmem:[#allocation205_spill] sm:$0xff] }
 0x2f0   :  { %13408 = vst [vmem:[#allocation254_spill] sm:$0xff] %v10102_v16  ;;  %3077 = vmatpush.msra.mxu3 %v10131_v48  ;;  %3148 = vmatpush.msrb.mxu1 %v9864_v63  ;;  %v13582_v16 = vld [vmem:[#allocation165_spill] sm:$0xff] }
 0x2f1   :  { %13409 = vst [vmem:[#allocation255_spill] sm:$0xff] %v10109_v46  ;;  %3185 = vmatpush.msrb.mxu2 %v9882_v8  ;;  %2900 = vmatpush.msra.mxu0 %v9826_v22  ;;  %v13417_v8 = vld [vmem:[#allocation207_spill] sm:$0xff] }
 0x2f2   :  { %13410 = vst [vmem:[#allocation256_spill] sm:$0xff] %v10113_v13  ;;  %3083 = vmatpush.msra.mxu3 %v10137_v27  ;;  %3150 = vmatpush.msrb.mxu1 %v9875_v0  ;;  %v13481_v13 = vld [vmem:[#allocation96_spill] sm:$0xff] }
 0x2f3   :  { %13411 = vst [vmem:[#allocation257_spill] sm:$0xff] %v10121_v21  ;;  %3085 = vmatmul.f32.vlgmr.msra.gmra.mxu3 %v9618_v26  ;;  %3189 = vmatpush.msrb.mxu2 %v13414_v33  ;;  %v13418_v33 = vld [vmem:[#allocation218_spill] sm:$0xff] }
 0x2f4   :  { %13412 = vst [vmem:[#allocation258_spill] sm:$0xff] %v10131_v48  ;;  %3252 = vmatpush.msrb.mxu3 %v9839_v20  ;;  %2904 = vmatpush.msra.mxu0 %v13415_v10  ;;  %v13457_v48 = vld [vmem:[#allocation80_spill] sm:$0xff]  ;;  %v13467_v21 = vld [vmem:[#allocation78_spill] sm:$0xff] }
 0x2f5   :  { %13413 = vst [vmem:[#allocation259_spill] sm:$0xff] %v10137_v27  ;;  %3152 = vmatpush.msrb.mxu1 %v9884_v37  ;;  %2906 = vmatmul.f32.vlgmr.msra.gmra.mxu0 %v9522_v6  ;;  %v13419_v27 = vld [vmem:[#allocation210_spill] sm:$0xff]  ;;  %v13420_v6 = vld [vmem:[#allocation221_spill] sm:$0xff] }
 0x2f6   :  { %3254 = vmatpush.msrb.mxu3 %v9849_v61  ;;  %3193 = vmatpush.msrb.mxu2 %v9913_v31  ;;  %v13421_v31 = vld [vmem:[#allocation212_spill] sm:$0xff] }
 0x2f7   :  { %3091 = vmatpush.msrb.mxu0 %v13416_v11  ;;  %3154 = vmatpush.msrb.mxu1 %v9896_v42 }
 0x2f8   :  { %3256 = vmatpush.msrb.mxu3 %v9864_v63  ;;  %3197 = vmatpush.msrb.mxu2 %v9927_v55  ;;  %v13422_v55 = vld [vmem:[#allocation213_spill] sm:$0xff] }
 0x2f9   :  { %3094 = vmatpush.msrb.mxu0 %v13417_v8  ;;  %3156 = vmatpush.msrb.mxu1 %v9915_v51 }
 0x2fa   :  { %3258 = vmatpush.msrb.mxu3 %v9875_v0  ;;  %3201 = vmatpush.msrb.mxu2 %v13418_v33  ;;  %v13423_v33 = vld [vmem:[#allocation215_spill] sm:$0xff] }
 0x2fb   :  { %3097 = vmatpush.msrb.mxu0 %v13419_v27  ;;  %3158 = vmatpush.msrb.mxu1 %v9929_v49 }
 0x2fc   :  { %3260 = vmatpush.msrb.mxu3 %v9884_v37  ;;  %3205 = vmatpush.msrb.mxu2 %v13420_v6  ;;  %v13444_v6 = vld [vmem:[#allocation39_spill] sm:$0xff] }
 0x2fd   :  { %3100 = vmatpush.msrb.mxu0 %v13421_v31  ;;  %3160 = vmatpush.msrb.mxu1 %v9945_v44 }
 0x2fe   :  { %3262 = vmatpush.msrb.mxu3 %v9896_v42  ;;  %3209 = vmatpush.msrb.mxu2 %v9972_v59  ;;  %v13424_v59 = vld [vmem:[#allocation222_spill] sm:$0xff] }
 0x2ff   :  { %3103 = vmatpush.msrb.mxu0 %v13422_v55  ;;  %3162 = vmatpush.msrb.mxu1 %v9961_v29 }
 0x300   :  { %3264 = vmatpush.msrb.mxu3 %v9915_v51  ;;  %3213 = vmatpush.msrb.mxu2 %v9988_v39  ;;  %v13438_v39 = vld [vmem:[#allocation32_spill] sm:$0xff] }
 0x301   :  { %3106 = vmatpush.msrb.mxu0 %v13423_v33  ;;  %3164 = vmatpush.msrb.mxu1 %v9977_v7 }
 0x302   :  { %3266 = vmatpush.msrb.mxu3 %v9929_v49  ;;  %3217 = vmatpush.msrb.mxu2 %v10004_v2  ;;  %v13435_v2 = vld [vmem:[#allocation29_spill] sm:$0xff] }
 0x303   :  { %3109 = vmatpush.msrb.mxu0 %v9943_v15  ;;  %3166 = vmatpush.msrb.mxu1 %v9993_v34 }
 0x304   :  { %3268 = vmatpush.msrb.mxu3 %v9945_v44  ;;  %3221 = vmatpush.msrb.mxu2 %v10020_v58  ;;  %v13433_v58 = vld [vmem:[#allocation48_spill] sm:$0xff] }
 0x305   :  { %3112 = vmatpush.msrb.mxu0 %v13424_v59  ;;  %3168 = vmatpush.msrb.mxu1 %v10009_v62 }
 0x306   :  { %3270 = vmatpush.msrb.mxu3 %v9961_v29  ;;  %3225 = vmatpush.msrb.mxu2 %v10036_v43  ;;  %v13432_v43 = vld [vmem:[#allocation31_spill] sm:$0xff] }
 0x307   :  { %3115 = vmatpush.msrb.mxu0 %v9975_v24  ;;  %3170 = vmatpush.msrb.mxu1 %v10025_v14 }
 0x308   :  { %3272 = vmatpush.msrb.mxu3 %v9977_v7  ;;  %3229 = vmatpush.msrb.mxu2 %v10052_v57  ;;  %v13425_v57 = vld [vmem:[#allocation176_spill] sm:$0xff]  ;;  %v13470_v7 = vld [vmem:[#allocation82_spill] sm:$0xff] }
 0x309   :  { %3118 = vmatpush.msrb.mxu0 %v9991_v32  ;;  %3172 = vmatpush.msrb.mxu1 %v10043_v28 }
 0x30a   :  { %3274 = vmatpush.msrb.mxu3 %v9993_v34  ;;  %3233 = vmatpush.msrb.mxu2 %v10068_v52  ;;  %v13426_v52 = vld [vmem:[#allocation36_spill] sm:$0xff]  ;;  %v13461_v34 = vld [vmem:[#allocation70_spill] sm:$0xff] }
 0x30b   :  { %3121 = vmatpush.msrb.mxu0 %v10007_v3  ;;  %3174 = vmatpush.msrb.mxu1 %v10059_v53 }
 0x30c   :  { %3276 = vmatpush.msrb.mxu3 %v10009_v62  ;;  %3237 = vmatpush.msrb.mxu2 %v10082_v56  ;;  %v13429_v56 = vld [vmem:[#allocation27_spill] sm:$0xff]  ;;  %v13452_v62 = vld [vmem:[#allocation58_spill] sm:$0xff] }
 0x30d   :  { %3124 = vmatpush.msrb.mxu0 %v10023_v40  ;;  %3178 = vmatmul.f32.vlgmr.msrb.gmra.mxu1 %v13425_v57  ;;  %v13427_v57 = vld [vmem:[#allocation40_spill] sm:$0xff]  ;;  %v13471_v40 = vld [vmem:[#allocation74_spill] sm:$0xff] }
 0x30e   :  { %3278 = vmatpush.msrb.mxu3 %v10025_v14  ;;  %3241 = vmatpush.msrb.mxu2 %v10098_v12  ;;  %v13428_v12 = vld [vmem:[#allocation28_spill] sm:$0xff]  ;;  %v13450_v14 = vld [vmem:[#allocation46_spill] sm:$0xff] }
 0x30f   :  { %3127 = vmatpush.msrb.mxu0 %v10039_v41  ;;  %3338 = vmatpush.msra.mxu1 %v13426_v52  ;;  %v13431_v52 = vld [vmem:[#allocation172_spill] sm:$0xff]  ;;  %v13463_v41 = vld [vmem:[#allocation87_spill] sm:$0xff] }
 0x310   :  { %3280 = vmatpush.msrb.mxu3 %v10043_v28  ;;  %3245 = vmatpush.msrb.mxu2 %v10109_v46  ;;  %v13430_v46 = vld [vmem:[#allocation44_spill] sm:$0xff]  ;;  %v13446_v28 = vld [vmem:[#allocation50_spill] sm:$0xff] }
 0x311   :  { %3130 = vmatpush.msrb.mxu0 %v10055_v19  ;;  %3247 = vmatmul.f32.vlgmr.msrb.gmra.mxu2 %v9618_v26 }
 0x312   :  { %3282 = vmatpush.msrb.mxu3 %v10059_v53  ;;  %3344 = vmatpush.msra.mxu1 %v13427_v57  ;;  %v13436_v57 = vld [vmem:[#allocation55_spill] sm:$0xff]  ;;  %v13445_v53 = vld [vmem:[#allocation64_spill] sm:$0xff] }
 0x313   :  { %3284 = vmatmul.f32.vlgmr.msrb.gmra.mxu3 %v9618_v26  ;;  %3133 = vmatpush.msrb.mxu0 %v10073_v60  ;;  %v13434_v26 = vld [vmem:[#allocation34_spill] sm:$0xff]  ;;  %v13451_v60 = vld [vmem:[#allocation75_spill] sm:$0xff] }
 0x314   :  { %3436 = vmatpush.msra.mxu2 %v13428_v12  ;;  %3489 = vmatpush.msra.mxu3 %v13429_v56  ;;  %v13437_v12 = vld [vmem:[#allocation38_spill] sm:$0xff] }
 0x315   :  { %3136 = vmatpush.msrb.mxu0 %v10087_v54  ;;  %3350 = vmatpush.msra.mxu1 %v13430_v46  ;;  %v13439_v46 = vld [vmem:[#allocation56_spill] sm:$0xff] }
 0x316   :  { %3139 = vmatmul.f32.vlgmr.msrb.gmra.mxu0 %v13431_v52  ;;  %3439 = vmatpush.msra.mxu2 %v13432_v43  ;;  %v13440_v43 = vld [vmem:[#allocation43_spill] sm:$0xff]  ;;  %v1962_v52 = vpop.f32.mrf.mxu0  ;;  %v13448_v54 = vld [vmem:[#allocation68_spill] sm:$0xff] }
 0x317   :  { %3356 = vmatpush.msra.mxu1 %v13433_v58  ;;  %3293 = vmatpush.msra.mxu0 %v13429_v56  ;;  %v13441_v58 = vld [vmem:[#allocation35_spill] sm:$0xff] }
 0x318   :  { %3442 = vmatpush.msra.mxu2 %v13434_v26  ;;  %3491 = vmatpush.msra.mxu3 %v13435_v2  ;;  %v13442_v26 = vld [vmem:[#allocation60_spill] sm:$0xff] }
 0x319   :  { %3362 = vmatpush.msra.mxu1 %v13436_v57  ;;  %3295 = vmatpush.msra.mxu0 %v13435_v2  ;;  %v13443_v57 = vld [vmem:[#allocation45_spill] sm:$0xff] }
 0x31a   :  { %3445 = vmatpush.msra.mxu2 %v13437_v12  ;;  %3493 = vmatpush.msra.mxu3 %v13438_v39  ;;  %v2063_v12 = vpop.f32.mrf.mxu1 }
 0x31b   :  { %3368 = vmatpush.msra.mxu1 %v13439_v46  ;;  %3297 = vmatpush.msra.mxu0 %v13438_v39  ;;  %v2064_v46 = vadd.f32 %v2063_v12, %v1962_v52  ;;  %v13453_v52 = vld [vmem:[#allocation51_spill] sm:$0xff]  ;;  %v13456_v12 = vld [vmem:[#allocation54_spill] sm:$0xff] }
 0x31c   :  { %3448 = vmatpush.msra.mxu2 %v13440_v43  ;;  %3495 = vmatpush.msra.mxu3 %v13441_v58  ;;  %v13447_v43 = vld [vmem:[#allocation42_spill] sm:$0xff] }
 0x31d   :  { %3374 = vmatpush.msra.mxu1 %v13442_v26  ;;  %3299 = vmatpush.msra.mxu0 %v13441_v58  ;;  %v13449_v26 = vld [vmem:[#allocation53_spill] sm:$0xff] }
 0x31e   :  { %3451 = vmatpush.msra.mxu2 %v13443_v57  ;;  %3497 = vmatpush.msra.mxu3 %v13444_v6  ;;  %v2117_v57 = vpop.f32.mrf.mxu2  ;;  %v2225_v19 = vpop.f32.mrf.mxu0 }
 0x31f   :  { %3380 = vmatpush.msra.mxu1 %v13445_v53  ;;  %3301 = vmatpush.msra.mxu0 %v13444_v6  ;;  %v2118_v53 = vadd.f32 %v2117_v57, %v2064_v46  ;;  %v13458_v46 = vld [vmem:[#allocation65_spill] sm:$0xff]  ;;  %v13460_v57 = vld [vmem:[#allocation84_spill] sm:$0xff] }
 0x320   :  { %3454 = vmatpush.msra.mxu2 %v13446_v28  ;;  %3499 = vmatpush.msra.mxu3 %v13447_v43  ;;  %v13454_v28 = vld [vmem:[#allocation76_spill] sm:$0xff] }
 0x321   :  { %3386 = vmatpush.msra.mxu1 %v13448_v54  ;;  %3303 = vmatpush.msra.mxu0 %v13447_v43  ;;  %v13455_v54 = vld [vmem:[#allocation63_spill] sm:$0xff] }
 0x322   :  { %3457 = vmatpush.msra.mxu2 %v13449_v26  ;;  %3501 = vmatpush.msra.mxu3 %v13450_v14  ;;  %v2156_v26 = vpop.f32.mrf.mxu3 }
 0x323   :  { %3392 = vmatpush.msra.mxu1 %v13451_v60  ;;  %3305 = vmatpush.msra.mxu0 %v13450_v14  ;;  %v2157_v60 = vadd.f32 %v2156_v26, %v2118_v53  ;;  %v13465_v53 = vld [vmem:[#allocation66_spill] sm:$0xff]  ;;  %v2262_v26 = vpop.f32.mrf.mxu1 }
 0x324   :  { %3460 = vmatpush.msra.mxu2 %v13452_v62  ;;  %3503 = vmatpush.msra.mxu3 %v13453_v52  ;;  %v13459_v62 = vld [vmem:[#allocation59_spill] sm:$0xff] }
 0x325   :  { %3398 = vmatpush.msra.mxu1 %v13454_v28  ;;  %3307 = vmatpush.msra.mxu0 %v13453_v52  ;;  %v2226_v28 = vadd.f32 %v2225_v19, %v2157_v60  ;;  %v13468_v19 = vld [vmem:[#allocation71_spill] sm:$0xff] }
 0x326   :  { %3463 = vmatpush.msra.mxu2 %v13455_v54  ;;  %3505 = vmatpush.msra.mxu3 %v13456_v12  ;;  %v13462_v54 = vld [vmem:[#allocation62_spill] sm:$0xff] }
 0x327   :  { %3404 = vmatpush.msra.mxu1 %v13457_v48  ;;  %3309 = vmatpush.msra.mxu0 %v13456_v12  ;;  %v13464_v48 = vld [vmem:[#allocation73_spill] sm:$0xff] }
 0x328   :  { %3466 = vmatpush.msra.mxu2 %v13458_v46  ;;  %3507 = vmatpush.msra.mxu3 %v13459_v62  ;;  %v13466_v46 = vld [vmem:[#allocation90_spill] sm:$0xff] }
 0x329   :  { %3410 = vmatpush.msra.mxu1 %v13460_v57  ;;  %3311 = vmatpush.msra.mxu0 %v13459_v62  ;;  %v2263_v57 = vadd.f32 %v2262_v26, %v2226_v28  ;;  %v13472_v28 = vld [vmem:[#allocation86_spill] sm:$0xff] }
 0x32a   :  { %3469 = vmatpush.msra.mxu2 %v13461_v34  ;;  %3509 = vmatpush.msra.mxu3 %v13462_v54  ;;  %v13469_v34 = vld [vmem:[#allocation93_spill] sm:$0xff]  ;;  %v2404_v60 = vpop.f32.mrf.mxu3 }
 0x32b   :  { %3416 = vmatpush.msra.mxu1 %v13463_v41  ;;  %3313 = vmatpush.msra.mxu0 %v13462_v54 }
 0x32c   :  { %3472 = vmatpush.msra.mxu2 %v13464_v48  ;;  %3511 = vmatpush.msra.mxu3 %v13465_v53 }
 0x32d   :  { %3422 = vmatpush.msra.mxu1 %v13466_v46  ;;  %3315 = vmatpush.msra.mxu0 %v13465_v53  ;;  %v13473_v46 = vld [vmem:[#allocation79_spill] sm:$0xff] }
 0x32e   :  { %3475 = vmatpush.msra.mxu2 %v13467_v21  ;;  %3513 = vmatpush.msra.mxu3 %v13468_v19  ;;  %v2303_v41 = vpop.f32.mrf.mxu2  ;;  %v2458_v26 = vpop.f32.mrf.mxu0 }
 0x32f   :  { %3428 = vmatpush.msra.mxu1 %v13469_v34  ;;  %3317 = vmatpush.msra.mxu0 %v13468_v19  ;;  %v2304_v48 = vadd.f32 %v2303_v41, %v2263_v57  ;;  %v13474_v57 = vld [vmem:[#allocation89_spill] sm:$0xff]  ;;  %v13475_v34 = vld [vmem:[#allocation83_spill] sm:$0xff] }
 0x330   :  { %3478 = vmatpush.msra.mxu2 %v13470_v7  ;;  %3515 = vmatpush.msra.mxu3 %v13471_v40  ;;  %v2497_v7 = vpop.f32.mrf.mxu1 }
 0x331   :  { %3597 = vmatpush.msrb.mxu1 %v13429_v56  ;;  %3319 = vmatpush.msra.mxu0 %v13471_v40  ;;  %v2405_v21 = vadd.f32 %v2404_v60, %v2304_v48  ;;  %v13477_v60 = vld [vmem:[#allocation100_spill] sm:$0xff] }
 0x332   :  { %3481 = vmatpush.msra.mxu2 %v13472_v28  ;;  %3517 = vmatpush.msra.mxu3 %v13473_v46  ;;  %v13478_v48 = vld [vmem:[#allocation92_spill] sm:$0xff]  ;;  %v2603_v29 = vpop.f32.mrf.mxu3 }
 0x333   :  { %3599 = vmatpush.msrb.mxu1 %v13435_v2  ;;  %3321 = vmatpush.msra.mxu0 %v13473_v46  ;;  %v2459_v56 = vadd.f32 %v2458_v26, %v2405_v21  ;;  %v13476_v2 = vld [vmem:[#allocation30_spill] sm:$0xff]  ;;  %v13480_v26 = vld [vmem:[#allocation104_spill] sm:$0xff] }
 0x334   :  { %3634 = vmatpush.msrb.mxu2 %v13474_v57  ;;  %3519 = vmatpush.msra.mxu3 %v13475_v34 }
 0x335   :  { %3601 = vmatpush.msrb.mxu1 %v13438_v39  ;;  %3323 = vmatpush.msra.mxu0 %v13475_v34  ;;  %v2498_v41 = vadd.f32 %v2497_v7, %v2459_v56  ;;  %v13479_v39 = vld [vmem:[#allocation33_spill] sm:$0xff]  ;;  %v13483_v7 = vld [vmem:[#allocation108_spill] sm:$0xff] }
 0x336   :  { %3679 = vmatpush.msrb.mxu3 %v13477_v60  ;;  %3636 = vmatpush.msrb.mxu2 %v13478_v48  ;;  %v13486_v60 = vld [vmem:[#allocation155_spill] sm:$0xff] }
 0x337   :  { %3603 = vmatpush.msrb.mxu1 %v13441_v58  ;;  %3530 = vmatpush.msrb.mxu0 %v13476_v2  ;;  %v13482_v58 = vld [vmem:[#allocation37_spill] sm:$0xff]  ;;  %v13484_v2 = vld [vmem:[#allocation99_spill] sm:$0xff] }
 0x338   :  { %v2566_v21 = vpop.f32.mrf.mxu2  ;;  %3685 = vmatpush.msrb.mxu3 %v13480_v26  ;;  %3638 = vmatpush.msrb.mxu2 %v13481_v13  ;;  %v13492_v26 = vld [vmem:[#allocation105_spill] sm:$0xff] }
 0x339   :  { %3605 = vmatpush.msrb.mxu1 %v13444_v6  ;;  %3534 = vmatpush.msrb.mxu0 %v13479_v39  ;;  %v2567_v28 = vadd.f32 %v2566_v21, %v2498_v41  ;;  %v13485_v6 = vld [vmem:[#allocation41_spill] sm:$0xff]  ;;  %v13488_v39 = vld [vmem:[#allocation115_spill] sm:$0xff] }
 0x33a   :  { %3691 = vmatpush.msrb.mxu3 %v13483_v7  ;;  %3640 = vmatpush.msrb.mxu2 %v13484_v2  ;;  %v13489_v21 = vld [vmem:[#allocation103_spill] sm:$0xff]  ;;  %v13495_v7 = vld [vmem:[#allocation110_spill] sm:$0xff] }
 0x33b   :  { %3607 = vmatpush.msrb.mxu1 %v13447_v43  ;;  %3538 = vmatpush.msrb.mxu0 %v13482_v58  ;;  %v2604_v56 = vadd.f32 %v2603_v29, %v2567_v28  ;;  %v13490_v43 = vld [vmem:[#allocation47_spill] sm:$0xff] }
 0x33c   :  { %3697 = vmatpush.msrb.mxu3 %v13488_v39  ;;  %3642 = vmatpush.msrb.mxu2 %v13489_v21  ;;  %v13491_v28 = vld [vmem:[#allocation119_spill] sm:$0xff] }
 0x33d   :  { %3609 = vmatpush.msrb.mxu1 %v13450_v14  ;;  %3542 = vmatpush.msrb.mxu0 %v13485_v6  ;;  %v10300_v41 = vsub.f32 %v13486_v60, %v2604_v56  ;;  %v13493_v14 = vld [vmem:[#allocation49_spill] sm:$0xff]  ;;  %v13494_v56 = vld [vmem:[#allocation120_spill] sm:$0xff] }
 0x33e   :  { %3703 = vmatpush.msrb.mxu3 %v13491_v28  ;;  %3644 = vmatpush.msrb.mxu2 %v13492_v26  ;;  %v13497_v60 = vld [vmem:[#allocation124_spill] sm:$0xff]  ;;  %v13501_v28 = vld [vmem:[#allocation114_spill] sm:$0xff] }
 0x33f   :  { %13487 = vst [vmem:[#allocation202_spill] sm:$0xff] %v10300_v41  ;;  %3611 = vmatpush.msrb.mxu1 %v13453_v52  ;;  %3546 = vmatpush.msrb.mxu0 %v13490_v43  ;;  %v3290_v29 = vmul.f32 %v10300_v41, %v10300_v41  ;;  %v13496_v52 = vld [vmem:[#allocation52_spill] sm:$0xff] }
 0x340   :  { %3709 = vmatpush.msrb.mxu3 %v13494_v56  ;;  %3646 = vmatpush.msrb.mxu2 %v13495_v7  ;;  %v13499_v43 = vld [vmem:[#allocation128_spill] sm:$0xff] }
 0x341   :  { %3613 = vmatpush.msrb.mxu1 %v13456_v12  ;;  %3550 = vmatpush.msrb.mxu0 %v13493_v14  ;;  %v10312_v58 = vand.u32 4294901760, %v3290_v29  ;;  %v13498_v12 = vld [vmem:[#allocation57_spill] sm:$0xff]  ;;  %v13503_v56 = vld [vmem:[#allocation132_spill] sm:$0xff] }
 0x342   :  { %3715 = vmatpush.msrb.mxu3 %v13497_v60  ;;  %3648 = vmatpush.msrb.mxu2 %v13501_v28  ;;  %v13506_v60 = vld [vmem:[#allocation139_spill] sm:$0xff] }
 0x343   :  { %3615 = vmatpush.msrb.mxu1 %v13459_v62  ;;  %3554 = vmatpush.msrb.mxu0 %v13496_v52  ;;  %v10320_v6 = vsub.f32 %v3290_v29, %v10312_v58  ;;  %v13500_v62 = vld [vmem:[#allocation61_spill] sm:$0xff]  ;;  %v13504_v52 = vld [vmem:[#allocation118_spill] sm:$0xff] }
 0x344   :  { %3430 = vmatmul.f32.vlgmr.msra.gmra.mxu1 %v10312_v58  ;;  %3721 = vmatpush.msrb.mxu3 %v13499_v43  ;;  %v13509_v43 = vld [vmem:[#allocation123_spill] sm:$0xff] }
 0x345   :  { %3617 = vmatpush.msrb.mxu1 %v13462_v54  ;;  %3558 = vmatpush.msrb.mxu0 %v13498_v12  ;;  %v10327_v39 = vand.u32 4294901760, %v10320_v6  ;;  %v13502_v54 = vld [vmem:[#allocation67_spill] sm:$0xff]  ;;  %v13507_v12 = vld [vmem:[#allocation72_spill] sm:$0xff] }
 0x346   :  { %3484 = vmatmul.f32.vlgmr.msra.gmra.mxu2 %v10320_v6  ;;  %3727 = vmatpush.msrb.mxu3 %v13503_v56  ;;  %v13515_v56 = vld [vmem:[#allocation85_spill] sm:$0xff] }
 0x347   :  { %3619 = vmatpush.msrb.mxu1 %v13465_v53  ;;  %3562 = vmatpush.msrb.mxu0 %v13500_v62  ;;  %v3327_v29 = vsub.f32 %v10320_v6, %v10327_v39  ;;  %v13505_v53 = vld [vmem:[#allocation69_spill] sm:$0xff] }
 0x348   :  { %3523 = vmatmul.f32.vlgmr.msra.gmra.mxu3 %v10327_v39  ;;  %3650 = vmatpush.msrb.mxu2 %v13504_v52  ;;  %v13510_v62 = vld [vmem:[#allocation77_spill] sm:$0xff] }
 0x349   :  { %3621 = vmatpush.msrb.mxu1 %v13468_v19  ;;  %3566 = vmatpush.msrb.mxu0 %v13502_v54  ;;  %v10338_v14 = vand.u32 4294901760, %v3327_v29  ;;  %v13508_v19 = vld [vmem:[#allocation140_spill] sm:$0xff]  ;;  %v13512_v29 = vld [vmem:[#allocation81_spill] sm:$0xff] }
 0x34a   :  { %3733 = vmatpush.msrb.mxu3 %v13506_v60  ;;  %3652 = vmatpush.msrb.mxu2 %v13509_v43  ;;  %v13513_v54 = vld [vmem:[#allocation148_spill] sm:$0xff] }
 0x34b   :  { %3623 = vmatpush.msrb.mxu1 %v13471_v40  ;;  %3570 = vmatpush.msrb.mxu0 %v13505_v53  ;;  %v13511_v40 = vld [vmem:[#allocation144_spill] sm:$0xff]  ;;  %v13516_v53 = vld [vmem:[#allocation151_spill] sm:$0xff] }
 0x34c   :  { %3329 = vmatmul.f32.vlgmr.msra.gmra.mxu0 %v10338_v14  ;;  %3739 = vmatpush.msrb.mxu3 %v13508_v19  ;;  %v13518_v60 = vld [vmem:[#allocation88_spill] sm:$0xff]  ;;  %v13520_v19 = vld [vmem:[#allocation91_spill] sm:$0xff] }
 0x34d   :  { %3625 = vmatpush.msrb.mxu1 %v13473_v46  ;;  %3574 = vmatpush.msrb.mxu0 %v13507_v12  ;;  %v13514_v46 = vld [vmem:[#allocation126_spill] sm:$0xff]  ;;  %v13519_v12 = vld [vmem:[#allocation153_spill] sm:$0xff] }
 0x34e   :  { %3745 = vmatpush.msrb.mxu3 %v13511_v40  ;;  %3654 = vmatpush.msrb.mxu2 %v13514_v46  ;;  %v13522_v40 = vld [vmem:[#allocation135_spill] sm:$0xff] }
 0x34f   :  { %3627 = vmatpush.msrb.mxu1 %v13475_v34  ;;  %3578 = vmatpush.msrb.mxu0 %v13510_v62  ;;  %v13517_v34 = vld [vmem:[#allocation130_spill] sm:$0xff] }
 0x350   :  { %3629 = vmatmul.f32.vlgmr.msrb.gmra.mxu1 %v10312_v58  ;;  %3751 = vmatpush.msrb.mxu3 %v13513_v54  ;;  %v13521_v62 = vld [vmem:[#allocation154_spill] sm:$0xff] }
 0x351   :  { %3582 = vmatpush.msrb.mxu0 %v13512_v29  ;;  %3830 = vmatpush.msra.mxu1 %v13474_v57  ;;  %v13523_v29 = vld [vmem:[#allocation95_spill] sm:$0xff]  ;;  %v13524_v54 = vld [vmem:[#allocation138_spill] sm:$0xff] }
 0x352   :  { %3757 = vmatpush.msrb.mxu3 %v13516_v53  ;;  %3656 = vmatpush.msrb.mxu2 %v13517_v34  ;;  %v13526_v53 = vld [vmem:[#allocation143_spill] sm:$0xff] }
 0x353   :  { %3586 = vmatpush.msrb.mxu0 %v13515_v56  ;;  %3832 = vmatpush.msra.mxu1 %v13478_v48  ;;  %v13525_v56 = vld [vmem:[#allocation98_spill] sm:$0xff] }
 0x354   :  { %3763 = vmatpush.msrb.mxu3 %v13519_v12  ;;  %3658 = vmatpush.msrb.mxu2 %v13522_v40  ;;  %v13528_v12 = vld [vmem:[#allocation146_spill] sm:$0xff] }
 0x355   :  { %3590 = vmatpush.msrb.mxu0 %v13518_v60  ;;  %3834 = vmatpush.msra.mxu1 %v13481_v13  ;;  %v13527_v60 = vld [vmem:[#allocation102_spill] sm:$0xff] }
 0x356   :  { %3592 = vmatmul.f32.vlgmr.msrb.gmra.mxu0 %v10312_v58  ;;  %3769 = vmatpush.msrb.mxu3 %v13521_v62  ;;  %v13531_v62 = vld [vmem:[#allocation109_spill] sm:$0xff] }
 0x357   :  { %3777 = vmatpush.msra.mxu0 %v13520_v19  ;;  %3836 = vmatpush.msra.mxu1 %v13484_v2  ;;  %v13529_v19 = vld [vmem:[#allocation107_spill] sm:$0xff] }
 0x358   :  { %3938 = vmatpush.msra.mxu3 %v13474_v57  ;;  %3660 = vmatpush.msrb.mxu2 %v13524_v54  ;;  %v13530_v57 = vld [vmem:[#allocation94_spill] sm:$0xff] }
 0x359   :  { %3780 = vmatpush.msra.mxu0 %v13523_v29  ;;  %3838 = vmatpush.msra.mxu1 %v13489_v21  ;;  %v13533_v29 = vld [vmem:[#allocation113_spill] sm:$0xff] }
 0x35a   :  { %3940 = vmatpush.msra.mxu3 %v13478_v48  ;;  %3662 = vmatpush.msrb.mxu2 %v13526_v53  ;;  %v13532_v48 = vld [vmem:[#allocation97_spill] sm:$0xff] }
 0x35b   :  { %3783 = vmatpush.msra.mxu0 %v13525_v56  ;;  %3840 = vmatpush.msra.mxu1 %v13492_v26  ;;  %v13535_v56 = vld [vmem:[#allocation117_spill] sm:$0xff] }
 0x35c   :  { %3942 = vmatpush.msra.mxu3 %v13481_v13  ;;  %3664 = vmatpush.msrb.mxu2 %v13528_v12  ;;  %v13534_v13 = vld [vmem:[#allocation101_spill] sm:$0xff] }
 0x35d   :  { %3786 = vmatpush.msra.mxu0 %v13527_v60  ;;  %3842 = vmatpush.msra.mxu1 %v13495_v7  ;;  %v13537_v60 = vld [vmem:[#allocation122_spill] sm:$0xff] }
 0x35e   :  { %3944 = vmatpush.msra.mxu3 %v13484_v2  ;;  %3871 = vmatpush.msra.mxu2 %v13530_v57  ;;  %v13536_v2 = vld [vmem:[#allocation106_spill] sm:$0xff]  ;;  %v13541_v57 = vld [vmem:[#allocation129_spill] sm:$0xff] }
 0x35f   :  { %3789 = vmatpush.msra.mxu0 %v13529_v19  ;;  %3844 = vmatpush.msra.mxu1 %v13501_v28  ;;  %v13539_v19 = vld [vmem:[#allocation127_spill] sm:$0xff] }
 0x360   :  { %3946 = vmatpush.msra.mxu3 %v13489_v21  ;;  %3875 = vmatpush.msra.mxu2 %v13532_v48  ;;  %v13538_v21 = vld [vmem:[#allocation111_spill] sm:$0xff]  ;;  %v13545_v48 = vld [vmem:[#allocation137_spill] sm:$0xff] }
 0x361   :  { %3792 = vmatpush.msra.mxu0 %v13531_v62  ;;  %3846 = vmatpush.msra.mxu1 %v13504_v52  ;;  %v13543_v62 = vld [vmem:[#allocation134_spill] sm:$0xff] }
 0x362   :  { %3948 = vmatpush.msra.mxu3 %v13492_v26  ;;  %3879 = vmatpush.msra.mxu2 %v13534_v13  ;;  %v13540_v26 = vld [vmem:[#allocation112_spill] sm:$0xff] }
 0x363   :  { %3795 = vmatpush.msra.mxu0 %v13533_v29  ;;  %3848 = vmatpush.msra.mxu1 %v13509_v43  ;;  %v13547_v29 = vld [vmem:[#allocation142_spill] sm:$0xff]  ;;  %v13549_v13 = vld [vmem:[#allocation180_spill] sm:$0xff] }
 0x364   :  { %3950 = vmatpush.msra.mxu3 %v13495_v7  ;;  %3883 = vmatpush.msra.mxu2 %v13536_v2  ;;  %v13542_v7 = vld [vmem:[#allocation116_spill] sm:$0xff]  ;;  %v13552_v2 = vld [vmem:[#allocation183_spill] sm:$0xff] }
 0x365   :  { %3798 = vmatpush.msra.mxu0 %v13535_v56  ;;  %3850 = vmatpush.msra.mxu1 %v13514_v46  ;;  %v13550_v56 = vld [vmem:[#allocation147_spill] sm:$0xff] }
 0x366   :  { %3952 = vmatpush.msra.mxu3 %v13501_v28  ;;  %3887 = vmatpush.msra.mxu2 %v13538_v21  ;;  %v13544_v28 = vld [vmem:[#allocation121_spill] sm:$0xff] }
 0x367   :  { %3801 = vmatpush.msra.mxu0 %v13537_v60  ;;  %3852 = vmatpush.msra.mxu1 %v13517_v34  ;;  %v13553_v60 = vld [vmem:[#allocation149_spill] sm:$0xff] }
 0x368   :  { %3954 = vmatpush.msra.mxu3 %v13504_v52  ;;  %3891 = vmatpush.msra.mxu2 %v13540_v26  ;;  %v13546_v52 = vld [vmem:[#allocation177_spill] sm:$0xff]  ;;  %v13557_v26 = vld [vmem:[#allocation136_spill] sm:$0xff] }
 0x369   :  { %3804 = vmatpush.msra.mxu0 %v13539_v19  ;;  %3854 = vmatpush.msra.mxu1 %v13522_v40  ;;  %v13554_v21 = vld [vmem:[#allocation133_spill] sm:$0xff]  ;;  %v13556_v19 = vld [vmem:[#allocation186_spill] sm:$0xff] }
 0x36a   :  { %3956 = vmatpush.msra.mxu3 %v13509_v43  ;;  %3895 = vmatpush.msra.mxu2 %v13542_v7  ;;  %v13548_v43 = vld [vmem:[#allocation125_spill] sm:$0xff] }
 0x36b   :  { %3807 = vmatpush.msra.mxu0 %v13541_v57  ;;  %3856 = vmatpush.msra.mxu1 %v13524_v54  ;;  %v13559_v57 = vld [vmem:[#allocation188_spill] sm:$0xff]  ;;  %v13560_v7 = vld [vmem:[#allocation141_spill] sm:$0xff] }
 0x36c   :  { %3958 = vmatpush.msra.mxu3 %v13514_v46  ;;  %3899 = vmatpush.msra.mxu2 %v13544_v28  ;;  %v13551_v46 = vld [vmem:[#allocation131_spill] sm:$0xff]  ;;  %v13562_v28 = vld [vmem:[#allocation190_spill] sm:$0xff] }
 0x36d   :  { %3810 = vmatpush.msra.mxu0 %v13543_v62  ;;  %3858 = vmatpush.msra.mxu1 %v13526_v53  ;;  %v13561_v62 = vld [vmem:[#allocation159_spill] sm:$0xff] }
 0x36e   :  { %3960 = vmatpush.msra.mxu3 %v13517_v34  ;;  %3903 = vmatpush.msra.mxu2 %v13548_v43  ;;  %v13555_v34 = vld [vmem:[#allocation156_spill] sm:$0xff] }
 0x36f   :  { %3813 = vmatpush.msra.mxu0 %v13545_v48  ;;  %3860 = vmatpush.msra.mxu1 %v13528_v12  ;;  %v13563_v48 = vld [vmem:[#allocation145_spill] sm:$0xff] }
 0x370   :  { %3962 = vmatpush.msra.mxu3 %v13522_v40  ;;  %3907 = vmatpush.msra.mxu2 %v13551_v46  ;;  %v13558_v40 = vld [vmem:[#allocation157_spill] sm:$0xff]  ;;  %v13567_v46 = vld [vmem:[#allocation164_spill] sm:$0xff] }
 0x371   :  { %4020 = vmatpush.msrb.mxu1 %v13546_v52  ;;  %3816 = vmatpush.msra.mxu0 %v13547_v29  ;;  %v2745_v52 = vpop.f32.mrf.mxu1  ;;  %v13564_v29 = vld [vmem:[#allocation161_spill] sm:$0xff] }
 0x372   :  { %3964 = vmatpush.msra.mxu3 %v13524_v54  ;;  %3911 = vmatpush.msra.mxu2 %v13554_v21  ;;  %v2644_v54 = vpop.f32.mrf.mxu0  ;;  %v13571_v21 = vld [vmem:[#allocation196_spill] sm:$0xff] }
 0x373   :  { %4026 = vmatpush.msrb.mxu1 %v13549_v13  ;;  %3819 = vmatpush.msra.mxu0 %v13550_v56  ;;  %v2746_v43 = vadd.f32 %v2745_v52, %v2644_v54  ;;  %v13566_v13 = vld [vmem:[#allocation150_spill] sm:$0xff]  ;;  %v2799_v56 = vpop.f32.mrf.mxu2 }
 0x374   :  { %3966 = vmatpush.msra.mxu3 %v13526_v53  ;;  %3915 = vmatpush.msra.mxu2 %v13557_v26  ;;  %v13565_v53 = vld [vmem:[#allocation192_spill] sm:$0xff]  ;;  %v13572_v26 = vld [vmem:[#allocation171_spill] sm:$0xff] }
 0x375   :  { %4032 = vmatpush.msrb.mxu1 %v13552_v2  ;;  %3822 = vmatpush.msra.mxu0 %v13553_v60  ;;  %v13569_v2 = vld [vmem:[#allocation152_spill] sm:$0xff] }
 0x376   :  { %3968 = vmatpush.msra.mxu3 %v13528_v12  ;;  %3919 = vmatpush.msra.mxu2 %v13560_v7  ;;  %v13568_v12 = vld [vmem:[#allocation194_spill] sm:$0xff]  ;;  %v13570_v60 = vld [vmem:[#allocation168_spill] sm:$0xff]  ;;  %v2838_v7 = vpop.f32.mrf.mxu3 }
 0x377   :  { %3975 = vmatpush.msrb.mxu0 %v13555_v34  ;;  %4038 = vmatpush.msrb.mxu1 %v13556_v19  ;;  %v2800_v19 = vadd.f32 %v2799_v56, %v2746_v43  ;;  %v13579_v56 = vld [vmem:[#allocation204_spill] sm:$0xff] }
 0x378   :  { %3923 = vmatpush.msra.mxu2 %v13563_v48  ;;  %v13575_v48 = vld [vmem:[#allocation200_spill] sm:$0xff] }
 0x379   :  { %3977 = vmatpush.msrb.mxu0 %v13558_v40  ;;  %4044 = vmatpush.msrb.mxu1 %v13559_v57  ;;  %v13573_v57 = vld [vmem:[#allocation198_spill] sm:$0xff]  ;;  %v2839_v52 = vadd.f32 %v2838_v7, %v2800_v19  ;;  %v2944_v43 = vpop.f32.mrf.mxu1  ;;  %v13581_v7 = vld [vmem:[#allocation208_spill] sm:$0xff] }
 0x37a   :  { %3927 = vmatpush.msra.mxu2 %v13566_v13  ;;  %v2907_v54 = vpop.f32.mrf.mxu0 }
 0x37b   :  { %3979 = vmatpush.msrb.mxu0 %v13561_v62  ;;  %4050 = vmatpush.msrb.mxu1 %v13562_v28  ;;  %v13574_v28 = vld [vmem:[#allocation175_spill] sm:$0xff]  ;;  %v2908_v13 = vadd.f32 %v2907_v54, %v2839_v52  ;;  %v2985_v19 = vpop.f32.mrf.mxu2 }
 0x37c   :  { %3931 = vmatpush.msra.mxu2 %v13569_v2  ;;  %v13578_v2 = vld [vmem:[#allocation203_spill] sm:$0xff] }
 0x37d   :  { %3981 = vmatpush.msrb.mxu0 %v13564_v29  ;;  %4056 = vmatpush.msrb.mxu1 %v13565_v53  ;;  %v13576_v53 = vld [vmem:[#allocation201_spill] sm:$0xff] }
 0x37f   :  { %3983 = vmatpush.msrb.mxu0 %v13567_v46  ;;  %4062 = vmatpush.msrb.mxu1 %v13568_v12  ;;  %v13577_v12 = vld [vmem:[#allocation182_spill] sm:$0xff] }
 0x381   :  { %3985 = vmatpush.msrb.mxu0 %v13570_v60  ;;  %4068 = vmatpush.msrb.mxu1 %v13571_v21  ;;  %v2945_v21 = vadd.f32 %v2944_v43, %v2908_v13 }
 0x383   :  { %3987 = vmatpush.msrb.mxu0 %v13572_v26  ;;  %4074 = vmatpush.msrb.mxu1 %v13573_v57  ;;  %v13580_v57 = vld [vmem:[#allocation206_spill] sm:$0xff]  ;;  %v2986_v54 = vadd.f32 %v2985_v19, %v2945_v21 }
 0x385   :  { %3989 = vmatpush.msrb.mxu0 %v13574_v28  ;;  %4080 = vmatpush.msrb.mxu1 %v13575_v48  ;;  %v3086_v48 = vpop.f32.mrf.mxu3 }
 0x386   :  { %v3087_v52 = vadd.f32 %v3086_v48, %v2986_v54 }
 0x387   :  { %3991 = vmatpush.msrb.mxu0 %v9675_v25  ;;  %4086 = vmatpush.msrb.mxu1 %v13576_v53 }
 0x389   :  { %3993 = vmatpush.msrb.mxu0 %v13577_v12  ;;  %4092 = vmatpush.msrb.mxu1 %v13578_v2 }
 0x38a   :  { %v3179_v2 = vpop.f32.mrf.mxu1 }
 0x38b   :  { %3995 = vmatpush.msrb.mxu0 %v9707_v1  ;;  %4098 = vmatpush.msrb.mxu1 %v13579_v56 }
 0x38d   :  { %3997 = vmatpush.msrb.mxu0 %v9723_v50  ;;  %4104 = vmatpush.msrb.mxu1 %v13580_v57 }
 0x38f   :  { %3999 = vmatpush.msrb.mxu0 %v9739_v9  ;;  %4110 = vmatpush.msrb.mxu1 %v13581_v7 }
 0x391   :  { %4001 = vmatpush.msrb.mxu0 %v9755_v17 }
 0x393   :  { %4003 = vmatpush.msrb.mxu0 %v9771_v35  ;;  %v3140_v53 = vpop.f32.mrf.mxu0 }
 0x394   :  { %v3141_v13 = vadd.f32 %v3140_v53, %v3087_v52  ;;  %v3248_v56 = vpop.f32.mrf.mxu2  ;;  %v13585_v52 = vld [vmem:[#allocation169_spill] sm:$0xff]  ;;  %v13586_v53 = vld [vmem:[#allocation158_spill] sm:$0xff] }
 0x395   :  { %4005 = vmatpush.msrb.mxu0 %v9787_v5 }
 0x396   :  { %v3180_v43 = vadd.f32 %v3179_v2, %v3141_v13  ;;  %v3285_v41 = vpop.f32.mrf.mxu3  ;;  %v13587_v13 = vld [vmem:[#allocation173_spill] sm:$0xff]  ;;  %v13589_v2 = vld [vmem:[#allocation178_spill] sm:$0xff] }
 0x398   :  { %v3249_v57 = vadd.f32 %v3248_v56, %v3180_v43  ;;  %v13629_v43 = vld [vmem:[#allocation259_spill] sm:$0xff]  ;;  %v13630_v56 = vld [vmem:[#allocation248_spill] sm:$0xff] }
 0x39a   :  { %v3286_v3 = vadd.f32 %v3285_v41, %v3249_v57  ;;  %v13584_v41 = vld [vmem:[#allocation166_spill] sm:$0xff]  ;;  %v13631_v57 = vld [vmem:[#allocation237_spill] sm:$0xff] }
 0x39c   :  { %v10465_v44 = vsub.f32 %v13582_v16, %v3286_v3  ;;  %v13583_v3 = vld [vmem:[#allocation162_spill] sm:$0xff] }
 0x39e   :  { %v3291_v21 = vmul.f32 %v10465_v44, %v10465_v44 }
 0x3a0   :  { %v10469_v19 = vand.u32 4294901760, %v3291_v21 }
 0x3a2   :  { %v10472_v7 = vsub.f32 %v3291_v21, %v10469_v19  ;;  %3771 = vmatmul.f32.vlgmr.msrb.gmra.mxu3 %v10469_v19  ;;  %v13632_v21 = vld [vmem:[#allocation251_spill] sm:$0xff] }
 0x3a3   :  { %4171 = vmatpush.msrb.mxu3 %v13555_v34 }
 0x3a4   :  { %3825 = vmatmul.f32.vlgmr.msra.gmra.mxu0 %v10472_v7  ;;  %v10478_v54 = vand.u32 4294901760, %v10472_v7 }
 0x3a5   :  { %4173 = vmatpush.msrb.mxu3 %v13558_v40  ;;  %4212 = vmatpush.msra.mxu0 %v13583_v3  ;;  %v13633_v3 = vld [vmem:[#allocation241_spill] sm:$0xff] }
 0x3a6   :  { %3864 = vmatmul.f32.vlgmr.msra.gmra.mxu1 %v10478_v54  ;;  %v3668_v16 = vsub.f32 %v10472_v7, %v10478_v54 }
 0x3a7   :  { %4175 = vmatpush.msrb.mxu3 %v13561_v62  ;;  %4216 = vmatpush.msra.mxu0 %v13584_v41 }
 0x3a8   :  { %4279 = vmatpush.msra.mxu1 %v13555_v34  ;;  %v10488_v48 = vand.u32 4294901760, %v3668_v16  ;;  %v13588_v34 = vld [vmem:[#allocation160_spill] sm:$0xff]  ;;  %v13634_v16 = vld [vmem:[#allocation245_spill] sm:$0xff] }
 0x3a9   :  { %4177 = vmatpush.msrb.mxu3 %v13564_v29  ;;  %4220 = vmatpush.msra.mxu0 %v13585_v52 }
 0x3aa   :  { %4281 = vmatpush.msra.mxu1 %v13558_v40  ;;  %3670 = vmatmul.f32.vlgmr.msrb.gmra.mxu2 %v10488_v48  ;;  %v13590_v40 = vld [vmem:[#allocation163_spill] sm:$0xff] }
 0x3ab   :  { %3970 = vmatmul.f32.vlgmr.msra.gmra.mxu3 %v10469_v19  ;;  %4118 = vmatpush.msrb.mxu2 %v13586_v53 }
 0x3ac   :  { %4179 = vmatpush.msrb.mxu3 %v13567_v46  ;;  %4224 = vmatpush.msra.mxu0 %v13587_v13 }
 0x3ad   :  { %4283 = vmatpush.msra.mxu1 %v13561_v62  ;;  %4011 = vmatmul.f32.vlgmr.msrb.gmra.mxu0 %v10338_v14  ;;  %v13591_v62 = vld [vmem:[#allocation167_spill] sm:$0xff]  ;;  %v13592_v14 = vld [vmem:[#allocation184_spill] sm:$0xff] }
 0x3ae   :  { %4121 = vmatpush.msrb.mxu2 %v13588_v34  ;;  %4181 = vmatpush.msrb.mxu3 %v13570_v60  ;;  %v13639_v34 = vld [vmem:[#allocation218_spill] sm:$0xff] }
 0x3af   :  { %4228 = vmatpush.msra.mxu0 %v13589_v2  ;;  %4285 = vmatpush.msra.mxu1 %v13564_v29  ;;  %v13593_v29 = vld [vmem:[#allocation170_spill] sm:$0xff] }
 0x3b0   :  { %4112 = vmatmul.f32.vlgmr.msrb.gmra.mxu1 %v10312_v58  ;;  %4124 = vmatpush.msrb.mxu2 %v13590_v40 }
 0x3b1   :  { %4183 = vmatpush.msrb.mxu3 %v13572_v26  ;;  %4232 = vmatpush.msra.mxu0 %v9682_v4  ;;  %v13594_v4 = vld [vmem:[#allocation174_spill] sm:$0xff] }
 0x3b2   :  { %4287 = vmatpush.msra.mxu1 %v13567_v46  ;;  %4127 = vmatpush.msrb.mxu2 %v13591_v62  ;;  %v13595_v46 = vld [vmem:[#allocation179_spill] sm:$0xff]  ;;  %v13640_v62 = vld [vmem:[#allocation221_spill] sm:$0xff] }
 0x3b3   :  { %4185 = vmatpush.msrb.mxu3 %v13574_v28  ;;  %4236 = vmatpush.msra.mxu0 %v13592_v14  ;;  %v13642_v14 = vld [vmem:[#allocation228_spill] sm:$0xff] }
 0x3b4   :  { %4289 = vmatpush.msra.mxu1 %v13570_v60  ;;  %3933 = vmatmul.f32.vlgmr.msra.gmra.mxu2 %v10469_v19  ;;  %v13596_v60 = vld [vmem:[#allocation181_spill] sm:$0xff] }
 0x3b5   :  { %4130 = vmatpush.msrb.mxu2 %v13593_v29  ;;  %4187 = vmatpush.msrb.mxu3 %v9675_v25  ;;  %v1847_v29 = vld [vmem:[#allocation17 + $0x1a0] sm:$0xff] }
 0x3b6   :  { %4240 = vmatpush.msra.mxu0 %v9716_v18  ;;  %4291 = vmatpush.msra.mxu1 %v13572_v26  ;;  %v13597_v18 = vld [vmem:[#allocation185_spill] sm:$0xff]  ;;  %v13626_v26 = vld [vmem:[#allocation258_spill] sm:$0xff] }
 0x3b7   :  { %4133 = vmatpush.msrb.mxu2 %v13594_v4  ;;  %4189 = vmatpush.msrb.mxu3 %v13577_v12  ;;  %v13643_v4 = vld [vmem:[#allocation231_spill] sm:$0xff] }
 0x3b8   :  { %4244 = vmatpush.msra.mxu0 %v9734_v47  ;;  %4293 = vmatpush.msra.mxu1 %v13574_v28  ;;  %v13598_v47 = vld [vmem:[#allocation187_spill] sm:$0xff]  ;;  %v13627_v28 = vld [vmem:[#allocation244_spill] sm:$0xff] }
 0x3b9   :  { %4136 = vmatpush.msrb.mxu2 %v13595_v46  ;;  %4191 = vmatpush.msrb.mxu3 %v9707_v1  ;;  %v10667_v46 = vand.u32 4294901760, %v1847_v29 }
 0x3ba   :  { %4248 = vmatpush.msra.mxu0 %v9750_v45  ;;  %4295 = vmatpush.msra.mxu1 %v9675_v25  ;;  %v13599_v45 = vld [vmem:[#allocation189_spill] sm:$0xff]  ;;  %v13600_v25 = vld [vmem:[#allocation191_spill] sm:$0xff] }
 0x3bb   :  { %4139 = vmatpush.msrb.mxu2 %v13596_v60  ;;  %4193 = vmatpush.msrb.mxu3 %v9723_v50  ;;  %v1843_v60 = vld [vmem:[#allocation17 + $0x180] sm:$0xff] }
 0x3bc   :  { %4252 = vmatpush.msra.mxu0 %v9766_v23  ;;  %4297 = vmatpush.msra.mxu1 %v13577_v12  ;;  %v13602_v23 = vld [vmem:[#allocation217_spill] sm:$0xff] }
 0x3bd   :  { %4142 = vmatpush.msrb.mxu2 %v13597_v18  ;;  %4195 = vmatpush.msrb.mxu3 %v9739_v9  ;;  %v13628_v12 = vld [vmem:[#allocation233_spill] sm:$0xff]  ;;  %v13644_v18 = vld [vmem:[#allocation235_spill] sm:$0xff] }
 0x3be   :  { %4256 = vmatpush.msra.mxu0 %v9782_v38  ;;  %4299 = vmatpush.msra.mxu1 %v9707_v1  ;;  %v13601_v1 = vld [vmem:[#allocation193_spill] sm:$0xff]  ;;  %v13608_v38 = vld [vmem:[#allocation199_spill] sm:$0xff] }
 0x3bf   :  { %4145 = vmatpush.msrb.mxu2 %v13598_v47  ;;  %4197 = vmatpush.msrb.mxu3 %v9755_v17  ;;  %v10672_v47 = vsub.f32 %v1847_v29, %v10667_v46 }
 0x3c0   :  { %4260 = vmatpush.msra.mxu0 %v9798_v36  ;;  %4301 = vmatpush.msra.mxu1 %v9723_v50  ;;  %v13606_v50 = vld [vmem:[#allocation197_spill] sm:$0xff]  ;;  %v13609_v36 = vld [vmem:[#allocation230_spill] sm:$0xff] }
 0x3c1   :  { %4148 = vmatpush.msrb.mxu2 %v13599_v45  ;;  %4199 = vmatpush.msrb.mxu3 %v9771_v35  ;;  %v10674_v45 = vand.u32 4294901760, %v1843_v60 }
 0x3c2   :  { %4264 = vmatpush.msra.mxu0 %v9812_v30  ;;  %4303 = vmatpush.msra.mxu1 %v9739_v9  ;;  %v13603_v30 = vld [vmem:[#allocation220_spill] sm:$0xff]  ;;  %v13604_v9 = vld [vmem:[#allocation195_spill] sm:$0xff] }
 0x3c3   :  { %4151 = vmatpush.msrb.mxu2 %v13600_v25  ;;  %4201 = vmatpush.msrb.mxu3 %v9787_v5  ;;  %v1839_v25 = vld [vmem:[#allocation17 + $0x160] sm:$0xff] }
 0x3c4   :  { %4268 = vmatpush.msra.mxu0 %v9826_v22  ;;  %4305 = vmatpush.msra.mxu1 %v9755_v17  ;;  %v13605_v17 = vld [vmem:[#allocation224_spill] sm:$0xff]  ;;  %v13613_v22 = vld [vmem:[#allocation246_spill] sm:$0xff] }
 0x3c5   :  { %4205 = vmatmul.f32.vlgmr.msrb.gmra.mxu3 %v10327_v39  ;;  %4154 = vmatpush.msrb.mxu2 %v13601_v1  ;;  %v13625_v39 = vld [vmem:[#allocation229_spill] sm:$0xff]  ;;  %v13645_v1 = vld [vmem:[#allocation239_spill] sm:$0xff] }
 0x3c6   :  { %4361 = vmatpush.msra.mxu3 %v13602_v23  ;;  %4272 = vmatpush.msra.mxu0 %v13415_v10  ;;  %v13619_v10 = vld [vmem:[#allocation223_spill] sm:$0xff]  ;;  %v4756_v23 = vand.u32 4294901760, %v10672_v47 }
 0x3c7   :  { %4307 = vmatpush.msra.mxu1 %v9771_v35  ;;  %4274 = vmatmul.f32.vlgmr.msra.gmra.mxu0 %v10312_v58  ;;  %v13607_v35 = vld [vmem:[#allocation227_spill] sm:$0xff] }
 0x3c8   :  { %4367 = vmatpush.msra.mxu3 %v13603_v30  ;;  %4459 = vmatpush.msrb.mxu0 %v13416_v11  ;;  %v13621_v11 = vld [vmem:[#allocation236_spill] sm:$0xff]  ;;  %v10681_v30 = vsub.f32 %v1843_v60, %v10674_v45  ;;  %v1807_v60 = vld [vmem:[#allocation17 + $0x60] sm:$0xff] }
 0x3c9   :  { %4157 = vmatpush.msrb.mxu2 %v13604_v9  ;;  %4309 = vmatpush.msra.mxu1 %v9787_v5  ;;  %v13610_v5 = vld [vmem:[#allocation234_spill] sm:$0xff]  ;;  %v10683_v9 = vand.u32 4294901760, %v1839_v25 }
 0x3ca   :  { %4311 = vmatmul.f32.vlgmr.msra.gmra.mxu1 %v10312_v58  ;;  %4373 = vmatpush.msra.mxu3 %v13605_v17  ;;  %v13622_v58 = vld [vmem:[#allocation226_spill] sm:$0xff]  ;;  %v1835_v17 = vld [vmem:[#allocation17 + $0x140] sm:$0xff] }
 0x3cb   :  { %4462 = vmatpush.msrb.mxu0 %v13417_v8  ;;  %4512 = vmatpush.msrb.mxu1 %v9839_v20  ;;  %v13611_v8 = vld [vmem:[#allocation238_spill] sm:$0xff] }
 0x3cc   :  { %4160 = vmatpush.msrb.mxu2 %v13606_v50  ;;  %4379 = vmatpush.msra.mxu3 %v13607_v35  ;;  %v10687_v50 = vand.u32 4294901760, %v1835_v17  ;;  %v13646_v35 = vld [vmem:[#allocation243_spill] sm:$0xff] }
 0x3cd   :  { %4465 = vmatpush.msrb.mxu0 %v13419_v27  ;;  %4514 = vmatpush.msrb.mxu1 %v9849_v61  ;;  %v13616_v27 = vld [vmem:[#allocation219_spill] sm:$0xff] }
 0x3ce   :  { %4163 = vmatpush.msrb.mxu2 %v13608_v38  ;;  %4385 = vmatpush.msra.mxu3 %v13609_v36  ;;  %v4757_v38 = vsub.f32 %v10672_v47, %v4756_v23  ;;  %v4762_v36 = vand.u32 4294901760, %v10681_v30 }
 0x3cf   :  { %4166 = vmatmul.f32.vlgmr.msrb.gmra.mxu2 %v10320_v6  ;;  %4468 = vmatpush.msrb.mxu0 %v13421_v31  ;;  %v13612_v31 = vld [vmem:[#allocation242_spill] sm:$0xff]  ;;  %v13624_v6 = vld [vmem:[#allocation240_spill] sm:$0xff] }
 0x3d0   :  { %4316 = vmatpush.msra.mxu2 %v9839_v20  ;;  %4516 = vmatpush.msrb.mxu1 %v9864_v63 }
 0x3d1   :  { %4391 = vmatpush.msra.mxu3 %v13610_v5  ;;  %4471 = vmatpush.msrb.mxu0 %v13422_v55  ;;  %v13614_v55 = vld [vmem:[#allocation249_spill] sm:$0xff]  ;;  %v10696_v5 = vsub.f32 %v1839_v25, %v10683_v9 }
 0x3d2   :  { %4318 = vmatpush.msra.mxu2 %v9849_v61  ;;  %4518 = vmatpush.msrb.mxu1 %v9875_v0 }
 0x3d3   :  { %4397 = vmatpush.msra.mxu3 %v13611_v8  ;;  %4474 = vmatpush.msrb.mxu0 %v13423_v33  ;;  %v13618_v33 = vld [vmem:[#allocation232_spill] sm:$0xff]  ;;  %v10699_v8 = vsub.f32 %v1835_v17, %v10687_v50  ;;  %v10778_v17 = vand.u32 4294901760, %v1807_v60 }
 0x3d4   :  { %4320 = vmatpush.msra.mxu2 %v9864_v63  ;;  %4520 = vmatpush.msrb.mxu1 %v9884_v37 }
 0x3d5   :  { %4403 = vmatpush.msra.mxu3 %v13612_v31  ;;  %4477 = vmatpush.msrb.mxu0 %v9943_v15  ;;  %v13615_v15 = vld [vmem:[#allocation252_spill] sm:$0xff]  ;;  %v1831_v31 = vld [vmem:[#allocation17 + $0x120] sm:$0xff] }
 0x3d6   :  { %4322 = vmatpush.msra.mxu2 %v9875_v0  ;;  %4522 = vmatpush.msrb.mxu1 %v9896_v42 }
 0x3d7   :  { %4409 = vmatpush.msra.mxu3 %v13613_v22  ;;  %4480 = vmatpush.msrb.mxu0 %v13424_v59  ;;  %v13617_v59 = vld [vmem:[#allocation254_spill] sm:$0xff]  ;;  %v13647_v22 = vld [vmem:[#allocation247_spill] sm:$0xff] }
 0x3d8   :  { %4324 = vmatpush.msra.mxu2 %v9884_v37  ;;  %4524 = vmatpush.msrb.mxu1 %v9915_v51 }
 0x3d9   :  { %4415 = vmatpush.msra.mxu3 %v13614_v55  ;;  %4483 = vmatpush.msrb.mxu0 %v9975_v24  ;;  %v13620_v24 = vld [vmem:[#allocation256_spill] sm:$0xff]  ;;  %v4758_v55 = vand.u32 4294901760, %v4757_v38 }
 0x3da   :  { %4326 = vmatpush.msra.mxu2 %v9896_v42  ;;  %4526 = vmatpush.msrb.mxu1 %v9929_v49 }
 0x3db   :  { %4421 = vmatpush.msra.mxu3 %v13615_v15  ;;  %4486 = vmatpush.msrb.mxu0 %v9991_v32  ;;  %v13623_v32 = vld [vmem:[#allocation257_spill] sm:$0xff]  ;;  %v4763_v15 = vsub.f32 %v10681_v30, %v4762_v36 }
 0x3dc   :  { %4328 = vmatpush.msra.mxu2 %v9915_v51  ;;  %4528 = vmatpush.msrb.mxu1 %v13616_v27 }
 0x3dd   :  { %4427 = vmatpush.msra.mxu3 %v13617_v59  ;;  %4489 = vmatpush.msrb.mxu0 %v13618_v33  ;;  %v10708_v59 = vand.u32 4294901760, %v1831_v31  ;;  %v4774_v33 = vand.u32 4294901760, %v10699_v8 }
 0x3de   :  { %4330 = vmatpush.msra.mxu2 %v9929_v49  ;;  %4530 = vmatpush.msrb.mxu1 %v13619_v10 }
 0x3df   :  { %4433 = vmatpush.msra.mxu3 %v13620_v24  ;;  %4492 = vmatpush.msrb.mxu0 %v13621_v11  ;;  %v13648_v24 = vld [vmem:[#allocation250_spill] sm:$0xff]  ;;  %v4764_v11 = vand.u32 4294901760, %v4763_v15 }
 0x3e0   :  { %4332 = vmatpush.msra.mxu2 %v13616_v27  ;;  %4532 = vmatpush.msrb.mxu1 %v13622_v58 }
 0x3e1   :  { %4439 = vmatpush.msra.mxu3 %v13623_v32  ;;  %4495 = vmatpush.msrb.mxu0 %v13624_v6  ;;  %v10718_v32 = vsub.f32 %v1831_v31, %v10708_v59  ;;  %v1803_v31 = vld [vmem:[#allocation17 + $0x40] sm:$0xff] }
 0x3e2   :  { %4334 = vmatpush.msra.mxu2 %v13619_v10  ;;  %4534 = vmatpush.msrb.mxu1 %v13625_v39  ;;  %v10788_v15 = vand.u32 4294901760, %v1803_v31 }
 0x3e3   :  { %4445 = vmatpush.msra.mxu3 %v13626_v26  ;;  %4498 = vmatpush.msrb.mxu0 %v13627_v28  ;;  %v1823_v26 = vld [vmem:[#allocation17 + $0xe0] sm:$0xff]  ;;  %v13649_v28 = vld [vmem:[#allocation253_spill] sm:$0xff] }
 0x3e4   :  { %4336 = vmatpush.msra.mxu2 %v13622_v58  ;;  %4536 = vmatpush.msrb.mxu1 %v13628_v12 }
 0x3e5   :  { %4451 = vmatpush.msra.mxu3 %v13629_v43  ;;  %4501 = vmatpush.msrb.mxu0 %v13630_v56  ;;  %v4780_v43 = vand.u32 4294901760, %v10718_v32 }
 0x3e6   :  { %4338 = vmatpush.msra.mxu2 %v13625_v39  ;;  %4538 = vmatpush.msrb.mxu1 %v13631_v57 }
 0x3e7   :  { %4453 = vmatmul.f32.vlgmr.msra.gmra.mxu3 %v10469_v19  ;;  %4504 = vmatpush.msrb.mxu0 %v13632_v21 }
 0x3e8   :  { %4620 = vmatpush.msrb.mxu3 %v9839_v20  ;;  %4340 = vmatpush.msra.mxu2 %v13628_v12  ;;  %v1855_v20 = vld [vmem:[#allocation17 + $0x1e0] sm:$0xff] }
 0x3e9   :  { %4540 = vmatpush.msrb.mxu1 %v13633_v3  ;;  %4507 = vmatmul.f32.vlgmr.msrb.gmra.mxu0 %v10472_v7  ;;  %v13635_v7 = vld [vmem:[#allocation209_spill] sm:$0xff]  ;;  %v10631_v41 = vand.u32 4294901760, %v1855_v20 }
 0x3ea   :  { %4622 = vmatpush.msrb.mxu3 %v9849_v61  ;;  %4342 = vmatpush.msra.mxu2 %v13631_v57  ;;  %v1851_v61 = vld [vmem:[#allocation17 + $0x1c0] sm:$0xff] }
 0x3eb   :  { %4542 = vmatpush.msrb.mxu1 %v13634_v16  ;;  %v10633_v52 = vand.u32 4294901760, %v1851_v61  ;;  %4702 = vmatpush.msra.mxu0 %v10631_v41 }
 0x3ec   :  { %4546 = vmatmul.f32.vlgmr.msrb.gmra.mxu1 %v10478_v54  ;;  %4624 = vmatpush.msrb.mxu3 %v9864_v63  ;;  %v13636_v63 = vld [vmem:[#allocation211_spill] sm:$0xff] }
 0x3ed   :  { %4344 = vmatpush.msra.mxu2 %v13633_v3  ;;  %v10641_v54 = vsub.f32 %v1851_v61, %v10633_v52  ;;  %4704 = vmatpush.msra.mxu0 %v10633_v52 }
 0x3ee   :  { %4626 = vmatpush.msrb.mxu3 %v9875_v0  ;;  %v10638_v0 = vsub.f32 %v1855_v20, %v10631_v41  ;;  %v4781_v20 = vsub.f32 %v10718_v32, %v4780_v43 }
 0x3ef   :  { %4346 = vmatpush.msra.mxu2 %v13634_v16  ;;  %v4750_v53 = vand.u32 4294901760, %v10641_v54  ;;  %4706 = vmatpush.msra.mxu0 %v10667_v46 }
 0x3f0   :  { %4352 = vmatmul.f32.vlgmr.msra.gmra.mxu2 %v10488_v48  ;;  %4628 = vmatpush.msrb.mxu3 %v9884_v37  ;;  %v13637_v37 = vld [vmem:[#allocation214_spill] sm:$0xff]  ;;  %v4744_v48 = vand.u32 4294901760, %v10638_v0 }
 0x3f1   :  { %4553 = vmatpush.msrb.mxu2 %v13635_v7  ;;  %4708 = vmatpush.msra.mxu0 %v10674_v45 }
 0x3f2   :  { %4630 = vmatpush.msrb.mxu3 %v9896_v42  ;;  %v13638_v42 = vld [vmem:[#allocation216_spill] sm:$0xff]  ;;  %v4745_v13 = vsub.f32 %v10638_v0, %v4744_v48 }
 0x3f3   :  { %4557 = vmatpush.msrb.mxu2 %v13636_v63  ;;  %4710 = vmatpush.msra.mxu0 %v10683_v9 }
 0x3f4   :  { %4632 = vmatpush.msrb.mxu3 %v9915_v51  ;;  %v4751_v51 = vsub.f32 %v10641_v54, %v4750_v53  ;;  %v4746_v2 = vand.u32 4294901760, %v4745_v13  ;;  %v4782_v13 = vand.u32 4294901760, %v4781_v20 }
 0x3f5   :  { %4561 = vmatpush.msrb.mxu2 %v13637_v37  ;;  %4712 = vmatpush.msra.mxu0 %v10687_v50  ;;  %v1815_v37 = vld [vmem:[#allocation17 + $0xa0] sm:$0xff] }
 0x3f6   :  { %4634 = vmatpush.msrb.mxu3 %v9929_v49  ;;  %v4752_v40 = vand.u32 4294901760, %v4751_v51  ;;  %4747 = vmatpush.msra.mxu1 %v4746_v2  ;;  %v13641_v49 = vld [vmem:[#allocation225_spill] sm:$0xff] }
 0x3f7   :  { %4565 = vmatpush.msrb.mxu2 %v13638_v42  ;;  %4714 = vmatpush.msra.mxu0 %v10708_v59  ;;  %v1811_v42 = vld [vmem:[#allocation17 + $0x80] sm:$0xff] }
 0x3f8   :  { %4636 = vmatpush.msrb.mxu3 %v13616_v27  ;;  %4753 = vmatpush.msra.mxu1 %v4752_v40  ;;  %v4768_v27 = vand.u32 4294901760, %v10696_v5  ;;  %v10756_v40 = vand.u32 4294901760, %v1815_v37 }
 0x3f9   :  { %4569 = vmatpush.msrb.mxu2 %v13639_v34 }
 0x3fa   :  { %4638 = vmatpush.msrb.mxu3 %v13619_v10  ;;  %v1827_v10 = vld [vmem:[#allocation17 + $0x100] sm:$0xff]  ;;  %4759 = vmatpush.msra.mxu1 %v4758_v55  ;;  %v10768_v29 = vsub.f32 %v1815_v37, %v10756_v40  ;;  %v10786_v55 = vsub.f32 %v1807_v60, %v10778_v17 }
 0x3fb   :  { %4573 = vmatpush.msrb.mxu2 %v13640_v62  ;;  %v10720_v6 = vand.u32 4294901760, %v1827_v10 }
 0x3fc   :  { %4640 = vmatpush.msrb.mxu3 %v13622_v58  ;;  %v4769_v58 = vsub.f32 %v10696_v5, %v4768_v27  ;;  %4765 = vmatpush.msra.mxu1 %v4764_v11 }
 0x3fd   :  { %4577 = vmatpush.msrb.mxu2 %v13641_v49  ;;  %v10730_v56 = vsub.f32 %v1827_v10, %v10720_v6  ;;  %4716 = vmatpush.msra.mxu0 %v10720_v6 }
 0x3fe   :  { %4642 = vmatpush.msrb.mxu3 %v13625_v39  ;;  %v4775_v39 = vsub.f32 %v10699_v8, %v4774_v33 }
 0x3ff   :  { %4581 = vmatpush.msrb.mxu2 %v13642_v14  ;;  %v4786_v61 = vand.u32 4294901760, %v10730_v56 }
 0x400   :  { %4644 = vmatpush.msrb.mxu3 %v13628_v12  ;;  %v4770_v12 = vand.u32 4294901760, %v4769_v58  ;;  %v4776_v21 = vand.u32 4294901760, %v4775_v39  ;;  %v1799_v58 = vld [vmem:[#allocation17 + $0x20] sm:$0xff]  ;;  %v4816_v39 = vand.u32 4294901760, %v10786_v55 }
 0x401   :  { %4585 = vmatpush.msrb.mxu2 %v13643_v4  ;;  %v4787_v51 = vsub.f32 %v10730_v56, %v4786_v61 }
 0x402   :  { %4646 = vmatpush.msrb.mxu3 %v13631_v57  ;;  %v10732_v57 = vand.u32 4294901760, %v1823_v26  ;;  %4771 = vmatpush.msra.mxu1 %v4770_v12  ;;  %v4817_v20 = vsub.f32 %v10786_v55, %v4816_v39 }
 0x403   :  { %4589 = vmatpush.msrb.mxu2 %v13644_v18  ;;  %v4788_v62 = vand.u32 4294901760, %v4787_v51  ;;  %v3330_v18 = vpop.f32.mrf.mxu0 }
 0x404   :  { %4648 = vmatpush.msrb.mxu3 %v13633_v3  ;;  %v1819_v3 = vld [vmem:[#allocation17 + $0xc0] sm:$0xff]  ;;  %v10742_v7 = vsub.f32 %v1823_v26, %v10732_v57  ;;  %4718 = vmatpush.msra.mxu0 %v10732_v57  ;;  %v3331_v10 = vadd.f32 1e-05, %v3330_v18  ;;  %v10801_v26 = vsub.f32 %v1803_v31, %v10788_v15 }
 0x405   :  { %4593 = vmatpush.msrb.mxu2 %v13645_v1  ;;  %v10744_v63 = vand.u32 4294901760, %v1819_v3  ;;  %4777 = vmatpush.msra.mxu1 %v4776_v21 }
 0x406   :  { %4650 = vmatpush.msrb.mxu3 %v13634_v16  ;;  %v13650_v16 = vld [vmem:[#allocation255_spill] sm:$0xff]  ;;  %v4792_v34 = vand.u32 4294901760, %v10742_v7  ;;  %v4822_v37 = vand.u32 4294901760, %v10801_v26 }
 0x407   :  { %4597 = vmatpush.msrb.mxu2 %v13646_v35  ;;  %4652 = vmatmul.f32.vlgmr.msrb.gmra.mxu3 %v10469_v19  ;;  %v10753_v2 = vsub.f32 %v1819_v3, %v10744_v63  ;;  %v4804_v35 = vand.u32 4294901760, %v10768_v29  ;;  %v1795_v3 = vld [vmem:[#allocation17] sm:$0xff] }
 0x408   :  { %4898 = vmatpush.msra.mxu3 %v10631_v41  ;;  %4720 = vmatpush.msra.mxu0 %v10744_v63  ;;  %v4793_v49 = vsub.f32 %v10742_v7, %v4792_v34 }
 0x409   :  { %4601 = vmatpush.msrb.mxu2 %v13647_v22  ;;  %4783 = vmatpush.msra.mxu1 %v4782_v13  ;;  %v4798_v14 = vand.u32 4294901760, %v10753_v2  ;;  %v10815_v13 = vand.u32 4294901760, %v1795_v3 }
 0x40a   :  { %4900 = vmatpush.msra.mxu3 %v10633_v52  ;;  %4722 = vmatpush.msra.mxu0 %v10756_v40  ;;  %v4794_v25 = vand.u32 4294901760, %v4793_v49  ;;  %v4823_v49 = vsub.f32 %v10801_v26, %v4822_v37 }
 0x40b   :  { %4605 = vmatpush.msrb.mxu2 %v13648_v24  ;;  %4789 = vmatpush.msra.mxu1 %v4788_v62  ;;  %v4799_v1 = vsub.f32 %v10753_v2, %v4798_v14  ;;  %v4805_v24 = vsub.f32 %v10768_v29, %v4804_v35  ;;  %v4818_v62 = vand.u32 4294901760, %v4817_v20  ;;  %v10824_v18 = vsub.f32 %v1795_v3, %v10815_v13  ;;  %v1903_v20 = vld [vmem:[#allocation17 + $0x360] sm:$0xff] }
 0x40c   :  { %4902 = vmatpush.msra.mxu3 %v10667_v46 }
 0x40d   :  { %4609 = vmatpush.msrb.mxu2 %v13649_v28  ;;  %4795 = vmatpush.msra.mxu1 %v4794_v25  ;;  %v4800_v22 = vand.u32 4294901760, %v4799_v1  ;;  %v10803_v28 = vand.u32 4294901760, %v1799_v58  ;;  %v4806_v12 = vand.u32 4294901760, %v4805_v24  ;;  %v3485_v25 = vpop.f32.mrf.mxu2  ;;  %v4824_v1 = vand.u32 4294901760, %v4823_v49 }
 0x40e   :  { %4904 = vmatpush.msra.mxu3 %v10674_v45  ;;  %v10941_v49 = vand.u32 4294901760, %v1903_v20 }
 0x40f   :  { %4613 = vmatpush.msrb.mxu2 %v13650_v16  ;;  %4801 = vmatpush.msra.mxu1 %v4800_v22  ;;  %v3431_v16 = vpop.f32.mrf.mxu1  ;;  %v4834_v22 = vand.u32 4294901760, %v10824_v18 }
 0x410   :  { %4615 = vmatmul.f32.vlgmr.msrb.gmra.mxu2 %v10469_v19  ;;  %v10758_v19 = vand.u32 4294901760, %v1811_v42  ;;  %4906 = vmatpush.msra.mxu3 %v10683_v9  ;;  %v3432_v51 = vadd.f32 %v3431_v16, %v3331_v10 }
 0x411   :  { %4845 = vmatpush.msra.mxu2 %v10638_v0  ;;  %4807 = vmatpush.msra.mxu1 %v4806_v12  ;;  %v3593_v12 = vpop.f32.mrf.mxu0 }
 0x412   :  { %v10771_v4 = vsub.f32 %v1811_v42, %v10758_v19  ;;  %4908 = vmatpush.msra.mxu3 %v10687_v50  ;;  %4724 = vmatpush.msra.mxu0 %v10758_v19  ;;  %v10813_v42 = vsub.f32 %v1799_v58, %v10803_v28  ;;  %v3486_v10 = vadd.f32 %v3485_v25, %v3432_v51  ;;  %v3524_v58 = vpop.f32.mrf.mxu3 }
 0x413   :  { %4848 = vmatpush.msra.mxu2 %v10641_v54 }
 0x414   :  { %v4810_v38 = vand.u32 4294901760, %v10771_v4  ;;  %4910 = vmatpush.msra.mxu3 %v10708_v59  ;;  %4726 = vmatpush.msra.mxu0 %v10778_v17  ;;  %v4828_v60 = vand.u32 4294901760, %v10813_v42 }
 0x415   :  { %4851 = vmatpush.msra.mxu2 %v10672_v47 }
 0x416   :  { %v4811_v11 = vsub.f32 %v10771_v4, %v4810_v38  ;;  %4912 = vmatpush.msra.mxu3 %v10720_v6  ;;  %4728 = vmatpush.msra.mxu0 %v10788_v15  ;;  %v4829_v31 = vsub.f32 %v10813_v42, %v4828_v60 }
 0x417   :  { %4854 = vmatpush.msra.mxu2 %v10681_v30 }
 0x418   :  { %v4812_v21 = vand.u32 4294901760, %v4811_v11  ;;  %4914 = vmatpush.msra.mxu3 %v10732_v57  ;;  %4730 = vmatpush.msra.mxu0 %v10803_v28  ;;  %v4830_v24 = vand.u32 4294901760, %v4829_v31  ;;  %v4835_v11 = vsub.f32 %v10824_v18, %v4834_v22 }
 0x419   :  { %4857 = vmatpush.msra.mxu2 %v10696_v5 }
 0x41a   :  { %4916 = vmatpush.msra.mxu3 %v10744_v63  ;;  %4813 = vmatpush.msra.mxu1 %v4812_v21  ;;  %v4836_v0 = vand.u32 4294901760, %v4835_v11 }
 0x41b   :  { %4860 = vmatpush.msra.mxu2 %v10699_v8  ;;  %4732 = vmatpush.msra.mxu0 %v10815_v13 }
 0x41c   :  { %4819 = vmatpush.msra.mxu1 %v4818_v62  ;;  %4918 = vmatpush.msra.mxu3 %v10756_v40 }
 0x41d   :  { %4863 = vmatpush.msra.mxu2 %v10718_v32  ;;  %4939 = vmatpush.msrb.mxu0 %v4744_v48  ;;  %v3525_v48 = vadd.f32 %v3524_v58, %v3486_v10  ;;  %v10953_v10 = vsub.f32 %v1903_v20, %v10941_v49 }
 0x41e   :  { %4825 = vmatpush.msra.mxu1 %v4824_v1  ;;  %4920 = vmatpush.msra.mxu3 %v10758_v19 }
 0x41f   :  { %4866 = vmatpush.msra.mxu2 %v10730_v56  ;;  %4943 = vmatpush.msrb.mxu0 %v4750_v53  ;;  %v3594_v54 = vadd.f32 %v3593_v12, %v3525_v48  ;;  %v3630_v53 = vpop.f32.mrf.mxu1  ;;  %v1891_v12 = vld [vmem:[#allocation17 + $0x300] sm:$0xff] }
 0x420   :  { %4831 = vmatpush.msra.mxu1 %v4830_v24  ;;  %4922 = vmatpush.msra.mxu3 %v10778_v17  ;;  %v1895_v24 = vld [vmem:[#allocation17 + $0x320] sm:$0xff] }
 0x421   :  { %4869 = vmatpush.msra.mxu2 %v10742_v7  ;;  %4947 = vmatpush.msrb.mxu0 %v4756_v23  ;;  %v3826_v30 = vpop.f32.mrf.mxu0  ;;  %v10963_v48 = vand.u32 4294901760, %v1895_v24 }
 0x422   :  { %4837 = vmatpush.msra.mxu1 %v4836_v0  ;;  %4924 = vmatpush.msra.mxu3 %v10788_v15 }
 0x423   :  { %4872 = vmatpush.msra.mxu2 %v10753_v2  ;;  %4951 = vmatpush.msrb.mxu0 %v4762_v36 }
 0x424   :  { %5006 = vmatpush.msrb.mxu1 %v10631_v41  ;;  %4926 = vmatpush.msra.mxu3 %v10803_v28  ;;  %v3631_v41 = vadd.f32 %v3630_v53, %v3594_v54  ;;  %v1887_v54 = vld [vmem:[#allocation17 + $0x2e0] sm:$0xff] }
 0x425   :  { %4875 = vmatpush.msra.mxu2 %v10768_v29  ;;  %4955 = vmatpush.msrb.mxu0 %v4768_v27  ;;  %v3772_v23 = vpop.f32.mrf.mxu3 }
 0x426   :  { %5008 = vmatpush.msrb.mxu1 %v10633_v52  ;;  %4928 = vmatpush.msra.mxu3 %v10815_v13 }
 0x427   :  { %4878 = vmatpush.msra.mxu2 %v10771_v4  ;;  %4959 = vmatpush.msrb.mxu0 %v4774_v33  ;;  %v1911_v4 = vld [vmem:[#allocation17 + $0x3a0] sm:$0xff] }
 0x428   :  { %5010 = vmatpush.msrb.mxu1 %v10667_v46 }
 0x429   :  { %4881 = vmatpush.msra.mxu2 %v10786_v55  ;;  %4963 = vmatpush.msrb.mxu0 %v4780_v43  ;;  %v10902_v43 = vld [vmem:[%s12739_s9] sm:$0x3] }
 0x42a   :  { %5012 = vmatpush.msrb.mxu1 %v10674_v45  ;;  %v3865_v45 = vpop.f32.mrf.mxu1  ;;  %v4679_v2 = vperm.slane %v10902_v43, 0 }
 0x42b   :  { %4884 = vmatpush.msra.mxu2 %v10801_v26  ;;  %4967 = vmatpush.msrb.mxu0 %v4786_v61  ;;  %v10904_v61 = vld [vmem:[#allocation16] sm:$0x3] }
 0x42c   :  { %5014 = vmatpush.msrb.mxu1 %v10683_v9  ;;  %v4686_v29 = vperm.slane %v10904_v61, 0 }
 0x42d   :  { %v3671_v47 = vpop.f32.mrf.mxu2  ;;  %4887 = vmatpush.msra.mxu2 %v10813_v42  ;;  %4971 = vmatpush.msrb.mxu0 %v4792_v34  ;;  %v1915_v34 = vld [vmem:[#allocation17 + $0x3c0] sm:$0xff] }
 0x42e   :  { %v3672_v52 = vadd.f32 %v3671_v47, %v3631_v41  ;;  %5016 = vmatpush.msrb.mxu1 %v10687_v50  ;;  %v3971_v8 = vpop.f32.mrf.mxu3  ;;  %v5109_v41 = vand.u32 4294901760, %v10953_v10  ;;  %v10970_v47 = vand.u32 4294901760, %v1891_v12 }
 0x42f   :  { %4890 = vmatpush.msra.mxu2 %v10824_v18  ;;  %4975 = vmatpush.msrb.mxu0 %v4798_v14 }
 0x430   :  { %v3773_v46 = vadd.f32 %v3772_v23, %v3672_v52  ;;  %5018 = vmatpush.msrb.mxu1 %v10708_v59 }
 0x431   :  { %4979 = vmatpush.msrb.mxu0 %v4804_v35 }
 0x432   :  { %v3827_v36 = vadd.f32 %v3826_v30, %v3773_v46  ;;  %5020 = vmatpush.msrb.mxu1 %v10720_v6  ;;  %v10979_v46 = vsub.f32 %v1895_v24, %v10963_v48  ;;  %v10981_v30 = vand.u32 4294901760, %v1887_v54 }
 0x433   :  { %4983 = vmatpush.msrb.mxu0 %v4810_v38 }
 0x434   :  { %v3866_v5 = vadd.f32 %v3865_v45, %v3827_v36  ;;  %5022 = vmatpush.msrb.mxu1 %v10732_v57  ;;  %v1919_v57 = vld [vmem:[#allocation17 + $0x3e0] sm:$0xff] }
 0x435   :  { %4987 = vmatpush.msrb.mxu0 %v4816_v39  ;;  %v10906_v7 = vand.u32 4294901760, %v1919_v57  ;;  %v1907_v39 = vld [vmem:[#allocation17 + $0x380] sm:$0xff] }
 0x436   :  { %5024 = vmatpush.msrb.mxu1 %v10744_v63  ;;  %v10932_v16 = vand.u32 4294901760, %v1907_v39  ;;  %v1883_v36 = vld [vmem:[#allocation17 + $0x2c0] sm:$0xff] }
 0x437   :  { %v3934_v9 = vpop.f32.mrf.mxu2  ;;  %4991 = vmatpush.msrb.mxu0 %v4822_v37  ;;  %5043 = vmatpush.msrb.mxu2 %v10906_v7  ;;  %v1879_v45 = vld [vmem:[#allocation17 + $0x2a0] sm:$0xff] }
 0x438   :  { %v3935_v50 = vadd.f32 %v3934_v9, %v3866_v5  ;;  %5026 = vmatpush.msrb.mxu1 %v10756_v40  ;;  %v10910_v40 = vsub.f32 %v1919_v57, %v10906_v7  ;;  %v10939_v62 = vsub.f32 %v1907_v39, %v10932_v16  ;;  %v5110_v9 = vsub.f32 %v10953_v10, %v5109_v41 }
 0x439   :  { %4995 = vmatpush.msrb.mxu0 %v4828_v60  ;;  %v1899_v60 = vld [vmem:[#allocation17 + $0x340] sm:$0xff]  ;;  %v11003_v57 = vand.u32 4294901760, %v1883_v36 }
 0x43a   :  { %v3972_v27 = vadd.f32 %v3971_v8, %v3935_v50  ;;  %5028 = vmatpush.msrb.mxu1 %v10758_v19  ;;  %v10912_v19 = vand.u32 4294901760, %v1915_v34  ;;  %v5085_v38 = vand.u32 4294901760, %v10910_v40  ;;  %v10949_v31 = vand.u32 4294901760, %v1899_v60 }
 0x43b   :  { %4999 = vmatpush.msrb.mxu0 %v4834_v22  ;;  %v5103_v22 = vand.u32 4294901760, %v10939_v62  ;;  %v10988_v50 = vsub.f32 %v1891_v12, %v10970_v47 }
 0x43c   :  { %7664 = vrsqrt.f32 %v3972_v27  ;;  %5030 = vmatpush.msrb.mxu1 %v10778_v17  ;;  %vm4662_vm12 = vweird.f32 %v3972_v27  ;;  %v13651_v17 = vld [vmem:[#allocation202_spill] sm:$0xff]  ;;  %v10919_v55 = vsub.f32 %v1915_v34, %v10912_v19  ;;  %5045 = vmatpush.msrb.mxu2 %v10912_v19  ;;  %v10961_v0 = vsub.f32 %v1899_v60, %v10949_v31 }
 0x43d   :  { %v5104_v53 = vsub.f32 %v10939_v62, %v5103_v22 }
 0x43e   :  { %5032 = vmatpush.msrb.mxu1 %v10788_v15  ;;  %v10921_v15 = vand.u32 4294901760, %v1911_v4  ;;  %v5091_v21 = vand.u32 4294901760, %v10919_v55  ;;  %v5115_v23 = vand.u32 4294901760, %v10961_v0 }
 0x43f   :  { %v5105_v5 = vand.u32 4294901760, %v5104_v53 }
 0x440   :  { %5034 = vmatpush.msrb.mxu1 %v10803_v28  ;;  %v5086_v28 = vsub.f32 %v10910_v40, %v5085_v38  ;;  %v10929_v3 = vsub.f32 %v1911_v4, %v10921_v15  ;;  %5047 = vmatpush.msrb.mxu2 %v10921_v15 }
 0x442   :  { %v7665_v59 = vpop.eup %7664  ;;  %5036 = vmatpush.msrb.mxu1 %v10815_v13  ;;  %v5087_v42 = vand.u32 4294901760, %v5086_v28  ;;  %v5092_v13 = vsub.f32 %v10919_v55, %v5091_v21  ;;  %v5097_v51 = vand.u32 4294901760, %v10929_v3  ;;  %5049 = vmatpush.msrb.mxu2 %v10932_v16 }
 0x443   :  { %v4657_v33 = vmul.f32 %v7665_v59, %v3972_v27  ;;  %vm4663_vm11 = vweird.f32 %v7665_v59  ;;  %v5116_v27 = vsub.f32 %v10961_v0, %v5115_v23 }
 0x444   :  { %vm4664_vm13 = vmor %vm4662_vm12, %vm4663_vm11  ;;  %5088 = vmatpush.msrb.mxu3 %v5087_v42  ;;  %v5093_v25 = vand.u32 4294901760, %v5092_v13  ;;  %v5098_v1 = vsub.f32 %v10929_v3, %v5097_v51  ;;  %5051 = vmatpush.msrb.mxu2 %v10941_v49 }
 0x445   :  { %v4658_v32 = vmul.f32 %v7665_v59, %v4657_v33  ;;  %v10999_v33 = vsub.f32 %v1887_v54, %v10981_v30 }
 0x446   :  { %5094 = vmatpush.msrb.mxu3 %v5093_v25  ;;  %v5099_v58 = vand.u32 4294901760, %v5098_v1  ;;  %5053 = vmatpush.msrb.mxu2 %v10949_v31 }
 0x447   :  { %v4659_v6 = vmul.f32 0.5, %v4658_v32  ;;  %v1875_v32 = vld [vmem:[#allocation17 + $0x280] sm:$0xff] }
 0x448   :  { %5100 = vmatpush.msrb.mxu3 %v5099_v58  ;;  %5055 = vmatpush.msrb.mxu2 %v10963_v48  ;;  %v11024_v39 = vand.u32 4294901760, %v1875_v32  ;;  %v1871_v58 = vld [vmem:[#allocation17 + $0x260] sm:$0xff] }
 0x449   :  { %v4660_v56 = vsub.f32 1.5, %v4659_v6  ;;  %v5111_v6 = vand.u32 4294901760, %v5110_v9  ;;  %v11048_v12 = vand.u32 4294901760, %v1871_v58 }
 0x44a   :  { %5106 = vmatpush.msrb.mxu3 %v5105_v5  ;;  %5057 = vmatpush.msrb.mxu2 %v10970_v47  ;;  %v11035_v13 = vsub.f32 %v1875_v32, %v11024_v39 }
 0x44b   :  { %v4661_v63 = vmul.f32 %v7665_v59, %v4660_v56  ;;  %v5127_v56 = vand.u32 4294901760, %v10988_v50 }
 0x44c   :  { %5112 = vmatpush.msrb.mxu3 %v5111_v6  ;;  %5059 = vmatpush.msrb.mxu2 %v10981_v30  ;;  %v13065_v24 = vand.u32 4294901760, %v11035_v13 }
 0x44d   :  { %v4665_v14 = vsel %vm4664_vm13, %v7665_v59, %v4661_v63  ;;  %v5121_v59 = vand.u32 4294901760, %v10979_v46  ;;  %v11005_v63 = vand.u32 4294901760, %v1879_v45  ;;  %v5128_v4 = vsub.f32 %v10988_v50, %v5127_v56 }
 0x44e   :  { %v4676_v35 = vmul.f32 %v4665_v14, %v13651_v17  ;;  %v11019_v17 = vsub.f32 %v1883_v36, %v11003_v57  ;;  %5061 = vmatpush.msrb.mxu2 %v11003_v57  ;;  %v5152_v53 = vsub.f32 %v11035_v13, %v13065_v24  ;;  %v1867_v36 = vld [vmem:[#allocation17 + $0x240] sm:$0xff]  ;;  %v4113_v24 = vpop.f32.mrf.mxu1 }
 0x44f   :  { %v5122_v14 = vsub.f32 %v10979_v46, %v5121_v59  ;;  %v5129_v20 = vand.u32 4294901760, %v5128_v4  ;;  %v11059_v5 = vand.u32 4294901760, %v1867_v36 }
 0x450   :  { %v4683_v26 = vmul.f32 %v4679_v2, %v4676_v35  ;;  %v5117_v2 = vand.u32 4294901760, %v5116_v27  ;;  %v11022_v35 = vsub.f32 %v1879_v45, %v11005_v63  ;;  %v11057_v45 = vsub.f32 %v1871_v58, %v11048_v12  ;;  %5063 = vmatpush.msrb.mxu2 %v11005_v63 }
 0x451   :  { %v11067_v32 = vsub.f32 %v1867_v36, %v11059_v5 }
 0x452   :  { %v4690_v37 = vadd.f32 %v4686_v29, %v4683_v26  ;;  %v13069_v29 = vand.u32 4294901760, %v10999_v33  ;;  %v5123_v26 = vand.u32 4294901760, %v5122_v14  ;;  %5118 = vmatpush.msrb.mxu3 %v5117_v2  ;;  %v13066_v42 = vand.u32 4294901760, %v11022_v35  ;;  %v1859_v14 = vld [vmem:[#allocation17 + $0x200] sm:$0xff]  ;;  %5065 = vmatpush.msrb.mxu2 %v11024_v39 }
 0x453   :  { %v13064_v27 = vand.u32 4294901760, %v11057_v45  ;;  %v5153_v2 = vand.u32 4294901760, %v5152_v53 }
 0x454   :  { %v10944_v18 = vand.u32 4294901760, %v4690_v37  ;;  %v5134_v28 = vsub.f32 %v10999_v33, %v13069_v29  ;;  %5124 = vmatpush.msrb.mxu3 %v5123_v26  ;;  %v5146_v1 = vsub.f32 %v11022_v35, %v13066_v42  ;;  %v13062_v26 = vand.u32 4294901760, %v11067_v32  ;;  %5067 = vmatpush.msrb.mxu2 %v11048_v12 }
 0x455   :  { %v5158_v4 = vsub.f32 %v11057_v45, %v13064_v27 }
 0x456   :  { %13652 = vst [vmem:[#allocation205_spill] sm:$0xff] %v10944_v18  ;;  %v10957_v11 = vsub.f32 %v4690_v37, %v10944_v18  ;;  %4839 = vmatmul.f32.vlgmr.msra.gmra.mxu1 %v10944_v18  ;;  %v13067_v37 = vand.u32 4294901760, %v11019_v17  ;;  %v5135_v60 = vand.u32 4294901760, %v5134_v28  ;;  %5130 = vmatpush.msrb.mxu3 %v5129_v20  ;;  %v5147_v9 = vand.u32 4294901760, %v5146_v1 }
 0x457   :  { %5239 = vmatpush.msra.mxu1 %v10906_v7  ;;  %v11081_v20 = vand.u32 4294901760, %v1859_v14  ;;  %5069 = vmatpush.msrb.mxu2 %v11059_v5 }
 0x458   :  { %13653 = vst [vmem:[#allocation207_spill] sm:$0xff] %v10957_v11  ;;  %4893 = vmatmul.f32.vlgmr.msra.gmra.mxu2 %v10957_v11  ;;  %v10975_v52 = vand.u32 4294901760, %v10957_v11  ;;  %v5140_v25 = vsub.f32 %v11019_v17, %v13067_v37  ;;  %5136 = vmatpush.msrb.mxu3 %v5135_v60  ;;  %v5159_v60 = vand.u32 4294901760, %v5158_v4  ;;  %v1852_v4 = vld [vmem:[#allocation17 + $0x1c8] sm:$0xff] }
 0x459   :  { %5241 = vmatpush.msra.mxu1 %v10912_v19  ;;  %v11090_v58 = vsub.f32 %v1859_v14, %v11081_v20 }
 0x45a   :  { %13654 = vst [vmem:[#allocation210_spill] sm:$0xff] %v10975_v52  ;;  %4932 = vmatmul.f32.vlgmr.msra.gmra.mxu3 %v10975_v52  ;;  %v4736_v8 = vsub.f32 %v10957_v11, %v10975_v52  ;;  %v5141_v54 = vand.u32 4294901760, %v5140_v25  ;;  %v5164_v25 = vsub.f32 %v11067_v32, %v13062_v26 }
 0x45b   :  { %5243 = vmatpush.msra.mxu1 %v10921_v15  ;;  %v13063_v36 = vand.u32 4294901760, %v11090_v58 }
 0x45c   :  { %v11007_v34 = vand.u32 4294901760, %v4736_v8  ;;  %v1863_v8 = vld [vmem:[#allocation17 + $0x220] sm:$0xff]  ;;  %5142 = vmatpush.msrb.mxu3 %v5141_v54  ;;  %v5165_v54 = vand.u32 4294901760, %v5164_v25  ;;  %v4012_v25 = vpop.f32.mrf.mxu0 }
 0x45d   :  { %5245 = vmatpush.msra.mxu1 %v10932_v16  ;;  %v11069_v6 = vand.u32 4294901760, %v1863_v8  ;;  %v5176_v14 = vsub.f32 %v11090_v58, %v13063_v36 }
 0x45e   :  { %4738 = vmatmul.f32.vlgmr.msra.gmra.mxu0 %v11007_v34  ;;  %5038 = vmatmul.f32.vlgmr.msrb.gmra.mxu1 %v10944_v18 }
 0x45f   :  { %5186 = vmatpush.msra.mxu0 %v10910_v40  ;;  %5247 = vmatpush.msra.mxu1 %v10941_v49  ;;  %v11078_v28 = vsub.f32 %v1863_v8, %v11069_v6  ;;  %v5177_v26 = vand.u32 4294901760, %v5176_v14  ;;  %v1844_v14 = vld [vmem:[#allocation17 + $0x188] sm:$0xff] }
 0x460   :  { %5148 = vmatpush.msrb.mxu3 %v5147_v9  ;;  %v1856_v9 = vld [vmem:[#allocation17 + $0x1e8] sm:$0xff]  ;;  %5071 = vmatpush.msrb.mxu2 %v11069_v6  ;;  %v11131_v37 = vand.u32 4294901760, %v1844_v14 }
 0x461   :  { %5189 = vmatpush.msra.mxu0 %v10919_v55  ;;  %5249 = vmatpush.msra.mxu1 %v10949_v31  ;;  %v13061_v1 = vand.u32 4294901760, %v11078_v28  ;;  %v11101_v8 = vand.u32 4294901760, %v1856_v9  ;;  %v1840_v40 = vld [vmem:[#allocation17 + $0x168] sm:$0xff] }
 0x462   :  { %5154 = vmatpush.msrb.mxu3 %v5153_v2  ;;  %5073 = vmatpush.msrb.mxu2 %v11081_v20 }
 0x463   :  { %5192 = vmatpush.msra.mxu0 %v10929_v3  ;;  %5251 = vmatpush.msra.mxu1 %v10963_v48  ;;  %v5170_v53 = vsub.f32 %v11078_v28, %v13061_v1  ;;  %v11110_v1 = vsub.f32 %v1856_v9, %v11101_v8  ;;  %v4013_v9 = vadd.f32 1e-05, %v4012_v25  ;;  %v1828_v3 = vld [vmem:[#allocation17 + $0x108] sm:$0xff] }
 0x464   :  { %5160 = vmatpush.msrb.mxu3 %v5159_v60  ;;  %v11112_v60 = vand.u32 4294901760, %v1852_v4  ;;  %5280 = vmatpush.msra.mxu2 %v5085_v38  ;;  %v4167_v38 = vpop.f32.mrf.mxu2 }
 0x465   :  { %5195 = vmatpush.msra.mxu0 %v10939_v62  ;;  %5253 = vmatpush.msra.mxu1 %v10970_v47  ;;  %v5171_v2 = vand.u32 4294901760, %v5170_v53  ;;  %v1848_v53 = vld [vmem:[#allocation17 + $0x1a8] sm:$0xff]  ;;  %v13068_v36 = vand.u32 4294901760, %v11110_v1  ;;  %v4114_v29 = vadd.f32 %v4113_v24, %v4013_v9 }
 0x466   :  { %5001 = vmatmul.f32.vlgmr.msrb.gmra.mxu0 %v10944_v18  ;;  %5166 = vmatpush.msrb.mxu3 %v5165_v54  ;;  %v11118_v27 = vand.u32 4294901760, %v1848_v53  ;;  %v11121_v54 = vsub.f32 %v1852_v4, %v11112_v60 }
 0x467   :  { %5198 = vmatpush.msra.mxu0 %v10953_v10  ;;  %5255 = vmatpush.msra.mxu1 %v10981_v30  ;;  %v1820_v10 = vld [vmem:[#allocation17 + $0xc8] sm:$0xff] }
 0x468   :  { %5172 = vmatpush.msrb.mxu3 %v5171_v2  ;;  %v5427_v2 = vsub.f32 %v11110_v1, %v13068_v36  ;;  %v13070_v42 = vand.u32 4294901760, %v11121_v54  ;;  %v11134_v4 = vsub.f32 %v1848_v53, %v11118_v27  ;;  %5284 = vmatpush.msra.mxu2 %v5091_v21  ;;  %v11145_v53 = vand.u32 4294901760, %v1840_v40 }
 0x469   :  { %5201 = vmatpush.msra.mxu0 %v10961_v0  ;;  %5257 = vmatpush.msra.mxu1 %v11003_v57 }
 0x46a   :  { %5178 = vmatpush.msrb.mxu3 %v5177_v26  ;;  %v5428_v26 = vand.u32 4294901760, %v5427_v2  ;;  %v5433_v25 = vsub.f32 %v11121_v54, %v13070_v42  ;;  %v13071_v36 = vand.u32 4294901760, %v11134_v4  ;;  %v1836_v2 = vld [vmem:[#allocation17 + $0x148] sm:$0xff]  ;;  %v11159_v24 = vsub.f32 %v1840_v40, %v11145_v53  ;;  %5288 = vmatpush.msra.mxu2 %v5097_v51  ;;  %v4206_v51 = vpop.f32.mrf.mxu3 }
 0x46b   :  { %5204 = vmatpush.msra.mxu0 %v10979_v46  ;;  %5259 = vmatpush.msra.mxu1 %v11005_v63  ;;  %v11156_v21 = vand.u32 4294901760, %v1836_v2 }
 0x46c   :  { %5347 = vmatpush.msra.mxu3 %v10906_v7  ;;  %v11150_v7 = vsub.f32 %v1844_v14, %v11131_v37  ;;  %v5434_v42 = vand.u32 4294901760, %v5433_v25  ;;  %v5439_v55 = vsub.f32 %v11134_v4, %v13071_v36  ;;  %v1832_v14 = vld [vmem:[#allocation17 + $0x128] sm:$0xff]  ;;  %v13072_v25 = vand.u32 4294901760, %v11159_v24  ;;  %5292 = vmatpush.msra.mxu2 %v5103_v22 }
 0x46d   :  { %5207 = vmatpush.msra.mxu0 %v10988_v50  ;;  %5261 = vmatpush.msra.mxu1 %v11024_v39  ;;  %v11167_v36 = vand.u32 4294901760, %v1832_v14  ;;  %v11170_v40 = vsub.f32 %v1836_v2, %v11156_v21  ;;  %v1824_v22 = vld [vmem:[#allocation17 + $0xe8] sm:$0xff] }
 0x46e   :  { %5349 = vmatpush.msra.mxu3 %v10912_v19  ;;  %v4168_v19 = vadd.f32 %v4167_v38, %v4114_v29  ;;  %v13073_v9 = vand.u32 4294901760, %v11150_v7  ;;  %v5451_v29 = vsub.f32 %v11159_v24, %v13072_v25  ;;  %v11183_v38 = vand.u32 4294901760, %v1828_v3  ;;  %5296 = vmatpush.msra.mxu2 %v5109_v41  ;;  %v4275_v41 = vpop.f32.mrf.mxu0 }
 0x46f   :  { %5210 = vmatpush.msra.mxu0 %v10999_v33  ;;  %5263 = vmatpush.msra.mxu1 %v11048_v12 }
 0x470   :  { %5351 = vmatpush.msra.mxu3 %v10921_v15  ;;  %v5445_v15 = vsub.f32 %v11150_v7, %v13073_v9  ;;  %v4207_v2 = vadd.f32 %v4206_v51, %v4168_v19  ;;  %v11196_v9 = vand.u32 4294901760, %v1824_v22  ;;  %5300 = vmatpush.msra.mxu2 %v5115_v23 }
 0x471   :  { %5213 = vmatpush.msra.mxu0 %v11019_v17  ;;  %5265 = vmatpush.msra.mxu1 %v11059_v5 }
 0x472   :  { %5353 = vmatpush.msra.mxu3 %v10932_v16  ;;  %v11186_v16 = vsub.f32 %v1832_v14, %v11167_v36  ;;  %v5446_v62 = vand.u32 4294901760, %v5445_v15  ;;  %v11208_v15 = vand.u32 4294901760, %v1820_v10  ;;  %v11211_v51 = vsub.f32 %v1824_v22, %v11196_v9  ;;  %5304 = vmatpush.msra.mxu2 %v5121_v59 }
 0x473   :  { %5216 = vmatpush.msra.mxu0 %v11022_v35  ;;  %5267 = vmatpush.msra.mxu1 %v11069_v6 }
 0x474   :  { %5355 = vmatpush.msra.mxu3 %v10941_v49  ;;  %v5462_v25 = vand.u32 4294901760, %v11186_v16  ;;  %v11201_v49 = vsub.f32 %v1828_v3, %v11183_v38  ;;  %v13075_v0 = vand.u32 4294901760, %v11211_v51  ;;  %v11222_v22 = vsub.f32 %v1820_v10, %v11208_v15  ;;  %5308 = vmatpush.msra.mxu2 %v5127_v56 }
 0x475   :  { %5219 = vmatpush.msra.mxu0 %v11035_v13  ;;  %5269 = vmatpush.msra.mxu1 %v11081_v20  ;;  %v13655_v56 = vand.u32 4294901760, %v10999_v33 }
 0x476   :  { %5357 = vmatpush.msra.mxu3 %v10949_v31  ;;  %v5463_v14 = vsub.f32 %v11186_v16, %v5462_v25  ;;  %v4276_v31 = vadd.f32 %v4275_v41, %v4207_v2  ;;  %v13074_v3 = vand.u32 4294901760, %v11201_v49  ;;  %v1812_v2 = vld [vmem:[#allocation17 + $0x88] sm:$0xff]  ;;  %v5475_v46 = vsub.f32 %v11211_v51, %v13075_v0 }
 0x477   :  { %5222 = vmatpush.msra.mxu0 %v11057_v45  ;;  %5429 = vmatpush.msrb.mxu1 %v5428_v26  ;;  %v5440_v26 = vand.u32 4294901760, %v5439_v55  ;;  %v5452_v55 = vand.u32 4294901760, %v5451_v29  ;;  %v1816_v29 = vld [vmem:[#allocation17 + $0xa8] sm:$0xff]  ;;  %v5480_v59 = vand.u32 4294901760, %v11222_v22  ;;  %v11235_v10 = vand.u32 4294901760, %v1812_v2 }
 0x478   :  { %5359 = vmatpush.msra.mxu3 %v10963_v48  ;;  %v11219_v23 = vand.u32 4294901760, %v1816_v29  ;;  %v5469_v48 = vsub.f32 %v11201_v49, %v13074_v3  ;;  %v5476_v3 = vand.u32 4294901760, %v5475_v46  ;;  %5312 = vmatpush.msra.mxu2 %v13655_v56 }
 0x479   :  { %5225 = vmatpush.msra.mxu0 %v11067_v32  ;;  %5435 = vmatpush.msrb.mxu1 %v5434_v42  ;;  %v5456_v42 = vand.u32 4294901760, %v11170_v40  ;;  %v5481_v50 = vsub.f32 %v11222_v22, %v5480_v59 }
 0x47a   :  { %5361 = vmatpush.msra.mxu3 %v10970_v47  ;;  %v11238_v47 = vsub.f32 %v1816_v29, %v11219_v23 }
 0x47b   :  { %5228 = vmatpush.msra.mxu0 %v11078_v28  ;;  %5441 = vmatpush.msrb.mxu1 %v5440_v26  ;;  %v5457_v26 = vsub.f32 %v11170_v40, %v5456_v42 }
 0x47c   :  { %5363 = vmatpush.msra.mxu3 %v10981_v30  ;;  %v5486_v0 = vand.u32 4294901760, %v11238_v47  ;;  %v11253_v30 = vsub.f32 %v1812_v2, %v11235_v10  ;;  %v1800_v2 = vld [vmem:[#allocation17 + $0x28] sm:$0xff] }
 0x47d   :  { %5231 = vmatpush.msra.mxu0 %v11090_v58  ;;  %5447 = vmatpush.msrb.mxu1 %v5446_v62  ;;  %v5458_v19 = vand.u32 4294901760, %v5457_v26  ;;  %v5464_v62 = vand.u32 4294901760, %v5463_v14  ;;  %v4353_v26 = vpop.f32.mrf.mxu2  ;;  %v1808_v14 = vld [vmem:[#allocation17 + $0x68] sm:$0xff]  ;;  %v11271_v56 = vand.u32 4294901760, %v1800_v2 }
 0x47e   :  { %v11248_v29 = vand.u32 4294901760, %v1808_v14  ;;  %5365 = vmatpush.msra.mxu3 %v11003_v57  ;;  %v5487_v33 = vsub.f32 %v11238_v47, %v5486_v0  ;;  %v5492_v57 = vand.u32 4294901760, %v11253_v30 }
 0x47f   :  { %5384 = vmatpush.msrb.mxu0 %v11101_v8  ;;  %5453 = vmatpush.msrb.mxu1 %v5452_v55  ;;  %v4312_v55 = vpop.f32.mrf.mxu1 }
 0x480   :  { %v4313_v41 = vadd.f32 %v4312_v55, %v4276_v31  ;;  %v13656_v55 = vand.u32 4294901760, %v11019_v17  ;;  %5367 = vmatpush.msra.mxu3 %v11005_v63  ;;  %v5493_v63 = vsub.f32 %v11253_v30, %v5492_v57 }
 0x481   :  { %5386 = vmatpush.msrb.mxu0 %v11112_v60  ;;  %5459 = vmatpush.msrb.mxu1 %v5458_v19  ;;  %v5470_v19 = vand.u32 4294901760, %v5469_v48  ;;  %v5482_v48 = vand.u32 4294901760, %v5481_v50  ;;  %v13657_v50 = vand.u32 4294901760, %v11022_v35 }
 0x482   :  { %v4354_v31 = vadd.f32 %v4353_v26, %v4313_v41  ;;  %5316 = vmatpush.msra.mxu2 %v13656_v55  ;;  %v11263_v26 = vsub.f32 %v1808_v14, %v11248_v29  ;;  %v4454_v41 = vpop.f32.mrf.mxu3  ;;  %5369 = vmatpush.msra.mxu3 %v11024_v39  ;;  %v5494_v39 = vand.u32 4294901760, %v5493_v63  ;;  %v13660_v63 = vand.u32 4294901760, %v11067_v32 }
 0x483   :  { %5388 = vmatpush.msrb.mxu0 %v11118_v27  ;;  %5465 = vmatpush.msrb.mxu1 %v5464_v62  ;;  %v1804_v62 = vld [vmem:[#allocation17 + $0x48] sm:$0xff] }
 0x484   :  { %v11260_v46 = vand.u32 4294901760, %v1804_v62  ;;  %5320 = vmatpush.msra.mxu2 %v13657_v50  ;;  %v13076_v17 = vand.u32 4294901760, %v11263_v26  ;;  %v4455_v55 = vadd.f32 %v4454_v41, %v4354_v31  ;;  %5371 = vmatpush.msra.mxu3 %v11048_v12  ;;  %v11292_v41 = vsub.f32 %v1800_v2, %v11271_v56 }
 0x485   :  { %5390 = vmatpush.msrb.mxu0 %v11131_v37  ;;  %5471 = vmatpush.msrb.mxu1 %v5470_v19  ;;  %v5488_v19 = vand.u32 4294901760, %v5487_v33  ;;  %v1796_v33 = vld [vmem:[#allocation17 + $0x8] sm:$0xff] }
 0x486   :  { %v11274_v14 = vsub.f32 %v1804_v62, %v11260_v46  ;;  %v5499_v35 = vsub.f32 %v11263_v26, %v13076_v17  ;;  %v11289_v31 = vand.u32 4294901760, %v1796_v33  ;;  %5373 = vmatpush.msra.mxu3 %v11059_v5  ;;  %v5510_v12 = vand.u32 4294901760, %v11292_v41 }
 0x487   :  { %5392 = vmatpush.msrb.mxu0 %v11145_v53  ;;  %5477 = vmatpush.msrb.mxu1 %v5476_v3  ;;  %v13658_v3 = vand.u32 4294901760, %v11035_v13 }
 0x488   :  { %v5504_v62 = vand.u32 4294901760, %v11274_v14  ;;  %v5500_v50 = vand.u32 4294901760, %v5499_v35  ;;  %v11303_v2 = vsub.f32 %v1796_v33, %v11289_v31  ;;  %5375 = vmatpush.msra.mxu3 %v11069_v6  ;;  %v13661_v35 = vand.u32 4294901760, %v11078_v28 }
 0x489   :  { %5394 = vmatpush.msrb.mxu0 %v11156_v21  ;;  %5483 = vmatpush.msrb.mxu1 %v5482_v48  ;;  %v4508_v48 = vpop.f32.mrf.mxu0 }
 0x48a   :  { %5324 = vmatpush.msra.mxu2 %v13658_v3  ;;  %v5505_v13 = vsub.f32 %v11274_v14, %v5504_v62  ;;  %v13659_v3 = vand.u32 4294901760, %v11057_v45  ;;  %v4509_v17 = vadd.f32 %v4508_v48, %v4455_v55  ;;  %v5511_v45 = vsub.f32 %v11292_v41, %v5510_v12  ;;  %v4547_v55 = vpop.f32.mrf.mxu1  ;;  %5377 = vmatpush.msra.mxu3 %v11081_v20 }
 0x48b   :  { %5396 = vmatpush.msrb.mxu0 %v11167_v36  ;;  %5489 = vmatpush.msrb.mxu1 %v5488_v19  ;;  %v5516_v5 = vand.u32 4294901760, %v11303_v2  ;;  %v13662_v48 = vand.u32 4294901760, %v11090_v58 }
 0x48c   :  { %5328 = vmatpush.msra.mxu2 %v13659_v3  ;;  %v5506_v19 = vand.u32 4294901760, %v5505_v13  ;;  %v4548_v33 = vadd.f32 %v4547_v55, %v4509_v17  ;;  %v5512_v32 = vand.u32 4294901760, %v5511_v45  ;;  %v4680_v55 = vperm.slane %v10902_v43, 1 }
 0x48d   :  { %5398 = vmatpush.msrb.mxu0 %v11183_v38  ;;  %5495 = vmatpush.msrb.mxu1 %v5494_v39  ;;  %v5517_v6 = vsub.f32 %v11303_v2, %v5516_v5 }
 0x48e   :  { %5332 = vmatpush.msra.mxu2 %v13660_v63 }
 0x48f   :  { %5400 = vmatpush.msrb.mxu0 %v11196_v9  ;;  %5501 = vmatpush.msrb.mxu1 %v5500_v50  ;;  %v5518_v28 = vand.u32 4294901760, %v5517_v6  ;;  %v4653_v50 = vpop.f32.mrf.mxu3 }
 0x490   :  { %5336 = vmatpush.msra.mxu2 %v13661_v35 }
 0x491   :  { %5402 = vmatpush.msrb.mxu0 %v11208_v15  ;;  %5507 = vmatpush.msrb.mxu1 %v5506_v19 }
 0x492   :  { %5340 = vmatpush.msra.mxu2 %v13662_v48 }
 0x493   :  { %5404 = vmatpush.msrb.mxu0 %v11219_v23  ;;  %v4616_v39 = vpop.f32.mrf.mxu2  ;;  %5513 = vmatpush.msrb.mxu1 %v5512_v32  ;;  %v4687_v32 = vperm.slane %v10904_v61, 1 }
 0x494   :  { %v4617_v13 = vadd.f32 %v4616_v39, %v4548_v33 }
 0x495   :  { %5406 = vmatpush.msrb.mxu0 %v11235_v10  ;;  %5519 = vmatpush.msrb.mxu1 %v5518_v28  ;;  %v13666_v28 = vand.u32 4294901760, %v11121_v54 }
 0x496   :  { %v4654_v17 = vadd.f32 %v4653_v50, %v4617_v13 }
 0x497   :  { %5408 = vmatpush.msrb.mxu0 %v11248_v29 }
 0x498   :  { %7666 = vrsqrt.f32 %v4654_v17  ;;  %vm4672_vm15 = vweird.f32 %v4654_v17 }
 0x499   :  { %5410 = vmatpush.msrb.mxu0 %v11260_v46 }
 0x49b   :  { %5412 = vmatpush.msrb.mxu0 %v11271_v56 }
 0x49d   :  { %5414 = vmatpush.msrb.mxu0 %v11289_v31 }
 0x49e   :  { %v7667_v20 = vpop.eup %7666 }
 0x49f   :  { %v4667_v58 = vmul.f32 %v7667_v20, %v4654_v17  ;;  %vm4673_vm14 = vweird.f32 %v7667_v20  ;;  %v13668_v17 = vand.u32 4294901760, %v11134_v4 }
 0x4a0   :  { %vm4674_vm0 = vmor %vm4672_vm15, %vm4673_vm14 }
 0x4a1   :  { %v4668_v3 = vmul.f32 %v7667_v20, %v4667_v58 }
 0x4a3   :  { %v4669_v19 = vmul.f32 0.5, %v4668_v3  ;;  %v1900_v3 = vld [vmem:[#allocation17 + $0x348] sm:$0xff] }
 0x4a5   :  { %v4670_v63 = vsub.f32 1.5, %v4669_v19  ;;  %v11428_v19 = vand.u32 4294901760, %v1900_v3 }
 0x4a7   :  { %v4671_v45 = vmul.f32 %v7667_v20, %v4670_v63 }
 0x4a9   :  { %v4675_v35 = vsel %vm4674_vm0, %v7667_v20, %v4671_v45  ;;  %v13669_v20 = vand.u32 4294901760, %v11150_v7  ;;  %v13673_v45 = vand.u32 4294901760, %v11263_v26 }
 0x4aa   :  { %v4677_v33 = vmul.f32 %v4675_v35, %v10465_v44  ;;  %v13665_v44 = vand.u32 4294901760, %v11110_v1  ;;  %v1888_v35 = vld [vmem:[#allocation17 + $0x2e8] sm:$0xff] }
 0x4ac   :  { %v4684_v6 = vmul.f32 %v4680_v55, %v4677_v33 }
 0x4ae   :  { %v4691_v39 = vadd.f32 %v4687_v32, %v4684_v6 }
 0x4b0   :  { %v11330_v48 = vand.u32 4294901760, %v4691_v39 }
 0x4b2   :  { %v11333_v13 = vsub.f32 %v4691_v39, %v11330_v48  ;;  %5180 = vmatmul.f32.vlgmr.msrb.gmra.mxu3 %v11330_v48  ;;  %v11470_v39 = vand.u32 4294901760, %v1888_v35 }
 0x4b3   :  { %5580 = vmatpush.msrb.mxu3 %v11101_v8 }
 0x4b4   :  { %13663 = vst [vmem:[#allocation212_spill] sm:$0xff] %v11333_v13  ;;  %5234 = vmatmul.f32.vlgmr.msra.gmra.mxu0 %v11333_v13  ;;  %v11339_v43 = vand.u32 4294901760, %v11333_v13 }
 0x4b5   :  { %5582 = vmatpush.msrb.mxu3 %v11112_v60  ;;  %5621 = vmatpush.msra.mxu0 %v13665_v44 }
 0x4b6   :  { %13664 = vst [vmem:[#allocation213_spill] sm:$0xff] %v11339_v43  ;;  %5273 = vmatmul.f32.vlgmr.msra.gmra.mxu1 %v11339_v43  ;;  %v5077_v61 = vsub.f32 %v11333_v13, %v11339_v43 }
 0x4b7   :  { %5584 = vmatpush.msrb.mxu3 %v11118_v27  ;;  %5625 = vmatpush.msra.mxu0 %v13666_v28 }
 0x4b8   :  { %5688 = vmatpush.msra.mxu1 %v11101_v8  ;;  %v11351_v50 = vand.u32 4294901760, %v5077_v61  ;;  %v13670_v8 = vand.u32 4294901760, %v11159_v24  ;;  %v1880_v61 = vld [vmem:[#allocation17 + $0x2a8] sm:$0xff] }
 0x4b9   :  { %5586 = vmatpush.msrb.mxu3 %v11131_v37  ;;  %5629 = vmatpush.msra.mxu0 %v13668_v17 }
 0x4ba   :  { %13667 = vst [vmem:[#allocation215_spill] sm:$0xff] %v11351_v50  ;;  %5690 = vmatpush.msra.mxu1 %v11112_v60  ;;  %5079 = vmatmul.f32.vlgmr.msrb.gmra.mxu2 %v11351_v50  ;;  %v1920_v60 = vld [vmem:[#allocation17 + $0x3e8] sm:$0xff] }
 0x4bb   :  { %5379 = vmatmul.f32.vlgmr.msra.gmra.mxu3 %v11330_v48  ;;  %5527 = vmatpush.msrb.mxu2 %v11110_v1  ;;  %v11377_v1 = vand.u32 4294901760, %v1920_v60 }
 0x4bc   :  { %5588 = vmatpush.msrb.mxu3 %v11145_v53  ;;  %5633 = vmatpush.msra.mxu0 %v13669_v20  ;;  %v1876_v20 = vld [vmem:[#allocation17 + $0x288] sm:$0xff] }
 0x4bd   :  { %5692 = vmatpush.msra.mxu1 %v11118_v27  ;;  %5420 = vmatmul.f32.vlgmr.msrb.gmra.mxu0 %v11007_v34  ;;  %v1916_v27 = vld [vmem:[#allocation17 + $0x3c8] sm:$0xff] }
 0x4be   :  { %5530 = vmatpush.msrb.mxu2 %v11121_v54  ;;  %5590 = vmatpush.msrb.mxu3 %v11156_v21  ;;  %v11384_v54 = vand.u32 4294901760, %v1916_v27 }
 0x4bf   :  { %5637 = vmatpush.msra.mxu0 %v13670_v8  ;;  %5694 = vmatpush.msra.mxu1 %v11131_v37  ;;  %v1912_v37 = vld [vmem:[#allocation17 + $0x3a8] sm:$0xff]  ;;  %v11497_v8 = vand.u32 4294901760, %v1880_v61 }
 0x4c0   :  { %5521 = vmatmul.f32.vlgmr.msrb.gmra.mxu1 %v10944_v18  ;;  %5533 = vmatpush.msrb.mxu2 %v11134_v4  ;;  %v1908_v4 = vld [vmem:[#allocation17 + $0x388] sm:$0xff] }
 0x4c1   :  { %5592 = vmatpush.msrb.mxu3 %v11167_v36  ;;  %5641 = vmatpush.msra.mxu0 %v5456_v42  ;;  %v11402_v42 = vsub.f32 %v1916_v27, %v11384_v54  ;;  %v11404_v58 = vand.u32 4294901760, %v1908_v4  ;;  %v1872_v27 = vld [vmem:[#allocation17 + $0x268] sm:$0xff] }
 0x4c2   :  { %5696 = vmatpush.msra.mxu1 %v11145_v53  ;;  %5536 = vmatpush.msrb.mxu2 %v11150_v7  ;;  %v13671_v53 = vand.u32 4294901760, %v11201_v49  ;;  %v11392_v7 = vsub.f32 %v1920_v60, %v11377_v1 }
 0x4c3   :  { %5594 = vmatpush.msrb.mxu3 %v11183_v38  ;;  %5645 = vmatpush.msra.mxu0 %v5462_v25  ;;  %v11394_v25 = vand.u32 4294901760, %v1912_v37 }
 0x4c4   :  { %5698 = vmatpush.msra.mxu1 %v11156_v21  ;;  %5342 = vmatmul.f32.vlgmr.msra.gmra.mxu2 %v11330_v48  ;;  %v1904_v21 = vld [vmem:[#allocation17 + $0x368] sm:$0xff] }
 0x4c5   :  { %5539 = vmatpush.msrb.mxu2 %v11159_v24  ;;  %5596 = vmatpush.msrb.mxu3 %v11196_v9  ;;  %v13672_v24 = vand.u32 4294901760, %v11211_v51 }
 0x4c6   :  { %5649 = vmatpush.msra.mxu0 %v13671_v53  ;;  %5700 = vmatpush.msra.mxu1 %v11167_v36  ;;  %v13093_v36 = vand.u32 4294901760, %v11392_v7 }
 0x4c7   :  { %5542 = vmatpush.msrb.mxu2 %v11170_v40  ;;  %5598 = vmatpush.msrb.mxu3 %v11208_v15  ;;  %v11413_v40 = vsub.f32 %v1912_v37, %v11394_v25 }
 0x4c8   :  { %5653 = vmatpush.msra.mxu0 %v13672_v24  ;;  %5702 = vmatpush.msra.mxu1 %v11183_v38  ;;  %v11415_v38 = vand.u32 4294901760, %v1904_v21  ;;  %v11519_v24 = vsub.f32 %v1880_v61, %v11497_v8 }
 0x4c9   :  { %5545 = vmatpush.msrb.mxu2 %v11186_v16  ;;  %5600 = vmatpush.msrb.mxu3 %v11219_v23  ;;  %v1896_v16 = vld [vmem:[#allocation17 + $0x328] sm:$0xff] }
 0x4ca   :  { %5657 = vmatpush.msra.mxu0 %v5480_v59  ;;  %5704 = vmatpush.msra.mxu1 %v11196_v9  ;;  %v13092_v9 = vand.u32 4294901760, %v11402_v42  ;;  %v11424_v59 = vsub.f32 %v1908_v4, %v11404_v58  ;;  %v11438_v63 = vsub.f32 %v1904_v21, %v11415_v38  ;;  %v11509_v4 = vand.u32 4294901760, %v1876_v20 }
 0x4cb   :  { %5548 = vmatpush.msrb.mxu2 %v11201_v49  ;;  %5602 = vmatpush.msrb.mxu3 %v11235_v10  ;;  %v1892_v49 = vld [vmem:[#allocation17 + $0x308] sm:$0xff] }
 0x4cc   :  { %5661 = vmatpush.msra.mxu0 %v5486_v0  ;;  %5706 = vmatpush.msra.mxu1 %v11208_v15  ;;  %v5768_v15 = vsub.f32 %v11392_v7, %v13093_v36  ;;  %v13090_v0 = vand.u32 4294901760, %v11413_v40  ;;  %v11451_v55 = vand.u32 4294901760, %v1892_v49  ;;  %v13088_v32 = vand.u32 4294901760, %v11438_v63 }
 0x4cd   :  { %5551 = vmatpush.msrb.mxu2 %v11211_v51  ;;  %5604 = vmatpush.msrb.mxu3 %v11248_v29  ;;  %v11440_v51 = vand.u32 4294901760, %v1896_v16 }
 0x4ce   :  { %5665 = vmatpush.msra.mxu0 %v5492_v57  ;;  %5708 = vmatpush.msra.mxu1 %v11219_v23  ;;  %v5774_v23 = vsub.f32 %v11402_v42, %v13092_v9  ;;  %v13089_v57 = vand.u32 4294901760, %v11424_v59  ;;  %v5780_v33 = vsub.f32 %v11413_v40, %v13090_v0  ;;  %v11479_v44 = vsub.f32 %v1892_v49, %v11451_v55  ;;  %v1864_v49 = vld [vmem:[#allocation17 + $0x228] sm:$0xff] }
 0x4cf   :  { %5554 = vmatpush.msrb.mxu2 %v11222_v22  ;;  %5606 = vmatpush.msrb.mxu3 %v11260_v46  ;;  %v11456_v22 = vsub.f32 %v1900_v3, %v11428_v19  ;;  %v11466_v6 = vsub.f32 %v1896_v16, %v11440_v51  ;;  %v11521_v3 = vand.u32 4294901760, %v1872_v27 }
 0x4d0   :  { %5669 = vmatpush.msra.mxu0 %v13673_v45  ;;  %5710 = vmatpush.msra.mxu1 %v11235_v10  ;;  %v5769_v10 = vand.u32 4294901760, %v5768_v15  ;;  %v13085_v60 = vand.u32 4294901760, %v11479_v44 }
 0x4d1   :  { %5557 = vmatpush.msrb.mxu2 %v11238_v47  ;;  %5608 = vmatpush.msrb.mxu3 %v11271_v56  ;;  %v1884_v47 = vld [vmem:[#allocation17 + $0x2c8] sm:$0xff]  ;;  %v13086_v17 = vand.u32 4294901760, %v11466_v6 }
 0x4d2   :  { %5673 = vmatpush.msra.mxu0 %v5504_v62  ;;  %5712 = vmatpush.msra.mxu1 %v11248_v29  ;;  %v5775_v29 = vand.u32 4294901760, %v5774_v23  ;;  %v5786_v62 = vsub.f32 %v11424_v59, %v13089_v57  ;;  %v11484_v28 = vand.u32 4294901760, %v1884_v47  ;;  %v5810_v16 = vsub.f32 %v11479_v44, %v13085_v60 }
 0x4d3   :  { %5560 = vmatpush.msrb.mxu2 %v11253_v30  ;;  %5610 = vmatpush.msrb.mxu3 %v11289_v31  ;;  %v13087_v30 = vand.u32 4294901760, %v11456_v22  ;;  %v5804_v21 = vsub.f32 %v11466_v6, %v13086_v17  ;;  %v11531_v23 = vsub.f32 %v1876_v20, %v11509_v4 }
 0x4d4   :  { %5677 = vmatpush.msra.mxu0 %v5510_v12  ;;  %5714 = vmatpush.msra.mxu1 %v11260_v46  ;;  %v5781_v46 = vand.u32 4294901760, %v5780_v33  ;;  %v5792_v12 = vsub.f32 %v11438_v63, %v13088_v32  ;;  %v11507_v37 = vsub.f32 %v1884_v47, %v11484_v28  ;;  %v13079_v47 = vand.u32 4294901760, %v11519_v24  ;;  %v1829_v32 = vld [vmem:[#allocation17 + $0x110] sm:$0xff] }
 0x4d5   :  { %5614 = vmatmul.f32.vlgmr.msrb.gmra.mxu3 %v10975_v52  ;;  %5563 = vmatpush.msrb.mxu2 %v11263_v26  ;;  %v11495_v26 = vsub.f32 %v1888_v35, %v11470_v39  ;;  %v11665_v9 = vand.u32 4294901760, %v1829_v32 }
 0x4d6   :  { %5770 = vmatpush.msra.mxu3 %v5769_v10  ;;  %5681 = vmatpush.msra.mxu0 %v5516_v5  ;;  %v5787_v5 = vand.u32 4294901760, %v5786_v62  ;;  %v5793_v53 = vand.u32 4294901760, %v5792_v12  ;;  %v13081_v45 = vand.u32 4294901760, %v11507_v37  ;;  %v1860_v10 = vld [vmem:[#allocation17 + $0x208] sm:$0xff]  ;;  %v11545_v62 = vand.u32 4294901760, %v1864_v49 }
 0x4d7   :  { %5716 = vmatpush.msra.mxu1 %v11271_v56  ;;  %5683 = vmatmul.f32.vlgmr.msra.gmra.mxu0 %v10944_v18  ;;  %v5798_v56 = vsub.f32 %v11456_v22, %v13087_v30  ;;  %v11557_v20 = vand.u32 4294901760, %v1860_v10  ;;  %v1833_v30 = vld [vmem:[#allocation17 + $0x130] sm:$0xff] }
 0x4d8   :  { %5776 = vmatpush.msra.mxu3 %v5775_v29  ;;  %5868 = vmatpush.msrb.mxu0 %v11392_v7  ;;  %v11543_v29 = vsub.f32 %v1872_v27, %v11521_v3  ;;  %v5822_v61 = vsub.f32 %v11507_v37, %v13081_v45  ;;  %v5828_v27 = vsub.f32 %v11519_v24, %v13079_v47  ;;  %v1849_v47 = vld [vmem:[#allocation17 + $0x1b0] sm:$0xff]  ;;  %v11652_v0 = vand.u32 4294901760, %v1833_v30 }
 0x4d9   :  { %5566 = vmatpush.msrb.mxu2 %v11274_v14  ;;  %5718 = vmatpush.msra.mxu1 %v11289_v31  ;;  %v1868_v14 = vld [vmem:[#allocation17 + $0x248] sm:$0xff]  ;;  %v13083_v31 = vand.u32 4294901760, %v11495_v26  ;;  %v5799_v15 = vand.u32 4294901760, %v5798_v56  ;;  %v1845_v45 = vld [vmem:[#allocation17 + $0x190] sm:$0xff] }
 0x4da   :  { %5720 = vmatmul.f32.vlgmr.msra.gmra.mxu1 %v10944_v18  ;;  %5782 = vmatpush.msra.mxu3 %v5781_v46  ;;  %v11533_v35 = vand.u32 4294901760, %v1868_v14  ;;  %v13077_v46 = vand.u32 4294901760, %v11531_v23  ;;  %v13078_v56 = vand.u32 4294901760, %v11543_v29 }
 0x4db   :  { %5871 = vmatpush.msrb.mxu0 %v11402_v42  ;;  %5921 = vmatpush.msrb.mxu1 %v11377_v1  ;;  %v5816_v33 = vsub.f32 %v11495_v26, %v13083_v31  ;;  %v1841_v31 = vld [vmem:[#allocation17 + $0x170] sm:$0xff] }
 0x4dc   :  { %5569 = vmatpush.msrb.mxu2 %v11292_v41  ;;  %5788 = vmatpush.msra.mxu3 %v5787_v5  ;;  %v5805_v41 = vand.u32 4294901760, %v5804_v21  ;;  %v11555_v12 = vsub.f32 %v1868_v14, %v11533_v35  ;;  %v5823_v21 = vand.u32 4294901760, %v5822_v61  ;;  %v5834_v14 = vsub.f32 %v11531_v23, %v13077_v46 }
 0x4dd   :  { %5874 = vmatpush.msrb.mxu0 %v11413_v40  ;;  %5923 = vmatpush.msrb.mxu1 %v11384_v54  ;;  %v5817_v5 = vand.u32 4294901760, %v5816_v33  ;;  %v5840_v33 = vsub.f32 %v11543_v29, %v13078_v56 }
 0x4de   :  { %5572 = vmatpush.msrb.mxu2 %v11303_v2  ;;  %5794 = vmatpush.msra.mxu3 %v5793_v53  ;;  %v5811_v2 = vand.u32 4294901760, %v5810_v16  ;;  %v11567_v53 = vsub.f32 %v1864_v49, %v11545_v62  ;;  %v13080_v16 = vand.u32 4294901760, %v11555_v12  ;;  %v1857_v49 = vld [vmem:[#allocation17 + $0x1f0] sm:$0xff]  ;;  %v5835_v61 = vand.u32 4294901760, %v5834_v14 }
 0x4df   :  { %5575 = vmatmul.f32.vlgmr.msrb.gmra.mxu2 %v10957_v11  ;;  %5877 = vmatpush.msrb.mxu0 %v11424_v59  ;;  %v11593_v46 = vand.u32 4294901760, %v1857_v49  ;;  %v5841_v56 = vand.u32 4294901760, %v5840_v33 }
 0x4e0   :  { %5725 = vmatpush.msra.mxu2 %v11377_v1  ;;  %5925 = vmatpush.msrb.mxu1 %v11394_v25 }
 0x4e1   :  { %5800 = vmatpush.msra.mxu3 %v5799_v15  ;;  %5880 = vmatpush.msrb.mxu0 %v11438_v63  ;;  %v11577_v15 = vsub.f32 %v1860_v10, %v11557_v20  ;;  %v1853_v10 = vld [vmem:[#allocation17 + $0x1d0] sm:$0xff]  ;;  %v11610_v33 = vsub.f32 %v1857_v49, %v11593_v46  ;;  %v11622_v49 = vand.u32 4294901760, %v1845_v45 }
 0x4e2   :  { %5727 = vmatpush.msra.mxu2 %v11384_v54  ;;  %5927 = vmatpush.msrb.mxu1 %v11404_v58  ;;  %v11601_v14 = vand.u32 4294901760, %v1853_v10 }
 0x4e3   :  { %5806 = vmatpush.msra.mxu3 %v5805_v41  ;;  %5883 = vmatpush.msrb.mxu0 %v11456_v22  ;;  %13674 = vst [vmem:[#allocation222_spill] sm:$0xff] %v11577_v15  ;;  %v5829_v41 = vand.u32 4294901760, %v5828_v27  ;;  %v13084_v27 = vand.u32 4294901760, %v11577_v15  ;;  %v13091_v17 = vand.u32 4294901760, %v11610_v33 }
 0x4e4   :  { %5729 = vmatpush.msra.mxu2 %v11394_v25  ;;  %5929 = vmatpush.msrb.mxu1 %v11415_v38 }
 0x4e5   :  { %5812 = vmatpush.msra.mxu3 %v5811_v2  ;;  %5886 = vmatpush.msrb.mxu0 %v11466_v6  ;;  %v13082_v2 = vand.u32 4294901760, %v11567_v53 }
 0x4e6   :  { %5731 = vmatpush.msra.mxu2 %v11404_v58  ;;  %5931 = vmatpush.msrb.mxu1 %v11428_v19 }
 0x4e7   :  { %5818 = vmatpush.msra.mxu3 %v5817_v5  ;;  %5889 = vmatpush.msrb.mxu0 %v11479_v44  ;;  %v5846_v5 = vsub.f32 %v11555_v12, %v13080_v16 }
 0x4e8   :  { %5733 = vmatpush.msra.mxu2 %v11415_v38  ;;  %5933 = vmatpush.msrb.mxu1 %v11440_v51 }
 0x4e9   :  { %5824 = vmatpush.msra.mxu3 %v5823_v21  ;;  %5892 = vmatpush.msrb.mxu0 %v11495_v26  ;;  %v5852_v21 = vsub.f32 %v11567_v53, %v13082_v2  ;;  %v5847_v16 = vand.u32 4294901760, %v5846_v5  ;;  %v11614_v2 = vand.u32 4294901760, %v1849_v47  ;;  %v11618_v5 = vsub.f32 %v1853_v10, %v11601_v14 }
 0x4ea   :  { %5735 = vmatpush.msra.mxu2 %v11428_v19  ;;  %5935 = vmatpush.msrb.mxu1 %v11451_v55 }
 0x4eb   :  { %5830 = vmatpush.msra.mxu3 %v5829_v41  ;;  %5895 = vmatpush.msrb.mxu0 %v11507_v37  ;;  %v5858_v41 = vsub.f32 %v11577_v15, %v13084_v27  ;;  %v1837_v27 = vld [vmem:[#allocation17 + $0x150] sm:$0xff]  ;;  %v11631_v10 = vsub.f32 %v1849_v47, %v11614_v2  ;;  %v6109_v47 = vsub.f32 %v11610_v33, %v13091_v17 }
 0x4ec   :  { %5737 = vmatpush.msra.mxu2 %v11440_v51  ;;  %5937 = vmatpush.msrb.mxu1 %v11470_v39  ;;  %v11676_v17 = vsub.f32 %v1833_v30, %v11652_v0  ;;  %v11689_v30 = vsub.f32 %v1829_v32, %v11665_v9 }
 0x4ed   :  { %5836 = vmatpush.msra.mxu3 %v5835_v61  ;;  %5898 = vmatpush.msrb.mxu0 %v11519_v24  ;;  %v5853_v61 = vand.u32 4294901760, %v5852_v21  ;;  %v5859_v60 = vand.u32 4294901760, %v5858_v41  ;;  %v13094_v21 = vand.u32 4294901760, %v11618_v5  ;;  %v11640_v41 = vsub.f32 %v1845_v45, %v11622_v49  ;;  %v1825_v45 = vld [vmem:[#allocation17 + $0xf0] sm:$0xff] }
 0x4ee   :  { %5739 = vmatpush.msra.mxu2 %v11451_v55  ;;  %5939 = vmatpush.msrb.mxu1 %v11484_v28  ;;  %v6110_v36 = vand.u32 4294901760, %v6109_v47  ;;  %v11678_v11 = vand.u32 4294901760, %v1825_v45 }
 0x4ef   :  { %5842 = vmatpush.msra.mxu3 %v5841_v56  ;;  %5901 = vmatpush.msrb.mxu0 %v11531_v23  ;;  %v11626_v56 = vand.u32 4294901760, %v1841_v31  ;;  %13675 = vst [vmem:[#allocation176_spill] sm:$0xff] %v11640_v41 }
 0x4f0   :  { %5741 = vmatpush.msra.mxu2 %v11470_v39  ;;  %5941 = vmatpush.msrb.mxu1 %v11497_v8  ;;  %v11701_v32 = vsub.f32 %v1825_v45, %v11678_v11 }
 0x4f1   :  { %5848 = vmatpush.msra.mxu3 %v5847_v16  ;;  %5904 = vmatpush.msrb.mxu0 %v11543_v29  ;;  %v11635_v16 = vand.u32 4294901760, %v1837_v27 }
 0x4f2   :  { %5743 = vmatpush.msra.mxu2 %v11484_v28  ;;  %5943 = vmatpush.msrb.mxu1 %v11509_v4 }
 0x4f3   :  { %5854 = vmatpush.msra.mxu3 %v5853_v61  ;;  %5907 = vmatpush.msrb.mxu0 %v11555_v12  ;;  %v11647_v61 = vsub.f32 %v1841_v31, %v11626_v56  ;;  %v11660_v31 = vsub.f32 %v1837_v27, %v11635_v16 }
 0x4f4   :  { %5745 = vmatpush.msra.mxu2 %v11497_v8  ;;  %5945 = vmatpush.msrb.mxu1 %v11521_v3 }
 0x4f5   :  { %5860 = vmatpush.msra.mxu3 %v5859_v60  ;;  %5910 = vmatpush.msrb.mxu0 %v11567_v53  ;;  %13676 = vst [vmem:[#allocation36_spill] sm:$0xff] %v11647_v61  ;;  %v6115_v60 = vsub.f32 %v11618_v5, %v13094_v21  ;;  %v1821_v21 = vld [vmem:[#allocation17 + $0xd0] sm:$0xff] }
 0x4f6   :  { %5747 = vmatpush.msra.mxu2 %v11509_v4  ;;  %5947 = vmatpush.msrb.mxu1 %v11533_v35  ;;  %13677 = vst [vmem:[#allocation40_spill] sm:$0xff] %v11660_v31  ;;  %v11691_v52 = vand.u32 4294901760, %v1821_v21 }
 0x4f7   :  { %5862 = vmatmul.f32.vlgmr.msra.gmra.mxu3 %v11330_v48  ;;  %5913 = vmatpush.msrb.mxu0 %v11577_v15  ;;  %v6116_v47 = vand.u32 4294901760, %v6115_v60  ;;  %v13680_v60 = vand.u32 4294901760, %v11647_v61  ;;  %v1813_v15 = vld [vmem:[#allocation17 + $0x90] sm:$0xff] }
 0x4f8   :  { %6029 = vmatpush.msrb.mxu3 %v11377_v1  ;;  %5749 = vmatpush.msra.mxu2 %v11521_v3  ;;  %v13678_v1 = vand.u32 4294901760, %v11631_v10  ;;  %v11713_v45 = vsub.f32 %v1821_v21, %v11691_v52 }
 0x4f9   :  { %5949 = vmatpush.msrb.mxu1 %v11545_v62  ;;  %5916 = vmatmul.f32.vlgmr.msrb.gmra.mxu0 %v11333_v13  ;;  %v1817_v13 = vld [vmem:[#allocation17 + $0xb0] sm:$0xff]  ;;  %v6133_v57 = vsub.f32 %v11647_v61, %v13680_v60 }
 0x4fa   :  { %6031 = vmatpush.msrb.mxu3 %v11384_v54  ;;  %6066 = vmatpush.msra.mxu0 %v11593_v46  ;;  %v6121_v27 = vsub.f32 %v11631_v10, %v13678_v1  ;;  %v13679_v54 = vand.u32 4294901760, %v11640_v41  ;;  %v1809_v61 = vld [vmem:[#allocation17 + $0x70] sm:$0xff] }
 0x4fb   :  { %5751 = vmatpush.msra.mxu2 %v11533_v35  ;;  %5951 = vmatpush.msrb.mxu1 %v11557_v20 }
 0x4fc   :  { %5955 = vmatmul.f32.vlgmr.msrb.gmra.mxu1 %v11339_v43  ;;  %6033 = vmatpush.msrb.mxu3 %v11394_v25  ;;  %v6127_v1 = vsub.f32 %v11640_v41, %v13679_v54  ;;  %v6122_v25 = vand.u32 4294901760, %v6121_v27  ;;  %v11703_v43 = vand.u32 4294901760, %v1817_v13  ;;  %v11715_v54 = vand.u32 4294901760, %v1813_v15  ;;  %v1805_v41 = vld [vmem:[#allocation17 + $0x50] sm:$0xff] }
 0x4fd   :  { %6068 = vmatpush.msra.mxu0 %v11601_v14  ;;  %6111 = vmatpush.msra.mxu1 %v6110_v36  ;;  %v13681_v36 = vand.u32 4294901760, %v11660_v31  ;;  %v11741_v27 = vand.u32 4294901760, %v1805_v41 }
 0x4fe   :  { %5753 = vmatpush.msra.mxu2 %v11545_v62  ;;  %6035 = vmatpush.msrb.mxu3 %v11404_v58  ;;  %v6128_v58 = vand.u32 4294901760, %v6127_v1  ;;  %v11726_v21 = vsub.f32 %v1817_v13, %v11703_v43  ;;  %v11739_v13 = vsub.f32 %v1813_v15, %v11715_v54 }
 0x4ff   :  { %6070 = vmatpush.msra.mxu0 %v11614_v2  ;;  %6117 = vmatpush.msra.mxu1 %v6116_v47  ;;  %v6139_v60 = vsub.f32 %v11660_v31, %v13681_v36  ;;  %v6134_v47 = vand.u32 4294901760, %v6133_v57  ;;  %v13682_v36 = vand.u32 4294901760, %v11392_v7  ;;  %v11728_v31 = vand.u32 4294901760, %v1809_v61 }
 0x500   :  { %5755 = vmatpush.msra.mxu2 %v11557_v20  ;;  %6037 = vmatpush.msrb.mxu3 %v11415_v38  ;;  %v13683_v38 = vand.u32 4294901760, %v11676_v17  ;;  %v13684_v7 = vand.u32 4294901760, %v11402_v42  ;;  %v13686_v42 = vand.u32 4294901760, %v11413_v40  ;;  %v13688_v40 = vand.u32 4294901760, %v11424_v59 }
 0x501   :  { %5761 = vmatmul.f32.vlgmr.msra.gmra.mxu2 %v11351_v50  ;;  %6072 = vmatpush.msra.mxu0 %v11622_v49  ;;  %v6140_v57 = vand.u32 4294901760, %v6139_v60  ;;  %v1801_v50 = vld [vmem:[#allocation17 + $0x30] sm:$0xff]  ;;  %v13687_v60 = vand.u32 4294901760, %v11701_v32  ;;  %v11752_v15 = vsub.f32 %v1809_v61, %v11728_v31  ;;  %v11765_v61 = vsub.f32 %v1805_v41, %v11741_v27 }
 0x502   :  { %5962 = vmatpush.msrb.mxu2 %v13682_v36  ;;  %6123 = vmatpush.msra.mxu1 %v6122_v25  ;;  %v6145_v1 = vsub.f32 %v11676_v17, %v13683_v38  ;;  %v13685_v25 = vand.u32 4294901760, %v11689_v30  ;;  %v6162_v38 = vand.u32 4294901760, %v11713_v45  ;;  %v13689_v59 = vand.u32 4294901760, %v11438_v63 }
 0x503   :  { %6039 = vmatpush.msrb.mxu3 %v11428_v19  ;;  %6074 = vmatpush.msra.mxu0 %v11626_v56  ;;  %v13690_v41 = vand.u32 4294901760, %v11456_v22 }
 0x504   :  { %5966 = vmatpush.msrb.mxu2 %v13684_v7  ;;  %6129 = vmatpush.msra.mxu1 %v6128_v58  ;;  %v6151_v36 = vsub.f32 %v11689_v30, %v13685_v25  ;;  %v6146_v19 = vand.u32 4294901760, %v6145_v1  ;;  %v6157_v58 = vsub.f32 %v11701_v32, %v13687_v60  ;;  %v6168_v7 = vand.u32 4294901760, %v11726_v21  ;;  %v1797_v25 = vld [vmem:[#allocation17 + $0x10] sm:$0xff] }
 0x505   :  { %6041 = vmatpush.msrb.mxu3 %v11440_v51  ;;  %6076 = vmatpush.msra.mxu0 %v11635_v16  ;;  %v11756_v51 = vand.u32 4294901760, %v1801_v50  ;;  %v6163_v1 = vsub.f32 %v11713_v45, %v6162_v38  ;;  %v6180_v60 = vand.u32 4294901760, %v11752_v15 }
 0x506   :  { %5970 = vmatpush.msrb.mxu2 %v13686_v42  ;;  %6135 = vmatpush.msra.mxu1 %v6134_v47  ;;  %v6152_v47 = vand.u32 4294901760, %v6151_v36  ;;  %v6174_v42 = vand.u32 4294901760, %v11739_v13  ;;  %v6169_v36 = vsub.f32 %v11726_v21, %v6168_v7 }
 0x507   :  { %6043 = vmatpush.msrb.mxu3 %v11451_v55  ;;  %6078 = vmatpush.msra.mxu0 %v11652_v0  ;;  %v11769_v55 = vand.u32 4294901760, %v1797_v25  ;;  %v6164_v63 = vand.u32 4294901760, %v6163_v1 }
 0x508   :  { %5974 = vmatpush.msrb.mxu2 %v13688_v40  ;;  %6141 = vmatpush.msra.mxu1 %v6140_v57  ;;  %v6158_v57 = vand.u32 4294901760, %v6157_v58  ;;  %v6186_v58 = vand.u32 4294901760, %v11765_v61  ;;  %v6170_v22 = vand.u32 4294901760, %v6169_v36  ;;  %v6181_v40 = vsub.f32 %v11752_v15, %v6180_v60 }
 0x509   :  { %6045 = vmatpush.msrb.mxu3 %v11470_v39  ;;  %6080 = vmatpush.msra.mxu0 %v11665_v9  ;;  %v11780_v39 = vsub.f32 %v1801_v50, %v11756_v51  ;;  %v13691_v50 = vand.u32 4294901760, %v11466_v6  ;;  %v13696_v36 = vand.u32 4294901760, %v11531_v23  ;;  %v13699_v23 = vand.u32 4294901760, %v11555_v12 }
 0x50a   :  { %5978 = vmatpush.msrb.mxu2 %v13689_v59  ;;  %6147 = vmatpush.msra.mxu1 %v6146_v19  ;;  %v6175_v19 = vsub.f32 %v11739_v13, %v6174_v42  ;;  %v6187_v6 = vsub.f32 %v11765_v61, %v6186_v58  ;;  %v6182_v59 = vand.u32 4294901760, %v6181_v40  ;;  %v13702_v12 = vand.u32 4294901760, %v11631_v10 }
 0x50b   :  { %6047 = vmatpush.msrb.mxu3 %v11484_v28  ;;  %6082 = vmatpush.msra.mxu0 %v11678_v11  ;;  %v11791_v28 = vsub.f32 %v1797_v25, %v11769_v55 }
 0x50c   :  { %5982 = vmatpush.msrb.mxu2 %v13690_v41  ;;  %6153 = vmatpush.msra.mxu1 %v6152_v47  ;;  %v13692_v47 = vand.u32 4294901760, %v11479_v44  ;;  %v6176_v25 = vand.u32 4294901760, %v6175_v19  ;;  %v13700_v41 = vand.u32 4294901760, %v11618_v5  ;;  %v13703_v19 = vld [vmem:[#allocation222_spill] sm:$0xff] }
 0x50d   :  { %6049 = vmatpush.msrb.mxu3 %v11497_v8  ;;  %6084 = vmatpush.msra.mxu0 %v11691_v52  ;;  %v6192_v8 = vand.u32 4294901760, %v11780_v39  ;;  %v6198_v1 = vand.u32 4294901760, %v11791_v28 }
 0x50e   :  { %5986 = vmatpush.msrb.mxu2 %v13691_v50  ;;  %6159 = vmatpush.msra.mxu1 %v6158_v57  ;;  %v13694_v57 = vand.u32 4294901760, %v11507_v37  ;;  %v13704_v50 = vand.u32 4294901760, %v13703_v19 }
 0x50f   :  { %6051 = vmatpush.msrb.mxu3 %v11509_v4  ;;  %6086 = vmatpush.msra.mxu0 %v11703_v43  ;;  %v13693_v4 = vand.u32 4294901760, %v11495_v26  ;;  %v6193_v44 = vsub.f32 %v11780_v39, %v6192_v8  ;;  %v6199_v26 = vsub.f32 %v11791_v28, %v6198_v1 }
 0x510   :  { %5990 = vmatpush.msrb.mxu2 %v13692_v47  ;;  %6165 = vmatpush.msra.mxu1 %v6164_v63  ;;  %v13701_v63 = vand.u32 4294901760, %v11567_v53  ;;  %v4739_v53 = vpop.f32.mrf.mxu0 }
 0x511   :  { %6053 = vmatpush.msrb.mxu3 %v11521_v3  ;;  %6088 = vmatpush.msra.mxu0 %v11715_v54  ;;  %v6188_v3 = vand.u32 4294901760, %v6187_v6  ;;  %v6194_v37 = vand.u32 4294901760, %v6193_v44  ;;  %v1917_v44 = vld [vmem:[#allocation17 + $0x3d0] sm:$0xff] }
 0x512   :  { %5994 = vmatpush.msrb.mxu2 %v13693_v4  ;;  %6171 = vmatpush.msra.mxu1 %v6170_v22  ;;  %v13705_v22 = vld [vmem:[#allocation176_spill] sm:$0xff] }
 0x513   :  { %6055 = vmatpush.msrb.mxu3 %v11533_v35  ;;  %6090 = vmatpush.msra.mxu0 %v11728_v31  ;;  %v13695_v35 = vand.u32 4294901760, %v11519_v24  ;;  %v13697_v24 = vand.u32 4294901760, %v11543_v29  ;;  %v11848_v29 = vld [vmem:[%s12742_s12] sm:$0xf]  ;;  %v13706_v40 = vand.u32 4294901760, %v13705_v22 }
 0x514   :  { %5998 = vmatpush.msrb.mxu2 %v13694_v57  ;;  %6177 = vmatpush.msra.mxu1 %v6176_v25  ;;  %v1921_v25 = vld [vmem:[#allocation17 + $0x3f0] sm:$0xff]  ;;  %v13709_v4 = vld [vmem:[#allocation40_spill] sm:$0xff]  ;;  %v11882_v57 = vand.u32 4294901760, %v1917_v44 }
 0x515   :  { %6057 = vmatpush.msrb.mxu3 %v11545_v62  ;;  %6092 = vmatpush.msra.mxu0 %v11741_v27  ;;  %v6200_v62 = vand.u32 4294901760, %v6199_v26 }
 0x516   :  { %6002 = vmatpush.msrb.mxu2 %v13695_v35  ;;  %6183 = vmatpush.msra.mxu1 %v6182_v59  ;;  %v13710_v59 = vand.u32 4294901760, %v13709_v4 }
 0x517   :  { %6059 = vmatpush.msrb.mxu3 %v11557_v20  ;;  %6094 = vmatpush.msra.mxu0 %v11756_v51  ;;  %v13698_v20 = vand.u32 4294901760, %v11610_v33 }
 0x518   :  { %6006 = vmatpush.msrb.mxu2 %v13696_v36  ;;  %6189 = vmatpush.msra.mxu1 %v6188_v3  ;;  %v4894_v36 = vpop.f32.mrf.mxu2 }
 0x519   :  { %6061 = vmatmul.f32.vlgmr.msrb.gmra.mxu3 %v11330_v48  ;;  %6096 = vmatpush.msra.mxu0 %v11769_v55 }
 0x51a   :  { %6262 = vmatpush.msra.mxu3 %v11593_v46  ;;  %6010 = vmatpush.msrb.mxu2 %v13697_v24 }
 0x51b   :  { %6195 = vmatpush.msra.mxu1 %v6194_v37  ;;  %6102 = vmatmul.f32.vlgmr.msra.gmra.mxu0 %v11007_v34  ;;  %v1905_v37 = vld [vmem:[#allocation17 + $0x370] sm:$0xff] }
 0x51c   :  { %6264 = vmatpush.msra.mxu3 %v11601_v14  ;;  %6303 = vmatpush.msrb.mxu0 %v13698_v20 }
 0x51d   :  { %6014 = vmatpush.msrb.mxu2 %v13699_v23  ;;  %6201 = vmatpush.msra.mxu1 %v6200_v62  ;;  %v11900_v62 = vsub.f32 %v1917_v44, %v11882_v57  ;;  %v13714_v44 = vld [vmem:[#allocation210_spill] sm:$0xff] }
 0x51e   :  { %6203 = vmatmul.f32.vlgmr.msra.gmra.mxu1 %v10944_v18  ;;  %6266 = vmatpush.msra.mxu3 %v11614_v2 }
 0x51f   :  { %6307 = vmatpush.msrb.mxu0 %v13700_v41  ;;  %6370 = vmatpush.msrb.mxu1 %v11593_v46  ;;  %v4693_v46 = vperm.slane %v11848_v29, 0  ;;  %v1901_v41 = vld [vmem:[#allocation17 + $0x350] sm:$0xff] }
 0x520   :  { %6018 = vmatpush.msrb.mxu2 %v13701_v63  ;;  %6268 = vmatpush.msra.mxu3 %v11622_v49  ;;  %v1897_v63 = vld [vmem:[#allocation17 + $0x330] sm:$0xff]  ;;  %v11927_v19 = vand.u32 4294901760, %v1901_v41 }
 0x521   :  { %6311 = vmatpush.msrb.mxu0 %v13702_v12  ;;  %6372 = vmatpush.msrb.mxu1 %v11601_v14  ;;  %v13707_v14 = vld [vmem:[#allocation36_spill] sm:$0xff]  ;;  %v4740_v6 = vadd.f32 %v4739_v53, %v4693_v46  ;;  %v4933_v12 = vpop.f32.mrf.mxu3 }
 0x522   :  { %6022 = vmatpush.msrb.mxu2 %v13704_v50  ;;  %6270 = vmatpush.msra.mxu3 %v11626_v56  ;;  %v13708_v47 = vand.u32 4294901760, %v13707_v14  ;;  %v5002_v50 = vpop.f32.mrf.mxu0 }
 0x523   :  { %6024 = vmatmul.f32.vlgmr.msrb.gmra.mxu2 %v11330_v48  ;;  %6315 = vmatpush.msrb.mxu0 %v13706_v40  ;;  %v1889_v40 = vld [vmem:[#allocation17 + $0x2f0] sm:$0xff] }
 0x524   :  { %6209 = vmatpush.msra.mxu2 %v11610_v33  ;;  %6374 = vmatpush.msrb.mxu1 %v11614_v2  ;;  %v11875_v2 = vand.u32 4294901760, %v1921_v25  ;;  %v13711_v33 = vand.u32 4294901760, %v11676_v17 }
 0x525   :  { %6272 = vmatpush.msra.mxu3 %v11635_v16  ;;  %6319 = vmatpush.msrb.mxu0 %v13708_v47 }
 0x526   :  { %6212 = vmatpush.msra.mxu2 %v11618_v5  ;;  %6376 = vmatpush.msrb.mxu1 %v11622_v49  ;;  %v1913_v5 = vld [vmem:[#allocation17 + $0x3b0] sm:$0xff]  ;;  %v4840_v49 = vpop.f32.mrf.mxu1  ;;  %v11890_v26 = vsub.f32 %v1921_v25, %v11875_v2 }
 0x527   :  { %6274 = vmatpush.msra.mxu3 %v11652_v0  ;;  %6323 = vmatpush.msrb.mxu0 %v13710_v59  ;;  %v4841_v3 = vadd.f32 %v4840_v49, %v4740_v6  ;;  %v11892_v35 = vand.u32 4294901760, %v1913_v5  ;;  %v1885_v25 = vld [vmem:[#allocation17 + $0x2d0] sm:$0xff] }
 0x528   :  { %6215 = vmatpush.msra.mxu2 %v11631_v10  ;;  %6378 = vmatpush.msrb.mxu1 %v11626_v56  ;;  %v13712_v56 = vand.u32 4294901760, %v11689_v30  ;;  %v1909_v10 = vld [vmem:[#allocation17 + $0x390] sm:$0xff]  ;;  %v13127_v20 = vand.u32 4294901760, %v11890_v26 }
 0x529   :  { %6276 = vmatpush.msra.mxu3 %v11665_v9  ;;  %6327 = vmatpush.msrb.mxu0 %v13711_v33  ;;  %v4895_v24 = vadd.f32 %v4894_v36, %v4841_v3  ;;  %v11911_v23 = vsub.f32 %v1913_v5, %v11892_v35  ;;  %v1877_v3 = vld [vmem:[#allocation17 + $0x290] sm:$0xff] }
 0x52a   :  { %6218 = vmatpush.msra.mxu2 %v13705_v22  ;;  %6380 = vmatpush.msrb.mxu1 %v11635_v16  ;;  %v13713_v16 = vand.u32 4294901760, %v11701_v32  ;;  %v11938_v22 = vand.u32 4294901760, %v1897_v63  ;;  %v1873_v36 = vld [vmem:[#allocation17 + $0x270] sm:$0xff] }
 0x52b   :  { %6278 = vmatpush.msra.mxu3 %v11678_v11  ;;  %6331 = vmatpush.msrb.mxu0 %v13712_v56 }
 0x52c   :  { %6221 = vmatpush.msra.mxu2 %v13707_v14  ;;  %6382 = vmatpush.msrb.mxu1 %v11652_v0  ;;  %v11902_v0 = vand.u32 4294901760, %v1909_v10  ;;  %v11964_v47 = vsub.f32 %v1897_v63, %v11938_v22  ;;  %v12007_v63 = vand.u32 4294901760, %v1877_v3 }
 0x52d   :  { %6280 = vmatpush.msra.mxu3 %v11691_v52  ;;  %6335 = vmatpush.msrb.mxu0 %v13713_v16 }
 0x52e   :  { %6224 = vmatpush.msra.mxu2 %v13709_v4  ;;  %6384 = vmatpush.msrb.mxu1 %v11665_v9  ;;  %v11913_v9 = vand.u32 4294901760, %v1905_v37  ;;  %v1881_v4 = vld [vmem:[#allocation17 + $0x2b0] sm:$0xff]  ;;  %v5039_v59 = vpop.f32.mrf.mxu1  ;;  %v13120_v5 = vand.u32 4294901760, %v11964_v47 }
 0x52f   :  { %6282 = vmatpush.msra.mxu3 %v11703_v43  ;;  %6339 = vmatpush.msrb.mxu0 %v6162_v38  ;;  %v4934_v38 = vadd.f32 %v4933_v12, %v4895_v24 }
 0x530   :  { %6227 = vmatpush.msra.mxu2 %v11676_v17  ;;  %6386 = vmatpush.msrb.mxu1 %v11678_v11  ;;  %v13126_v11 = vand.u32 4294901760, %v11900_v62  ;;  %v11922_v17 = vsub.f32 %v1909_v10, %v11902_v0  ;;  %v11936_v46 = vsub.f32 %v1905_v37, %v11913_v9  ;;  %v11995_v10 = vand.u32 4294901760, %v1881_v4 }
 0x531   :  { %6284 = vmatpush.msra.mxu3 %v11715_v54  ;;  %6343 = vmatpush.msrb.mxu0 %v6168_v7  ;;  %v1893_v7 = vld [vmem:[#allocation17 + $0x310] sm:$0xff]  ;;  %v5003_v53 = vadd.f32 %v5002_v50, %v4934_v38 }
 0x532   :  { %6230 = vmatpush.msra.mxu2 %v11689_v30  ;;  %6388 = vmatpush.msrb.mxu1 %v11691_v52  ;;  %v6450_v52 = vsub.f32 %v11890_v26, %v13127_v20  ;;  %v13125_v30 = vand.u32 4294901760, %v11911_v23  ;;  %v13122_v14 = vand.u32 4294901760, %v11936_v46 }
 0x533   :  { %6286 = vmatpush.msra.mxu3 %v11728_v31  ;;  %6347 = vmatpush.msrb.mxu0 %v6174_v42  ;;  %v11949_v42 = vand.u32 4294901760, %v1893_v7  ;;  %v5040_v49 = vadd.f32 %v5039_v59, %v5003_v53 }
 0x534   :  { %6233 = vmatpush.msra.mxu2 %v11701_v32  ;;  %6390 = vmatpush.msrb.mxu1 %v11703_v43  ;;  %v6456_v43 = vsub.f32 %v11900_v62, %v13126_v11  ;;  %v13123_v32 = vand.u32 4294901760, %v11922_v17  ;;  %v6474_v33 = vsub.f32 %v11936_v46, %v13122_v14 }
 0x535   :  { %6288 = vmatpush.msra.mxu3 %v11741_v27  ;;  %6351 = vmatpush.msrb.mxu0 %v6180_v60  ;;  %v11955_v60 = vsub.f32 %v1901_v41, %v11927_v19  ;;  %v11977_v6 = vsub.f32 %v1893_v7, %v11949_v42  ;;  %v5235_v7 = vpop.f32.mrf.mxu0 }
 0x536   :  { %6236 = vmatpush.msra.mxu2 %v11713_v45  ;;  %6392 = vmatpush.msrb.mxu1 %v11715_v54  ;;  %v6451_v54 = vand.u32 4294901760, %v6450_v52  ;;  %v6462_v45 = vsub.f32 %v11911_v23, %v13125_v30  ;;  %v6475_v12 = vand.u32 4294901760, %v6474_v33  ;;  %v12017_v52 = vsub.f32 %v1881_v4, %v11995_v10  ;;  %v13715_v33 = vld [vmem:[#allocation207_spill] sm:$0xff] }
 0x537   :  { %6290 = vmatpush.msra.mxu3 %v11756_v51  ;;  %6355 = vmatpush.msrb.mxu0 %v6186_v58  ;;  %v11969_v58 = vand.u32 4294901760, %v1889_v40  ;;  %v13118_v16 = vand.u32 4294901760, %v11977_v6 }
 0x538   :  { %6239 = vmatpush.msra.mxu2 %v11726_v21  ;;  %6394 = vmatpush.msrb.mxu1 %v11728_v31  ;;  %v6457_v31 = vand.u32 4294901760, %v6456_v43  ;;  %v6468_v21 = vsub.f32 %v11922_v17, %v13123_v32  ;;  %v12019_v43 = vand.u32 4294901760, %v1873_v36 }
 0x539   :  { %6292 = vmatpush.msra.mxu3 %v11769_v55  ;;  %6359 = vmatpush.msrb.mxu0 %v6192_v8  ;;  %v13121_v8 = vand.u32 4294901760, %v11955_v60  ;;  %v11993_v56 = vsub.f32 %v1889_v40, %v11969_v58  ;;  %v6492_v40 = vsub.f32 %v11977_v6, %v13118_v16  ;;  %v1846_v16 = vld [vmem:[#allocation17 + $0x198] sm:$0xff] }
 0x53a   :  { %6242 = vmatpush.msra.mxu2 %v11739_v13  ;;  %6396 = vmatpush.msrb.mxu1 %v11741_v27  ;;  %v11983_v13 = vand.u32 4294901760, %v1885_v25  ;;  %v6463_v27 = vand.u32 4294901760, %v6462_v45  ;;  %v5274_v45 = vpop.f32.mrf.mxu1  ;;  %v12129_v32 = vand.u32 4294901760, %v1846_v16 }
 0x53b   :  { %6296 = vmatmul.f32.vlgmr.msra.gmra.mxu3 %v13714_v44  ;;  %6363 = vmatpush.msrb.mxu0 %v6198_v1  ;;  %v6480_v24 = vsub.f32 %v11955_v60, %v13121_v8  ;;  %v13117_v50 = vand.u32 4294901760, %v11993_v56 }
 0x53c   :  { %6452 = vmatpush.msrb.mxu3 %v6451_v54  ;;  %6245 = vmatpush.msra.mxu2 %v11752_v15  ;;  %v6469_v15 = vand.u32 4294901760, %v6468_v21  ;;  %v12005_v41 = vsub.f32 %v1885_v25, %v11983_v13  ;;  %v1865_v54 = vld [vmem:[#allocation17 + $0x230] sm:$0xff]  ;;  %v12029_v21 = vsub.f32 %v1877_v3, %v12007_v63  ;;  %v12041_v3 = vsub.f32 %v1873_v36, %v12019_v43 }
 0x53d   :  { %6398 = vmatpush.msrb.mxu1 %v11756_v51  ;;  %6365 = vmatmul.f32.vlgmr.msrb.gmra.mxu0 %v10944_v18  ;;  %v5080_v1 = vpop.f32.mrf.mxu2  ;;  %v5181_v51 = vpop.f32.mrf.mxu3  ;;  %v6481_v25 = vand.u32 4294901760, %v6480_v24  ;;  %13721 = vst [vmem:[#allocation48_spill] sm:$0xff] %v12129_v32 }
 0x53e   :  { %6458 = vmatpush.msrb.mxu3 %v6457_v31  ;;  %6550 = vmatpush.msra.mxu0 %v11890_v26  ;;  %v5081_v37 = vadd.f32 %v5080_v1, %v5040_v49  ;;  %v13115_v31 = vand.u32 4294901760, %v12005_v41  ;;  %v6498_v49 = vsub.f32 %v11993_v56, %v13117_v50  ;;  %v13114_v1 = vand.u32 4294901760, %v12017_v52 }
 0x53f   :  { %6248 = vmatpush.msra.mxu2 %v11765_v61  ;;  %6400 = vmatpush.msrb.mxu1 %v11769_v55  ;;  %v6486_v61 = vsub.f32 %v11964_v47, %v13120_v5  ;;  %v1869_v55 = vld [vmem:[#allocation17 + $0x250] sm:$0xff] }
 0x540   :  { %6402 = vmatmul.f32.vlgmr.msrb.gmra.mxu1 %v10944_v18  ;;  %6464 = vmatpush.msrb.mxu3 %v6463_v27  ;;  %v5182_v38 = vadd.f32 %v5181_v51, %v5081_v37  ;;  %v12031_v4 = vand.u32 4294901760, %v1869_v55  ;;  %v1861_v27 = vld [vmem:[#allocation17 + $0x210] sm:$0xff]  ;;  %v6504_v37 = vsub.f32 %v12005_v41, %v13115_v31  ;;  %v13113_v51 = vand.u32 4294901760, %v12029_v21  ;;  %v1850_v31 = vld [vmem:[#allocation17 + $0x1b8] sm:$0xff] }
 0x541   :  { %6553 = vmatpush.msra.mxu0 %v11900_v62  ;;  %6603 = vmatpush.msra.mxu1 %v11875_v2  ;;  %v12121_v5 = vand.u32 4294901760, %v1850_v31 }
 0x542   :  { %6251 = vmatpush.msra.mxu2 %v11780_v39  ;;  %6470 = vmatpush.msrb.mxu3 %v6469_v15  ;;  %v5236_v53 = vadd.f32 %v5235_v7, %v5182_v38  ;;  %v6487_v39 = vand.u32 4294901760, %v6486_v61  ;;  %v12043_v15 = vand.u32 4294901760, %v1865_v54  ;;  %v12053_v36 = vsub.f32 %v1869_v55, %v12031_v4 }
 0x543   :  { %6556 = vmatpush.msra.mxu0 %v11911_v23  ;;  %6605 = vmatpush.msra.mxu1 %v11882_v57  ;;  %v6499_v7 = vand.u32 4294901760, %v6498_v49 }
 0x544   :  { %6254 = vmatpush.msra.mxu2 %v11791_v28  ;;  %6476 = vmatpush.msrb.mxu3 %v6475_v12  ;;  %v5275_v59 = vadd.f32 %v5274_v45, %v5236_v53  ;;  %v6493_v28 = vand.u32 4294901760, %v6492_v40  ;;  %13716 = vst [vmem:[#allocation28_spill] sm:$0xff] %v12053_v36  ;;  %v12055_v12 = vand.u32 4294901760, %v1861_v27  ;;  %v6510_v40 = vsub.f32 %v12017_v52, %v13114_v1 }
 0x545   :  { %6257 = vmatmul.f32.vlgmr.msra.gmra.mxu2 %v13715_v33  ;;  %6559 = vmatpush.msra.mxu0 %v11922_v17  ;;  %v5380_v38 = vpop.f32.mrf.mxu3  ;;  %v13112_v53 = vand.u32 4294901760, %v12041_v3  ;;  %v12065_v55 = vsub.f32 %v1865_v54, %v12043_v15 }
 0x546   :  { %6407 = vmatpush.msrb.mxu2 %v11875_v2  ;;  %6607 = vmatpush.msra.mxu1 %v11892_v35  ;;  %v12077_v49 = vsub.f32 %v1861_v27, %v12055_v12 }
 0x547   :  { %6482 = vmatpush.msrb.mxu3 %v6481_v25  ;;  %6562 = vmatpush.msra.mxu0 %v11936_v46  ;;  %v5343_v24 = vpop.f32.mrf.mxu2  ;;  %13717 = vst [vmem:[#allocation27_spill] sm:$0xff] %v12065_v55  ;;  %v6505_v25 = vand.u32 4294901760, %v6504_v37  ;;  %v6511_v37 = vand.u32 4294901760, %v6510_v40 }
 0x548   :  { %6409 = vmatpush.msrb.mxu2 %v11882_v57  ;;  %6609 = vmatpush.msra.mxu1 %v11902_v0  ;;  %v5344_v61 = vadd.f32 %v5343_v24, %v5275_v59  ;;  %v13116_v59 = vand.u32 4294901760, %v12053_v36  ;;  %13718 = vst [vmem:[#allocation44_spill] sm:$0xff] %v12077_v49  ;;  %v6522_v24 = vsub.f32 %v12041_v3, %v13112_v53  ;;  %v13124_v53 = vand.u32 4294901760, %v12077_v49 }
 0x549   :  { %6488 = vmatpush.msrb.mxu3 %v6487_v39  ;;  %6565 = vmatpush.msra.mxu0 %v11955_v60  ;;  %v6516_v39 = vsub.f32 %v12029_v21, %v13113_v51 }
 0x54a   :  { %6411 = vmatpush.msrb.mxu2 %v11892_v35  ;;  %6611 = vmatpush.msra.mxu1 %v11913_v9  ;;  %v12069_v45 = vadd.f32 %v5380_v38, %v5344_v61  ;;  %v13119_v61 = vand.u32 4294901760, %v12065_v55  ;;  %v1854_v38 = vld [vmem:[#allocation17 + $0x1d8] sm:$0xff]  ;;  %v6528_v40 = vsub.f32 %v12053_v36, %v13116_v59 }
 0x54b   :  { %6494 = vmatpush.msrb.mxu3 %v6493_v28  ;;  %6568 = vmatpush.msra.mxu0 %v11964_v47  ;;  %v1858_v28 = vld [vmem:[#allocation17 + $0x1f8] sm:$0xff]  ;;  %v12108_v59 = vand.u32 4294901760, %v1854_v38 }
 0x54c   :  { %6413 = vmatpush.msrb.mxu2 %v11902_v0  ;;  %6613 = vmatpush.msra.mxu1 %v11927_v19  ;;  %v12082_v54 = vmul.f32 0.70710677, %v12069_v45  ;;  %v12098_v51 = vand.u32 4294901760, %v1858_v28 }
 0x54d   :  { %6500 = vmatpush.msrb.mxu3 %v6499_v7  ;;  %6571 = vmatpush.msra.mxu0 %v11977_v6  ;;  %v6517_v7 = vand.u32 4294901760, %v6516_v39  ;;  %v6534_v39 = vsub.f32 %v12065_v55, %v13119_v61 }
 0x54e   :  { %6415 = vmatpush.msrb.mxu2 %v11913_v9  ;;  %6615 = vmatpush.msra.mxu1 %v11938_v22  ;;  %v7437_v27 = vmul.f32 %v12082_v54, %v12082_v54  ;;  %v12119_v61 = vsub.f32 %v1858_v28, %v12098_v51 }
 0x54f   :  { %6506 = vmatpush.msrb.mxu3 %v6505_v25  ;;  %6574 = vmatpush.msra.mxu0 %v11993_v56  ;;  %v6523_v25 = vand.u32 4294901760, %v6522_v24  ;;  %v6540_v24 = vsub.f32 %v12077_v49, %v13124_v53  ;;  %v1842_v53 = vld [vmem:[#allocation17 + $0x178] sm:$0xff] }
 0x550   :  { %6417 = vmatpush.msrb.mxu2 %v11927_v19  ;;  %6617 = vmatpush.msra.mxu1 %v11949_v42  ;;  %v12102_v1 = vmin.f32 %v7437_v27, 16.0  ;;  %13719 = vst [vmem:[#allocation172_spill] sm:$0xff] %v12119_v61 }
 0x551   :  { %6512 = vmatpush.msrb.mxu3 %v6511_v37  ;;  %6577 = vmatpush.msra.mxu0 %v12005_v41  ;;  %v6529_v37 = vand.u32 4294901760, %v6528_v40  ;;  %v12127_v40 = vsub.f32 %v1854_v38, %v12108_v59  ;;  %v12138_v38 = vsub.f32 %v1850_v31, %v12121_v5  ;;  %v1834_v31 = vld [vmem:[#allocation17 + $0x138] sm:$0xff] }
 0x552   :  { %6419 = vmatpush.msrb.mxu2 %v11938_v22  ;;  %6619 = vmatpush.msra.mxu1 %v11969_v58  ;;  %v7439_v50 = vmul.f32 2.1237322e-06, %v12102_v1  ;;  %v7450_v27 = vmul.f32 3.8918573e-05, %v12102_v1 }
 0x553   :  { %6518 = vmatpush.msrb.mxu3 %v6517_v7  ;;  %6580 = vmatpush.msra.mxu0 %v12017_v52  ;;  %v6535_v7 = vand.u32 4294901760, %v6534_v39  ;;  %13720 = vst [vmem:[#allocation31_spill] sm:$0xff] %v12127_v40  ;;  %v13128_v39 = vand.u32 4294901760, %v12119_v61 }
 0x554   :  { %6421 = vmatpush.msrb.mxu2 %v11949_v42  ;;  %6621 = vmatpush.msra.mxu1 %v11983_v13  ;;  %v7440_v8 = vadd.f32 0.00028619796, %v7439_v50  ;;  %v7451_v14 = vadd.f32 0.001143296, %v7450_v27  ;;  %v1838_v50 = vld [vmem:[#allocation17 + $0x158] sm:$0xff]  ;;  %13722 = vst [vmem:[#allocation34_spill] sm:$0xff] %v12138_v38 }
 0x555   :  { %6524 = vmatpush.msrb.mxu3 %v6523_v25  ;;  %6583 = vmatpush.msra.mxu0 %v12029_v21  ;;  %v6541_v25 = vand.u32 4294901760, %v6540_v24  ;;  %v12147_v24 = vsub.f32 %v1846_v16, %v12129_v32  ;;  %v12149_v11 = vand.u32 4294901760, %v1838_v50  ;;  %v1830_v16 = vld [vmem:[#allocation17 + $0x118] sm:$0xff] }
 0x556   :  { %v7441_v28 = vmul.f32 %v7440_v8, %v12102_v1  ;;  %v7452_v30 = vmul.f32 %v7451_v14, %v12102_v1  ;;  %6423 = vmatpush.msrb.mxu2 %v11969_v58  ;;  %6623 = vmatpush.msra.mxu1 %v11995_v10  ;;  %v12142_v14 = vand.u32 4294901760, %v1842_v53 }
 0x557   :  { %6530 = vmatpush.msrb.mxu3 %v6529_v37  ;;  %6586 = vmatpush.msra.mxu0 %v12041_v3  ;;  %13723 = vst [vmem:[#allocation29_spill] sm:$0xff] %v12147_v24  ;;  %v12164_v37 = vand.u32 4294901760, %v1834_v31  ;;  %v12174_v44 = vsub.f32 %v1838_v50, %v12149_v11  ;;  %v1822_v50 = vld [vmem:[#allocation17 + $0xd8] sm:$0xff] }
 0x558   :  { %v7453_v27 = vadd.f32 0.014752088, %v7452_v30  ;;  %6425 = vmatpush.msrb.mxu2 %v11983_v13  ;;  %6625 = vmatpush.msra.mxu1 %v12007_v63  ;;  %v7442_v8 = vadd.f32 0.0036580483, %v7441_v28 }
 0x559   :  { %6536 = vmatpush.msrb.mxu3 %v6535_v7  ;;  %6589 = vmatpush.msra.mxu0 %v12053_v36  ;;  %v6791_v7 = vsub.f32 %v12119_v61, %v13128_v39  ;;  %v13725_v39 = vand.u32 4294901760, %v12127_v40  ;;  %13726 = vst [vmem:[#allocation38_spill] sm:$0xff] %v12174_v44  ;;  %v13730_v61 = vld [vmem:[#allocation213_spill] sm:$0xff] }
 0x55a   :  { %v7454_v30 = vmul.f32 %v7453_v27, %v12102_v1  ;;  %6427 = vmatpush.msrb.mxu2 %v11995_v10  ;;  %6627 = vmatpush.msra.mxu1 %v12019_v43  ;;  %v12162_v27 = vsub.f32 %v1842_v53, %v12142_v14  ;;  %v7443_v33 = vmul.f32 %v7442_v8, %v12102_v1  ;;  %v12179_v8 = vand.u32 4294901760, %v1830_v16 }
 0x55b   :  { %6542 = vmatpush.msrb.mxu3 %v6541_v25  ;;  %6592 = vmatpush.msra.mxu0 %v12065_v55  ;;  %v1826_v25 = vld [vmem:[#allocation17 + $0xf8] sm:$0xff]  ;;  %v6792_v55 = vand.u32 4294901760, %v6791_v7 }
 0x55c   :  { %v7455_v20 = vadd.f32 0.112945676, %v7454_v30  ;;  %6429 = vmatpush.msrb.mxu2 %v12007_v63  ;;  %6629 = vmatpush.msra.mxu1 %v12031_v4  ;;  %13724 = vst [vmem:[#allocation55_spill] sm:$0xff] %v12162_v27  ;;  %v6797_v30 = vsub.f32 %v12127_v40, %v13725_v39  ;;  %v13728_v39 = vand.u32 4294901760, %v12138_v38  ;;  %v12186_v40 = vand.u32 4294901760, %v1826_v25 }
 0x55d   :  { %6544 = vmatmul.f32.vlgmr.msrb.gmra.mxu3 %v11330_v48  ;;  %6595 = vmatpush.msra.mxu0 %v12077_v49  ;;  %v13727_v49 = vld [vmem:[#allocation212_spill] sm:$0xff]  ;;  %v7444_v36 = vadd.f32 0.05243302, %v7443_v33  ;;  %v12204_v33 = vsub.f32 %v1830_v16, %v12179_v8  ;;  %v13735_v16 = vand.u32 4294901760, %v11890_v26  ;;  %v13737_v26 = vand.u32 4294901760, %v11900_v62 }
 0x55e   :  { %v7456_v53 = vmul.f32 %v7455_v20, %v12102_v1  ;;  %6711 = vmatpush.msra.mxu3 %v11875_v2  ;;  %6431 = vmatpush.msrb.mxu2 %v12019_v43  ;;  %v6803_v28 = vsub.f32 %v12138_v38, %v13728_v39  ;;  %v12192_v20 = vsub.f32 %v1834_v31, %v12164_v37  ;;  %v6798_v7 = vand.u32 4294901760, %v6797_v30 }
 0x55f   :  { %6631 = vmatpush.msra.mxu1 %v12043_v15  ;;  %6598 = vmatmul.f32.vlgmr.msra.gmra.mxu0 %v13727_v49  ;;  %v13729_v39 = vand.u32 4294901760, %v12147_v24  ;;  %13731 = vst [vmem:[#allocation32_spill] sm:$0xff] %v12204_v33  ;;  %v12206_v31 = vand.u32 4294901760, %v1822_v50 }
 0x560   :  { %v7457_v18 = vadd.f32 0.4994258, %v7456_v53  ;;  %6713 = vmatpush.msra.mxu3 %v11882_v57  ;;  %6748 = vmatpush.msrb.mxu0 %v12098_v51  ;;  %v1818_v57 = vld [vmem:[#allocation17 + $0xb8] sm:$0xff]  ;;  %v6804_v30 = vand.u32 4294901760, %v6803_v28 }
 0x561   :  { %6433 = vmatpush.msrb.mxu2 %v12031_v4  ;;  %6633 = vmatpush.msra.mxu1 %v12055_v12  ;;  %v6809_v49 = vsub.f32 %v12147_v24, %v13729_v39  ;;  %v12210_v39 = vsub.f32 %v1826_v25, %v12186_v40  ;;  %v1814_v53 = vld [vmem:[#allocation17 + $0x98] sm:$0xff] }
 0x562   :  { %v7458_v38 = vmul.f32 %v7457_v18, %v12102_v1  ;;  %6637 = vmatmul.f32.vlgmr.msra.gmra.mxu1 %v13730_v61  ;;  %6715 = vmatpush.msra.mxu3 %v11892_v35  ;;  %v13732_v18 = vand.u32 4294901760, %v12162_v27  ;;  %v12220_v61 = vand.u32 4294901760, %v1818_v57  ;;  %v1810_v24 = vld [vmem:[#allocation17 + $0x78] sm:$0xff] }
 0x563   :  { %6750 = vmatpush.msrb.mxu0 %v12108_v59  ;;  %6793 = vmatpush.msrb.mxu1 %v6792_v55  ;;  %v7445_v55 = vmul.f32 %v7444_v36, %v12102_v1  ;;  %v6810_v28 = vand.u32 4294901760, %v6809_v49  ;;  %v12234_v36 = vand.u32 4294901760, %v1814_v53 }
 0x564   :  { %v12212_v2 = vadd.f32 1.0, %v7458_v38  ;;  %6435 = vmatpush.msrb.mxu2 %v12043_v15  ;;  %6717 = vmatpush.msra.mxu3 %v11902_v0  ;;  %v6815_v35 = vsub.f32 %v12162_v27, %v13732_v18  ;;  %v13733_v38 = vand.u32 4294901760, %v12174_v44  ;;  %v12232_v18 = vsub.f32 %v1822_v50, %v12206_v31 }
 0x565   :  { %6752 = vmatpush.msrb.mxu0 %v12121_v5  ;;  %6799 = vmatpush.msrb.mxu1 %v6798_v7  ;;  %v13734_v7 = vld [vmem:[#allocation215_spill] sm:$0xff]  ;;  %v12245_v50 = vsub.f32 %v1818_v57, %v12220_v61  ;;  %v12247_v27 = vand.u32 4294901760, %v1810_v24 }
 0x566   :  { %v6821_v25 = vsub.f32 %v12174_v44, %v13733_v38  ;;  %7668 = vrcp.f32 %v12212_v2  ;;  %6437 = vmatpush.msrb.mxu2 %v12055_v12  ;;  %6719 = vmatpush.msra.mxu3 %v11913_v9  ;;  %v1806_v38 = vld [vmem:[#allocation17 + $0x58] sm:$0xff]  ;;  %v6816_v44 = vand.u32 4294901760, %v6815_v35  ;;  %v13736_v9 = vand.u32 4294901760, %v12192_v20 }
 0x567   :  { %6443 = vmatmul.f32.vlgmr.msrb.gmra.mxu2 %v13734_v7  ;;  %6754 = vmatpush.msrb.mxu0 %v12129_v32  ;;  %v7446_v7 = vadd.f32 0.18741608, %v7445_v55  ;;  %v1802_v32 = vld [vmem:[#allocation17 + $0x38] sm:$0xff]  ;;  %v12260_v55 = vand.u32 4294901760, %v1806_v38  ;;  %vm7465_vm2 = vweird.f32 %v12212_v2 }
 0x568   :  { %6644 = vmatpush.msra.mxu2 %v13735_v16  ;;  %6805 = vmatpush.msrb.mxu1 %v6804_v30  ;;  %v6827_v0 = vsub.f32 %v12192_v20, %v13736_v9  ;;  %v6822_v49 = vand.u32 4294901760, %v6821_v25  ;;  %v13738_v30 = vand.u32 4294901760, %v12204_v33  ;;  %v12258_v16 = vsub.f32 %v1814_v53, %v12234_v36 }
 0x569   :  { %6721 = vmatpush.msra.mxu3 %v11927_v19  ;;  %6756 = vmatpush.msrb.mxu0 %v12142_v14  ;;  %v13739_v19 = vand.u32 4294901760, %v12210_v39  ;;  %v13740_v25 = vand.u32 4294901760, %v11911_v23  ;;  %v12271_v53 = vsub.f32 %v1810_v24, %v12247_v27  ;;  %v7447_v57 = vmul.f32 %v7446_v7, %v12102_v1 }
 0x56a   :  { %6648 = vmatpush.msra.mxu2 %v13737_v26  ;;  %6811 = vmatpush.msrb.mxu1 %v6810_v28  ;;  %v6833_v35 = vsub.f32 %v12204_v33, %v13738_v30  ;;  %v6828_v9 = vand.u32 4294901760, %v6827_v0  ;;  %v6850_v26 = vand.u32 4294901760, %v12245_v50  ;;  %v12273_v30 = vand.u32 4294901760, %v1802_v32 }
 0x56b   :  { %6723 = vmatpush.msra.mxu3 %v11938_v22  ;;  %6758 = vmatpush.msrb.mxu0 %v12149_v11  ;;  %v6839_v62 = vsub.f32 %v12210_v39, %v13739_v19  ;;  %v1798_v22 = vld [vmem:[#allocation17 + $0x18] sm:$0xff]  ;;  %v13741_v23 = vand.u32 4294901760, %v11922_v17  ;;  %v13742_v0 = vand.u32 4294901760, %v12232_v18  ;;  %v6856_v19 = vand.u32 4294901760, %v12258_v16 }
 0x56c   :  { %v7669_v28 = vpop.eup %7668  ;;  %6652 = vmatpush.msra.mxu2 %v13740_v25  ;;  %6817 = vmatpush.msrb.mxu1 %v6816_v44  ;;  %v6834_v44 = vand.u32 4294901760, %v6833_v35  ;;  %v12286_v25 = vsub.f32 %v1806_v38, %v12260_v55  ;;  %v12290_v7 = vand.u32 4294901760, %v1798_v22  ;;  %v7471_v17 = vand.u32 2147483648, %v12212_v2 }
 0x56d   :  { %v7461_v33 = vmul.f32 %v7669_v28, %v12212_v2  ;;  %6725 = vmatpush.msra.mxu3 %v11949_v42  ;;  %6760 = vmatpush.msrb.mxu0 %v12164_v37  ;;  %v6845_v24 = vsub.f32 %v12232_v18, %v13742_v0  ;;  %v6840_v42 = vand.u32 4294901760, %v6839_v62  ;;  %v6851_v35 = vsub.f32 %v12245_v50, %v6850_v26 }
 0x56e   :  { %6656 = vmatpush.msra.mxu2 %v13741_v23  ;;  %6823 = vmatpush.msrb.mxu1 %v6822_v49  ;;  %v13743_v49 = vand.u32 4294901760, %v11936_v46  ;;  %v6862_v38 = vand.u32 4294901760, %v12271_v53  ;;  %vm7466_vm1 = vweird.f32 %v7669_v28  ;;  %v7469_v62 = vand.u32 2147483647, %v12212_v2 }
 0x56f   :  { %v7462_v1 = vsub.f32 1.0, %v7461_v33  ;;  %6727 = vmatpush.msra.mxu3 %v11969_v58  ;;  %6762 = vmatpush.msrb.mxu0 %v12179_v8  ;;  %v12300_v33 = vsub.f32 %v1802_v32, %v12273_v30  ;;  %v7448_v58 = vadd.f32 1.1283791, %v7447_v57  ;;  %v13744_v46 = vand.u32 4294901760, %v11955_v60  ;;  %vm7467_vm3 = vmor %vm7465_vm2, %vm7466_vm1 }
 0x570   :  { %6660 = vmatpush.msra.mxu2 %v13743_v49  ;;  %6829 = vmatpush.msrb.mxu1 %v6828_v9  ;;  %v6846_v9 = vand.u32 4294901760, %v6845_v24  ;;  %v6857_v0 = vsub.f32 %v12258_v16, %v6856_v19  ;;  %v6868_v32 = vand.u32 4294901760, %v12286_v25  ;;  %v7472_v60 = vor.u32 1.1754944e-38, %v7471_v17 }
 0x571   :  { %v7463_v23 = vmul.f32 %v7669_v28, %v7462_v1  ;;  %6729 = vmatpush.msra.mxu3 %v11983_v13  ;;  %6764 = vmatpush.msrb.mxu0 %v12186_v40  ;;  %v12315_v13 = vsub.f32 %v1798_v22, %v12290_v7  ;;  %v6852_v24 = vand.u32 4294901760, %v6851_v35  ;;  %v6863_v1 = vsub.f32 %v12271_v53, %v6862_v38 }
 0x572   :  { %6664 = vmatpush.msra.mxu2 %v13744_v46  ;;  %6835 = vmatpush.msrb.mxu1 %v6834_v44  ;;  %v13745_v44 = vand.u32 4294901760, %v11964_v47  ;;  %v7449_v2 = vmul.f32 %v7448_v58, %v12082_v54  ;;  %vm7470_vm4 = vcmp.eq.f32.partialorder %v7469_v62, 8.507059e+37  ;;  %v13746_v47 = vand.u32 4294901760, %v11977_v6 }
 0x573   :  { %v7464_v57 = vadd.f32 %v7669_v28, %v7463_v23  ;;  %6731 = vmatpush.msra.mxu3 %v11995_v10  ;;  %6766 = vmatpush.msrb.mxu0 %v12206_v31  ;;  %v6874_v10 = vand.u32 4294901760, %v12300_v33  ;;  %v6869_v17 = vsub.f32 %v12286_v25, %v6868_v32  ;;  %v13747_v54 = vand.u32 4294901760, %v11993_v56 }
 0x574   :  { %6668 = vmatpush.msra.mxu2 %v13745_v44  ;;  %6841 = vmatpush.msrb.mxu1 %v6840_v42  ;;  %v6858_v42 = vand.u32 4294901760, %v6857_v0  ;;  %v7429_v62 = vmul.f32 0.5, %v12069_v45  ;;  %v13749_v46 = vand.u32 4294901760, %v12017_v52  ;;  %v13750_v45 = vand.u32 4294901760, %v12029_v21  ;;  %v5421_v0 = vpop.f32.mrf.mxu0  ;;  %v13752_v21 = vld [vmem:[#allocation172_spill] sm:$0xff] }
 0x575   :  { %v7468_v49 = vsel %vm7467_vm3, %v7669_v28, %v7464_v57  ;;  %6733 = vmatpush.msra.mxu3 %v12007_v63  ;;  %6768 = vmatpush.msrb.mxu0 %v12220_v61  ;;  %v6880_v63 = vand.u32 4294901760, %v12315_v13  ;;  %v6864_v28 = vand.u32 4294901760, %v6863_v1  ;;  %v6875_v58 = vsub.f32 %v12300_v33, %v6874_v10  ;;  %v13757_v1 = vld [vmem:[#allocation31_spill] sm:$0xff] }
 0x576   :  { %v7473_v22 = vsel %vm7470_vm4, %v7472_v60, %v7468_v49  ;;  %6672 = vmatpush.msra.mxu2 %v13746_v47  ;;  %6847 = vmatpush.msrb.mxu1 %v6846_v9  ;;  %v6870_v23 = vand.u32 4294901760, %v6869_v17  ;;  %v13751_v52 = vand.u32 4294901760, %v12041_v3  ;;  %v13753_v57 = vand.u32 4294901760, %v13752_v21  ;;  %v13754_v60 = vld [vmem:[#allocation28_spill] sm:$0xff]  ;;  %v13762_v47 = vld [vmem:[#allocation34_spill] sm:$0xff]  ;;  %v5576_v17 = vpop.f32.mrf.mxu2 }
 0x577   :  { %v7474_v35 = vmul.f32 %v7473_v22, %v7449_v2  ;;  %6735 = vmatpush.msra.mxu3 %v12019_v43  ;;  %6770 = vmatpush.msrb.mxu0 %v12234_v36  ;;  %v13748_v43 = vand.u32 4294901760, %v12005_v41  ;;  %v6876_v41 = vand.u32 4294901760, %v6875_v58  ;;  %v13755_v44 = vand.u32 4294901760, %v13754_v60  ;;  %v13759_v2 = vld [vmem:[#allocation27_spill] sm:$0xff]  ;;  %v13761_v22 = vld [vmem:[#allocation48_spill] sm:$0xff] }
 0x578   :  { %6676 = vmatpush.msra.mxu2 %v13747_v54  ;;  %6853 = vmatpush.msrb.mxu1 %v6852_v24  ;;  %v13756_v24 = vld [vmem:[#allocation205_spill] sm:$0xff]  ;;  %v13760_v49 = vand.u32 4294901760, %v13759_v2 }
 0x579   :  { %v7633_v6 = vclamps-f32 %v7474_v35, 1.0  ;;  %6737 = vmatpush.msra.mxu3 %v12031_v4  ;;  %6772 = vmatpush.msrb.mxu0 %v12247_v27  ;;  %v6881_v4 = vsub.f32 %v12315_v13, %v6880_v63  ;;  %v13764_v35 = vld [vmem:[#allocation44_spill] sm:$0xff] }
 0x57a   :  { %6680 = vmatpush.msra.mxu2 %v13748_v43  ;;  %6859 = vmatpush.msrb.mxu1 %v6858_v42  ;;  %v13763_v42 = vand.u32 4294901760, %v13762_v47  ;;  %v13765_v54 = vand.u32 4294901760, %v13764_v35 }
 0x57b   :  { %v7597_v56 = vadd.f32 1.0, %v7633_v6  ;;  %6739 = vmatpush.msra.mxu3 %v12043_v15  ;;  %6774 = vmatpush.msrb.mxu0 %v12260_v55  ;;  %v6882_v15 = vand.u32 4294901760, %v6881_v4  ;;  %v1918_v4 = vld [vmem:[#allocation17 + $0x3d8] sm:$0xff] }
 0x57c   :  { %6684 = vmatpush.msra.mxu2 %v13749_v46  ;;  %6865 = vmatpush.msrb.mxu1 %v6864_v28  ;;  %v5615_v46 = vpop.f32.mrf.mxu3 }
 0x57d   :  { %v7601_v9 = vmul.f32 %v7597_v56, %v7429_v62  ;;  %6741 = vmatpush.msra.mxu3 %v12055_v12  ;;  %6776 = vmatpush.msrb.mxu0 %v12273_v30  ;;  %v4694_v12 = vperm.slane %v11848_v29, 1  ;;  %v13758_v29 = vand.u32 4294901760, %v13757_v1  ;;  %v13770_v62 = vld [vmem:[#allocation38_spill] sm:$0xff] }
 0x57e   :  { %6688 = vmatpush.msra.mxu2 %v13750_v45  ;;  %6871 = vmatpush.msrb.mxu1 %v6870_v23  ;;  %v1922_v23 = vld [vmem:[#allocation17 + $0x3f8] sm:$0xff]  ;;  %v13771_v56 = vand.u32 4294901760, %v13770_v62 }
 0x57f   :  { %7605 = vst [vmem:[#allocation19] sm:$0xff] %v7601_v9  ;;  %6743 = vmatmul.f32.vlgmr.msra.gmra.mxu3 %v11330_v48  ;;  %6778 = vmatpush.msrb.mxu0 %v12290_v7  ;;  %v5422_v3 = vadd.f32 %v5421_v0, %v4694_v12  ;;  %v1914_v45 = vld [vmem:[#allocation17 + $0x3b8] sm:$0xff]  ;;  %v5684_v0 = vpop.f32.mrf.mxu0 }
 0x580   :  { %6944 = vmatpush.msrb.mxu3 %v12098_v51  ;;  %6692 = vmatpush.msra.mxu2 %v13751_v52  ;;  %v13773_v52 = vld [vmem:[#allocation32_spill] sm:$0xff] }
 0x581   :  { %6877 = vmatpush.msrb.mxu1 %v6876_v41  ;;  %6784 = vmatmul.f32.vlgmr.msrb.gmra.mxu0 %v11007_v34  ;;  %v5522_v34 = vpop.f32.mrf.mxu1  ;;  %v13772_v41 = vand.u32 4294901760, %v12192_v20  ;;  %v13774_v12 = vand.u32 4294901760, %v13773_v52 }
 0x582   :  { %6946 = vmatpush.msrb.mxu3 %v12108_v59  ;;  %6985 = vmatpush.msra.mxu0 %v13753_v57  ;;  %v5523_v28 = vadd.f32 %v5522_v34, %v5422_v3  ;;  %v12413_v57 = vand.u32 4294901760, %v1914_v45 }
 0x583   :  { %6696 = vmatpush.msra.mxu2 %v13755_v44  ;;  %6883 = vmatpush.msrb.mxu1 %v6882_v15  ;;  %v12403_v15 = vand.u32 4294901760, %v1918_v4  ;;  %v1906_v44 = vld [vmem:[#allocation17 + $0x378] sm:$0xff] }
 0x584   :  { %6885 = vmatmul.f32.vlgmr.msrb.gmra.mxu1 %v13756_v24  ;;  %6948 = vmatpush.msrb.mxu3 %v12121_v5  ;;  %v5577_v58 = vadd.f32 %v5576_v17, %v5523_v28  ;;  %v5762_v34 = vpop.f32.mrf.mxu2 }
 0x585   :  { %6989 = vmatpush.msra.mxu0 %v13758_v29  ;;  %7052 = vmatpush.msra.mxu1 %v12098_v51  ;;  %v13766_v51 = vld [vmem:[#allocation29_spill] sm:$0xff]  ;;  %v12421_v3 = vsub.f32 %v1918_v4, %v12403_v15 }
 0x586   :  { %6700 = vmatpush.msra.mxu2 %v13760_v49  ;;  %6950 = vmatpush.msrb.mxu3 %v13761_v22  ;;  %v13767_v6 = vand.u32 4294901760, %v13766_v51  ;;  %v5616_v9 = vadd.f32 %v5615_v46, %v5577_v58  ;;  %v12434_v49 = vand.u32 4294901760, %v1906_v44 }
 0x587   :  { %6993 = vmatpush.msra.mxu0 %v13763_v42  ;;  %7054 = vmatpush.msra.mxu1 %v12108_v59  ;;  %v13768_v59 = vld [vmem:[#allocation55_spill] sm:$0xff]  ;;  %v1898_v42 = vld [vmem:[#allocation17 + $0x338] sm:$0xff] }
 0x588   :  { %6704 = vmatpush.msra.mxu2 %v13765_v54  ;;  %6952 = vmatpush.msrb.mxu3 %v12142_v14  ;;  %v13769_v43 = vand.u32 4294901760, %v13768_v59  ;;  %v5685_v60 = vadd.f32 %v5684_v0, %v5616_v9  ;;  %v12457_v54 = vsub.f32 %v1906_v44, %v12434_v49  ;;  %v12459_v28 = vand.u32 4294901760, %v1898_v42  ;;  %v13777_v9 = vld [vmem:[#allocation210_spill] sm:$0xff] }
 0x589   :  { %6706 = vmatmul.f32.vlgmr.msra.gmra.mxu2 %v11330_v48  ;;  %6997 = vmatpush.msra.mxu0 %v13767_v6  ;;  %v5721_v29 = vpop.f32.mrf.mxu1  ;;  %v1890_v6 = vld [vmem:[#allocation17 + $0x2f8] sm:$0xff] }
 0x58a   :  { %6891 = vmatpush.msrb.mxu2 %v13752_v21  ;;  %7056 = vmatpush.msra.mxu1 %v12121_v5  ;;  %v12396_v5 = vand.u32 4294901760, %v1922_v23  ;;  %v1874_v44 = vld [vmem:[#allocation17 + $0x278] sm:$0xff] }
 0x58b   :  { %6954 = vmatpush.msrb.mxu3 %v12149_v11  ;;  %7001 = vmatpush.msra.mxu0 %v13769_v43 }
 0x58c   :  { %6894 = vmatpush.msrb.mxu2 %v13757_v1  ;;  %7058 = vmatpush.msra.mxu1 %v13761_v22  ;;  %v12411_v21 = vsub.f32 %v1922_v23, %v12396_v5  ;;  %v13776_v1 = vand.u32 4294901760, %v12232_v18  ;;  %v1902_v22 = vld [vmem:[#allocation17 + $0x358] sm:$0xff]  ;;  %v7155_v23 = vand.u32 4294901760, %v12457_v54 }
 0x58d   :  { %6956 = vmatpush.msrb.mxu3 %v12164_v37  ;;  %7005 = vmatpush.msra.mxu0 %v13771_v56  ;;  %v12448_v35 = vand.u32 4294901760, %v1902_v22  ;;  %v5917_v56 = vpop.f32.mrf.mxu0 }
 0x58e   :  { %6897 = vmatpush.msrb.mxu2 %v13762_v47  ;;  %7060 = vmatpush.msra.mxu1 %v12142_v14  ;;  %v1910_v14 = vld [vmem:[#allocation17 + $0x398] sm:$0xff]  ;;  %v7131_v2 = vand.u32 4294901760, %v12411_v21  ;;  %v5722_v47 = vadd.f32 %v5721_v29, %v5685_v60 }
 0x58f   :  { %6958 = vmatpush.msrb.mxu3 %v12179_v8  ;;  %7009 = vmatpush.msra.mxu0 %v13772_v41 }
 0x590   :  { %6900 = vmatpush.msrb.mxu2 %v13766_v51  ;;  %7062 = vmatpush.msra.mxu1 %v12149_v11  ;;  %v13775_v11 = vand.u32 4294901760, %v12210_v39  ;;  %v5763_v17 = vadd.f32 %v5762_v34, %v5722_v47  ;;  %v1894_v51 = vld [vmem:[#allocation17 + $0x318] sm:$0xff] }
 0x591   :  { %6960 = vmatpush.msrb.mxu3 %v12186_v40  ;;  %7013 = vmatpush.msra.mxu0 %v13774_v12  ;;  %v5956_v0 = vpop.f32.mrf.mxu1 }
 0x592   :  { %6903 = vmatpush.msrb.mxu2 %v13768_v59  ;;  %7064 = vmatpush.msra.mxu1 %v12164_v37  ;;  %v12423_v37 = vand.u32 4294901760, %v1910_v14  ;;  %v12476_v59 = vand.u32 4294901760, %v1894_v51 }
 0x593   :  { %6962 = vmatpush.msrb.mxu3 %v12206_v31  ;;  %7017 = vmatpush.msra.mxu0 %v13775_v11 }
 0x594   :  { %6906 = vmatpush.msrb.mxu2 %v13770_v62  ;;  %7066 = vmatpush.msra.mxu1 %v12179_v8  ;;  %v12432_v8 = vsub.f32 %v1914_v45, %v12413_v57  ;;  %v12485_v62 = vsub.f32 %v1898_v42, %v12459_v28  ;;  %v12504_v41 = vsub.f32 %v1894_v51, %v12476_v59  ;;  %v1878_v45 = vld [vmem:[#allocation17 + $0x298] sm:$0xff] }
 0x595   :  { %6964 = vmatpush.msrb.mxu3 %v12220_v61  ;;  %7021 = vmatpush.msra.mxu0 %v13776_v1  ;;  %v12522_v11 = vand.u32 4294901760, %v1878_v45 }
 0x596   :  { %6909 = vmatpush.msrb.mxu2 %v12192_v20  ;;  %7068 = vmatpush.msra.mxu1 %v12186_v40  ;;  %v7137_v40 = vand.u32 4294901760, %v12421_v3  ;;  %v12443_v20 = vsub.f32 %v1910_v14, %v12423_v37  ;;  %v7167_v12 = vand.u32 4294901760, %v12485_v62  ;;  %v7173_v1 = vand.u32 4294901760, %v12504_v41 }
 0x597   :  { %6966 = vmatpush.msrb.mxu3 %v12234_v36  ;;  %7025 = vmatpush.msra.mxu0 %v6850_v26  ;;  %v7143_v26 = vand.u32 4294901760, %v12432_v8 }
 0x598   :  { %6912 = vmatpush.msrb.mxu2 %v13773_v52  ;;  %7070 = vmatpush.msra.mxu1 %v12206_v31  ;;  %v7132_v31 = vsub.f32 %v12411_v21, %v7131_v2  ;;  %v7156_v52 = vsub.f32 %v12457_v54, %v7155_v23 }
 0x599   :  { %6968 = vmatpush.msrb.mxu3 %v12247_v27  ;;  %7029 = vmatpush.msra.mxu0 %v6856_v19  ;;  %v7149_v19 = vand.u32 4294901760, %v12443_v20  ;;  %v7144_v43 = vsub.f32 %v12432_v8, %v7143_v26 }
 0x59a   :  { %6915 = vmatpush.msrb.mxu2 %v12210_v39  ;;  %7072 = vmatpush.msra.mxu1 %v12220_v61  ;;  %v5863_v39 = vpop.f32.mrf.mxu3  ;;  %v7138_v61 = vsub.f32 %v12421_v3, %v7137_v40  ;;  %v7157_v34 = vand.u32 4294901760, %v7156_v52 }
 0x59b   :  { %6970 = vmatpush.msrb.mxu3 %v12260_v55  ;;  %7033 = vmatpush.msra.mxu0 %v6862_v38  ;;  %v5864_v58 = vadd.f32 %v5863_v39, %v5763_v17  ;;  %v12474_v38 = vsub.f32 %v1902_v22, %v12448_v35  ;;  %v7150_v4 = vsub.f32 %v12443_v20, %v7149_v19 }
 0x59c   :  { %6918 = vmatpush.msrb.mxu2 %v12232_v18  ;;  %7074 = vmatpush.msra.mxu1 %v12234_v36  ;;  %v1886_v18 = vld [vmem:[#allocation17 + $0x2d8] sm:$0xff]  ;;  %v7133_v36 = vand.u32 4294901760, %v7132_v31  ;;  %v7168_v22 = vsub.f32 %v12485_v62, %v7167_v12  ;;  %v12540_v31 = vand.u32 4294901760, %v1874_v44  ;;  %v12545_v39 = vsub.f32 %v1878_v45, %v12522_v11 }
 0x59d   :  { %6972 = vmatpush.msrb.mxu3 %v12273_v30  ;;  %7037 = vmatpush.msra.mxu0 %v6868_v32  ;;  %v12490_v32 = vand.u32 4294901760, %v1890_v6  ;;  %v12497_v46 = vand.u32 4294901760, %v1886_v18 }
 0x59e   :  { %6921 = vmatpush.msrb.mxu2 %v12245_v50  ;;  %7076 = vmatpush.msra.mxu1 %v12247_v27  ;;  %v1882_v50 = vld [vmem:[#allocation17 + $0x2b8] sm:$0xff]  ;;  %v7139_v27 = vand.u32 4294901760, %v7138_v61  ;;  %v7197_v45 = vand.u32 4294901760, %v12545_v39 }
 0x59f   :  { %6974 = vmatpush.msrb.mxu3 %v12290_v7  ;;  %7041 = vmatpush.msra.mxu0 %v6874_v10  ;;  %v7161_v10 = vand.u32 4294901760, %v12474_v38  ;;  %v12511_v14 = vand.u32 4294901760, %v1882_v50  ;;  %v12520_v60 = vsub.f32 %v1886_v18, %v12497_v46  ;;  %v1866_v61 = vld [vmem:[#allocation17 + $0x238] sm:$0xff] }
 0x5a0   :  { %6924 = vmatpush.msrb.mxu2 %v12258_v16  ;;  %7078 = vmatpush.msra.mxu1 %v12260_v55  ;;  %v5918_v16 = vadd.f32 %v5917_v56, %v5864_v58  ;;  %v7145_v55 = vand.u32 4294901760, %v7144_v43  ;;  %v7174_v58 = vsub.f32 %v12504_v41, %v7173_v1  ;;  %v13778_v56 = vld [vmem:[#allocation207_spill] sm:$0xff] }
 0x5a1   :  { %6978 = vmatmul.f32.vlgmr.msrb.gmra.mxu3 %v13777_v9  ;;  %7045 = vmatpush.msra.mxu0 %v6880_v63  ;;  %v12516_v63 = vsub.f32 %v1890_v6, %v12490_v32  ;;  %v7185_v51 = vand.u32 4294901760, %v12520_v60  ;;  %v12567_v9 = vsub.f32 %v1874_v44, %v12540_v31 }
 0x5a2   :  { %7134 = vmatpush.msra.mxu3 %v7133_v36  ;;  %6927 = vmatpush.msrb.mxu2 %v12271_v53  ;;  %v7151_v53 = vand.u32 4294901760, %v7150_v4  ;;  %v5957_v29 = vadd.f32 %v5956_v0, %v5918_v16  ;;  %v7169_v36 = vand.u32 4294901760, %v7168_v22 }
 0x5a3   :  { %7080 = vmatpush.msra.mxu1 %v12273_v30  ;;  %7047 = vmatmul.f32.vlgmr.msra.gmra.mxu0 %v13756_v24  ;;  %v7162_v30 = vsub.f32 %v12474_v38, %v7161_v10  ;;  %v7179_v17 = vand.u32 4294901760, %v12516_v63  ;;  %v7186_v16 = vsub.f32 %v12520_v60, %v7185_v51 }
 0x5a4   :  { %7140 = vmatpush.msra.mxu3 %v7139_v27  ;;  %7232 = vmatpush.msrb.mxu0 %v12411_v21 }
 0x5a5   :  { %6930 = vmatpush.msrb.mxu2 %v12286_v25  ;;  %7082 = vmatpush.msra.mxu1 %v12290_v7  ;;  %v12535_v25 = vsub.f32 %v1882_v50, %v12511_v14  ;;  %v1870_v7 = vld [vmem:[#allocation17 + $0x258] sm:$0xff]  ;;  %v7163_v6 = vand.u32 4294901760, %v7162_v30  ;;  %v7180_v4 = vsub.f32 %v12516_v63, %v7179_v17 }
 0x5a6   :  { %7084 = vmatmul.f32.vlgmr.msra.gmra.mxu1 %v13756_v24  ;;  %7146 = vmatpush.msra.mxu3 %v7145_v55  ;;  %v6025_v47 = vpop.f32.mrf.mxu2  ;;  %v6062_v24 = vpop.f32.mrf.mxu3  ;;  %v1862_v50 = vld [vmem:[#allocation17 + $0x218] sm:$0xff]  ;;  %v7175_v55 = vand.u32 4294901760, %v7174_v58 }
 0x5a7   :  { %7235 = vmatpush.msrb.mxu0 %v12421_v3  ;;  %7285 = vmatpush.msrb.mxu1 %v12396_v5  ;;  %v6026_v42 = vadd.f32 %v6025_v47, %v5957_v29  ;;  %v7191_v43 = vand.u32 4294901760, %v12535_v25  ;;  %v7181_v29 = vand.u32 4294901760, %v7180_v4  ;;  %v7187_v47 = vand.u32 4294901760, %v7186_v16 }
 0x5a8   :  { %6933 = vmatpush.msrb.mxu2 %v12300_v33  ;;  %7152 = vmatpush.msra.mxu3 %v7151_v53  ;;  %v12554_v33 = vand.u32 4294901760, %v1870_v7  ;;  %v12583_v53 = vand.u32 4294901760, %v1862_v50 }
 0x5a9   :  { %7238 = vmatpush.msrb.mxu0 %v12432_v8  ;;  %7287 = vmatpush.msrb.mxu1 %v12403_v15  ;;  %v12552_v18 = vadd.f32 %v6062_v24, %v6026_v42  ;;  %v7192_v44 = vsub.f32 %v12535_v25, %v7191_v43 }
 0x5aa   :  { %6936 = vmatpush.msrb.mxu2 %v12315_v13  ;;  %7158 = vmatpush.msra.mxu3 %v7157_v34  ;;  %v12569_v13 = vand.u32 4294901760, %v1866_v61  ;;  %v12581_v0 = vsub.f32 %v1870_v7, %v12554_v33  ;;  %v7203_v34 = vand.u32 4294901760, %v12567_v9  ;;  %v7198_v7 = vsub.f32 %v12545_v39, %v7197_v45 }
 0x5ab   :  { %6939 = vmatmul.f32.vlgmr.msrb.gmra.mxu2 %v13778_v56  ;;  %7241 = vmatpush.msrb.mxu0 %v12443_v20  ;;  %v12561_v27 = vmul.f32 0.70710677, %v12552_v18  ;;  %v7193_v58 = vand.u32 4294901760, %v7192_v44  ;;  %v7430_v20 = vmul.f32 0.5, %v12552_v18 }
 0x5ac   :  { %7089 = vmatpush.msra.mxu2 %v12396_v5  ;;  %7289 = vmatpush.msrb.mxu1 %v12413_v57  ;;  %v12595_v22 = vsub.f32 %v1866_v61, %v12569_v13  ;;  %v12607_v61 = vsub.f32 %v1862_v50, %v12583_v53  ;;  %v7204_v4 = vsub.f32 %v12567_v9, %v7203_v34  ;;  %v7199_v50 = vand.u32 4294901760, %v7198_v7 }
 0x5ad   :  { %7164 = vmatpush.msra.mxu3 %v7163_v6  ;;  %7244 = vmatpush.msrb.mxu0 %v12457_v54  ;;  %v7477_v52 = vmul.f32 %v12561_v27, %v12561_v27  ;;  %v7209_v6 = vand.u32 4294901760, %v12581_v0 }
 0x5ae   :  { %7091 = vmatpush.msra.mxu2 %v12403_v15  ;;  %7291 = vmatpush.msrb.mxu1 %v12423_v37  ;;  %v7215_v16 = vand.u32 4294901760, %v12595_v22  ;;  %v7205_v7 = vand.u32 4294901760, %v7204_v4 }
 0x5af   :  { %7170 = vmatpush.msra.mxu3 %v7169_v36  ;;  %7247 = vmatpush.msrb.mxu0 %v12474_v38  ;;  %v12591_v30 = vmin.f32 %v7477_v52, 16.0  ;;  %v7210_v44 = vsub.f32 %v12581_v0, %v7209_v6  ;;  %v6103_v38 = vpop.f32.mrf.mxu0 }
 0x5b0   :  { %7093 = vmatpush.msra.mxu2 %v12413_v57  ;;  %7293 = vmatpush.msrb.mxu1 %v12434_v49 }
 0x5b1   :  { %7176 = vmatpush.msra.mxu3 %v7175_v55  ;;  %7250 = vmatpush.msrb.mxu0 %v12485_v62  ;;  %v7479_v42 = vmul.f32 2.1237322e-06, %v12591_v30  ;;  %v7490_v24 = vmul.f32 3.8918573e-05, %v12591_v30 }
 0x5b2   :  { %7095 = vmatpush.msra.mxu2 %v12423_v37  ;;  %7295 = vmatpush.msrb.mxu1 %v12448_v35 }
 0x5b3   :  { %v7480_v36 = vadd.f32 0.00028619796, %v7479_v42  ;;  %v7491_v56 = vadd.f32 0.001143296, %v7490_v24  ;;  %7182 = vmatpush.msra.mxu3 %v7181_v29  ;;  %7253 = vmatpush.msrb.mxu0 %v12504_v41  ;;  %v7221_v29 = vand.u32 4294901760, %v12607_v61 }
 0x5b4   :  { %7097 = vmatpush.msra.mxu2 %v12434_v49  ;;  %7297 = vmatpush.msrb.mxu1 %v12459_v28 }
 0x5b5   :  { %v7481_v55 = vmul.f32 %v7480_v36, %v12591_v30  ;;  %v7492_v52 = vmul.f32 %v7491_v56, %v12591_v30  ;;  %7188 = vmatpush.msra.mxu3 %v7187_v47  ;;  %7256 = vmatpush.msrb.mxu0 %v12516_v63  ;;  %v7216_v47 = vsub.f32 %v12595_v22, %v7215_v16  ;;  %v7211_v56 = vand.u32 4294901760, %v7210_v44 }
 0x5b6   :  { %7099 = vmatpush.msra.mxu2 %v12448_v35  ;;  %7299 = vmatpush.msrb.mxu1 %v12476_v59 }
 0x5b7   :  { %v7493_v42 = vadd.f32 0.014752088, %v7492_v52  ;;  %7194 = vmatpush.msra.mxu3 %v7193_v58  ;;  %7259 = vmatpush.msrb.mxu0 %v12520_v60  ;;  %v7482_v24 = vadd.f32 0.0036580483, %v7481_v55  ;;  %v7222_v58 = vsub.f32 %v12607_v61, %v7221_v29  ;;  %v7217_v55 = vand.u32 4294901760, %v7216_v47 }
 0x5b8   :  { %7101 = vmatpush.msra.mxu2 %v12459_v28  ;;  %7301 = vmatpush.msrb.mxu1 %v12490_v32 }
 0x5b9   :  { %v7494_v36 = vmul.f32 %v7493_v42, %v12591_v30  ;;  %7200 = vmatpush.msra.mxu3 %v7199_v50  ;;  %7262 = vmatpush.msrb.mxu0 %v12535_v25  ;;  %v7483_v52 = vmul.f32 %v7482_v24, %v12591_v30  ;;  %v7223_v44 = vand.u32 4294901760, %v7222_v58 }
 0x5ba   :  { %7103 = vmatpush.msra.mxu2 %v12476_v59  ;;  %7303 = vmatpush.msrb.mxu1 %v12497_v46 }
 0x5bb   :  { %v7495_v4 = vadd.f32 0.112945676, %v7494_v36  ;;  %7206 = vmatpush.msra.mxu3 %v7205_v7  ;;  %7265 = vmatpush.msrb.mxu0 %v12545_v39  ;;  %v7484_v7 = vadd.f32 0.05243302, %v7483_v52 }
 0x5bc   :  { %7105 = vmatpush.msra.mxu2 %v12490_v32  ;;  %7305 = vmatpush.msrb.mxu1 %v12511_v14 }
 0x5bd   :  { %v7496_v50 = vmul.f32 %v7495_v4, %v12591_v30  ;;  %7212 = vmatpush.msra.mxu3 %v7211_v56  ;;  %7268 = vmatpush.msrb.mxu0 %v12567_v9  ;;  %v7485_v36 = vmul.f32 %v7484_v7, %v12591_v30  ;;  %v13779_v56 = vld [vmem:[#allocation212_spill] sm:$0xff]  ;;  %v13780_v4 = vld [vmem:[#allocation213_spill] sm:$0xff] }
 0x5be   :  { %7107 = vmatpush.msra.mxu2 %v12497_v46  ;;  %7307 = vmatpush.msrb.mxu1 %v12522_v11 }
 0x5bf   :  { %v7497_v42 = vadd.f32 0.4994258, %v7496_v50  ;;  %7218 = vmatpush.msra.mxu3 %v7217_v55  ;;  %7271 = vmatpush.msrb.mxu0 %v12581_v0  ;;  %v7486_v58 = vadd.f32 0.18741608, %v7485_v36 }
 0x5c0   :  { %7109 = vmatpush.msra.mxu2 %v12511_v14  ;;  %7309 = vmatpush.msrb.mxu1 %v12540_v31 }
 0x5c1   :  { %v7498_v47 = vmul.f32 %v7497_v42, %v12591_v30  ;;  %7224 = vmatpush.msra.mxu3 %v7223_v44  ;;  %7274 = vmatpush.msrb.mxu0 %v12595_v22  ;;  %v7487_v55 = vmul.f32 %v7486_v58, %v12591_v30 }
 0x5c2   :  { %7111 = vmatpush.msra.mxu2 %v12522_v11  ;;  %7311 = vmatpush.msrb.mxu1 %v12554_v33 }
 0x5c3   :  { %v7499_v24 = vadd.f32 1.0, %v7498_v47  ;;  %7226 = vmatmul.f32.vlgmr.msra.gmra.mxu3 %v11330_v48  ;;  %7277 = vmatpush.msrb.mxu0 %v12607_v61 }
 0x5c4   :  { %7393 = vmatpush.msrb.mxu3 %v12396_v5  ;;  %7113 = vmatpush.msra.mxu2 %v12540_v31 }
 0x5c5   :  { %7670 = vrcp.f32 %v7499_v24  ;;  %7313 = vmatpush.msrb.mxu1 %v12569_v13  ;;  %7280 = vmatmul.f32.vlgmr.msrb.gmra.mxu0 %v13779_v56  ;;  %v7509_v42 = vand.u32 2147483647, %v7499_v24  ;;  %vm7505_vm6 = vweird.f32 %v7499_v24 }
 0x5c6   :  { %7395 = vmatpush.msrb.mxu3 %v12403_v15  ;;  %7115 = vmatpush.msra.mxu2 %v12554_v33  ;;  %v13781_v15 = vld [vmem:[#allocation215_spill] sm:$0xff] }
 0x5c7   :  { %7315 = vmatpush.msrb.mxu1 %v12583_v53  ;;  %vm7510_vm8 = vcmp.eq.f32.partialorder %v7509_v42, 8.507059e+37 }
 0x5c8   :  { %7319 = vmatmul.f32.vlgmr.msrb.gmra.mxu1 %v13780_v4  ;;  %7397 = vmatpush.msrb.mxu3 %v12413_v57  ;;  %v7511_v57 = vand.u32 2147483648, %v7499_v24  ;;  %v6258_v62 = vpop.f32.mrf.mxu2 }
 0x5c9   :  { %7117 = vmatpush.msra.mxu2 %v12569_v13 }
 0x5ca   :  { %7399 = vmatpush.msrb.mxu3 %v12423_v37  ;;  %v7488_v37 = vadd.f32 1.1283791, %v7487_v55  ;;  %v7512_v21 = vor.u32 1.1754944e-38, %v7511_v57 }
 0x5cb   :  { %v7671_v5 = vpop.eup %7670  ;;  %7119 = vmatpush.msra.mxu2 %v12583_v53 }
 0x5cc   :  { %v7501_v52 = vmul.f32 %v7671_v5, %v7499_v24  ;;  %7125 = vmatmul.f32.vlgmr.msra.gmra.mxu2 %v13781_v15  ;;  %7401 = vmatpush.msrb.mxu3 %v12434_v49  ;;  %vm7506_vm5 = vweird.f32 %v7671_v5  ;;  %v7489_v3 = vmul.f32 %v7488_v37, %v12561_v27 }
 0x5cd   :  { %7326 = vmatpush.msrb.mxu2 %v7131_v2  ;;  %vm7507_vm7 = vmor %vm7505_vm6, %vm7506_vm5 }
 0x5ce   :  { %v7502_v50 = vsub.f32 1.0, %v7501_v52  ;;  %7403 = vmatpush.msrb.mxu3 %v12448_v35 }
 0x5cf   :  { %7330 = vmatpush.msrb.mxu2 %v7137_v40 }
 0x5d0   :  { %v7503_v44 = vmul.f32 %v7671_v5, %v7502_v50  ;;  %7405 = vmatpush.msrb.mxu3 %v12459_v28  ;;  %v12716_v28 = vld [vmem:[%s12742_s12] sm:$0xf]  ;;  %s7971_s12 = smov [#allocation19]  }
 0x5d1   :  { %7334 = vmatpush.msrb.mxu2 %v7143_v26  ;;  %s7614_s1 = sshll.u32 %s7971_s12, 4  ;;  %s7615_s1 = int_to_ptr.vmem [resolvable:$true] %s7614_s1 }
 0x5d2   :  { %v7504_v49 = vadd.f32 %v7671_v5, %v7503_v44  ;;  %7407 = vmatpush.msrb.mxu3 %v12476_v59 }
 0x5d3   :  { %7338 = vmatpush.msrb.mxu2 %v7149_v19  ;;  %v4695_v19 = vperm.slane %v12716_v28, 2 }
 0x5d4   :  { %v7508_v2 = vsel %vm7507_vm7, %v7671_v5, %v7504_v49  ;;  %7409 = vmatpush.msrb.mxu3 %v12490_v32 }
 0x5d5   :  { %v7513_v40 = vsel %vm7510_vm8, %v7512_v21, %v7508_v2  ;;  %7342 = vmatpush.msrb.mxu2 %v7155_v23  ;;  %v6104_v59 = vadd.f32 %v6103_v38, %v4695_v19  ;;  %v6204_v23 = vpop.f32.mrf.mxu1  ;;  %v4696_v38 = vperm.slane %v12716_v28, 3 }
 0x5d6   :  { %v7514_v8 = vmul.f32 %v7513_v40, %v7489_v3  ;;  %7411 = vmatpush.msrb.mxu3 %v12497_v46 }
 0x5d7   :  { %7346 = vmatpush.msrb.mxu2 %v7161_v10  ;;  %v6205_v32 = vadd.f32 %v6204_v23, %v6104_v59  ;;  %v6297_v10 = vpop.f32.mrf.mxu3 }
 0x5d8   :  { %v7634_v35 = vclamps-f32 %v7514_v8, 1.0  ;;  %7413 = vmatpush.msrb.mxu3 %v12511_v14 }
 0x5d9   :  { %7350 = vmatpush.msrb.mxu2 %v7167_v12  ;;  %v6259_v46 = vadd.f32 %v6258_v62, %v6205_v32  ;;  %v6366_v12 = vpop.f32.mrf.mxu0 }
 0x5da   :  { %v7598_v26 = vadd.f32 1.0, %v7634_v35  ;;  %7415 = vmatpush.msrb.mxu3 %v12522_v11 }
 0x5db   :  { %7354 = vmatpush.msrb.mxu2 %v7173_v1  ;;  %v6298_v41 = vadd.f32 %v6297_v10, %v6259_v46 }
 0x5dc   :  { %v7602_v54 = vmul.f32 %v7598_v26, %v7430_v20  ;;  %7417 = vmatpush.msrb.mxu3 %v12540_v31 }
 0x5dd   :  { %7358 = vmatpush.msrb.mxu2 %v7179_v17  ;;  %v6367_v14 = vadd.f32 %v6366_v12, %v6298_v41  ;;  %v6403_v63 = vpop.f32.mrf.mxu1 }
 0x5de   :  { %7606 = vst [vmem:[#allocation19 + $0x8] sm:$0xff] %v7602_v54  ;;  %7419 = vmatpush.msrb.mxu3 %v12554_v33 }
 0x5df   :  { %7362 = vmatpush.msrb.mxu2 %v7185_v51  ;;  %v6404_v11 = vadd.f32 %v6403_v63, %v6367_v14 }
 0x5e0   :  { %7421 = vmatpush.msrb.mxu3 %v12569_v13  ;;  %v6545_v25 = vpop.f32.mrf.mxu3 }
 0x5e1   :  { %7366 = vmatpush.msrb.mxu2 %v7191_v43  ;;  %v6599_v31 = vpop.f32.mrf.mxu0 }
 0x5e2   :  { %7423 = vmatpush.msrb.mxu3 %v12583_v53 }
 0x5e3   :  { %7370 = vmatpush.msrb.mxu2 %v7197_v45  ;;  %7425 = vmatmul.f32.vlgmr.msrb.gmra.mxu3 %v11330_v48 }
 0x5e5   :  { %7374 = vmatpush.msrb.mxu2 %v7203_v34  ;;  %v6638_v39 = vpop.f32.mrf.mxu1 }
 0x5e7   :  { %7378 = vmatpush.msrb.mxu2 %v7209_v6 }
 0x5e9   :  { %7382 = vmatpush.msrb.mxu2 %v7215_v16 }
 0x5ea   :  { %v6444_v60 = vpop.f32.mrf.mxu2 }
 0x5eb   :  { %7386 = vmatpush.msrb.mxu2 %v7221_v29  ;;  %v6445_v1 = vadd.f32 %v6444_v60, %v6404_v11 }
 0x5ec   :  { %7388 = vmatmul.f32.vlgmr.msrb.gmra.mxu2 %v11330_v48 }
 0x5ed   :  { %v6546_v17 = vadd.f32 %v6545_v25, %v6445_v1 }
 0x5ef   :  { %v6600_v51 = vadd.f32 %v6599_v31, %v6546_v17 }
 0x5f1   :  { %v6639_v18 = vadd.f32 %v6638_v39, %v6600_v51 }
 0x5fe   :  { %v6785_v59 = vpop.f32.mrf.mxu0 }
 0x5ff   :  { %v6786_v23 = vadd.f32 %v6785_v59, %v4696_v38 }
 0x601   :  { %v6886_v62 = vpop.f32.mrf.mxu1 }
 0x602   :  { %v6744_v48 = vpop.f32.mrf.mxu3  ;;  %v6887_v46 = vadd.f32 %v6886_v62, %v6786_v23 }
 0x60c   :  { %v6707_v33 = vpop.f32.mrf.mxu2 }
 0x60d   :  { %v6708_v43 = vadd.f32 %v6707_v33, %v6639_v18 }
 0x60f   :  { %v6745_v27 = vadd.f32 %v6744_v48, %v6708_v43 }
 0x611   :  { %v7435_v9 = vmul.f32 0.70710677, %v6745_v27  ;;  %v7431_v26 = vmul.f32 0.5, %v6745_v27 }
 0x613   :  { %v7517_v13 = vmul.f32 %v7435_v9, %v7435_v9 }
 0x615   :  { %v7518_v45 = vmin.f32 %v7517_v13, 16.0 }
 0x617   :  { %v7519_v0 = vmul.f32 2.1237322e-06, %v7518_v45  ;;  %v7530_v53 = vmul.f32 3.8918573e-05, %v7518_v45 }
 0x619   :  { %v7520_v30 = vadd.f32 0.00028619796, %v7519_v0  ;;  %v7531_v34 = vadd.f32 0.001143296, %v7530_v53 }
 0x61b   :  { %v7521_v22 = vmul.f32 %v7520_v30, %v7518_v45  ;;  %v7532_v6 = vmul.f32 %v7531_v34, %v7518_v45 }
 0x61d   :  { %v7533_v61 = vadd.f32 0.014752088, %v7532_v6  ;;  %v7522_v16 = vadd.f32 0.0036580483, %v7521_v22 }
 0x61f   :  { %v7534_v29 = vmul.f32 %v7533_v61, %v7518_v45  ;;  %v7523_v47 = vmul.f32 %v7522_v16, %v7518_v45 }
 0x620   :  { %v7048_v14 = vpop.f32.mrf.mxu0 }
 0x621   :  { %v7535_v7 = vadd.f32 0.112945676, %v7534_v29  ;;  %v7524_v56 = vadd.f32 0.05243302, %v7523_v47 }
 0x623   :  { %v7536_v24 = vmul.f32 %v7535_v7, %v7518_v45  ;;  %v7525_v5 = vmul.f32 %v7524_v56, %v7518_v45  ;;  %v7085_v60 = vpop.f32.mrf.mxu1 }
 0x624   :  { %v6979_v41 = vpop.f32.mrf.mxu3 }
 0x625   :  { %v7537_v36 = vadd.f32 0.4994258, %v7536_v24  ;;  %v7526_v55 = vadd.f32 0.18741608, %v7525_v5 }
 0x627   :  { %v7538_v58 = vmul.f32 %v7537_v36, %v7518_v45  ;;  %v7527_v15 = vmul.f32 %v7526_v55, %v7518_v45 }
 0x629   :  { %v7539_v4 = vadd.f32 1.0, %v7538_v58  ;;  %v7528_v44 = vadd.f32 1.1283791, %v7527_v15 }
 0x62b   :  { %7672 = vrcp.f32 %v7539_v4  ;;  %v7551_v37 = vand.u32 2147483648, %v7539_v4  ;;  %v7549_v49 = vand.u32 2147483647, %v7539_v4  ;;  %vm7545_vm10 = vweird.f32 %v7539_v4 }
 0x62c   :  { %v7529_v2 = vmul.f32 %v7528_v44, %v7435_v9 }
 0x62d   :  { %v7552_v3 = vor.u32 1.1754944e-38, %v7551_v37  ;;  %vm7550_vm12 = vcmp.eq.f32.partialorder %v7549_v49, 8.507059e+37 }
 0x62e   :  { %v6940_v32 = vpop.f32.mrf.mxu2 }
 0x62f   :  { %v6941_v10 = vadd.f32 %v6940_v32, %v6887_v46 }
 0x631   :  { %v7673_v52 = vpop.eup %7672  ;;  %v6980_v12 = vadd.f32 %v6979_v41, %v6941_v10 }
 0x632   :  { %v7541_v50 = vmul.f32 %v7673_v52, %v7539_v4  ;;  %vm7546_vm9 = vweird.f32 %v7673_v52 }
 0x633   :  { %vm7547_vm11 = vmor %vm7545_vm10, %vm7546_vm9  ;;  %v7049_v63 = vadd.f32 %v7048_v14, %v6980_v12 }
 0x634   :  { %v7542_v57 = vsub.f32 1.0, %v7541_v50 }
 0x635   :  { %v7086_v1 = vadd.f32 %v7085_v60, %v7049_v63 }
 0x636   :  { %v7543_v42 = vmul.f32 %v7673_v52, %v7542_v57 }
 0x638   :  { %v7544_v21 = vadd.f32 %v7673_v52, %v7543_v42 }
 0x63a   :  { %v7548_v40 = vsel %vm7547_vm11, %v7673_v52, %v7544_v21 }
 0x63b   :  { %v7553_v8 = vsel %vm7550_vm12, %v7552_v3, %v7548_v40 }
 0x63c   :  { %v7554_v35 = vmul.f32 %v7553_v8, %v7529_v2 }
 0x63e   :  { %v7635_v20 = vclamps-f32 %v7554_v35, 1.0 }
 0x640   :  { %v7599_v54 = vadd.f32 1.0, %v7635_v20 }
 0x642   :  { %v7603_v19 = vmul.f32 %v7599_v54, %v7431_v26  ;;  %v7281_v51 = vpop.f32.mrf.mxu0 }
 0x644   :  { %7607 = vst [vmem:[#allocation19 + $0x10] sm:$0xff] %v7603_v19 }
 0x645   :  { %v7320_v18 = vpop.f32.mrf.mxu1 }
 0x646   :  { %v7227_v17 = vpop.f32.mrf.mxu3 }
 0x64f   :  { %v7126_v11 = vpop.f32.mrf.mxu2 }
 0x650   :  { %v7127_v25 = vadd.f32 %v7126_v11, %v7086_v1 }
 0x652   :  { %v7228_v31 = vadd.f32 %v7227_v17, %v7127_v25 }
 0x654   :  { %v7282_v39 = vadd.f32 %v7281_v51, %v7228_v31 }
 0x656   :  { %v7321_v28 = vadd.f32 %v7320_v18, %v7282_v39 }
 0x666   :  { %v7426_v48 = vpop.f32.mrf.mxu3 }
 0x66f   :  { %v7389_v33 = vpop.f32.mrf.mxu2 }
 0x670   :  { %v7390_v43 = vadd.f32 %v7389_v33, %v7321_v28 }
 0x672   :  { %v7427_v27 = vadd.f32 %v7426_v48, %v7390_v43 }
 0x674   :  { %v7436_v9 = vmul.f32 0.70710677, %v7427_v27  ;;  %v7432_v26 = vmul.f32 0.5, %v7427_v27 }
 0x676   :  { %v7557_v13 = vmul.f32 %v7436_v9, %v7436_v9 }
 0x678   :  { %v7558_v45 = vmin.f32 %v7557_v13, 16.0 }
 0x67a   :  { %v7559_v0 = vmul.f32 2.1237322e-06, %v7558_v45  ;;  %v7570_v53 = vmul.f32 3.8918573e-05, %v7558_v45 }
 0x67c   :  { %v7560_v30 = vadd.f32 0.00028619796, %v7559_v0  ;;  %v7571_v34 = vadd.f32 0.001143296, %v7570_v53 }
 0x67e   :  { %v7561_v22 = vmul.f32 %v7560_v30, %v7558_v45  ;;  %v7572_v6 = vmul.f32 %v7571_v34, %v7558_v45 }
 0x680   :  { %v7573_v61 = vadd.f32 0.014752088, %v7572_v6  ;;  %v7562_v16 = vadd.f32 0.0036580483, %v7561_v22 }
 0x682   :  { %v7574_v29 = vmul.f32 %v7573_v61, %v7558_v45  ;;  %v7563_v47 = vmul.f32 %v7562_v16, %v7558_v45 }
 0x684   :  { %v7575_v7 = vadd.f32 0.112945676, %v7574_v29  ;;  %v7564_v56 = vadd.f32 0.05243302, %v7563_v47 }
 0x686   :  { %v7576_v24 = vmul.f32 %v7575_v7, %v7558_v45  ;;  %v7565_v5 = vmul.f32 %v7564_v56, %v7558_v45 }
 0x688   :  { %v7577_v36 = vadd.f32 0.4994258, %v7576_v24  ;;  %v7566_v55 = vadd.f32 0.18741608, %v7565_v5 }
 0x68a   :  { %v7578_v58 = vmul.f32 %v7577_v36, %v7558_v45  ;;  %v7567_v15 = vmul.f32 %v7566_v55, %v7558_v45 }
 0x68c   :  { %v7579_v4 = vadd.f32 1.0, %v7578_v58  ;;  %v7568_v44 = vadd.f32 1.1283791, %v7567_v15 }
 0x68e   :  { %7674 = vrcp.f32 %v7579_v4  ;;  %v7591_v37 = vand.u32 2147483648, %v7579_v4  ;;  %v7589_v49 = vand.u32 2147483647, %v7579_v4  ;;  %vm7585_vm14 = vweird.f32 %v7579_v4 }
 0x68f   :  { %v7569_v2 = vmul.f32 %v7568_v44, %v7436_v9 }
 0x690   :  { %v7592_v3 = vor.u32 1.1754944e-38, %v7591_v37  ;;  %vm7590_vm0 = vcmp.eq.f32.partialorder %v7589_v49, 8.507059e+37 }
 0x694   :  { %v7675_v52 = vpop.eup %7674 }
 0x695   :  { %v7581_v50 = vmul.f32 %v7675_v52, %v7579_v4  ;;  %vm7586_vm13 = vweird.f32 %v7675_v52 }
 0x696   :  { %vm7587_vm15 = vmor %vm7585_vm14, %vm7586_vm13 }
 0x697   :  { %v7582_v57 = vsub.f32 1.0, %v7581_v50 }
 0x699   :  { %v7583_v42 = vmul.f32 %v7675_v52, %v7582_v57 }
 0x69b   :  { %v7584_v21 = vadd.f32 %v7675_v52, %v7583_v42 }
 0x69d   :  { %v7588_v40 = vsel %vm7587_vm15, %v7675_v52, %v7584_v21 }
 0x69e   :  { %v7593_v8 = vsel %vm7590_vm0, %v7592_v3, %v7588_v40 }
 0x69f   :  { %v7594_v35 = vmul.f32 %v7593_v8, %v7569_v2 }
 0x6a1   :  { %v7636_v20 = vclamps-f32 %v7594_v35, 1.0 }
 0x6a3   :  { %v7600_v54 = vadd.f32 1.0, %v7636_v20 }
 0x6a5   :  { %v7604_v19 = vmul.f32 %v7600_v54, %v7432_v26 }
 0x6a7   :  { %7608 = vst [vmem:[#allocation19 + $0x18] sm:$0xff] %v7604_v19 }
 0x6a8   :  { %7619 = dma.vmem_to_hbm [thread:$0]  %s7615_s1, 512, %s7617_s23, [#allocation4]  }
 0x6a9   :  { %7953 = dma.done.wait [#allocation4], 512  }
 0x6aa   :  { %7954 = vsyncadd [#allocation4], 4294966784 }
 0x6ab   :  { %7624 = vsyncpa [#allocation3], 1 }
 0x6ac   :  { %7625 = vsyncpa [#allocation6], 1 }
 0x6ad   :  { %7626 = vsyncpa [#allocation9], 1 }
 0x6ae   :  { %7627 = vsyncpa [#allocation12], 1 }
 0x6af   :  { %7628 = vsyncpa [#allocation15], 1 }
 0x6b0   :  { %7629 = vsyncpa [#allocation18], 1 }
 0x6b1   :  { %7630 = vsyncpa [#allocation4], 1 }

</bundles_post_ra>
